<compile_context>
chip_gen: v6e
topology: v6e:2x2x1
jax: 0.10.0
libtpu: 0.0.40
codegen_flags: <defaults>
</compile_context>

<pallas_src>
import functools

import jax
import jax.numpy as jnp
from jax.experimental import pallas as pl
from jax.experimental.pallas import tpu as pltpu

CPAD = 128                      # channel / feature padding -> lane-dense layouts
VMEM_LIMIT = 32 * 1024 * 1024   # well above need, below every chip's physical VMEM


# ----------------------------------------------------------------------------
# Fused kernel: conv1+pool+relu -> conv2+pool+relu -> fc1+relu -> fc2 -> log_softmax
# One block of `nimg` images per grid step.
# ----------------------------------------------------------------------------

def _cnn_fused_kernel(p1_ref, w1_ref, b1_ref, w2_ref, b2_ref,
                      wf1_ref, bf1_ref, wf2_ref, bf2_ref,
                      o_ref,
                      act1_ref, act2_ref, pool_ref, *, nimg, n_classes):
    """Refs (per grid step):
      p1_ref : (nimg, 4, 192, 25) bf16  conv1 patches grouped by 2x2 pool position;
                                        rows = hp*16 + wp (wp 12..15 zero padding)
      w1_ref : (25, 128)   bf16         conv1 weight, row = kh*5 + kw
      w2_ref : (3200, 128) bf16         conv2 weight, row = (kh*5+kw)*128 + cin
      wf1_ref: (2048, 128) bf16         fc1 weight, row = (h*4+w)*128 + c
      wf2_ref: (128, 128)  bf16         fc2 weight
      b*_ref : (1, 128)    f32          zero-padded biases
      o_ref  : (1, nimg, 128) f32       log-softmax (classes in lanes)
      act1_ref: VMEM (12, 16, 128) bf16 conv1 pooled map of the current image
      act2_ref: VMEM (nimg*16, 128) f32 conv2 pooled maps (fc1 input), row = img*16 + (h*4+w)
      pool_ref: VMEM (4, 8, 128) f32    conv2 W-pool staging (tiny)
    """

    def per_image(img, carry):
        # ---- conv1: 4 pool-position matmuls; their elementwise max IS the 2x2 pool
        p1i = p1_ref.at[img]                                           # (4, 192, 25)
        m = None
        for k in range(4):
            c = jnp.dot(p1i[k], w1_ref[...], preferred_element_type=jnp.float32)
            m = c if m is None else jnp.maximum(m, c)                  # (192, 128) f32
        a1 = jnp.maximum(m + b1_ref[...], 0.0)                         # + bias, relu
        act1_ref[...] = a1.reshape(12, 16, 128).astype(jnp.bfloat16)   # (hp, wp, c)

        # ---- conv2: 25 accumulated lane-dense tap matmuls (no im2col scratch)
        # TODO(synk): nn.Dropout2d is identity here (inference semantics).
        acc = jnp.zeros((64, 128), jnp.float32)                        # rows = h*8 + w
        for kh in range(5):
            for kw in range(5):
                tap = kh * 5 + kw
                lhs = act1_ref[kh:kh + 8, kw:kw + 8, :]                # (8, 8, 128) bf16
                acc = acc + jnp.dot(lhs.reshape(64, 128),
                                    w2_ref[tap * 128:(tap + 1) * 128, :],
                                    preferred_element_type=jnp.float32)

        # 2x2 max-pool: H direction via contiguous halves on the register value,
        # W direction via one tiny strided-ref read; then bias + relu.
        a = acc.reshape(4, 16, 128)                                    # (hp, hpar*8 + w, c)
        pool_ref[...] = jnp.maximum(a[:, :8, :], a[:, 8:, :])          # (4, 8, 128)
        pooled = jnp.maximum(pool_ref[:, pl.ds(0, 4, 2), :],
                             pool_ref[:, pl.ds(1, 4, 2), :])           # (4, 4, 128)
        a2 = jnp.maximum(pooled + b2_ref[...], 0.0)                    # relu
        row0 = pl.multiple_of(img * 16, 16)
        act2_ref[pl.ds(row0, 16), :] = a2.reshape(16, 128)             # fc1 input rows
        return carry

    jax.lax.fori_loop(0, nimg, per_image, 0)

    # ---- fc1 + relu + (dropout) + fc2 + log_softmax for the whole image block
    h = jnp.zeros((nimg, 128), jnp.float32)
    for s in range(16):                                                # s = h*4 + w
        xs = act2_ref[pl.ds(s, nimg, 16), :].astype(jnp.bfloat16)      # (nimg, 128)
        h = h + jnp.dot(xs, wf1_ref[s * 128:(s + 1) * 128, :],
                        preferred_element_type=jnp.float32)
    h = jnp.maximum(h + bf1_ref[...], 0.0)
    # TODO(synk): F.dropout is identity here (inference semantics).
    logits = jnp.dot(h.astype(jnp.bfloat16), wf2_ref[...],
                     preferred_element_type=jnp.float32) + bf2_ref[...]
    # Mask padded class lanes so softmax only sees the real classes.
    lane = jax.lax.broadcasted_iota(jnp.int32, logits.shape, 1)
    logits = jnp.where(lane < n_classes, logits, -1e30)
    mx = jnp.max(logits, axis=-1, keepdims=True)
    lse = jnp.log(jnp.sum(jnp.exp(logits - mx), axis=-1, keepdims=True))
    o_ref[0] = logits - mx - lse


def _cnn_pallas(patches, packed, *, blk, nb):
    kern = functools.partial(_cnn_fused_kernel, nimg=blk, n_classes=10)
    return pl.pallas_call(
        kern,
        out_shape=jax.ShapeDtypeStruct((nb, blk, CPAD), jnp.float32),
        grid=(nb,),
        in_specs=[
            pl.BlockSpec((blk, 4, 192, 25), lambda i: (i, 0, 0, 0)),   # conv1 patches
            pl.BlockSpec((25, CPAD), lambda i: (0, 0)),                # conv1 w
            pl.BlockSpec((1, CPAD), lambda i: (0, 0)),                 # conv1 b
            pl.BlockSpec((25 * CPAD, CPAD), lambda i: (0, 0)),         # conv2 w
            pl.BlockSpec((1, CPAD), lambda i: (0, 0)),                 # conv2 b
            pl.BlockSpec((16 * CPAD, CPAD), lambda i: (0, 0)),         # fc1 w
            pl.BlockSpec((1, CPAD), lambda i: (0, 0)),                 # fc1 b
            pl.BlockSpec((CPAD, CPAD), lambda i: (0, 0)),              # fc2 w
            pl.BlockSpec((1, CPAD), lambda i: (0, 0)),                 # fc2 b
        ],
        out_specs=pl.BlockSpec((1, blk, CPAD), lambda i: (i, 0, 0)),
        scratch_shapes=[
            pltpu.VMEM((12, 16, CPAD), jnp.bfloat16),    # act1 (current image)
            pltpu.VMEM((blk * 16, CPAD), jnp.float32),   # act2 (fc1 input, whole block)
            pltpu.VMEM((4, 8, CPAD), jnp.float32),       # conv2 W-pool staging
        ],
        compiler_params=pltpu.CompilerParams(
            dimension_semantics=("parallel",),
            vmem_limit_bytes=VMEM_LIMIT),
    )(patches, packed["c1_w"], packed["c1_b"], packed["c2_w"], packed["c2_b"],
      packed["f1_w"], packed["f1_b"], packed["f2_w"], packed["f2_b"])


# ----------------------------------------------------------------------------
# Parameter init (PyTorch layout) and one-time packing into lane-dense layouts
# ----------------------------------------------------------------------------

def init_params(key):
    ks = jax.random.split(key, 8)
    s = 0.1
    return {
        "conv1_w": s * jax.random.normal(ks[0], (10, 1, 5, 5), jnp.float32),
        "conv1_b": s * jax.random.normal(ks[1], (10,), jnp.float32),
        "conv2_w": s * jax.random.normal(ks[2], (20, 10, 5, 5), jnp.float32),
        "conv2_b": s * jax.random.normal(ks[3], (20,), jnp.float32),
        "fc1_w": s * jax.random.normal(ks[4], (50, 320), jnp.float32),
        "fc1_b": s * jax.random.normal(ks[5], (50,), jnp.float32),
        "fc2_w": s * jax.random.normal(ks[6], (10, 50), jnp.float32),
        "fc2_b": s * jax.random.normal(ks[7], (10,), jnp.float32),
    }


def _pad_bias(b, n):
    return jnp.zeros((1, n), jnp.float32).at[0, :b.shape[0]].set(b.astype(jnp.float32))


def _pack_conv_w(w, cin_pad, cout_pad):
    # torch (OC, C, kh, kw) -> (K*K*cin_pad, cout_pad); row = (kh*K + kw)*cin_pad + ci.
    OC, C, K, _ = w.shape
    wt = jnp.transpose(w, (2, 3, 1, 0))                                 # (kh, kw, ci, oc)
    wp = jnp.zeros((K, K, cin_pad, cout_pad), w.dtype).at[:, :, :C, :OC].set(wt)
    return wp.reshape(K * K * cin_pad, cout_pad)


def _pack_fc1_w(w, c, hh, ww, cin_pad, out_pad):
    # torch fc1_w: (50, 320), columns ordered c*hh*ww + h*ww + w (NCHW .view(-1, 320)).
    # Kernel activations flatten as (h, w, c_padded): fold that permutation + padding in.
    O, I = w.shape
    assert I == c * hh * ww
    wt = jnp.transpose(w.reshape(O, c, hh, ww), (2, 3, 1, 0))           # (h, w, c, o)
    wp = jnp.zeros((hh, ww, cin_pad, out_pad), w.dtype).at[:, :, :c, :O].set(wt)
    return wp.reshape(hh * ww * cin_pad, out_pad)


def _pack_fc2_w(w, n_pad):
    O, I = w.shape                                                      # (10, 50)
    return jnp.zeros((n_pad, n_pad), w.dtype).at[:I, :O].set(w.T)


def pack_params(p):
    return {
        "c1_w": _pack_conv_w(p["conv1_w"], 1, CPAD).astype(jnp.bfloat16),    # (25, 128)
        "c1_b": _pad_bias(p["conv1_b"], CPAD),
        "c2_w": _pack_conv_w(p["conv2_w"], CPAD, CPAD).astype(jnp.bfloat16), # (3200, 128)
        "c2_b": _pad_bias(p["conv2_b"], CPAD),
        "f1_w": _pack_fc1_w(p["fc1_w"], 20, 4, 4, CPAD, CPAD).astype(jnp.bfloat16),
        "f1_b": _pad_bias(p["fc1_b"], CPAD),
        "f2_w": _pack_fc2_w(p["fc2_w"], CPAD).astype(jnp.bfloat16),
        "f2_b": _pad_bias(p["fc2_b"], CPAD),
    }


# ----------------------------------------------------------------------------
# Forward pass (matches the PyTorch CNN.forward, inference semantics)
# ----------------------------------------------------------------------------

@jax.jit
def cnn_forward(packed, x):
    # x: (B, 1, 28, 28) NCHW float32
    B = x.shape[0]
    assert x.shape[1:] == (1, 28, 28), x.shape
    blk = min(8, max(1, B // 2))        # >= 2 grid steps whenever B >= 2 (v7x megacore)
    nb = -(-B // blk)
    b_pad = nb * blk

    # conv1 patches, grouped by 2x2 pool position (built once in XLA; the Pallas
    # kernel then never touches single-lane data).
    x2 = x[:, 0].astype(jnp.float32)                                    # (B, 28, 28)
    taps = [x2[:, kh:kh + 24, kw:kw + 24] for kh in range(5) for kw in range(5)]
    pat = jnp.stack(taps, axis=-1)                                      # (B, 24, 24, 25)
    pat = pat.reshape(B, 12, 2, 12, 2, 25)                              # (b, hp, py, wp, px, t)
    pat = jnp.transpose(pat, (0, 2, 4, 1, 3, 5))                        # (b, py, px, hp, wp, t)
    pat = jnp.pad(pat, ((0, b_pad - B), (0, 0), (0, 0), (0, 0), (0, 4), (0, 0)))
    pat = pat.reshape(b_pad, 4, 12 * 16, 25).astype(jnp.bfloat16)       # rows = hp*16 + wp

    out = _cnn_pallas(pat, packed, blk=blk, nb=nb)                      # (nb, blk, 128)
    return out.reshape(b_pad, CPAD)[:B, :10]


# Pure-JAX f32 reference (numerical self-check only).
def cnn_forward_ref(params, x):
    def conv(z, w, b):
        y = jax.lax.conv_general_dilated(
            z, w, window_strides=(1, 1), padding="VALID",
            dimension_numbers=("NCHW", "OIHW", "NCHW"))
        return y + b[None, :, None, None]

    def pool2(z):
        return jax.lax.reduce_window(z, -jnp.inf, jax.lax.max,
                                     (1, 1, 2, 2), (1, 1, 2, 2), "VALID")

    x = jax.nn.relu(pool2(conv(x, params["conv1_w"], params["conv1_b"])))
    x = jax.nn.relu(pool2(conv(x, params["conv2_w"], params["conv2_b"])))
    x = x.reshape(x.shape[0], -1)                  # channel-major == .view(-1, 320)
    x = jax.nn.relu(x @ params["fc1_w"].T + params["fc1_b"])
    x = x @ params["fc2_w"].T + params["fc2_b"]
    return jax.nn.log_softmax(x, axis=-1)


if __name__ == "__main__":
    key = jax.random.PRNGKey(0)
    pkey, xkey = jax.random.split(key)
    params = init_params(pkey)
    packed = pack_params(params)

    # MNIST-shaped input: the .view(-1, 320) in the reference forward implies 28x28.
    x = jax.random.normal(xkey, (2, 1, 28, 28), jnp.float32)
    out = jax.block_until_ready(cnn_forward(packed, x))
    assert out.shape == (2, 10), out.shape
    # log_softmax rows must (approximately) sum to 1 in probability space.
    assert jnp.allclose(jnp.sum(jnp.exp(out), axis=-1), 1.0, atol=1e-3)
    ref = cnn_forward_ref(params, x)
    max_err = float(jnp.max(jnp.abs(out - ref)))
    assert max_err < 0.15, max_err

    # Exercise the multi-image-per-step + batch-padding path as well (blk=3, nb=3).
    x7 = jax.random.normal(jax.random.PRNGKey(7), (7, 1, 28, 28), jnp.float32)
    out7 = jax.block_until_ready(cnn_forward(packed, x7))
    ref7 = cnn_forward_ref(params, x7)
    assert out7.shape == (7, 10), out7.shape
    assert float(jnp.max(jnp.abs(out7 - ref7))) < 0.15

    print("KERNEL_OK")
</pallas_src>

<mosaic_0001>
module attributes {stable_mosaic.version = 11 : i64} {
  func.func @_cnn_fused_kernel(%arg0: i32, %arg1: memref<1x4x192x25xbf16, #tpu.memory_space<vmem>>, %arg2: memref<25x128xbf16, #tpu.memory_space<vmem>>, %arg3: memref<1x128xf32, #tpu.memory_space<vmem>>, %arg4: memref<3200x128xbf16, #tpu.memory_space<vmem>>, %arg5: memref<1x128xf32, #tpu.memory_space<vmem>>, %arg6: memref<2048x128xbf16, #tpu.memory_space<vmem>>, %arg7: memref<1x128xf32, #tpu.memory_space<vmem>>, %arg8: memref<128x128xbf16, #tpu.memory_space<vmem>>, %arg9: memref<1x128xf32, #tpu.memory_space<vmem>>, %arg10: memref<1x1x128xf32, #tpu.memory_space<vmem>>, %arg11: memref<12x16x128xbf16, #tpu.memory_space<vmem>>, %arg12: memref<16x128xf32, #tpu.memory_space<vmem>>, %arg13: memref<4x8x128xf32, #tpu.memory_space<vmem>>) attributes {dimension_semantics = [#tpu.dimension_semantics<parallel>], iteration_bounds = array<i64: 2>, scalar_prefetch = 0 : i64, scratch_operands = 3 : i64, tpu.core_type = #tpu.core_type<tc>, window_params = [{transform_indices = @transform_0, window_bounds = array<i64: 1, 4, 192, 25>}, {pipeline_mode = #tpu.pipeline_mode<synchronous>, transform_indices = @transform_1, window_bounds = array<i64: 25, 128>}, {pipeline_mode = #tpu.pipeline_mode<synchronous>, transform_indices = @transform_2, window_bounds = array<i64: 1, 128>}, {pipeline_mode = #tpu.pipeline_mode<synchronous>, transform_indices = @transform_3, window_bounds = array<i64: 3200, 128>}, {pipeline_mode = #tpu.pipeline_mode<synchronous>, transform_indices = @transform_4, window_bounds = array<i64: 1, 128>}, {pipeline_mode = #tpu.pipeline_mode<synchronous>, transform_indices = @transform_5, window_bounds = array<i64: 2048, 128>}, {pipeline_mode = #tpu.pipeline_mode<synchronous>, transform_indices = @transform_6, window_bounds = array<i64: 1, 128>}, {pipeline_mode = #tpu.pipeline_mode<synchronous>, transform_indices = @transform_7, window_bounds = array<i64: 128, 128>}, {pipeline_mode = #tpu.pipeline_mode<synchronous>, transform_indices = @transform_8, window_bounds = array<i64: 1, 128>}, {transform_indices = @transform_9, window_bounds = array<i64: 1, 1, 128>}]} {
    %c0_i32 = arith.constant 0 : i32
    %c0_i32_0 = arith.constant 0 : i32
    %c0_i32_1 = arith.constant 0 : i32
    %c0_i32_2 = arith.constant 0 : i32
    %0 = tpu.memref_slice %arg1[%c0_i32, %c0_i32_0, %c0_i32_1, %c0_i32_2] : memref<1x4x192x25xbf16, #tpu.memory_space<vmem>> -> memref<1x4x192x25xbf16, #tpu.memory_space<vmem>>
    %1 = tpu.memref_squeeze %0 : memref<1x4x192x25xbf16, #tpu.memory_space<vmem>> -> memref<4x192x25xbf16, #tpu.memory_space<vmem>>
    %c0 = arith.constant 0 : index
    %c0_3 = arith.constant 0 : index
    %c0_4 = arith.constant 0 : index
    %2 = vector.load %1[%c0, %c0_3, %c0_4] : memref<4x192x25xbf16, #tpu.memory_space<vmem>>, vector<1x192x25xbf16>
    %3 = vector.shape_cast %2 : vector<1x192x25xbf16> to vector<192x25xbf16>
    %c0_5 = arith.constant 0 : index
    %c0_6 = arith.constant 0 : index
    %4 = vector.load %arg2[%c0_5, %c0_6] : memref<25x128xbf16, #tpu.memory_space<vmem>>, vector<25x128xbf16>
    %cst = arith.constant dense<0.000000e+00> : vector<192x128xf32>
    %5 = tpu.matmul %3, %4, %cst {dimension_numbers = #tpu.dot_dimension_numbers<[1], [0], [0], [1], [0, 0, 1, 1], [], []>} : vector<192x25xbf16>, vector<25x128xbf16>, vector<192x128xf32> -> vector<192x128xf32>
    %c0_i32_7 = arith.constant 0 : i32
    %c0_i32_8 = arith.constant 0 : i32
    %c0_i32_9 = arith.constant 0 : i32
    %6 = tpu.memref_slice %arg1[%c0_i32, %c0_i32_7, %c0_i32_8, %c0_i32_9] : memref<1x4x192x25xbf16, #tpu.memory_space<vmem>> -> memref<1x4x192x25xbf16, #tpu.memory_space<vmem>>
    %7 = tpu.memref_squeeze %6 : memref<1x4x192x25xbf16, #tpu.memory_space<vmem>> -> memref<4x192x25xbf16, #tpu.memory_space<vmem>>
    %c1 = arith.constant 1 : index
    %c0_10 = arith.constant 0 : index
    %c0_11 = arith.constant 0 : index
    %8 = vector.load %7[%c1, %c0_10, %c0_11] : memref<4x192x25xbf16, #tpu.memory_space<vmem>>, vector<1x192x25xbf16>
    %9 = vector.shape_cast %8 : vector<1x192x25xbf16> to vector<192x25xbf16>
    %c0_12 = arith.constant 0 : index
    %c0_13 = arith.constant 0 : index
    %10 = vector.load %arg2[%c0_12, %c0_13] : memref<25x128xbf16, #tpu.memory_space<vmem>>, vector<25x128xbf16>
    %cst_14 = arith.constant dense<0.000000e+00> : vector<192x128xf32>
    %11 = tpu.matmul %9, %10, %cst_14 {dimension_numbers = #tpu.dot_dimension_numbers<[1], [0], [0], [1], [0, 0, 1, 1], [], []>} : vector<192x25xbf16>, vector<25x128xbf16>, vector<192x128xf32> -> vector<192x128xf32>
    %12 = arith.maximumf %5, %11 : vector<192x128xf32>
    %c0_i32_15 = arith.constant 0 : i32
    %c0_i32_16 = arith.constant 0 : i32
    %c0_i32_17 = arith.constant 0 : i32
    %13 = tpu.memref_slice %arg1[%c0_i32, %c0_i32_15, %c0_i32_16, %c0_i32_17] : memref<1x4x192x25xbf16, #tpu.memory_space<vmem>> -> memref<1x4x192x25xbf16, #tpu.memory_space<vmem>>
    %14 = tpu.memref_squeeze %13 : memref<1x4x192x25xbf16, #tpu.memory_space<vmem>> -> memref<4x192x25xbf16, #tpu.memory_space<vmem>>
    %c2 = arith.constant 2 : index
    %c0_18 = arith.constant 0 : index
    %c0_19 = arith.constant 0 : index
    %15 = vector.load %14[%c2, %c0_18, %c0_19] : memref<4x192x25xbf16, #tpu.memory_space<vmem>>, vector<1x192x25xbf16>
    %16 = vector.shape_cast %15 : vector<1x192x25xbf16> to vector<192x25xbf16>
    %c0_20 = arith.constant 0 : index
    %c0_21 = arith.constant 0 : index
    %17 = vector.load %arg2[%c0_20, %c0_21] : memref<25x128xbf16, #tpu.memory_space<vmem>>, vector<25x128xbf16>
    %cst_22 = arith.constant dense<0.000000e+00> : vector<192x128xf32>
    %18 = tpu.matmul %16, %17, %cst_22 {dimension_numbers = #tpu.dot_dimension_numbers<[1], [0], [0], [1], [0, 0, 1, 1], [], []>} : vector<192x25xbf16>, vector<25x128xbf16>, vector<192x128xf32> -> vector<192x128xf32>
    %19 = arith.maximumf %12, %18 : vector<192x128xf32>
    %c0_i32_23 = arith.constant 0 : i32
    %c0_i32_24 = arith.constant 0 : i32
    %c0_i32_25 = arith.constant 0 : i32
    %20 = tpu.memref_slice %arg1[%c0_i32, %c0_i32_23, %c0_i32_24, %c0_i32_25] : memref<1x4x192x25xbf16, #tpu.memory_space<vmem>> -> memref<1x4x192x25xbf16, #tpu.memory_space<vmem>>
    %21 = tpu.memref_squeeze %20 : memref<1x4x192x25xbf16, #tpu.memory_space<vmem>> -> memref<4x192x25xbf16, #tpu.memory_space<vmem>>
    %c3 = arith.constant 3 : index
    %c0_26 = arith.constant 0 : index
    %c0_27 = arith.constant 0 : index
    %22 = vector.load %21[%c3, %c0_26, %c0_27] : memref<4x192x25xbf16, #tpu.memory_space<vmem>>, vector<1x192x25xbf16>
    %23 = vector.shape_cast %22 : vector<1x192x25xbf16> to vector<192x25xbf16>
    %c0_28 = arith.constant 0 : index
    %c0_29 = arith.constant 0 : index
    %24 = vector.load %arg2[%c0_28, %c0_29] : memref<25x128xbf16, #tpu.memory_space<vmem>>, vector<25x128xbf16>
    %cst_30 = arith.constant dense<0.000000e+00> : vector<192x128xf32>
    %25 = tpu.matmul %23, %24, %cst_30 {dimension_numbers = #tpu.dot_dimension_numbers<[1], [0], [0], [1], [0, 0, 1, 1], [], []>} : vector<192x25xbf16>, vector<25x128xbf16>, vector<192x128xf32> -> vector<192x128xf32>
    %26 = arith.maximumf %19, %25 : vector<192x128xf32>
    %c0_31 = arith.constant 0 : index
    %c0_32 = arith.constant 0 : index
    %27 = vector.load %arg3[%c0_31, %c0_32] : memref<1x128xf32, #tpu.memory_space<vmem>>, vector<1x128xf32>
    %28 = vector.broadcast %27 : vector<1x128xf32> to vector<192x128xf32>
    %29 = arith.addf %26, %28 : vector<192x128xf32>
    %cst_33 = arith.constant 0.000000e+00 : f32
    %30 = vector.broadcast %cst_33 : f32 to vector<192x128xf32>
    %31 = arith.maximumf %29, %30 : vector<192x128xf32>
    %32 = vector.shape_cast %31 : vector<192x128xf32> to vector<12x16x128xf32>
    %33 = arith.truncf %32 : vector<12x16x128xf32> to vector<12x16x128xbf16>
    %c0_34 = arith.constant 0 : index
    %c0_35 = arith.constant 0 : index
    %c0_36 = arith.constant 0 : index
    %34 = vector.load %arg11[%c0_34, %c0_35, %c0_36] : memref<12x16x128xbf16, #tpu.memory_space<vmem>>, vector<12x16x128xbf16>
    tpu.vector_store %arg11[%c0_34, %c0_35, %c0_36], %33 {strides = array<i32>} : memref<12x16x128xbf16, #tpu.memory_space<vmem>>, vector<12x16x128xbf16>,
    %cst_37 = arith.constant 0.000000e+00 : f32
    %35 = vector.broadcast %cst_37 : f32 to vector<64x128xf32>
    %c0_38 = arith.constant 0 : index
    %c0_39 = arith.constant 0 : index
    %c0_40 = arith.constant 0 : index
    %36 = vector.load %arg11[%c0_38, %c0_39, %c0_40] : memref<12x16x128xbf16, #tpu.memory_space<vmem>>, vector<8x8x128xbf16>
    %37 = vector.shape_cast %36 : vector<8x8x128xbf16> to vector<64x128xbf16>
    %c0_41 = arith.constant 0 : index
    %c0_42 = arith.constant 0 : index
    %38 = vector.load %arg4[%c0_41, %c0_42] : memref<3200x128xbf16, #tpu.memory_space<vmem>>, vector<128x128xbf16>
    %cst_43 = arith.constant dense<0.000000e+00> : vector<64x128xf32>
    %39 = tpu.matmul %37, %38, %cst_43 {dimension_numbers = #tpu.dot_dimension_numbers<[1], [0], [0], [1], [0, 0, 1, 1], [], []>} : vector<64x128xbf16>, vector<128x128xbf16>, vector<64x128xf32> -> vector<64x128xf32>
    %40 = arith.addf %35, %39 : vector<64x128xf32>
    %c0_44 = arith.constant 0 : index
    %c1_45 = arith.constant 1 : index
    %c0_46 = arith.constant 0 : index
    %41 = vector.load %arg11[%c0_44, %c1_45, %c0_46] : memref<12x16x128xbf16, #tpu.memory_space<vmem>>, vector<8x8x128xbf16>
    %42 = vector.shape_cast %41 : vector<8x8x128xbf16> to vector<64x128xbf16>
    %c128 = arith.constant 128 : index
    %c0_47 = arith.constant 0 : index
    %43 = vector.load %arg4[%c128, %c0_47] : memref<3200x128xbf16, #tpu.memory_space<vmem>>, vector<128x128xbf16>
    %cst_48 = arith.constant dense<0.000000e+00> : vector<64x128xf32>
    %44 = tpu.matmul %42, %43, %cst_48 {dimension_numbers = #tpu.dot_dimension_numbers<[1], [0], [0], [1], [0, 0, 1, 1], [], []>} : vector<64x128xbf16>, vector<128x128xbf16>, vector<64x128xf32> -> vector<64x128xf32>
    %45 = arith.addf %40, %44 : vector<64x128xf32>
    %c0_49 = arith.constant 0 : index
    %c2_50 = arith.constant 2 : index
    %c0_51 = arith.constant 0 : index
    %46 = vector.load %arg11[%c0_49, %c2_50, %c0_51] : memref<12x16x128xbf16, #tpu.memory_space<vmem>>, vector<8x8x128xbf16>
    %47 = vector.shape_cast %46 : vector<8x8x128xbf16> to vector<64x128xbf16>
    %c256 = arith.constant 256 : index
    %c0_52 = arith.constant 0 : index
    %48 = vector.load %arg4[%c256, %c0_52] : memref<3200x128xbf16, #tpu.memory_space<vmem>>, vector<128x128xbf16>
    %cst_53 = arith.constant dense<0.000000e+00> : vector<64x128xf32>
    %49 = tpu.matmul %47, %48, %cst_53 {dimension_numbers = #tpu.dot_dimension_numbers<[1], [0], [0], [1], [0, 0, 1, 1], [], []>} : vector<64x128xbf16>, vector<128x128xbf16>, vector<64x128xf32> -> vector<64x128xf32>
    %50 = arith.addf %45, %49 : vector<64x128xf32>
    %c0_54 = arith.constant 0 : index
    %c3_55 = arith.constant 3 : index
    %c0_56 = arith.constant 0 : index
    %51 = vector.load %arg11[%c0_54, %c3_55, %c0_56] : memref<12x16x128xbf16, #tpu.memory_space<vmem>>, vector<8x8x128xbf16>
    %52 = vector.shape_cast %51 : vector<8x8x128xbf16> to vector<64x128xbf16>
    %c384 = arith.constant 384 : index
    %c0_57 = arith.constant 0 : index
    %53 = vector.load %arg4[%c384, %c0_57] : memref<3200x128xbf16, #tpu.memory_space<vmem>>, vector<128x128xbf16>
    %cst_58 = arith.constant dense<0.000000e+00> : vector<64x128xf32>
    %54 = tpu.matmul %52, %53, %cst_58 {dimension_numbers = #tpu.dot_dimension_numbers<[1], [0], [0], [1], [0, 0, 1, 1], [], []>} : vector<64x128xbf16>, vector<128x128xbf16>, vector<64x128xf32> -> vector<64x128xf32>
    %55 = arith.addf %50, %54 : vector<64x128xf32>
    %c0_59 = arith.constant 0 : index
    %c4 = arith.constant 4 : index
    %c0_60 = arith.constant 0 : index
    %56 = vector.load %arg11[%c0_59, %c4, %c0_60] : memref<12x16x128xbf16, #tpu.memory_space<vmem>>, vector<8x8x128xbf16>
    %57 = vector.shape_cast %56 : vector<8x8x128xbf16> to vector<64x128xbf16>
    %c512 = arith.constant 512 : index
    %c0_61 = arith.constant 0 : index
    %58 = vector.load %arg4[%c512, %c0_61] : memref<3200x128xbf16, #tpu.memory_space<vmem>>, vector<128x128xbf16>
    %cst_62 = arith.constant dense<0.000000e+00> : vector<64x128xf32>
    %59 = tpu.matmul %57, %58, %cst_62 {dimension_numbers = #tpu.dot_dimension_numbers<[1], [0], [0], [1], [0, 0, 1, 1], [], []>} : vector<64x128xbf16>, vector<128x128xbf16>, vector<64x128xf32> -> vector<64x128xf32>
    %60 = arith.addf %55, %59 : vector<64x128xf32>
    %c1_63 = arith.constant 1 : index
    %c0_64 = arith.constant 0 : index
    %c0_65 = arith.constant 0 : index
    %61 = vector.load %arg11[%c1_63, %c0_64, %c0_65] : memref<12x16x128xbf16, #tpu.memory_space<vmem>>, vector<8x8x128xbf16>
    %62 = vector.shape_cast %61 : vector<8x8x128xbf16> to vector<64x128xbf16>
    %c640 = arith.constant 640 : index
    %c0_66 = arith.constant 0 : index
    %63 = vector.load %arg4[%c640, %c0_66] : memref<3200x128xbf16, #tpu.memory_space<vmem>>, vector<128x128xbf16>
    %cst_67 = arith.constant dense<0.000000e+00> : vector<64x128xf32>
    %64 = tpu.matmul %62, %63, %cst_67 {dimension_numbers = #tpu.dot_dimension_numbers<[1], [0], [0], [1], [0, 0, 1, 1], [], []>} : vector<64x128xbf16>, vector<128x128xbf16>, vector<64x128xf32> -> vector<64x128xf32>
    %65 = arith.addf %60, %64 : vector<64x128xf32>
    %c1_68 = arith.constant 1 : index
    %c1_69 = arith.constant 1 : index
    %c0_70 = arith.constant 0 : index
    %66 = vector.load %arg11[%c1_68, %c1_69, %c0_70] : memref<12x16x128xbf16, #tpu.memory_space<vmem>>, vector<8x8x128xbf16>
    %67 = vector.shape_cast %66 : vector<8x8x128xbf16> to vector<64x128xbf16>
    %c768 = arith.constant 768 : index
    %c0_71 = arith.constant 0 : index
    %68 = vector.load %arg4[%c768, %c0_71] : memref<3200x128xbf16, #tpu.memory_space<vmem>>, vector<128x128xbf16>
    %cst_72 = arith.constant dense<0.000000e+00> : vector<64x128xf32>
    %69 = tpu.matmul %67, %68, %cst_72 {dimension_numbers = #tpu.dot_dimension_numbers<[1], [0], [0], [1], [0, 0, 1, 1], [], []>} : vector<64x128xbf16>, vector<128x128xbf16>, vector<64x128xf32> -> vector<64x128xf32>
    %70 = arith.addf %65, %69 : vector<64x128xf32>
    %c1_73 = arith.constant 1 : index
    %c2_74 = arith.constant 2 : index
    %c0_75 = arith.constant 0 : index
    %71 = vector.load %arg11[%c1_73, %c2_74, %c0_75] : memref<12x16x128xbf16, #tpu.memory_space<vmem>>, vector<8x8x128xbf16>
    %72 = vector.shape_cast %71 : vector<8x8x128xbf16> to vector<64x128xbf16>
    %c896 = arith.constant 896 : index
    %c0_76 = arith.constant 0 : index
    %73 = vector.load %arg4[%c896, %c0_76] : memref<3200x128xbf16, #tpu.memory_space<vmem>>, vector<128x128xbf16>
    %cst_77 = arith.constant dense<0.000000e+00> : vector<64x128xf32>
    %74 = tpu.matmul %72, %73, %cst_77 {dimension_numbers = #tpu.dot_dimension_numbers<[1], [0], [0], [1], [0, 0, 1, 1], [], []>} : vector<64x128xbf16>, vector<128x128xbf16>, vector<64x128xf32> -> vector<64x128xf32>
    %75 = arith.addf %70, %74 : vector<64x128xf32>
    %c1_78 = arith.constant 1 : index
    %c3_79 = arith.constant 3 : index
    %c0_80 = arith.constant 0 : index
    %76 = vector.load %arg11[%c1_78, %c3_79, %c0_80] : memref<12x16x128xbf16, #tpu.memory_space<vmem>>, vector<8x8x128xbf16>
    %77 = vector.shape_cast %76 : vector<8x8x128xbf16> to vector<64x128xbf16>
    %c1024 = arith.constant 1024 : index
    %c0_81 = arith.constant 0 : index
    %78 = vector.load %arg4[%c1024, %c0_81] : memref<3200x128xbf16, #tpu.memory_space<vmem>>, vector<128x128xbf16>
    %cst_82 = arith.constant dense<0.000000e+00> : vector<64x128xf32>
    %79 = tpu.matmul %77, %78, %cst_82 {dimension_numbers = #tpu.dot_dimension_numbers<[1], [0], [0], [1], [0, 0, 1, 1], [], []>} : vector<64x128xbf16>, vector<128x128xbf16>, vector<64x128xf32> -> vector<64x128xf32>
    %80 = arith.addf %75, %79 : vector<64x128xf32>
    %c1_83 = arith.constant 1 : index
    %c4_84 = arith.constant 4 : index
    %c0_85 = arith.constant 0 : index
    %81 = vector.load %arg11[%c1_83, %c4_84, %c0_85] : memref<12x16x128xbf16, #tpu.memory_space<vmem>>, vector<8x8x128xbf16>
    %82 = vector.shape_cast %81 : vector<8x8x128xbf16> to vector<64x128xbf16>
    %c1152 = arith.constant 1152 : index
    %c0_86 = arith.constant 0 : index
    %83 = vector.load %arg4[%c1152, %c0_86] : memref<3200x128xbf16, #tpu.memory_space<vmem>>, vector<128x128xbf16>
    %cst_87 = arith.constant dense<0.000000e+00> : vector<64x128xf32>
    %84 = tpu.matmul %82, %83, %cst_87 {dimension_numbers = #tpu.dot_dimension_numbers<[1], [0], [0], [1], [0, 0, 1, 1], [], []>} : vector<64x128xbf16>, vector<128x128xbf16>, vector<64x128xf32> -> vector<64x128xf32>
    %85 = arith.addf %80, %84 : vector<64x128xf32>
    %c2_88 = arith.constant 2 : index
    %c0_89 = arith.constant 0 : index
    %c0_90 = arith.constant 0 : index
    %86 = vector.load %arg11[%c2_88, %c0_89, %c0_90] : memref<12x16x128xbf16, #tpu.memory_space<vmem>>, vector<8x8x128xbf16>
    %87 = vector.shape_cast %86 : vector<8x8x128xbf16> to vector<64x128xbf16>
    %c1280 = arith.constant 1280 : index
    %c0_91 = arith.constant 0 : index
    %88 = vector.load %arg4[%c1280, %c0_91] : memref<3200x128xbf16, #tpu.memory_space<vmem>>, vector<128x128xbf16>
    %cst_92 = arith.constant dense<0.000000e+00> : vector<64x128xf32>
    %89 = tpu.matmul %87, %88, %cst_92 {dimension_numbers = #tpu.dot_dimension_numbers<[1], [0], [0], [1], [0, 0, 1, 1], [], []>} : vector<64x128xbf16>, vector<128x128xbf16>, vector<64x128xf32> -> vector<64x128xf32>
    %90 = arith.addf %85, %89 : vector<64x128xf32>
    %c2_93 = arith.constant 2 : index
    %c1_94 = arith.constant 1 : index
    %c0_95 = arith.constant 0 : index
    %91 = vector.load %arg11[%c2_93, %c1_94, %c0_95] : memref<12x16x128xbf16, #tpu.memory_space<vmem>>, vector<8x8x128xbf16>
    %92 = vector.shape_cast %91 : vector<8x8x128xbf16> to vector<64x128xbf16>
    %c1408 = arith.constant 1408 : index
    %c0_96 = arith.constant 0 : index
    %93 = vector.load %arg4[%c1408, %c0_96] : memref<3200x128xbf16, #tpu.memory_space<vmem>>, vector<128x128xbf16>
    %cst_97 = arith.constant dense<0.000000e+00> : vector<64x128xf32>
    %94 = tpu.matmul %92, %93, %cst_97 {dimension_numbers = #tpu.dot_dimension_numbers<[1], [0], [0], [1], [0, 0, 1, 1], [], []>} : vector<64x128xbf16>, vector<128x128xbf16>, vector<64x128xf32> -> vector<64x128xf32>
    %95 = arith.addf %90, %94 : vector<64x128xf32>
    %c2_98 = arith.constant 2 : index
    %c2_99 = arith.constant 2 : index
    %c0_100 = arith.constant 0 : index
    %96 = vector.load %arg11[%c2_98, %c2_99, %c0_100] : memref<12x16x128xbf16, #tpu.memory_space<vmem>>, vector<8x8x128xbf16>
    %97 = vector.shape_cast %96 : vector<8x8x128xbf16> to vector<64x128xbf16>
    %c1536 = arith.constant 1536 : index
    %c0_101 = arith.constant 0 : index
    %98 = vector.load %arg4[%c1536, %c0_101] : memref<3200x128xbf16, #tpu.memory_space<vmem>>, vector<128x128xbf16>
    %cst_102 = arith.constant dense<0.000000e+00> : vector<64x128xf32>
    %99 = tpu.matmul %97, %98, %cst_102 {dimension_numbers = #tpu.dot_dimension_numbers<[1], [0], [0], [1], [0, 0, 1, 1], [], []>} : vector<64x128xbf16>, vector<128x128xbf16>, vector<64x128xf32> -> vector<64x128xf32>
    %100 = arith.addf %95, %99 : vector<64x128xf32>
    %c2_103 = arith.constant 2 : index
    %c3_104 = arith.constant 3 : index
    %c0_105 = arith.constant 0 : index
    %101 = vector.load %arg11[%c2_103, %c3_104, %c0_105] : memref<12x16x128xbf16, #tpu.memory_space<vmem>>, vector<8x8x128xbf16>
    %102 = vector.shape_cast %101 : vector<8x8x128xbf16> to vector<64x128xbf16>
    %c1664 = arith.constant 1664 : index
    %c0_106 = arith.constant 0 : index
    %103 = vector.load %arg4[%c1664, %c0_106] : memref<3200x128xbf16, #tpu.memory_space<vmem>>, vector<128x128xbf16>
    %cst_107 = arith.constant dense<0.000000e+00> : vector<64x128xf32>
    %104 = tpu.matmul %102, %103, %cst_107 {dimension_numbers = #tpu.dot_dimension_numbers<[1], [0], [0], [1], [0, 0, 1, 1], [], []>} : vector<64x128xbf16>, vector<128x128xbf16>, vector<64x128xf32> -> vector<64x128xf32>
    %105 = arith.addf %100, %104 : vector<64x128xf32>
    %c2_108 = arith.constant 2 : index
    %c4_109 = arith.constant 4 : index
    %c0_110 = arith.constant 0 : index
    %106 = vector.load %arg11[%c2_108, %c4_109, %c0_110] : memref<12x16x128xbf16, #tpu.memory_space<vmem>>, vector<8x8x128xbf16>
    %107 = vector.shape_cast %106 : vector<8x8x128xbf16> to vector<64x128xbf16>
    %c1792 = arith.constant 1792 : index
    %c0_111 = arith.constant 0 : index
    %108 = vector.load %arg4[%c1792, %c0_111] : memref<3200x128xbf16, #tpu.memory_space<vmem>>, vector<128x128xbf16>
    %cst_112 = arith.constant dense<0.000000e+00> : vector<64x128xf32>
    %109 = tpu.matmul %107, %108, %cst_112 {dimension_numbers = #tpu.dot_dimension_numbers<[1], [0], [0], [1], [0, 0, 1, 1], [], []>} : vector<64x128xbf16>, vector<128x128xbf16>, vector<64x128xf32> -> vector<64x128xf32>
    %110 = arith.addf %105, %109 : vector<64x128xf32>
    %c3_113 = arith.constant 3 : index
    %c0_114 = arith.constant 0 : index
    %c0_115 = arith.constant 0 : index
    %111 = vector.load %arg11[%c3_113, %c0_114, %c0_115] : memref<12x16x128xbf16, #tpu.memory_space<vmem>>, vector<8x8x128xbf16>
    %112 = vector.shape_cast %111 : vector<8x8x128xbf16> to vector<64x128xbf16>
    %c1920 = arith.constant 1920 : index
    %c0_116 = arith.constant 0 : index
    %113 = vector.load %arg4[%c1920, %c0_116] : memref<3200x128xbf16, #tpu.memory_space<vmem>>, vector<128x128xbf16>
    %cst_117 = arith.constant dense<0.000000e+00> : vector<64x128xf32>
    %114 = tpu.matmul %112, %113, %cst_117 {dimension_numbers = #tpu.dot_dimension_numbers<[1], [0], [0], [1], [0, 0, 1, 1], [], []>} : vector<64x128xbf16>, vector<128x128xbf16>, vector<64x128xf32> -> vector<64x128xf32>
    %115 = arith.addf %110, %114 : vector<64x128xf32>
    %c3_118 = arith.constant 3 : index
    %c1_119 = arith.constant 1 : index
    %c0_120 = arith.constant 0 : index
    %116 = vector.load %arg11[%c3_118, %c1_119, %c0_120] : memref<12x16x128xbf16, #tpu.memory_space<vmem>>, vector<8x8x128xbf16>
    %117 = vector.shape_cast %116 : vector<8x8x128xbf16> to vector<64x128xbf16>
    %c2048 = arith.constant 2048 : index
    %c0_121 = arith.constant 0 : index
    %118 = vector.load %arg4[%c2048, %c0_121] : memref<3200x128xbf16, #tpu.memory_space<vmem>>, vector<128x128xbf16>
    %cst_122 = arith.constant dense<0.000000e+00> : vector<64x128xf32>
    %119 = tpu.matmul %117, %118, %cst_122 {dimension_numbers = #tpu.dot_dimension_numbers<[1], [0], [0], [1], [0, 0, 1, 1], [], []>} : vector<64x128xbf16>, vector<128x128xbf16>, vector<64x128xf32> -> vector<64x128xf32>
    %120 = arith.addf %115, %119 : vector<64x128xf32>
    %c3_123 = arith.constant 3 : index
    %c2_124 = arith.constant 2 : index
    %c0_125 = arith.constant 0 : index
    %121 = vector.load %arg11[%c3_123, %c2_124, %c0_125] : memref<12x16x128xbf16, #tpu.memory_space<vmem>>, vector<8x8x128xbf16>
    %122 = vector.shape_cast %121 : vector<8x8x128xbf16> to vector<64x128xbf16>
    %c2176 = arith.constant 2176 : index
    %c0_126 = arith.constant 0 : index
    %123 = vector.load %arg4[%c2176, %c0_126] : memref<3200x128xbf16, #tpu.memory_space<vmem>>, vector<128x128xbf16>
    %cst_127 = arith.constant dense<0.000000e+00> : vector<64x128xf32>
    %124 = tpu.matmul %122, %123, %cst_127 {dimension_numbers = #tpu.dot_dimension_numbers<[1], [0], [0], [1], [0, 0, 1, 1], [], []>} : vector<64x128xbf16>, vector<128x128xbf16>, vector<64x128xf32> -> vector<64x128xf32>
    %125 = arith.addf %120, %124 : vector<64x128xf32>
    %c3_128 = arith.constant 3 : index
    %c3_129 = arith.constant 3 : index
    %c0_130 = arith.constant 0 : index
    %126 = vector.load %arg11[%c3_128, %c3_129, %c0_130] : memref<12x16x128xbf16, #tpu.memory_space<vmem>>, vector<8x8x128xbf16>
    %127 = vector.shape_cast %126 : vector<8x8x128xbf16> to vector<64x128xbf16>
    %c2304 = arith.constant 2304 : index
    %c0_131 = arith.constant 0 : index
    %128 = vector.load %arg4[%c2304, %c0_131] : memref<3200x128xbf16, #tpu.memory_space<vmem>>, vector<128x128xbf16>
    %cst_132 = arith.constant dense<0.000000e+00> : vector<64x128xf32>
    %129 = tpu.matmul %127, %128, %cst_132 {dimension_numbers = #tpu.dot_dimension_numbers<[1], [0], [0], [1], [0, 0, 1, 1], [], []>} : vector<64x128xbf16>, vector<128x128xbf16>, vector<64x128xf32> -> vector<64x128xf32>
    %130 = arith.addf %125, %129 : vector<64x128xf32>
    %c3_133 = arith.constant 3 : index
    %c4_134 = arith.constant 4 : index
    %c0_135 = arith.constant 0 : index
    %131 = vector.load %arg11[%c3_133, %c4_134, %c0_135] : memref<12x16x128xbf16, #tpu.memory_space<vmem>>, vector<8x8x128xbf16>
    %132 = vector.shape_cast %131 : vector<8x8x128xbf16> to vector<64x128xbf16>
    %c2432 = arith.constant 2432 : index
    %c0_136 = arith.constant 0 : index
    %133 = vector.load %arg4[%c2432, %c0_136] : memref<3200x128xbf16, #tpu.memory_space<vmem>>, vector<128x128xbf16>
    %cst_137 = arith.constant dense<0.000000e+00> : vector<64x128xf32>
    %134 = tpu.matmul %132, %133, %cst_137 {dimension_numbers = #tpu.dot_dimension_numbers<[1], [0], [0], [1], [0, 0, 1, 1], [], []>} : vector<64x128xbf16>, vector<128x128xbf16>, vector<64x128xf32> -> vector<64x128xf32>
    %135 = arith.addf %130, %134 : vector<64x128xf32>
    %c4_138 = arith.constant 4 : index
    %c0_139 = arith.constant 0 : index
    %c0_140 = arith.constant 0 : index
    %136 = vector.load %arg11[%c4_138, %c0_139, %c0_140] : memref<12x16x128xbf16, #tpu.memory_space<vmem>>, vector<8x8x128xbf16>
    %137 = vector.shape_cast %136 : vector<8x8x128xbf16> to vector<64x128xbf16>
    %c2560 = arith.constant 2560 : index
    %c0_141 = arith.constant 0 : index
    %138 = vector.load %arg4[%c2560, %c0_141] : memref<3200x128xbf16, #tpu.memory_space<vmem>>, vector<128x128xbf16>
    %cst_142 = arith.constant dense<0.000000e+00> : vector<64x128xf32>
    %139 = tpu.matmul %137, %138, %cst_142 {dimension_numbers = #tpu.dot_dimension_numbers<[1], [0], [0], [1], [0, 0, 1, 1], [], []>} : vector<64x128xbf16>, vector<128x128xbf16>, vector<64x128xf32> -> vector<64x128xf32>
    %140 = arith.addf %135, %139 : vector<64x128xf32>
    %c4_143 = arith.constant 4 : index
    %c1_144 = arith.constant 1 : index
    %c0_145 = arith.constant 0 : index
    %141 = vector.load %arg11[%c4_143, %c1_144, %c0_145] : memref<12x16x128xbf16, #tpu.memory_space<vmem>>, vector<8x8x128xbf16>
    %142 = vector.shape_cast %141 : vector<8x8x128xbf16> to vector<64x128xbf16>
    %c2688 = arith.constant 2688 : index
    %c0_146 = arith.constant 0 : index
    %143 = vector.load %arg4[%c2688, %c0_146] : memref<3200x128xbf16, #tpu.memory_space<vmem>>, vector<128x128xbf16>
    %cst_147 = arith.constant dense<0.000000e+00> : vector<64x128xf32>
    %144 = tpu.matmul %142, %143, %cst_147 {dimension_numbers = #tpu.dot_dimension_numbers<[1], [0], [0], [1], [0, 0, 1, 1], [], []>} : vector<64x128xbf16>, vector<128x128xbf16>, vector<64x128xf32> -> vector<64x128xf32>
    %145 = arith.addf %140, %144 : vector<64x128xf32>
    %c4_148 = arith.constant 4 : index
    %c2_149 = arith.constant 2 : index
    %c0_150 = arith.constant 0 : index
    %146 = vector.load %arg11[%c4_148, %c2_149, %c0_150] : memref<12x16x128xbf16, #tpu.memory_space<vmem>>, vector<8x8x128xbf16>
    %147 = vector.shape_cast %146 : vector<8x8x128xbf16> to vector<64x128xbf16>
    %c2816 = arith.constant 2816 : index
    %c0_151 = arith.constant 0 : index
    %148 = vector.load %arg4[%c2816, %c0_151] : memref<3200x128xbf16, #tpu.memory_space<vmem>>, vector<128x128xbf16>
    %cst_152 = arith.constant dense<0.000000e+00> : vector<64x128xf32>
    %149 = tpu.matmul %147, %148, %cst_152 {dimension_numbers = #tpu.dot_dimension_numbers<[1], [0], [0], [1], [0, 0, 1, 1], [], []>} : vector<64x128xbf16>, vector<128x128xbf16>, vector<64x128xf32> -> vector<64x128xf32>
    %150 = arith.addf %145, %149 : vector<64x128xf32>
    %c4_153 = arith.constant 4 : index
    %c3_154 = arith.constant 3 : index
    %c0_155 = arith.constant 0 : index
    %151 = vector.load %arg11[%c4_153, %c3_154, %c0_155] : memref<12x16x128xbf16, #tpu.memory_space<vmem>>, vector<8x8x128xbf16>
    %152 = vector.shape_cast %151 : vector<8x8x128xbf16> to vector<64x128xbf16>
    %c2944 = arith.constant 2944 : index
    %c0_156 = arith.constant 0 : index
    %153 = vector.load %arg4[%c2944, %c0_156] : memref<3200x128xbf16, #tpu.memory_space<vmem>>, vector<128x128xbf16>
    %cst_157 = arith.constant dense<0.000000e+00> : vector<64x128xf32>
    %154 = tpu.matmul %152, %153, %cst_157 {dimension_numbers = #tpu.dot_dimension_numbers<[1], [0], [0], [1], [0, 0, 1, 1], [], []>} : vector<64x128xbf16>, vector<128x128xbf16>, vector<64x128xf32> -> vector<64x128xf32>
    %155 = arith.addf %150, %154 : vector<64x128xf32>
    %c4_158 = arith.constant 4 : index
    %c4_159 = arith.constant 4 : index
    %c0_160 = arith.constant 0 : index
    %156 = vector.load %arg11[%c4_158, %c4_159, %c0_160] : memref<12x16x128xbf16, #tpu.memory_space<vmem>>, vector<8x8x128xbf16>
    %157 = vector.shape_cast %156 : vector<8x8x128xbf16> to vector<64x128xbf16>
    %c3072 = arith.constant 3072 : index
    %c0_161 = arith.constant 0 : index
    %158 = vector.load %arg4[%c3072, %c0_161] : memref<3200x128xbf16, #tpu.memory_space<vmem>>, vector<128x128xbf16>
    %cst_162 = arith.constant dense<0.000000e+00> : vector<64x128xf32>
    %159 = tpu.matmul %157, %158, %cst_162 {dimension_numbers = #tpu.dot_dimension_numbers<[1], [0], [0], [1], [0, 0, 1, 1], [], []>} : vector<64x128xbf16>, vector<128x128xbf16>, vector<64x128xf32> -> vector<64x128xf32>
    %160 = arith.addf %155, %159 : vector<64x128xf32>
    %161 = vector.shape_cast %160 : vector<64x128xf32> to vector<4x16x128xf32>
    %162 = vector.extract_strided_slice %161 {offsets = [0, 0, 0], sizes = [4, 8, 128], strides = [1, 1, 1]} : vector<4x16x128xf32> to vector<4x8x128xf32>
    %163 = vector.extract_strided_slice %161 {offsets = [0, 8, 0], sizes = [4, 8, 128], strides = [1, 1, 1]} : vector<4x16x128xf32> to vector<4x8x128xf32>
    %164 = arith.maximumf %162, %163 : vector<4x8x128xf32>
    %c0_163 = arith.constant 0 : index
    %c0_164 = arith.constant 0 : index
    %c0_165 = arith.constant 0 : index
    %165 = vector.load %arg13[%c0_163, %c0_164, %c0_165] : memref<4x8x128xf32, #tpu.memory_space<vmem>>, vector<4x8x128xf32>
    tpu.vector_store %arg13[%c0_163, %c0_164, %c0_165], %164 {strides = array<i32>} : memref<4x8x128xf32, #tpu.memory_space<vmem>>, vector<4x8x128xf32>,
    %c0_166 = arith.constant 0 : index
    %c0_167 = arith.constant 0 : index
    %c0_168 = arith.constant 0 : index
    %166 = tpu.strided_load %arg13[%c0_166, %c0_167, %c0_168] {strides = array<i32: 1, 2, 1>} : memref<4x8x128xf32, #tpu.memory_space<vmem>>, vector<4x4x128xf32>
    %c0_169 = arith.constant 0 : index
    %c1_170 = arith.constant 1 : index
    %c0_171 = arith.constant 0 : index
    %167 = tpu.strided_load %arg13[%c0_169, %c1_170, %c0_171] {strides = array<i32: 1, 2, 1>} : memref<4x8x128xf32, #tpu.memory_space<vmem>>, vector<4x4x128xf32>
    %168 = arith.maximumf %166, %167 : vector<4x4x128xf32>
    %c0_172 = arith.constant 0 : index
    %c0_173 = arith.constant 0 : index
    %169 = vector.load %arg5[%c0_172, %c0_173] : memref<1x128xf32, #tpu.memory_space<vmem>>, vector<1x128xf32>
    %170 = vector.shape_cast %169 : vector<1x128xf32> to vector<1x1x128xf32>
    %171 = vector.broadcast %170 : vector<1x1x128xf32> to vector<4x4x128xf32>
    %172 = arith.addf %168, %171 : vector<4x4x128xf32>
    %cst_174 = arith.constant 0.000000e+00 : f32
    %173 = vector.broadcast %cst_174 : f32 to vector<4x4x128xf32>
    %174 = arith.maximumf %172, %173 : vector<4x4x128xf32>
    %c16_i32 = arith.constant 16 : i32
    %175 = arith.muli %c0_i32, %c16_i32 : i32
    %176 = tpu.assume_multiple %175, 16 : i32
    %177 = vector.shape_cast %174 : vector<4x4x128xf32> to vector<16x128xf32>
    %178 = arith.index_cast %176 : i32 to index
    %c0_175 = arith.constant 0 : index
    %179 = vector.load %arg12[%178, %c0_175] : memref<16x128xf32, #tpu.memory_space<vmem>>, vector<16x128xf32>
    tpu.vector_store %arg12[%178, %c0_175], %177 {strides = array<i32>} : memref<16x128xf32, #tpu.memory_space<vmem>>, vector<16x128xf32>,
    %c1_i32 = arith.constant 1 : i32
    %cst_176 = arith.constant 0.000000e+00 : f32
    %180 = vector.broadcast %cst_176 : f32 to vector<1x128xf32>
    %c0_177 = arith.constant 0 : index
    %c0_178 = arith.constant 0 : index
    %181 = tpu.strided_load %arg12[%c0_177, %c0_178] {strides = array<i32: 16, 1>} : memref<16x128xf32, #tpu.memory_space<vmem>>, vector<1x128xf32>
    %182 = arith.truncf %181 : vector<1x128xf32> to vector<1x128xbf16>
    %c0_179 = arith.constant 0 : index
    %c0_180 = arith.constant 0 : index
    %183 = vector.load %arg6[%c0_179, %c0_180] : memref<2048x128xbf16, #tpu.memory_space<vmem>>, vector<128x128xbf16>
    %cst_181 = arith.constant dense<0.000000e+00> : vector<1x128xf32>
    %184 = tpu.matmul %182, %183, %cst_181 {dimension_numbers = #tpu.dot_dimension_numbers<[1], [0], [0], [1], [0, 0, 1, 1], [], []>} : vector<1x128xbf16>, vector<128x128xbf16>, vector<1x128xf32> -> vector<1x128xf32>
    %185 = arith.addf %180, %184 : vector<1x128xf32>
    %c1_182 = arith.constant 1 : index
    %c0_183 = arith.constant 0 : index
    %186 = tpu.strided_load %arg12[%c1_182, %c0_183] {strides = array<i32: 16, 1>} : memref<16x128xf32, #tpu.memory_space<vmem>>, vector<1x128xf32>
    %187 = arith.truncf %186 : vector<1x128xf32> to vector<1x128xbf16>
    %c128_184 = arith.constant 128 : index
    %c0_185 = arith.constant 0 : index
    %188 = vector.load %arg6[%c128_184, %c0_185] : memref<2048x128xbf16, #tpu.memory_space<vmem>>, vector<128x128xbf16>
    %cst_186 = arith.constant dense<0.000000e+00> : vector<1x128xf32>
    %189 = tpu.matmul %187, %188, %cst_186 {dimension_numbers = #tpu.dot_dimension_numbers<[1], [0], [0], [1], [0, 0, 1, 1], [], []>} : vector<1x128xbf16>, vector<128x128xbf16>, vector<1x128xf32> -> vector<1x128xf32>
    %190 = arith.addf %185, %189 : vector<1x128xf32>
    %c2_187 = arith.constant 2 : index
    %c0_188 = arith.constant 0 : index
    %191 = tpu.strided_load %arg12[%c2_187, %c0_188] {strides = array<i32: 16, 1>} : memref<16x128xf32, #tpu.memory_space<vmem>>, vector<1x128xf32>
    %192 = arith.truncf %191 : vector<1x128xf32> to vector<1x128xbf16>
    %c256_189 = arith.constant 256 : index
    %c0_190 = arith.constant 0 : index
    %193 = vector.load %arg6[%c256_189, %c0_190] : memref<2048x128xbf16, #tpu.memory_space<vmem>>, vector<128x128xbf16>
    %cst_191 = arith.constant dense<0.000000e+00> : vector<1x128xf32>
    %194 = tpu.matmul %192, %193, %cst_191 {dimension_numbers = #tpu.dot_dimension_numbers<[1], [0], [0], [1], [0, 0, 1, 1], [], []>} : vector<1x128xbf16>, vector<128x128xbf16>, vector<1x128xf32> -> vector<1x128xf32>
    %195 = arith.addf %190, %194 : vector<1x128xf32>
    %c3_192 = arith.constant 3 : index
    %c0_193 = arith.constant 0 : index
    %196 = tpu.strided_load %arg12[%c3_192, %c0_193] {strides = array<i32: 16, 1>} : memref<16x128xf32, #tpu.memory_space<vmem>>, vector<1x128xf32>
    %197 = arith.truncf %196 : vector<1x128xf32> to vector<1x128xbf16>
    %c384_194 = arith.constant 384 : index
    %c0_195 = arith.constant 0 : index
    %198 = vector.load %arg6[%c384_194, %c0_195] : memref<2048x128xbf16, #tpu.memory_space<vmem>>, vector<128x128xbf16>
    %cst_196 = arith.constant dense<0.000000e+00> : vector<1x128xf32>
    %199 = tpu.matmul %197, %198, %cst_196 {dimension_numbers = #tpu.dot_dimension_numbers<[1], [0], [0], [1], [0, 0, 1, 1], [], []>} : vector<1x128xbf16>, vector<128x128xbf16>, vector<1x128xf32> -> vector<1x128xf32>
    %200 = arith.addf %195, %199 : vector<1x128xf32>
    %c4_197 = arith.constant 4 : index
    %c0_198 = arith.constant 0 : index
    %201 = tpu.strided_load %arg12[%c4_197, %c0_198] {strides = array<i32: 16, 1>} : memref<16x128xf32, #tpu.memory_space<vmem>>, vector<1x128xf32>
    %202 = arith.truncf %201 : vector<1x128xf32> to vector<1x128xbf16>
    %c512_199 = arith.constant 512 : index
    %c0_200 = arith.constant 0 : index
    %203 = vector.load %arg6[%c512_199, %c0_200] : memref<2048x128xbf16, #tpu.memory_space<vmem>>, vector<128x128xbf16>
    %cst_201 = arith.constant dense<0.000000e+00> : vector<1x128xf32>
    %204 = tpu.matmul %202, %203, %cst_201 {dimension_numbers = #tpu.dot_dimension_numbers<[1], [0], [0], [1], [0, 0, 1, 1], [], []>} : vector<1x128xbf16>, vector<128x128xbf16>, vector<1x128xf32> -> vector<1x128xf32>
    %205 = arith.addf %200, %204 : vector<1x128xf32>
    %c5 = arith.constant 5 : index
    %c0_202 = arith.constant 0 : index
    %206 = tpu.strided_load %arg12[%c5, %c0_202] {strides = array<i32: 16, 1>} : memref<16x128xf32, #tpu.memory_space<vmem>>, vector<1x128xf32>
    %207 = arith.truncf %206 : vector<1x128xf32> to vector<1x128xbf16>
    %c640_203 = arith.constant 640 : index
    %c0_204 = arith.constant 0 : index
    %208 = vector.load %arg6[%c640_203, %c0_204] : memref<2048x128xbf16, #tpu.memory_space<vmem>>, vector<128x128xbf16>
    %cst_205 = arith.constant dense<0.000000e+00> : vector<1x128xf32>
    %209 = tpu.matmul %207, %208, %cst_205 {dimension_numbers = #tpu.dot_dimension_numbers<[1], [0], [0], [1], [0, 0, 1, 1], [], []>} : vector<1x128xbf16>, vector<128x128xbf16>, vector<1x128xf32> -> vector<1x128xf32>
    %210 = arith.addf %205, %209 : vector<1x128xf32>
    %c6 = arith.constant 6 : index
    %c0_206 = arith.constant 0 : index
    %211 = tpu.strided_load %arg12[%c6, %c0_206] {strides = array<i32: 16, 1>} : memref<16x128xf32, #tpu.memory_space<vmem>>, vector<1x128xf32>
    %212 = arith.truncf %211 : vector<1x128xf32> to vector<1x128xbf16>
    %c768_207 = arith.constant 768 : index
    %c0_208 = arith.constant 0 : index
    %213 = vector.load %arg6[%c768_207, %c0_208] : memref<2048x128xbf16, #tpu.memory_space<vmem>>, vector<128x128xbf16>
    %cst_209 = arith.constant dense<0.000000e+00> : vector<1x128xf32>
    %214 = tpu.matmul %212, %213, %cst_209 {dimension_numbers = #tpu.dot_dimension_numbers<[1], [0], [0], [1], [0, 0, 1, 1], [], []>} : vector<1x128xbf16>, vector<128x128xbf16>, vector<1x128xf32> -> vector<1x128xf32>
    %215 = arith.addf %210, %214 : vector<1x128xf32>
    %c7 = arith.constant 7 : index
    %c0_210 = arith.constant 0 : index
    %216 = tpu.strided_load %arg12[%c7, %c0_210] {strides = array<i32: 16, 1>} : memref<16x128xf32, #tpu.memory_space<vmem>>, vector<1x128xf32>
    %217 = arith.truncf %216 : vector<1x128xf32> to vector<1x128xbf16>
    %c896_211 = arith.constant 896 : index
    %c0_212 = arith.constant 0 : index
    %218 = vector.load %arg6[%c896_211, %c0_212] : memref<2048x128xbf16, #tpu.memory_space<vmem>>, vector<128x128xbf16>
    %cst_213 = arith.constant dense<0.000000e+00> : vector<1x128xf32>
    %219 = tpu.matmul %217, %218, %cst_213 {dimension_numbers = #tpu.dot_dimension_numbers<[1], [0], [0], [1], [0, 0, 1, 1], [], []>} : vector<1x128xbf16>, vector<128x128xbf16>, vector<1x128xf32> -> vector<1x128xf32>
    %220 = arith.addf %215, %219 : vector<1x128xf32>
    %c8 = arith.constant 8 : index
    %c0_214 = arith.constant 0 : index
    %221 = tpu.strided_load %arg12[%c8, %c0_214] {strides = array<i32: 16, 1>} : memref<16x128xf32, #tpu.memory_space<vmem>>, vector<1x128xf32>
    %222 = arith.truncf %221 : vector<1x128xf32> to vector<1x128xbf16>
    %c1024_215 = arith.constant 1024 : index
    %c0_216 = arith.constant 0 : index
    %223 = vector.load %arg6[%c1024_215, %c0_216] : memref<2048x128xbf16, #tpu.memory_space<vmem>>, vector<128x128xbf16>
    %cst_217 = arith.constant dense<0.000000e+00> : vector<1x128xf32>
    %224 = tpu.matmul %222, %223, %cst_217 {dimension_numbers = #tpu.dot_dimension_numbers<[1], [0], [0], [1], [0, 0, 1, 1], [], []>} : vector<1x128xbf16>, vector<128x128xbf16>, vector<1x128xf32> -> vector<1x128xf32>
    %225 = arith.addf %220, %224 : vector<1x128xf32>
    %c9 = arith.constant 9 : index
    %c0_218 = arith.constant 0 : index
    %226 = tpu.strided_load %arg12[%c9, %c0_218] {strides = array<i32: 16, 1>} : memref<16x128xf32, #tpu.memory_space<vmem>>, vector<1x128xf32>
    %227 = arith.truncf %226 : vector<1x128xf32> to vector<1x128xbf16>
    %c1152_219 = arith.constant 1152 : index
    %c0_220 = arith.constant 0 : index
    %228 = vector.load %arg6[%c1152_219, %c0_220] : memref<2048x128xbf16, #tpu.memory_space<vmem>>, vector<128x128xbf16>
    %cst_221 = arith.constant dense<0.000000e+00> : vector<1x128xf32>
    %229 = tpu.matmul %227, %228, %cst_221 {dimension_numbers = #tpu.dot_dimension_numbers<[1], [0], [0], [1], [0, 0, 1, 1], [], []>} : vector<1x128xbf16>, vector<128x128xbf16>, vector<1x128xf32> -> vector<1x128xf32>
    %230 = arith.addf %225, %229 : vector<1x128xf32>
    %c10 = arith.constant 10 : index
    %c0_222 = arith.constant 0 : index
    %231 = tpu.strided_load %arg12[%c10, %c0_222] {strides = array<i32: 16, 1>} : memref<16x128xf32, #tpu.memory_space<vmem>>, vector<1x128xf32>
    %232 = arith.truncf %231 : vector<1x128xf32> to vector<1x128xbf16>
    %c1280_223 = arith.constant 1280 : index
    %c0_224 = arith.constant 0 : index
    %233 = vector.load %arg6[%c1280_223, %c0_224] : memref<2048x128xbf16, #tpu.memory_space<vmem>>, vector<128x128xbf16>
    %cst_225 = arith.constant dense<0.000000e+00> : vector<1x128xf32>
    %234 = tpu.matmul %232, %233, %cst_225 {dimension_numbers = #tpu.dot_dimension_numbers<[1], [0], [0], [1], [0, 0, 1, 1], [], []>} : vector<1x128xbf16>, vector<128x128xbf16>, vector<1x128xf32> -> vector<1x128xf32>
    %235 = arith.addf %230, %234 : vector<1x128xf32>
    %c11 = arith.constant 11 : index
    %c0_226 = arith.constant 0 : index
    %236 = tpu.strided_load %arg12[%c11, %c0_226] {strides = array<i32: 16, 1>} : memref<16x128xf32, #tpu.memory_space<vmem>>, vector<1x128xf32>
    %237 = arith.truncf %236 : vector<1x128xf32> to vector<1x128xbf16>
    %c1408_227 = arith.constant 1408 : index
    %c0_228 = arith.constant 0 : index
    %238 = vector.load %arg6[%c1408_227, %c0_228] : memref<2048x128xbf16, #tpu.memory_space<vmem>>, vector<128x128xbf16>
    %cst_229 = arith.constant dense<0.000000e+00> : vector<1x128xf32>
    %239 = tpu.matmul %237, %238, %cst_229 {dimension_numbers = #tpu.dot_dimension_numbers<[1], [0], [0], [1], [0, 0, 1, 1], [], []>} : vector<1x128xbf16>, vector<128x128xbf16>, vector<1x128xf32> -> vector<1x128xf32>
    %240 = arith.addf %235, %239 : vector<1x128xf32>
    %c12 = arith.constant 12 : index
    %c0_230 = arith.constant 0 : index
    %241 = tpu.strided_load %arg12[%c12, %c0_230] {strides = array<i32: 16, 1>} : memref<16x128xf32, #tpu.memory_space<vmem>>, vector<1x128xf32>
    %242 = arith.truncf %241 : vector<1x128xf32> to vector<1x128xbf16>
    %c1536_231 = arith.constant 1536 : index
    %c0_232 = arith.constant 0 : index
    %243 = vector.load %arg6[%c1536_231, %c0_232] : memref<2048x128xbf16, #tpu.memory_space<vmem>>, vector<128x128xbf16>
    %cst_233 = arith.constant dense<0.000000e+00> : vector<1x128xf32>
    %244 = tpu.matmul %242, %243, %cst_233 {dimension_numbers = #tpu.dot_dimension_numbers<[1], [0], [0], [1], [0, 0, 1, 1], [], []>} : vector<1x128xbf16>, vector<128x128xbf16>, vector<1x128xf32> -> vector<1x128xf32>
    %245 = arith.addf %240, %244 : vector<1x128xf32>
    %c13 = arith.constant 13 : index
    %c0_234 = arith.constant 0 : index
    %246 = tpu.strided_load %arg12[%c13, %c0_234] {strides = array<i32: 16, 1>} : memref<16x128xf32, #tpu.memory_space<vmem>>, vector<1x128xf32>
    %247 = arith.truncf %246 : vector<1x128xf32> to vector<1x128xbf16>
    %c1664_235 = arith.constant 1664 : index
    %c0_236 = arith.constant 0 : index
    %248 = vector.load %arg6[%c1664_235, %c0_236] : memref<2048x128xbf16, #tpu.memory_space<vmem>>, vector<128x128xbf16>
    %cst_237 = arith.constant dense<0.000000e+00> : vector<1x128xf32>
    %249 = tpu.matmul %247, %248, %cst_237 {dimension_numbers = #tpu.dot_dimension_numbers<[1], [0], [0], [1], [0, 0, 1, 1], [], []>} : vector<1x128xbf16>, vector<128x128xbf16>, vector<1x128xf32> -> vector<1x128xf32>
    %250 = arith.addf %245, %249 : vector<1x128xf32>
    %c14 = arith.constant 14 : index
    %c0_238 = arith.constant 0 : index
    %251 = tpu.strided_load %arg12[%c14, %c0_238] {strides = array<i32: 16, 1>} : memref<16x128xf32, #tpu.memory_space<vmem>>, vector<1x128xf32>
    %252 = arith.truncf %251 : vector<1x128xf32> to vector<1x128xbf16>
    %c1792_239 = arith.constant 1792 : index
    %c0_240 = arith.constant 0 : index
    %253 = vector.load %arg6[%c1792_239, %c0_240] : memref<2048x128xbf16, #tpu.memory_space<vmem>>, vector<128x128xbf16>
    %cst_241 = arith.constant dense<0.000000e+00> : vector<1x128xf32>
    %254 = tpu.matmul %252, %253, %cst_241 {dimension_numbers = #tpu.dot_dimension_numbers<[1], [0], [0], [1], [0, 0, 1, 1], [], []>} : vector<1x128xbf16>, vector<128x128xbf16>, vector<1x128xf32> -> vector<1x128xf32>
    %255 = arith.addf %250, %254 : vector<1x128xf32>
    %c15 = arith.constant 15 : index
    %c0_242 = arith.constant 0 : index
    %256 = tpu.strided_load %arg12[%c15, %c0_242] {strides = array<i32: 16, 1>} : memref<16x128xf32, #tpu.memory_space<vmem>>, vector<1x128xf32>
    %257 = arith.truncf %256 : vector<1x128xf32> to vector<1x128xbf16>
    %c1920_243 = arith.constant 1920 : index
    %c0_244 = arith.constant 0 : index
    %258 = vector.load %arg6[%c1920_243, %c0_244] : memref<2048x128xbf16, #tpu.memory_space<vmem>>, vector<128x128xbf16>
    %cst_245 = arith.constant dense<0.000000e+00> : vector<1x128xf32>
    %259 = tpu.matmul %257, %258, %cst_245 {dimension_numbers = #tpu.dot_dimension_numbers<[1], [0], [0], [1], [0, 0, 1, 1], [], []>} : vector<1x128xbf16>, vector<128x128xbf16>, vector<1x128xf32> -> vector<1x128xf32>
    %260 = arith.addf %255, %259 : vector<1x128xf32>
    %c0_246 = arith.constant 0 : index
    %c0_247 = arith.constant 0 : index
    %261 = vector.load %arg7[%c0_246, %c0_247] : memref<1x128xf32, #tpu.memory_space<vmem>>, vector<1x128xf32>
    %262 = arith.addf %260, %261 : vector<1x128xf32>
    %cst_248 = arith.constant 0.000000e+00 : f32
    %263 = vector.broadcast %cst_248 : f32 to vector<1x128xf32>
    %264 = arith.maximumf %262, %263 : vector<1x128xf32>
    %265 = arith.truncf %264 : vector<1x128xf32> to vector<1x128xbf16>
    %c0_249 = arith.constant 0 : index
    %c0_250 = arith.constant 0 : index
    %266 = vector.load %arg8[%c0_249, %c0_250] : memref<128x128xbf16, #tpu.memory_space<vmem>>, vector<128x128xbf16>
    %cst_251 = arith.constant dense<0.000000e+00> : vector<1x128xf32>
    %267 = tpu.matmul %265, %266, %cst_251 {dimension_numbers = #tpu.dot_dimension_numbers<[1], [0], [0], [1], [0, 0, 1, 1], [], []>} : vector<1x128xbf16>, vector<128x128xbf16>, vector<1x128xf32> -> vector<1x128xf32>
    %c0_252 = arith.constant 0 : index
    %c0_253 = arith.constant 0 : index
    %268 = vector.load %arg9[%c0_252, %c0_253] : memref<1x128xf32, #tpu.memory_space<vmem>>, vector<1x128xf32>
    %269 = arith.addf %267, %268 : vector<1x128xf32>
    %270 = tpu.iota {dimensions = array<i32: 1>} : vector<1x128xi32>
    %c10_i32 = arith.constant 10 : i32
    %271 = vector.broadcast %c10_i32 : i32 to vector<1x128xi32>
    %272 = arith.cmpi slt, %270, %271 : vector<1x128xi32>
    %cst_254 = arith.constant -1.000000e+30 : f32
    %273 = vector.broadcast %cst_254 : f32 to vector<1x128xf32>
    %274 = arith.select %272, %269, %273 : vector<1x128xi1>, vector<1x128xf32>
    %cst_255 = arith.constant dense<0xFF800000> : vector<1xf32>
    %275 = vector.multi_reduction <maximumf>, %274, %cst_255 [1] : vector<1x128xf32> to vector<1xf32>
    %276 = vector.shape_cast %275 : vector<1xf32> to vector<1x1xf32>
    %277 = vector.broadcast %276 : vector<1x1xf32> to vector<1x128xf32>
    %278 = arith.subf %274, %277 : vector<1x128xf32>
    %279 = math.exp %278 : vector<1x128xf32>
    %cst_256 = arith.constant dense<0.000000e+00> : vector<1xf32>
    %280 = vector.multi_reduction <add>, %279, %cst_256 [1] : vector<1x128xf32> to vector<1xf32>
    %281 = vector.shape_cast %280 : vector<1xf32> to vector<1x1xf32>
    %282 = math.log %281 : vector<1x1xf32>
    %283 = vector.broadcast %276 : vector<1x1xf32> to vector<1x128xf32>
    %284 = arith.subf %274, %283 : vector<1x128xf32>
    %285 = vector.broadcast %282 : vector<1x1xf32> to vector<1x128xf32>
    %286 = arith.subf %284, %285 : vector<1x128xf32>
    %c0_257 = arith.constant 0 : index
    %c0_258 = arith.constant 0 : index
    %c0_259 = arith.constant 0 : index
    %287 = vector.load %arg10[%c0_257, %c0_258, %c0_259] : memref<1x1x128xf32, #tpu.memory_space<vmem>>, vector<1x1x128xf32>
    %288 = vector.shape_cast %287 : vector<1x1x128xf32> to vector<1x128xf32>
    %289 = vector.shape_cast %286 : vector<1x128xf32> to vector<1x1x128xf32>
    tpu.vector_store %arg10[%c0_257, %c0_258, %c0_259], %289 {strides = array<i32>} : memref<1x1x128xf32, #tpu.memory_space<vmem>>, vector<1x1x128xf32>,
    return
  }
  func.func @transform_0(%arg0: i32) -> (i32, i32, i32, i32) {
    %c0_i32 = arith.constant 0 : i32
    %c0_i32_0 = arith.constant 0 : i32
    %c0_i32_1 = arith.constant 0 : i32
    %c0_i32_2 = arith.constant 0 : i32
    return %arg0, %c0_i32, %c0_i32_0, %c0_i32_1 : i32, i32, i32, i32
  }
  func.func @transform_1(%arg0: i32) -> (i32, i32) {
    %c0_i32 = arith.constant 0 : i32
    %c0_i32_0 = arith.constant 0 : i32
    %c0_i32_1 = arith.constant 0 : i32
    return %c0_i32, %c0_i32_0 : i32, i32
  }
  func.func @transform_2(%arg0: i32) -> (i32, i32) {
    %c0_i32 = arith.constant 0 : i32
    %c0_i32_0 = arith.constant 0 : i32
    %c0_i32_1 = arith.constant 0 : i32
    return %c0_i32, %c0_i32_0 : i32, i32
  }
  func.func @transform_3(%arg0: i32) -> (i32, i32) {
    %c0_i32 = arith.constant 0 : i32
    %c0_i32_0 = arith.constant 0 : i32
    %c0_i32_1 = arith.constant 0 : i32
    return %c0_i32, %c0_i32_0 : i32, i32
  }
  func.func @transform_4(%arg0: i32) -> (i32, i32) {
    %c0_i32 = arith.constant 0 : i32
    %c0_i32_0 = arith.constant 0 : i32
    %c0_i32_1 = arith.constant 0 : i32
    return %c0_i32, %c0_i32_0 : i32, i32
  }
  func.func @transform_5(%arg0: i32) -> (i32, i32) {
    %c0_i32 = arith.constant 0 : i32
    %c0_i32_0 = arith.constant 0 : i32
    %c0_i32_1 = arith.constant 0 : i32
    return %c0_i32, %c0_i32_0 : i32, i32
  }
  func.func @transform_6(%arg0: i32) -> (i32, i32) {
    %c0_i32 = arith.constant 0 : i32
    %c0_i32_0 = arith.constant 0 : i32
    %c0_i32_1 = arith.constant 0 : i32
    return %c0_i32, %c0_i32_0 : i32, i32
  }
  func.func @transform_7(%arg0: i32) -> (i32, i32) {
    %c0_i32 = arith.constant 0 : i32
    %c0_i32_0 = arith.constant 0 : i32
    %c0_i32_1 = arith.constant 0 : i32
    return %c0_i32, %c0_i32_0 : i32, i32
  }
  func.func @transform_8(%arg0: i32) -> (i32, i32) {
    %c0_i32 = arith.constant 0 : i32
    %c0_i32_0 = arith.constant 0 : i32
    %c0_i32_1 = arith.constant 0 : i32
    return %c0_i32, %c0_i32_0 : i32, i32
  }
  func.func @transform_9(%arg0: i32) -> (i32, i32, i32) {
    %c0_i32 = arith.constant 0 : i32
    %c0_i32_0 = arith.constant 0 : i32
    %c0_i32_1 = arith.constant 0 : i32
    return %arg0, %c0_i32, %c0_i32_0 : i32, i32, i32
  }
}

</mosaic_0001>

<bundles_post_ra>
// kernel: cnn_forward.1
= control target key start
LH: loop header
LB: loop body
LE: loop exit
PB: predicated region body
PF: predicated region fallthrough
CT: control target
= control target key end

     0   :  { %14 = vsyncpa [#allocation6], 0  ;;  %s15560_s0 = inlined_call_operand.vmem [shape: bf16[2,4,192,25], index: 0, kind: input, shape index: {}]   ;;  %s15561_s1 = inlined_call_operand.vmem [shape: bf16[25,128], index: 1, kind: input, shape index: {}]   ;;  %s15562_s2 = inlined_call_operand.vmem [shape: f32[1,128], index: 2, kind: input, shape index: {}]   ;;  %s15563_s3 = inlined_call_operand.vmem [shape: bf16[3200,128], index: 3, kind: input, shape index: {}]   ;;  %s15564_s4 = inlined_call_operand.vmem [shape: f32[1,128], index: 4, kind: input, shape index: {}]   ;;  %s15565_s5 = inlined_call_operand.vmem [shape: bf16[2048,128], index: 5, kind: input, shape index: {}]   ;;  %s15566_s6 = inlined_call_operand.vmem [shape: f32[1,128], index: 6, kind: input, shape index: {}]   ;;  %s15567_s7 = inlined_call_operand.vmem [shape: bf16[128,128], index: 7, kind: input, shape index: {}]   ;;  %s15568_s8 = inlined_call_operand.vmem [shape: f32[1,128], index: 8, kind: input, shape index: {}]   ;;  %s15569_s9 = inlined_call_operand.hbm [shape: f32[2,1,128], index: 9, kind: output, shape index: {}]  }
   0x1   :  { %16 = vsyncpa [#allocation6 + $0x1], 0  ;;  %s12376_s30 = smov 0   ;;  %s12378_s10 = smov 0  }
   0x2   :  { %s12380_s11 = smov 0   ;;  %s12382_s12 = smov 0  }
   0x3 LB: > { %s12397_s13 = sadd.s32 4294967295, %s12320_s12   ;;  %s9429_s14 = sadd.s32 4294967294, %s12320_s12   ;;  %s12320_s12 = sphi %s12382_s12, %s15639_s12   ;;  %s12316_s11 = sphi %s12380_s11, %s15638_s11   ;;  %s12312_s10 = sphi %s12378_s10, %s15637_s10   ;;  %s12308_s30 = sphi %s12376_s30, %s15636_s30  }
   0x4   : > { %s12401_s15 = sadd.s32 1, %s12320_s12   ;;  %s223_s16 = sadd.s32 1, %s12316_s11 }
   0x5   : > { %s220_s17 = ssub.s32 %s12320_s12, %s12401_s15  ;;  %p233_p0 = scmp.ne.s32.totalorder %s12316_s11, %s12312_s10 }
   0x6   : > { %p221_p1 = scmp.eq.s32.totalorder %s220_s17, 0  ;;  %p234_p2 = scmp.eq.s32.totalorder %s12397_s13, 1 }
   0x7   : > { %p239_p3 = scmp.ne.s32.totalorder %s12312_s10, %s12308_s30  ;;  %p240_p4 = scmp.eq.s32.totalorder %s9429_s14, 1 }
   0x8   : > { %s12412_s18 = scalar_select %p221_p1, %s12316_s11, %s223_s16  }
   0x9   : > { %p12414_p5 = por %p234_p2, %p233_p0  ;;  %p12418_p6 = por %p240_p4, %p239_p3 }
   0xa   : > { %p9432_p7 = scmp.ge.s32.totalorder %s12320_s12, 1  ;;  %p290_p8 = scmp.lt.s32.totalorder %s12320_s12, 3 }
   0xc   : > { %p291_p9 = pnand %p9432_p7, %p290_p8 }
   0xe   : > { %294 = sbr.rel (%p291_p9) target bundleno = 1895 (0x767), region = 56 }
  0x13   : > { %v11848_v0 = vld [vmem:[%s15561_s1 + $0x8] sm:$0x1f]   ;;  %vm467_vm0 = vcmask 1043456   ;;  %vm468_vm1 = vcmask 1044480   ;;  %v12322_v1 = vmov 65535   ;;  %p325_p10 = scmp.lt.s32.totalorder %s12397_s13, 1 }
  0x14   : > { %v469_v2 = vsel %vm467_vm0, 4294967295, %v12322_v1  ;;  %v11849_v5 = vld [vmem:[%s15561_s1] sm:$0xff]   ;;  %vm430_vm2 = vcmask 203776   ;;  %v11898_v54 = vld [vmem:[%s15563_s3 + $0x78] sm:$0xff]   ;;  %v11901_v56 = vld [vmem:[%s15563_s3 + $0x30] sm:$0xff]   ;;  %vm2053_vm8 = vcmask 1042432  }
  0x15   : > { %v470_v3 = vsel %vm468_vm1, %v469_v2, 0  ;;  %s326_s25 = scalar_select %p325_p10, %s12397_s13, 1  ;;  %v11900_v55 = vld [vmem:[%s15563_s3 + $0x38] sm:$0xff]   ;;  %v11903_v57 = vld [vmem:[%s15563_s3 + $0x28] sm:$0xff]   ;;  %v11899_v58 = vld [vmem:[%s15563_s3 + $0x70] sm:$0xff]   ;;  %vm2054_vm9 = vcmask 1046532  }
  0x16   : > { %v472_v4 = vand.u32 %v11848_v0, %v470_v3  ;;  %v11905_v59 = vld [vmem:[%s15563_s3 + $0x20] sm:$0xff]   ;;  %v11902_v60 = vld [vmem:[%s15563_s3 + $0x68] sm:$0xff]   ;;  %v11906_v61 = vld [vmem:[%s15563_s3 + $0x18] sm:$0xff]   ;;  %vm1632_vm3 = vsmask.f32 3328  ;;  %vm2573_vm12 = vcmask 1041408  }
  0x17   : > { %s11805_s26 = smul.u32 384, %s326_s25  ;;  %v11908_v62 = vld [vmem:[%s15563_s3 + $0x10] sm:$0xff]   ;;  %v11904_v63 = vld [vmem:[%s15563_s3 + $0x60] sm:$0xff]   ;;  %v11907_v0 = vld [vmem:[%s15563_s3 + $0x58] sm:$0xff]   ;;  %vm1633_vm4 = vsmask.f32 7440 }
  0x18   : > { %10753 = vmatprep.subr.bf16.mxu0 %v472_v4  ;;  %10781 = vmatprep.subr.bf16.mxu1 %v472_v4  ;;  %v11910_v1 = vld [vmem:[%s15563_s3 + $0x8] sm:$0xff]   ;;  %v11909_v2 = vld [vmem:[%s15563_s3 + $0x50] sm:$0xff]   ;;  %v11912_v3 = vld [vmem:[%s15563_s3] sm:$0xff]   ;;  %vm2249_vm6 = vsmask.f32 2304  ;;  %vm2574_vm13 = vcmask 1045508  }
  0x19   : > { %10754 = vmatpush3.bf16.msra.mxu0 %v472_v4  ;;  %10782 = vmatpush3.bf16.msra.mxu1 %v472_v4  ;;  %s12435_s29 = scalar_lea.vmem %s15560_s0, %s11805_s26  ;;  %vm12769_vm5 = vmor %vm1632_vm3, %vm1633_vm4  ;;  %vm2250_vm7 = vsmask.f32 6416  ;;  %vm12324_vm15 = vmmov 0   ;;  %vm9347_vm1 = vcmask 1040384   ;;  %s323_s14 = sand.u32 1, %s12312_s10  }
  0x1a   : > { %10755 = vmatprep.subr.bf16.mxu0 %v11849_v5  ;;  %10783 = vmatprep.subr.bf16.mxu1 %v11849_v5  ;;  %v11850_v6 = vld [vmem:[%s12435_s29] sm:$0xff]   ;;  %v11852_v8 = vld [vmem:[%s12435_s29 + $0x8] sm:$0xff]   ;;  %v11854_v10 = vld [vmem:[%s12435_s29 + $0x10] sm:$0xff]   ;;  %s10146_s16 = sshll.u32 %s12397_s13, 4  ;;  %s324_s17 = scalar_lea.vmem [#allocation5], %s323_s14 }
  0x1b   : > { %v11851_v7 = vld [vmem:[%s12435_s29 + $0x60] sm:$0xff]   ;;  %10757 = vmatprep.mubr.msk.bf16.mxu0 %vm430_vm2, %v11850_v6  ;;  %v11853_v9 = vld [vmem:[%s12435_s29 + $0x68] sm:$0xff]   ;;  %v11855_v11 = vld [vmem:[%s12435_s29 + $0x70] sm:$0xff]   ;;  %s9374_s21 = sshll.u32 %s324_s17, 4  ;;  %s9372_s24 = scalar_lea.hbm %s15569_s9, %s10146_s16  ;;  %s9375_s21 = int_to_ptr.vmem [resolvable:$true] %s9374_s21 }
  0x1c   : > { %10785 = vmatprep.mubr.msk.bf16.mxu1 %vm430_vm2, %v11851_v7  ;;  %v11856_v12 = vld [vmem:[%s12435_s29 + $0x18] sm:$0xff]   ;;  %v11858_v14 = vld [vmem:[%s12435_s29 + $0x20] sm:$0xff]   ;;  %v11860_v16 = vld [vmem:[%s12435_s29 + $0x28] sm:$0xff]   ;;  %s9362_s25 = scalar_lea.sflag [#allocation6], %s323_s14  ;;  %s12260_s26 = scalar_lea.vmem %s9375_s21, 16 }
  0x1d   : > { %10756 = vmatpush3.bf16.msra.mxu0 %v11849_v5  ;;  %10784 = vmatpush3.bf16.msra.mxu1 %v11849_v5  ;;  %v11857_v13 = vld [vmem:[%s12435_s29 + $0x78] sm:$0xff]   ;;  %v11859_v15 = vld [vmem:[%s12435_s29 + $0x80] sm:$0xff]   ;;  %v11861_v17 = vld [vmem:[%s12435_s29 + $0x88] sm:$0xff]   ;;  %p12261_p11 = scmp.ne.s32.totalorder %s9375_s21, %s12260_s26  ;;  %s12325_s27 = smov [#allocation5]  }
  0x1e   : > { %10809 = vmatprep.subr.bf16.mxu0 %v472_v4  ;;  %10837 = vmatprep.subr.bf16.mxu1 %v472_v4  ;;  %v11862_v18 = vld [vmem:[%s12435_s29 + $0x30] sm:$0xff]   ;;  %v11864_v20 = vld [vmem:[%s12435_s29 + $0x38] sm:$0xff]   ;;  %v11866_v22 = vld [vmem:[%s12435_s29 + $0x40] sm:$0xff]   ;;  %s12264_s28 = sshll.u32 %s12325_s27, 4  ;;  %s12265_s28 = int_to_ptr.vmem [resolvable:$false] %s12264_s28 }
  0x1f   : > { %v11863_v19 = vld [vmem:[%s12435_s29 + $0x90] sm:$0xff]   ;;  %v11865_v21 = vld [vmem:[%s12435_s29 + $0x98] sm:$0xff]   ;;  %v11867_v23 = vld [vmem:[%s12435_s29 + $0xa0] sm:$0xff]   ;;  %p12262_p12 = pnand %p12261_p11, %p12414_p5  ;;  %s12266_s13 = scalar_lea.vmem %s12265_s28, 32 }
  0x20   : > { %10758 = vmatmul.mubr.msk.bf16.vlgmr.msra.gmra.mxu0 %vm430_vm2, %v11852_v8  ;;  %10786 = vmatmul.mubr.msk.bf16.vlgmr.msra.gmra.mxu1 %vm430_vm2, %v11853_v9  ;;  %v11868_v24 = vld [vmem:[%s12435_s29 + $0x48] sm:$0xff]   ;;  %v11870_v26 = vld [vmem:[%s12435_s29 + $0x50] sm:$0xff]   ;;  %v11872_v28 = vld [vmem:[%s12435_s29 + $0x58] sm:$0xff]   ;;  %p12267_p0 = scmp.lt.s32.totalorder %s9375_s21, %s12265_s28  ;;  %p12268_p1 = scmp.lt.s32.totalorder %s12266_s13, %s12260_s26 }
  0x21   : > { %10810 = vmatpush3.bf16.msra.mxu0 %v472_v4  ;;  %10838 = vmatpush3.bf16.msra.mxu1 %v472_v4  ;;  %v11869_v25 = vld [vmem:[%s12435_s29 + $0xa8] sm:$0xff]   ;;  %v11871_v27 = vld [vmem:[%s12435_s29 + $0xb0] sm:$0xff]   ;;  %v11873_v29 = vld [vmem:[%s12435_s29 + $0xb8] sm:$0xff]   ;;  %p12263_p13 = pneg %p12262_p12 }
  0x22   : > { %10761 = vmatprep.mubr.msk.bf16.mxu0 %vm430_vm2, %v11854_v10  ;;  %10789 = vmatprep.mubr.msk.bf16.mxu1 %vm430_vm2, %v11855_v11  ;;  %v11874_v30 = vld [vmem:[%s12435_s29 + $0xc0] sm:$0xff]   ;;  %v11876_v32 = vld [vmem:[%s12435_s29 + $0xc8] sm:$0xff]   ;;  %v11878_v34 = vld [vmem:[%s12435_s29 + $0xd0] sm:$0xff]   ;;  %p12269_p2 = por %p12268_p1, %p12267_p0 }
  0x23   : > { %10811 = vmatprep.subr.bf16.mxu0 %v11849_v5  ;;  %10839 = vmatprep.subr.bf16.mxu1 %v11849_v5  ;;  %v11875_v31 = vld [vmem:[%s12435_s29 + $0x120] sm:$0xff]   ;;  %v11877_v33 = vld [vmem:[%s12435_s29 + $0x128] sm:$0xff]   ;;  %v11879_v35 = vld [vmem:[%s12435_s29 + $0x130] sm:$0xff]  }
  0x24   : > { %v11880_v36 = vld [vmem:[%s12435_s29 + $0xd8] sm:$0xff]   ;;  %v11882_v38 = vld [vmem:[%s12435_s29 + $0xe0] sm:$0xff]   ;;  %v11883_v40 = vld [vmem:[%s12435_s29 + $0xe8] sm:$0xff]   ;;  %p12270_p3 = pnand %p12269_p2, %p12263_p13 }
  0x25   : > { %10812 = vmatpush3.bf16.msra.mxu0 %v11849_v5  ;;  %10840 = vmatpush3.bf16.msra.mxu1 %v11849_v5  ;;  %v11881_v37 = vld [vmem:[%s12435_s29 + $0x138] sm:$0xff]   ;;  %v11884_v39 = vld [vmem:[%s12435_s29 + $0x140] sm:$0xff]   ;;  %v11885_v41 = vld [vmem:[%s12435_s29 + $0x148] sm:$0xff]  }
  0x26   : > { %v11886_v42 = vld [vmem:[%s12435_s29 + $0xf0] sm:$0xff]   ;;  %v11887_v44 = vld [vmem:[%s12435_s29 + $0xf8] sm:$0xff]   ;;  %v11890_v46 = vld [vmem:[%s12435_s29 + $0x100] sm:$0xff]   ;;  %10865 = vmatprep.subr.bf16.mxu0 %v11898_v54  ;;  %10889 = vmatprep.subr.bf16.mxu1 %v11900_v55 }
  0x27   : > { %v11888_v43 = vld [vmem:[%s12435_s29 + $0x150] sm:$0xff]   ;;  %v11889_v45 = vld [vmem:[%s12435_s29 + $0x158] sm:$0xff]   ;;  %v11892_v47 = vld [vmem:[%s12435_s29 + $0x160] sm:$0xff]  }
  0x28   : > { %10762 = vmatmul.mubr.msk.bf16.gmra.mxu0 %vm430_vm2, %v11856_v12  ;;  %10790 = vmatmul.mubr.msk.bf16.gmra.mxu1 %vm430_vm2, %v11857_v13  ;;  %v11891_v48 = vld [vmem:[%s12435_s29 + $0x108] sm:$0xff]   ;;  %v11894_v50 = vld [vmem:[%s12435_s29 + $0x110] sm:$0xff]   ;;  %v11895_v52 = vld [vmem:[%s12435_s29 + $0x118] sm:$0xff]  }
  0x29   : > { %10765 = vmatprep.mubr.msk.bf16.mxu0 %vm430_vm2, %v11858_v14  ;;  %10793 = vmatprep.mubr.msk.bf16.mxu1 %vm430_vm2, %v11859_v15  ;;  %v11893_v49 = vld [vmem:[%s12435_s29 + $0x168] sm:$0xff]   ;;  %v11896_v51 = vld [vmem:[%s12435_s29 + $0x170] sm:$0xff]   ;;  %v11897_v53 = vld [vmem:[%s12435_s29 + $0x178] sm:$0xff]  }
  0x2a   : > { %v11914_v4 = vld [vmem:[%s15563_s3 + $0xf8] sm:$0xff]   ;;  %v11913_v5 = vld [vmem:[%s15563_s3 + $0x48] sm:$0xff]   ;;  %v11916_v6 = vld [vmem:[%s15563_s3 + $0x40] sm:$0xff]  }
  0x2b   : > { %v11920_v7 = vld [vmem:[%s15563_s3 + $0xb8] sm:$0xff]   ;;  %vm12915_vm10 = vmor %vm2249_vm6, %vm2250_vm7 }
  0x2c   : > { %vm12930_vm11 = vmor %vm2053_vm8, %vm2054_vm9 }
  0x2d   : > { %vm13068_vm14 = vmor %vm2573_vm12, %vm2574_vm13 }
  0x30   : > { %10766 = vmatmul.mubr.msk.bf16.gmra.mxu0 %vm430_vm2, %v11860_v16  ;;  %10794 = vmatmul.mubr.msk.bf16.gmra.mxu1 %vm430_vm2, %v11861_v17 }
  0x31   : > { %10769 = vmatprep.mubr.msk.bf16.mxu0 %vm430_vm2, %v11862_v18  ;;  %10797 = vmatprep.mubr.msk.bf16.mxu1 %vm430_vm2, %v11863_v19 }
  0x38   : > { %10770 = vmatmul.mubr.msk.bf16.gmra.mxu0 %vm430_vm2, %v11864_v20  ;;  %10798 = vmatmul.mubr.msk.bf16.gmra.mxu1 %vm430_vm2, %v11865_v21 }
  0x39   : > { %10773 = vmatprep.mubr.msk.bf16.mxu0 %vm430_vm2, %v11866_v22  ;;  %10801 = vmatprep.mubr.msk.bf16.mxu1 %vm430_vm2, %v11867_v23 }
  0x40   : > { %10774 = vmatmul.mubr.msk.bf16.gmra.mxu0 %vm430_vm2, %v11868_v24  ;;  %10802 = vmatmul.mubr.msk.bf16.gmra.mxu1 %vm430_vm2, %v11869_v25 }
  0x41   : > { %10777 = vmatprep.mubr.msk.bf16.mxu0 %vm430_vm2, %v11870_v26  ;;  %10805 = vmatprep.mubr.msk.bf16.mxu1 %vm430_vm2, %v11871_v27 }
  0x48   : > { %10778 = vmatmul.mubr.msk.bf16.gmra.mxu0 %vm430_vm2, %v11872_v28  ;;  %10806 = vmatmul.mubr.msk.bf16.gmra.mxu1 %vm430_vm2, %v11873_v29 }
  0x49   : > { %10813 = vmatprep.mubr.msk.bf16.mxu0 %vm430_vm2, %v11874_v30  ;;  %10841 = vmatprep.mubr.msk.bf16.mxu1 %vm430_vm2, %v11875_v31 }
  0x50   : > { %10814 = vmatmul.mubr.msk.bf16.vlgmr.msra.gmra.mxu0 %vm430_vm2, %v11876_v32  ;;  %10842 = vmatmul.mubr.msk.bf16.vlgmr.msra.gmra.mxu1 %vm430_vm2, %v11877_v33 }
  0x51   : > { %10817 = vmatprep.mubr.msk.bf16.mxu0 %vm430_vm2, %v11878_v34  ;;  %10845 = vmatprep.mubr.msk.bf16.mxu1 %vm430_vm2, %v11879_v35 }
  0x52   : > { %10866 = vmatpush3.bf16.msra.mxu0 %v11898_v54  ;;  %10890 = vmatpush3.bf16.msra.mxu1 %v11900_v55 }
  0x53   : > { %10891 = vmatprep.subr.bf16.mxu1 %v11901_v56  ;;  %10867 = vmatprep.subr.bf16.mxu0 %v11899_v58 }
  0x56   : > { %10892 = vmatpush3.bf16.msra.mxu1 %v11901_v56  ;;  %10868 = vmatpush3.bf16.msra.mxu0 %v11899_v58 }
  0x57   : > { %10893 = vmatprep.subr.bf16.mxu1 %v11903_v57  ;;  %10869 = vmatprep.subr.bf16.mxu0 %v11902_v60 }
  0x58   : > { %10818 = vmatmul.mubr.msk.bf16.gmra.mxu0 %vm430_vm2, %v11880_v36  ;;  %10846 = vmatmul.mubr.msk.bf16.gmra.mxu1 %vm430_vm2, %v11881_v37 }
  0x59   : > { %10821 = vmatprep.mubr.msk.bf16.mxu0 %vm430_vm2, %v11882_v38  ;;  %10849 = vmatprep.mubr.msk.bf16.mxu1 %vm430_vm2, %v11884_v39 }
  0x5a   : > { %10894 = vmatpush3.bf16.msra.mxu1 %v11903_v57  ;;  %10870 = vmatpush3.bf16.msra.mxu0 %v11902_v60 }
  0x5b   : > { %10895 = vmatprep.subr.bf16.mxu1 %v11905_v59  ;;  %10871 = vmatprep.subr.bf16.mxu0 %v11904_v63 }
  0x5e   : > { %10896 = vmatpush3.bf16.msra.mxu1 %v11905_v59  ;;  %10872 = vmatpush3.bf16.msra.mxu0 %v11904_v63 }
  0x5f   : > { %10897 = vmatprep.subr.bf16.mxu1 %v11906_v61  ;;  %10873 = vmatprep.subr.bf16.mxu0 %v11907_v0 }
  0x60   : > { %10822 = vmatmul.mubr.msk.bf16.gmra.mxu0 %vm430_vm2, %v11883_v40  ;;  %10850 = vmatmul.mubr.msk.bf16.gmra.mxu1 %vm430_vm2, %v11885_v41 }
  0x61   : > { %10825 = vmatprep.mubr.msk.bf16.mxu0 %vm430_vm2, %v11886_v42  ;;  %10853 = vmatprep.mubr.msk.bf16.mxu1 %vm430_vm2, %v11888_v43 }
  0x62   : > { %10898 = vmatpush3.bf16.msra.mxu1 %v11906_v61  ;;  %10874 = vmatpush3.bf16.msra.mxu0 %v11907_v0 }
  0x63   : > { %10899 = vmatprep.subr.bf16.mxu1 %v11908_v62  ;;  %10875 = vmatprep.subr.bf16.mxu0 %v11909_v2 }
  0x66   : > { %10900 = vmatpush3.bf16.msra.mxu1 %v11908_v62  ;;  %10876 = vmatpush3.bf16.msra.mxu0 %v11909_v2  ;;  %v12674_v2 = vld [vmem:[%s15562_s2] ss:$0 sm:$0xff] }
  0x67   : > { %10901 = vmatprep.subr.bf16.mxu1 %v11910_v1  ;;  %10877 = vmatprep.subr.bf16.mxu0 %v11913_v5 }
  0x68   : > { %10826 = vmatmul.mubr.msk.bf16.gmra.mxu0 %vm430_vm2, %v11887_v44  ;;  %10854 = vmatmul.mubr.msk.bf16.gmra.mxu1 %vm430_vm2, %v11889_v45 }
  0x69   : > { %10829 = vmatprep.mubr.msk.bf16.mxu0 %vm430_vm2, %v11890_v46  ;;  %10857 = vmatprep.mubr.msk.bf16.mxu1 %vm430_vm2, %v11892_v47 }
  0x6a   : > { %10902 = vmatpush3.bf16.msra.mxu1 %v11910_v1  ;;  %10878 = vmatpush3.bf16.msra.mxu0 %v11913_v5 }
  0x6b   : > { %10903 = vmatprep.subr.bf16.mxu1 %v11912_v3  ;;  %10879 = vmatprep.subr.bf16.mxu0 %v11916_v6 }
  0x6e   : > { %10904 = vmatpush3.bf16.msra.mxu1 %v11912_v3  ;;  %10880 = vmatpush3.bf16.msra.mxu0 %v11916_v6 }
  0x6f   : > { %10937 = vmatprep.subr.bf16.mxu1 %v11914_v4  ;;  %10913 = vmatprep.subr.bf16.mxu0 %v11920_v7 }
  0x70   : > { %10830 = vmatmul.mubr.msk.bf16.gmra.mxu0 %vm430_vm2, %v11891_v48  ;;  %10858 = vmatmul.mubr.msk.bf16.gmra.mxu1 %vm430_vm2, %v11893_v49 }
  0x71   : > { %10833 = vmatprep.mubr.msk.bf16.mxu0 %vm430_vm2, %v11894_v50  ;;  %10861 = vmatprep.mubr.msk.bf16.mxu1 %vm430_vm2, %v11896_v51 }
  0x78   : > { %10834 = vmatmul.mubr.msk.bf16.gmra.mxu0 %vm430_vm2, %v11895_v52  ;;  %10862 = vmatmul.mubr.msk.bf16.gmra.mxu1 %vm430_vm2, %v11897_v53 }
  0xe0   : > { %v10759_v8 = vpop.f32.mrf.mxu0  ;;  %v10787_v9 = vpop.f32.mrf.mxu1 }
  0xe1   : > { %v855_v56 = vmax.f32 %v10759_v8, %v10787_v9 }
  0xe2   : > { %v508_v10 = vpop.f32.mrf.mxu0  ;;  %v758_v11 = vpop.f32.mrf.mxu1 }
  0xe3   : > { %v853_v59 = vmax.f32 %v508_v10, %v758_v11 }
  0xe4   : > { %v10760_v12 = vpop.f32.mrf.mxu0  ;;  %v10788_v13 = vpop.f32.mrf.mxu1 }
  0xe5   : > { %v856_v63 = vmax.f32 %v10760_v12, %v10788_v13 }
  0xe6   : > { %v12587_v14 = vpop.f32.mrf.mxu0  ;;  %v12589_v15 = vpop.f32.mrf.mxu1 }
  0xe7   : > { %v854_v5 = vmax.f32 %v12587_v14, %v12589_v15 }
  0xe8   : > { %v12591_v16 = vpop.f32.mrf.mxu0  ;;  %v12593_v17 = vpop.f32.mrf.mxu1 }
  0xe9   : > { %v859_v10 = vmax.f32 %v12591_v16, %v12593_v17 }
  0xea   : > { %v12595_v18 = vpop.f32.mrf.mxu0  ;;  %v12597_v19 = vpop.f32.mrf.mxu1 }
  0xec   : > { %v12599_v20 = vpop.f32.mrf.mxu0  ;;  %v12601_v21 = vpop.f32.mrf.mxu1 }
  0xee   : > { %v12603_v22 = vpop.f32.mrf.mxu0  ;;  %v12605_v23 = vpop.f32.mrf.mxu1 }
  0xf0   : > { %v12607_v24 = vpop.f32.mrf.mxu0  ;;  %v12609_v25 = vpop.f32.mrf.mxu1 }
  0xf2   : > { %v12611_v26 = vpop.f32.mrf.mxu0  ;;  %v12613_v27 = vpop.f32.mrf.mxu1 }
  0xf4   : > { %v12615_v28 = vpop.f32.mrf.mxu0  ;;  %v12617_v29 = vpop.f32.mrf.mxu1 }
  0xf6   : > { %v12619_v30 = vpop.f32.mrf.mxu0  ;;  %v12621_v31 = vpop.f32.mrf.mxu1 }
  0xf8   : > { %v12623_v32 = vpop.f32.mrf.mxu0  ;;  %v12625_v33 = vpop.f32.mrf.mxu1 }
  0xfa   : > { %v12627_v34 = vpop.f32.mrf.mxu0  ;;  %v12629_v35 = vpop.f32.mrf.mxu1 }
  0xfc   : > { %v12631_v36 = vpop.f32.mrf.mxu0  ;;  %v12633_v37 = vpop.f32.mrf.mxu1 }
  0xfe   : > { %v12635_v38 = vpop.f32.mrf.mxu0  ;;  %v12637_v39 = vpop.f32.mrf.mxu1 }
 0x100   : > { %v12639_v40 = vpop.f32.mrf.mxu0  ;;  %v12641_v41 = vpop.f32.mrf.mxu1 }
 0x102   : > { %v12643_v42 = vpop.f32.mrf.mxu0  ;;  %v12645_v43 = vpop.f32.mrf.mxu1 }
 0x104   : > { %v12647_v44 = vpop.f32.mrf.mxu0  ;;  %v12649_v45 = vpop.f32.mrf.mxu1 }
 0x106   : > { %v12651_v46 = vpop.f32.mrf.mxu0  ;;  %v12653_v47 = vpop.f32.mrf.mxu1 }
 0x108   : > { %v12655_v48 = vpop.f32.mrf.mxu0  ;;  %v12657_v49 = vpop.f32.mrf.mxu1 }
 0x10a   : > { %v12659_v50 = vpop.f32.mrf.mxu0  ;;  %v12661_v51 = vpop.f32.mrf.mxu1 }
 0x10c   : > { %v12663_v52 = vpop.f32.mrf.mxu0  ;;  %v12665_v53 = vpop.f32.mrf.mxu1 }
 0x10e   : > { %v12667_v54 = vpop.f32.mrf.mxu0  ;;  %v12669_v55 = vpop.f32.mrf.mxu1 }
 0x110   : > { %v10815_v57 = vpop.f32.mrf.mxu0  ;;  %v10843_v58 = vpop.f32.mrf.mxu1 }
 0x111   : > { %v1129_v60 = vmax.f32 %v855_v56, %v10815_v57  ;;  %v857_v56 = vmax.f32 %v12595_v18, %v12597_v19  ;;  %v858_v18 = vmax.f32 %v12603_v22, %v12605_v23 }
 0x112   : > { %v1032_v61 = vpop.f32.mrf.mxu0  ;;  %v1306_v62 = vpop.f32.mrf.mxu1 }
 0x113   : > { %v1403_v0 = vmax.f32 %v1129_v60, %v10843_v58  ;;  %v1127_v1 = vmax.f32 %v853_v59, %v1032_v61 }
 0x114   : > { %v10816_v3 = vpop.f32.mrf.mxu0  ;;  %v10844_v4 = vpop.f32.mrf.mxu1 }
 0x115   : > { %v1401_v6 = vmax.f32 %v1127_v1, %v1306_v62  ;;  %v1130_v7 = vmax.f32 %v856_v63, %v10816_v3  ;;  %v1434_v11 = vadd.f32 %v12674_v2, %v1403_v0  ;;  %v860_v0 = vmax.f32 %v12599_v20, %v12601_v21 }
 0x116   : > { %v1035_v8 = vpop.f32.mrf.mxu0  ;;  %v1309_v9 = vpop.f32.mrf.mxu1  ;;  %v864_v20 = vmax.f32 %v12615_v28, %v12617_v29  ;;  %v862_v21 = vmax.f32 %v12619_v30, %v12621_v31  ;;  %v868_v28 = vmax.f32 %v12631_v36, %v12633_v37  ;;  %v866_v31 = vmax.f32 %v12635_v38, %v12637_v39 }
 0x117   : > { %v1404_v12 = vmax.f32 %v1130_v7, %v10844_v4  ;;  %v1128_v13 = vmax.f32 %v854_v5, %v1035_v8  ;;  %v1432_v59 = vadd.f32 %v12674_v2, %v1401_v6  ;;  %v1458_v63 = vmax.f32 %v1434_v11, 0.0 }
 0x118   : > { %v10819_v57 = vpop.f32.mrf.mxu0  ;;  %v10847_v58 = vpop.f32.mrf.mxu1 }
 0x119   : > { %v1435_v14 = vadd.f32 %v12674_v2, %v1404_v12  ;;  %v1402_v15 = vmax.f32 %v1128_v13, %v1309_v9  ;;  %v1133_v60 = vmax.f32 %v859_v10, %v10819_v57  ;;  %v1456_v5 = vmax.f32 %v1432_v59, 0.0 }
 0x11a   : > { %v1048_v61 = vpop.f32.mrf.mxu0  ;;  %v1322_v62 = vpop.f32.mrf.mxu1  ;;  %v863_v9 = vmax.f32 %v12607_v24, %v12609_v25  ;;  %v861_v10 = vmax.f32 %v12611_v26, %v12613_v27 }
 0x11b   : > { %v1459_v1 = vmax.f32 %v1435_v14, 0.0  ;;  %v1433_v16 = vadd.f32 %v12674_v2, %v1402_v15  ;;  %v1131_v17 = vmax.f32 %v857_v56, %v1048_v61  ;;  %v1407_v19 = vmax.f32 %v1133_v60, %v10847_v58 }
 0x11c   : > { %v10820_v3 = vpop.f32.mrf.mxu0  ;;  %v10848_v4 = vpop.f32.mrf.mxu1  ;;  %v867_v56 = vmax.f32 %v12623_v32, %v12625_v33  ;;  %v865_v58 = vmax.f32 %v12627_v34, %v12629_v35  ;;  %v871_v32 = vmax.f32 %v12639_v40, %v12641_v41  ;;  %v869_v33 = vmax.f32 %v12643_v42, %v12645_v43 }
 0x11d   : > { %v10181_v6 = vpack.c.bf16 %v1459_v1, %v1458_v63  ;;  %v1457_v7 = vmax.f32 %v1433_v16, 0.0  ;;  %v1405_v8 = vmax.f32 %v1131_v17, %v1322_v62  ;;  %v1134_v11 = vmax.f32 %v860_v0, %v10820_v3 }
 0x11e   : > { %v1051_v12 = vpop.f32.mrf.mxu0  ;;  %v1325_v13 = vpop.f32.mrf.mxu1  ;;  %v1438_v24 = vadd.f32 %v12674_v2, %v1407_v19  ;;  %v872_v34 = vmax.f32 %v12647_v44, %v12649_v45  ;;  %v870_v62 = vmax.f32 %v12651_v46, %v12653_v47 }
 0x11f   : > { %10233 = vst [vmem:[#allocation2 + $0x8] sm:$0xff] %v10181_v6   ;;  %v10176_v22 = vpack.c.bf16 %v1457_v7, %v1456_v5  ;;  %v1132_v23 = vmax.f32 %v858_v18, %v1051_v12  ;;  %v1436_v25 = vadd.f32 %v12674_v2, %v1405_v8  ;;  %v1408_v26 = vmax.f32 %v1134_v11, %v10848_v4 }
 0x120   : > { %v10823_v27 = vpop.f32.mrf.mxu0  ;;  %v10851_v57 = vpop.f32.mrf.mxu1  ;;  %v1462_v63 = vmax.f32 %v1438_v24, 0.0  ;;  %v875_v5 = vmax.f32 %v12655_v48, %v12657_v49  ;;  %v873_v6 = vmax.f32 %v12659_v50, %v12661_v51  ;;  %v876_v7 = vmax.f32 %v12663_v52, %v12665_v53 }
 0x121   : > { %10177 = vst [vmem:[#allocation2] sm:$0xff] %v10176_v22   ;;  %v1406_v29 = vmax.f32 %v1132_v23, %v1325_v13  ;;  %v1137_v30 = vmax.f32 %v863_v9, %v10823_v27  ;;  %v1439_v59 = vadd.f32 %v12674_v2, %v1408_v26  ;;  %v1460_v1 = vmax.f32 %v1436_v25, 0.0 }
 0x122   : > { %v1064_v14 = vpop.f32.mrf.mxu0  ;;  %v1338_v15 = vpop.f32.mrf.mxu1  ;;  %v874_v12 = vmax.f32 %v12667_v54, %v12669_v55  ;;  %v11922_v55 = vld [vmem:[%s15563_s3 + $0xb0] sm:$0xff]  }
 0x123   : > { %v1437_v35 = vadd.f32 %v12674_v2, %v1406_v29  ;;  %v1135_v60 = vmax.f32 %v861_v10, %v1064_v14  ;;  %v1411_v61 = vmax.f32 %v1137_v30, %v10851_v57  ;;  %v1463_v16 = vmax.f32 %v1439_v59, 0.0 }
 0x124   : > { %v10824_v17 = vpop.f32.mrf.mxu0  ;;  %v10852_v0 = vpop.f32.mrf.mxu1 }
 0x125   : > { %v1461_v18 = vmax.f32 %v1437_v35, 0.0  ;;  %v1442_v19 = vadd.f32 %v12674_v2, %v1411_v61  ;;  %v1138_v3 = vmax.f32 %v864_v20, %v10824_v17  ;;  %v1409_v4 = vmax.f32 %v1135_v60, %v1338_v15 }
 0x126   : > { %v10191_v8 = vpack.c.bf16 %v1463_v16, %v1462_v63  ;;  %v1067_v9 = vpop.f32.mrf.mxu0  ;;  %v1341_v10 = vpop.f32.mrf.mxu1  ;;  %v1601_v11 = vld [vmem:[#allocation2 + $0x8] sm:$0xf]  ;;  %v12765_v41 = vld [vmem:[#allocation2 + $0xc] sm:$0x1] }
 0x127   : > { %v10186_v13 = vpack.c.bf16 %v1461_v18, %v1460_v1  ;;  %v1440_v20 = vadd.f32 %v12674_v2, %v1409_v4  ;;  %v1136_v22 = vmax.f32 %v862_v21, %v1067_v9  ;;  %v1466_v23 = vmax.f32 %v1442_v19, 0.0 }
 0x128   : > { %10235 = vst [vmem:[#allocation2 + $0x18] sm:$0xff] %v10191_v8   ;;  %v1412_v24 = vmax.f32 %v1138_v3, %v10852_v0  ;;  %v10827_v25 = vpop.f32.mrf.mxu0  ;;  %v10855_v26 = vpop.f32.mrf.mxu1  ;;  %v1600_v27 = vld [vmem:[#allocation2] sm:$0xf]  ;;  %v1650_v57 = vshrl.u32 %v1601_v11, 16  ;;  %v1653_v29 = vshll.u32 %v1601_v11, 16 }
 0x129   : > { %10234 = vst [vmem:[#allocation2 + $0x10] sm:$0xff] %v10186_v13   ;;  %v1464_v30 = vmax.f32 %v1440_v20, 0.0  ;;  %v1141_v59 = vmax.f32 %v867_v56, %v10827_v25  ;;  %v1410_v14 = vmax.f32 %v1136_v22, %v1341_v10  ;;  %v1636_v15 = vshrl.u32 %v1600_v27, 16  ;;  %v12728_v35 = vld [vmem:[#allocation2 + $0x4] sm:$0x1] }
 0x12a   : > { %v1443_v60 = vadd.f32 %v12674_v2, %v1412_v24  ;;  %v1080_v21 = vpop.f32.mrf.mxu0  ;;  %v1639_v61 = vshll.u32 %v1600_v27, 16  ;;  %v12731_v63 = vrot.slane %v1650_v57, 4  ;;  %v12733_v1 = vrot.slane %v1653_v29, 5  ;;  %v1354_v16 = vpop.f32.mrf.mxu1 }
 0x12b   : > { %v1441_v17 = vadd.f32 %v12674_v2, %v1410_v14  ;;  %v1139_v0 = vmax.f32 %v865_v58, %v1080_v21  ;;  %v1415_v18 = vmax.f32 %v1141_v59, %v10855_v26  ;;  %v1638_v19 = vrot.slane %v1636_v15, 4 }
 0x12c   : > { %v1467_v3 = vmax.f32 %v1443_v60, 0.0  ;;  %v1641_v56 = vrot.slane %v1639_v61, 5  ;;  %v9641_v4 = vcombine.low %v1600_v27, %v1601_v11  ;;  %v10828_v8 = vpop.f32.mrf.mxu0  ;;  %v10856_v9 = vpop.f32.mrf.mxu1  ;;  %v1645_v10 = vshll.u32 %v12728_v35, 16 }
 0x12d   : > { %v1465_v13 = vmax.f32 %v1441_v17, 0.0  ;;  %v1446_v20 = vadd.f32 %v12674_v2, %v1415_v18  ;;  %v1142_v22 = vmax.f32 %v868_v28, %v10828_v8  ;;  %v1413_v24 = vmax.f32 %v1139_v0, %v1354_v16 }
 0x12e   : > { %v10201_v25 = vpack.c.bf16 %v1467_v3, %v1466_v23  ;;  %10905 = vmatprep.mubr.bf16.mxu1 %v9641_v4  ;;  %v1083_v58 = vpop.f32.mrf.mxu0  ;;  %v1357_v26 = vpop.f32.mrf.mxu1  ;;  %v1642_v57 = vor.u32 %v1641_v56, %v1638_v19  ;;  %v12741_v29 = vrot.slane %v1645_v10, 5  ;;  %v1656_v11 = vor.u32 %v12733_v1, %v12731_v63 }
 0x12f   : > { %v10196_v27 = vpack.c.bf16 %v1465_v13, %v1464_v30  ;;  %v1470_v59 = vmax.f32 %v1446_v20, 0.0  ;;  %v1444_v14 = vadd.f32 %v12674_v2, %v1413_v24  ;;  %v1140_v36 = vmax.f32 %v866_v31, %v1083_v58  ;;  %v1603_v37 = vld [vmem:[#allocation2 + $0x18] sm:$0xf] }
 0x130   : > { %10237 = vst [vmem:[#allocation2 + $0x28] sm:$0xff] %v10201_v25   ;;  %v1416_v28 = vmax.f32 %v1142_v22, %v10856_v9  ;;  %v10831_v23 = vpop.f32.mrf.mxu0  ;;  %v10859_v15 = vpop.f32.mrf.mxu1  ;;  %v1602_v60 = vld [vmem:[#allocation2 + $0x10] sm:$0xf]  ;;  %v1678_v21 = vshrl.u32 %v1603_v37, 16  ;;  %v1681_v61 = vshll.u32 %v1603_v37, 16  ;;  %v12749_v16 = vrot.slane %v1642_v57, 4 }
 0x131   : > { %10236 = vst [vmem:[#allocation2 + $0x20] sm:$0xff] %v10196_v27   ;;  %v1468_v63 = vmax.f32 %v1444_v14, 0.0  ;;  %v1145_v30 = vmax.f32 %v871_v32, %v10831_v23  ;;  %v1414_v1 = vmax.f32 %v1140_v36, %v1357_v26  ;;  %v1664_v17 = vshrl.u32 %v1602_v60, 16 }
 0x132   : > { %v1447_v38 = vadd.f32 %v12674_v2, %v1416_v28  ;;  %v1096_v39 = vpop.f32.mrf.mxu0  ;;  %v1667_v31 = vshll.u32 %v1602_v60, 16  ;;  %v12755_v0 = vrot.slane %v1678_v21, 4  ;;  %v12757_v18 = vrot.slane %v1681_v61, 5  ;;  %v1370_v19 = vpop.f32.mrf.mxu1  ;;  %v12258_v28 = vld [vmem:[%s15563_s3 + $0xf8] sm:$0xff]  }
 0x133   : > { %v1445_v3 = vadd.f32 %v12674_v2, %v1414_v1  ;;  %v1143_v56 = vmax.f32 %v869_v33, %v1096_v39  ;;  %v1419_v4 = vmax.f32 %v1145_v30, %v10859_v15  ;;  %v12763_v40 = vrot.slane %v1664_v17, 4  ;;  %v11917_v33 = vld [vmem:[%s15563_s3 + $0xf0] sm:$0xff]  }
 0x134   : > { %v1471_v8 = vmax.f32 %v1447_v38, 0.0  ;;  %v12773_v9 = vrot.slane %v1667_v31, 5  ;;  %v9642_v10 = vcombine.low %v1602_v60, %v1603_v37  ;;  %v10832_v13 = vpop.f32.mrf.mxu0  ;;  %v1648_v42 = vsel %vm12769_vm5, %v12749_v16, %v12741_v29  ;;  %v10860_v43 = vpop.f32.mrf.mxu1  ;;  %v11918_v60 = vld [vmem:[%s15563_s3 + $0xe8] sm:$0xff]  }
 0x135   : > { %v1469_v20 = vmax.f32 %v1445_v3, 0.0  ;;  %v1450_v22 = vadd.f32 %v12674_v2, %v1419_v4  ;;  %v1146_v24 = vmax.f32 %v872_v34, %v10832_v13  ;;  %v1417_v25 = vmax.f32 %v1143_v56, %v1370_v19  ;;  %v11921_v19 = vld [vmem:[%s15563_s3 + $0xe0] sm:$0xff]   ;;  %v12814_v56 = vld [vmem:[#allocation2 + $0x14] sm:$0x1]  ;;  %v12816_v4 = vld [vmem:[#allocation2 + $0x1c] sm:$0x1] }
 0x136   : > { %v10211_v58 = vpack.c.bf16 %v1471_v8, %v1470_v59  ;;  %10906 = vmatmul.mubr.bf16.vlgmr.msra.gmra.mxu1 %v9642_v10  ;;  %v1657_v26 = vrot.slane %v1656_v11, 4  ;;  %v1659_v57 = vshll.u32 %v12765_v41, 16  ;;  %v1099_v27 = vpop.f32.mrf.mxu0  ;;  %v1373_v29 = vpop.f32.mrf.mxu1  ;;  %v1670_v14 = vor.u32 %v12773_v9, %v12763_v40 }
 0x137   : > { %v10206_v36 = vpack.c.bf16 %v1469_v20, %v1468_v63  ;;  %v1474_v37 = vmax.f32 %v1450_v22, 0.0  ;;  %10938 = vmatpush3.bf16.msra.mxu1 %v12258_v28  ;;  %v1448_v44 = vadd.f32 %v12674_v2, %v1417_v25  ;;  %v1144_v45 = vmax.f32 %v870_v62, %v1099_v27  ;;  %v1605_v34 = vld [vmem:[#allocation2 + $0x28] sm:$0xf] }
 0x138   : > { %10239 = vst [vmem:[#allocation2 + $0x38] sm:$0xff] %v10211_v58   ;;  %v1661_v11 = vrot.slane %v1659_v57, 5  ;;  %v1420_v59 = vmax.f32 %v1146_v24, %v10860_v43  ;;  %10939 = vmatprep.subr.bf16.mxu1 %v11917_v33  ;;  %v10835_v23 = vpop.f32.mrf.mxu0  ;;  %v10863_v15 = vpop.f32.mrf.mxu1  ;;  %v1604_v21 = vld [vmem:[#allocation2 + $0x20] sm:$0xf]  ;;  %v1706_v61 = vshrl.u32 %v1605_v34, 16  ;;  %v1709_v16 = vshll.u32 %v1605_v34, 16 }
 0x139   : > { %10238 = vst [vmem:[#allocation2 + $0x30] sm:$0xff] %v10206_v36   ;;  %v1472_v63 = vmax.f32 %v1448_v44, 0.0  ;;  %v1149_v46 = vmax.f32 %v875_v5, %v10835_v23  ;;  %v1418_v47 = vmax.f32 %v1144_v45, %v1373_v29  ;;  %v1692_v62 = vshrl.u32 %v1604_v21, 16  ;;  %v11923_v36 = vld [vmem:[%s15563_s3 + $0xd8] sm:$0xff]  }
 0x13a   : > { %v1662_v30 = vsel %vm12769_vm5, %v1657_v26, %v1661_v11  ;;  %v1451_v1 = vadd.f32 %v12674_v2, %v1420_v59  ;;  %v1112_v17 = vpop.f32.mrf.mxu0  ;;  %v1695_v38 = vshll.u32 %v1604_v21, 16  ;;  %v12805_v39 = vrot.slane %v1706_v61, 4  ;;  %v1386_v31 = vpop.f32.mrf.mxu1  ;;  %v12845_v59 = vld [vmem:[#allocation2 + $0x24] sm:$0x1]  ;;  %v12853_v61 = vld [vmem:[#allocation2] sm:$0xe] }
 0x13b   : > { %v9629_v3 = vcombine.low %v1648_v42, %v1662_v30  ;;  %10940 = vmatpush3.bf16.msra.mxu1 %v11917_v33  ;;  %v1449_v48 = vadd.f32 %v12674_v2, %v1418_v47  ;;  %v1147_v49 = vmax.f32 %v873_v6, %v1112_v17  ;;  %v1423_v5 = vmax.f32 %v1149_v46, %v10863_v15  ;;  %v12859_v30 = vld [vmem:[#allocation2 + $0x2c] sm:$0x1] }
 0x13c   : > { %v1475_v40 = vmax.f32 %v1451_v1, 0.0  ;;  %10941 = vmatprep.subr.bf16.mxu1 %v11918_v60  ;;  %v12818_v8 = vrot.slane %v1692_v62, 4  ;;  %v12820_v9 = vrot.slane %v1695_v38, 5  ;;  %v12822_v10 = vrot.slane %v1709_v16, 5  ;;  %v10836_v13 = vpop.f32.mrf.mxu0  ;;  %v10864_v42 = vpop.f32.mrf.mxu1  ;;  %v11926_v16 = vld [vmem:[%s15563_s3 + $0xd0] sm:$0xff]  }
 0x13d   : > { %10881 = vmatprep.mubr.bf16.mxu0 %v9629_v3  ;;  %v1473_v43 = vmax.f32 %v1449_v48, 0.0  ;;  %v1454_v50 = vadd.f32 %v12674_v2, %v1423_v5  ;;  %v9643_v51 = vcombine.low %v1604_v21, %v1605_v34  ;;  %v1150_v6 = vmax.f32 %v876_v7, %v10836_v13  ;;  %v12872_v5 = vld [vmem:[#allocation2 + $0x8] sm:$0xe] }
 0x13e   : > { %v10221_v33 = vpack.c.bf16 %v1475_v40, %v1474_v37  ;;  %v1421_v20 = vmax.f32 %v1147_v49, %v1386_v31  ;;  %v1671_v22 = vrot.slane %v1670_v14, 4  ;;  %v1673_v24 = vshll.u32 %v12814_v56, 16  ;;  %v1115_v25 = vpop.f32.mrf.mxu0  ;;  %v1389_v29 = vpop.f32.mrf.mxu1  ;;  %v12259_v40 = vld [vmem:[%s15563_s3 + $0xb8] sm:$0xff]  }
 0x13f   : > { %v10216_v58 = vpack.c.bf16 %v1473_v43, %v1472_v63  ;;  %v1478_v26 = vmax.f32 %v1454_v50, 0.0  ;;  %10909 = vmatprep.mubr.bf16.mxu1 %v9643_v51  ;;  %10942 = vmatpush3.bf16.msra.mxu1 %v11918_v60  ;;  %v1684_v57 = vor.u32 %v12757_v18, %v12755_v0  ;;  %v1687_v27 = vshll.u32 %v12816_v4, 16  ;;  %v1607_v28 = vld [vmem:[#allocation2 + $0x38] sm:$0xf] }
 0x140   : > { %10241 = vst [vmem:[#allocation2 + $0x48] sm:$0xff] %v10221_v33   ;;  %v1452_v52 = vadd.f32 %v12674_v2, %v1421_v20  ;;  %v1675_v53 = vrot.slane %v1673_v24, 5  ;;  %v1148_v7 = vmax.f32 %v874_v12, %v1115_v25  ;;  %v1424_v14 = vmax.f32 %v1150_v6, %v10864_v42  ;;  %10943 = vmatprep.subr.bf16.mxu1 %v11921_v19  ;;  %v1606_v37 = vld [vmem:[#allocation2 + $0x30] sm:$0xf]  ;;  %v12878_v42 = vld [vmem:[#allocation2 + $0xc] sm:$0x3] }
 0x141   : > { %10240 = vst [vmem:[#allocation2 + $0x40] sm:$0xff] %v10216_v58   ;;  %v1685_v0 = vrot.slane %v1684_v57, 4  ;;  %v1689_v18 = vrot.slane %v1687_v27, 5  ;;  %v1720_v44 = vshrl.u32 %v1606_v37, 16  ;;  %v1723_v45 = vshll.u32 %v1606_v37, 16  ;;  %v11928_v25 = vld [vmem:[%s15563_s3 + $0xc8] sm:$0xff]  }
 0x142   : > { %v1476_v34 = vmax.f32 %v1452_v52, 0.0  ;;  %v1676_v11 = vsel %vm12769_vm5, %v1671_v22, %v1675_v53  ;;  %v1455_v54 = vadd.f32 %v12674_v2, %v1424_v14  ;;  %v1422_v12 = vmax.f32 %v1148_v7, %v1389_v29  ;;  %v12898_v14 = vld [vmem:[#allocation2 + $0x34] sm:$0x1] }
 0x143   : > { %v1690_v23 = vsel %vm12769_vm5, %v1685_v0, %v1689_v18  ;;  %10944 = vmatpush3.bf16.msra.mxu1 %v11921_v19  ;;  %v12849_v15 = vrot.slane %v1720_v44, 4  ;;  %v12851_v60 = vrot.slane %v1723_v45, 5  ;;  %v1734_v21 = vshrl.u32 %v1607_v28, 16  ;;  %v12866_v19 = vld [vmem:[#allocation2 + $0x4] sm:$0x3] }
 0x144   : > { %v9630_v63 = vcombine.low %v1676_v11, %v1690_v23  ;;  %v1479_v46 = vmax.f32 %v1455_v54, 0.0  ;;  %v1453_v47 = vadd.f32 %v12674_v2, %v1422_v12  ;;  %10945 = vmatprep.subr.bf16.mxu1 %v11923_v36  ;;  %v1737_v62 = vshll.u32 %v1607_v28, 16  ;;  %v11927_v18 = vld [vmem:[%s15563_s3 + $0xa0] sm:$0xff]   ;;  %v12903_v44 = vld [vmem:[#allocation2 + $0x3c] sm:$0x1] }
 0x145   : > { %v12861_v1 = vrot.slane %v1734_v21, 4  ;;  %v9644_v17 = vcombine.low %v1606_v37, %v1607_v28  ;;  %v1698_v38 = vor.u32 %v12820_v9, %v12818_v8  ;;  %v1701_v31 = vshll.u32 %v12845_v59, 16 }
 0x146   : > { %10882 = vmatmul.mubr.bf16.vlgmr.msra.gmra.mxu0 %v9630_v63  ;;  %v10231_v2 = vpack.c.bf16 %v1479_v46, %v1478_v26  ;;  %v1477_v3 = vmax.f32 %v1453_v47, 0.0  ;;  %v12868_v48 = vrot.slane %v1737_v62, 5  ;;  %v1712_v49 = vor.u32 %v12822_v10, %v12805_v39  ;;  %v11925_v39 = vld [vmem:[%s15563_s3 + $0xa8] sm:$0xff]   ;;  %v12921_v62 = vld [vmem:[#allocation2 + $0x10] sm:$0xe] }
 0x147   : > { %10914 = vmatpush3.bf16.msra.mxu0 %v12259_v40  ;;  %10910 = vmatmul.mubr.bf16.gmra.mxu1 %v9644_v17  ;;  %v1699_v8 = vrot.slane %v1698_v38, 4  ;;  %v1703_v9 = vrot.slane %v1701_v31, 5  ;;  %v1715_v13 = vshll.u32 %v12859_v30, 16  ;;  %v2253_v43 = vshrl.u32 %v12853_v61, 16 }
 0x148   : > { %10243 = vst [vmem:[#allocation2 + $0x58] sm:$0xff] %v10231_v2   ;;  %10915 = vmatprep.subr.bf16.mxu0 %v11922_v55  ;;  %v10226_v50 = vpack.c.bf16 %v1477_v3, %v1476_v34  ;;  %10946 = vmatpush3.bf16.msra.mxu1 %v11923_v36  ;;  %v1713_v10 = vrot.slane %v1712_v49, 4  ;;  %v2256_v51 = vshll.u32 %v12853_v61, 16  ;;  %v2262_v6 = vshrl.u32 %v12866_v19, 16 }
 0x149   : > { %v1704_v33 = vsel %vm12769_vm5, %v1699_v8, %v1703_v9  ;;  %v1717_v20 = vrot.slane %v1715_v13, 5  ;;  %v2255_v22 = vrot.slane %v2253_v43, 5  ;;  %v2265_v24 = vshll.u32 %v12866_v19, 16  ;;  %10947 = vmatprep.subr.bf16.mxu1 %v11926_v16  ;;  %v12940_v8 = vld [vmem:[%s15563_s3 + $0x178] sm:$0xff]  }
 0x14a   : > { %10242 = vst [vmem:[#allocation2 + $0x50] sm:$0xff] %v10226_v50   ;;  %v2258_v58 = vrot.slane %v2256_v51, 6  ;;  %v2264_v26 = vrot.slane %v2262_v6, 5  ;;  %v2271_v57 = vshrl.u32 %v12872_v5, 16  ;;  %v2274_v27 = vshll.u32 %v12872_v5, 16 }
 0x14b   : > { %10916 = vmatpush3.bf16.msra.mxu0 %v11922_v55  ;;  %v1718_v29 = vsel %vm12769_vm5, %v1713_v10, %v1717_v20  ;;  %v2267_v52 = vrot.slane %v2265_v24, 6  ;;  %v2280_v53 = vshrl.u32 %v12878_v42, 16  ;;  %v2283_v7 = vshll.u32 %v12878_v42, 16  ;;  %v11930_v55 = vld [vmem:[%s15563_s3 + $0xc0] sm:$0xff]   ;;  %v12946_v43 = vld [vmem:[#allocation2 + $0x18] sm:$0xe] }
 0x14c   : > { %10917 = vmatprep.subr.bf16.mxu0 %v11925_v39  ;;  %v9631_v36 = vcombine.low %v1704_v33, %v1718_v29  ;;  %v2259_v37 = vor.u32 %v2258_v58, %v2255_v22  ;;  %v2273_v28 = vrot.slane %v2271_v57, 5  ;;  %v2276_v0 = vrot.slane %v2274_v27, 6  ;;  %10948 = vmatpush3.bf16.msra.mxu1 %v11926_v16  ;;  %v12948_v50 = vld [vmem:[#allocation2 + $0x14] sm:$0x3]  ;;  %v12958_v6 = vld [vmem:[#allocation2 + $0x1c] sm:$0x3] }
 0x14d   : > { %v2268_v45 = vor.u32 %v2267_v52, %v2264_v26  ;;  %v2282_v34 = vrot.slane %v2280_v53, 5  ;;  %v2285_v11 = vrot.slane %v2283_v7, 6  ;;  %10949 = vmatprep.subr.bf16.mxu1 %v11928_v25  ;;  %v1726_v54 = vor.u32 %v12851_v60, %v12849_v15  ;;  %v12960_v33 = vld [vmem:[#allocation2 + $0x20] sm:$0xe]  ;;  %v11931_v24 = vld [vmem:[%s15563_s3 + $0x90] sm:$0xff]  }
 0x14e   : > { %10885 = vmatprep.mubr.bf16.mxu0 %v9631_v36  ;;  %v2260_v12 = vrot.slane %v2259_v37, 4  ;;  %v2277_v23 = vor.u32 %v2276_v0, %v2273_v28  ;;  %v1729_v21 = vshll.u32 %v12898_v14, 16  ;;  %v1740_v16 = vor.u32 %v12868_v48, %v12861_v1  ;;  %v11929_v1 = vld [vmem:[%s15563_s3 + $0x98] sm:$0xff]   ;;  %v12972_v36 = vld [vmem:[#allocation2 + $0x24] sm:$0x3] }
 0x14f   : > { %10918 = vmatpush3.bf16.msra.mxu0 %v11925_v39  ;;  %v2286_v15 = vor.u32 %v2285_v11, %v2282_v34  ;;  %v1727_v60 = vrot.slane %v1726_v54, 4  ;;  %v1743_v46 = vshll.u32 %v12903_v44, 16  ;;  %v9653_v47 = vrot.slane %v12853_v61, 9  ;;  %v12975_v34 = vld [vmem:[#allocation2 + $0x28] sm:$0xe] }
 0x150   : > { %v2269_v17 = vsel %vm12915_vm10, %v2260_v12, %v2268_v45  ;;  %v2278_v38 = vrot.slane %v2277_v23, 4  ;;  %10919 = vmatprep.subr.bf16.mxu0 %v11927_v18  ;;  %10950 = vmatpush3.bf16.msra.mxu1 %v11928_v25  ;;  %v1731_v31 = vrot.slane %v1729_v21, 5  ;;  %v1741_v2 = vrot.slane %v1740_v16, 4  ;;  %v11933_v12 = vld [vmem:[%s15563_s3 + $0x88] sm:$0xff]  }
 0x151   : > { %v15582_v3 = vmov 0  ;;  %v1745_v61 = vrot.slane %v1743_v46, 5  ;;  %v2058_v48 = vrot.slane %v12728_v35, 5  ;;  %v9654_v49 = vrot.slane %v12872_v5, 9  ;;  %10951 = vmatprep.subr.bf16.mxu1 %v11930_v55 }
 0x152   : > { %v15583_v3 = vsel %vm12930_vm11, 4294967295, %v15582_v3  ;;  %v2062_v40 = vrot.slane %v12765_v41, 5  ;;  %v2287_v9 = vsel %vm12915_vm10, %v2278_v38, %v2286_v15  ;;  %v1732_v13 = vsel %vm12769_vm5, %v1727_v60, %v1731_v31  ;;  %v12980_v15 = vld [vmem:[#allocation2 + $0x2c] sm:$0x3]  ;;  %v12987_v31 = vld [vmem:[#allocation2 + $0x30] sm:$0xe] }
 0x153   : > { %15584 = vst [vmem:[#allocation8_spill] sm:$0xff] %v15583_v3  ;;  %v2289_v35 = vshrl.u32 %v12921_v62, 16  ;;  %v2292_v41 = vshll.u32 %v12921_v62, 16  ;;  %v9673_v5 = vcombine.low %v2269_v17, %v2287_v9  ;;  %10920 = vmatpush3.bf16.msra.mxu0 %v11927_v18  ;;  %v1746_v39 = vsel %vm12769_vm5, %v1741_v2, %v1745_v61 }
 0x154   : > { %v2059_v10 = vsel %vm12930_vm11, %v9653_v47, %v2058_v48  ;;  %v2063_v51 = vsel %vm12930_vm11, %v9654_v49, %v2062_v40  ;;  %10921 = vmatprep.subr.bf16.mxu0 %v11929_v1  ;;  %v9632_v20 = vcombine.low %v1732_v13, %v1746_v39  ;;  %10952 = vmatpush3.bf16.msra.mxu1 %v11930_v55  ;;  %v2298_v26 = vshrl.u32 %v12948_v50, 16 }
 0x155   : > { %v9661_v22 = vcombine.low %v2059_v10, %v2063_v51  ;;  %v2291_v25 = vrot.slane %v2289_v35, 5  ;;  %v2294_v58 = vrot.slane %v2292_v41, 6  ;;  %10953 = vmatprep.mubr.bf16.mxu1 %v9673_v5  ;;  %v2301_v57 = vshll.u32 %v12948_v50, 16  ;;  %10985 = vmatprep.subr.bf16.mxu1 %v12940_v8  ;;  %v11935_v41 = vld [vmem:[%s15563_s3 + $0x80] sm:$0xff]   ;;  %v12998_v51 = vld [vmem:[#allocation2 + $0x38] sm:$0xe] }
 0x156   : > { %v2307_v27 = vshrl.u32 %v12946_v43, 16  ;;  %v2310_v29 = vshll.u32 %v12946_v43, 16  ;;  %10886 = vmatmul.mubr.bf16.gmra.mxu0 %v9632_v20  ;;  %v2316_v53 = vshrl.u32 %v12958_v6, 16  ;;  %v2319_v7 = vshll.u32 %v12958_v6, 16  ;;  %v13000_v20 = vld [vmem:[#allocation2 + $0x34] sm:$0x3] }
 0x157   : > { %v2295_v52 = vor.u32 %v2294_v58, %v2291_v25  ;;  %v2325_v37 = vshrl.u32 %v12960_v33, 16  ;;  %10922 = vmatpush3.bf16.msra.mxu0 %v11929_v1  ;;  %10929 = vmatprep.mubr.bf16.mxu0 %v9661_v22  ;;  %v2300_v28 = vrot.slane %v2298_v26, 5  ;;  %v2303_v0 = vrot.slane %v2301_v57, 6  ;;  %v11934_v57 = vld [vmem:[%s15563_s3 + $0x170] sm:$0xff]  }
 0x158   : > { %v2309_v18 = vrot.slane %v2307_v27, 5  ;;  %v2312_v45 = vrot.slane %v2310_v29, 6  ;;  %10923 = vmatprep.subr.bf16.mxu0 %v11931_v24  ;;  %v2318_v54 = vrot.slane %v2316_v53, 5  ;;  %v2321_v55 = vrot.slane %v2319_v7, 6 }
 0x159   : > { %v2296_v11 = vrot.slane %v2295_v52, 4  ;;  %v2327_v23 = vrot.slane %v2325_v37, 5  ;;  %v2304_v21 = vor.u32 %v2303_v0, %v2300_v28  ;;  %v2328_v60 = vshll.u32 %v12960_v33, 16  ;;  %v13006_v52 = vld [vmem:[#allocation2 + $0x3c] sm:$0x3] }
 0x15a   : > { %v2313_v16 = vor.u32 %v2312_v45, %v2309_v18  ;;  %v2334_v46 = vshrl.u32 %v12972_v36, 16  ;;  %v2322_v47 = vor.u32 %v2321_v55, %v2318_v54  ;;  %v2337_v17 = vshll.u32 %v12972_v36, 16  ;;  %v11937_v45 = vld [vmem:[%s15563_s3 + $0x138] sm:$0xff]  }
 0x15b   : > { %v2343_v38 = vshrl.u32 %v12975_v34, 16  ;;  %v2346_v1 = vshll.u32 %v12975_v34, 16  ;;  %10924 = vmatpush3.bf16.msra.mxu0 %v11931_v24  ;;  %v2305_v2 = vsel %vm12915_vm10, %v2296_v11, %v2304_v21  ;;  %v2330_v48 = vrot.slane %v2328_v60, 6 }
 0x15c   : > { %v2314_v61 = vrot.slane %v2313_v16, 4  ;;  %v2336_v49 = vrot.slane %v2334_v46, 5  ;;  %10925 = vmatprep.subr.bf16.mxu0 %v11933_v12  ;;  %v2339_v40 = vrot.slane %v2337_v17, 6  ;;  %v2352_v35 = vshrl.u32 %v12980_v15, 16 }
 0x15d   : > { %v2345_v9 = vrot.slane %v2343_v38, 5  ;;  %v2348_v13 = vrot.slane %v2346_v1, 6  ;;  %v2331_v39 = vor.u32 %v2330_v48, %v2327_v23  ;;  %v2355_v10 = vshll.u32 %v12980_v15, 16  ;;  %v11936_v23 = vld [vmem:[%s15563_s3 + $0x168] sm:$0xff]  }
 0x15e   : > { %v2323_v5 = vsel %vm12915_vm10, %v2314_v61, %v2322_v47  ;;  %v2361_v22 = vshrl.u32 %v12987_v31, 16  ;;  %v2340_v25 = vor.u32 %v2339_v40, %v2336_v49  ;;  %v2354_v26 = vrot.slane %v2352_v35, 5 }
 0x15f   : > { %v9674_v24 = vcombine.low %v2305_v2, %v2323_v5  ;;  %v2349_v58 = vor.u32 %v2348_v13, %v2345_v9  ;;  %v2332_v27 = vrot.slane %v2331_v39, 4  ;;  %v2357_v29 = vrot.slane %v2355_v10, 6  ;;  %10926 = vmatpush3.bf16.msra.mxu0 %v11933_v12 }
 0x160   : > { %v2363_v53 = vrot.slane %v2361_v22, 5  ;;  %v2364_v7 = vshll.u32 %v12987_v31, 16  ;;  %10927 = vmatprep.subr.bf16.mxu0 %v11935_v41  ;;  %v2370_v28 = vshrl.u32 %v13000_v20, 16  ;;  %v2373_v0 = vshll.u32 %v13000_v20, 16 }
 0x161   : > { %10954 = vmatmul.mubr.bf16.vlgmr.msra.gmra.mxu1 %v9674_v24  ;;  %v2350_v37 = vrot.slane %v2349_v58, 4  ;;  %v2379_v18 = vshrl.u32 %v12998_v51, 16  ;;  %v2341_v11 = vsel %vm12915_vm10, %v2332_v27, %v2340_v25  ;;  %v2358_v54 = vor.u32 %v2357_v29, %v2354_v26  ;;  %v2549_v25 = vld [vmem:[#allocation2] sm:$0xc]  ;;  %v11940_v29 = vld [vmem:[%s15563_s3 + $0x130] sm:$0xff]  }
 0x162   : > { %10986 = vmatpush3.bf16.msra.mxu1 %v12940_v8  ;;  %v2366_v55 = vrot.slane %v2364_v7, 6  ;;  %v2382_v12 = vshll.u32 %v12998_v51, 16  ;;  %v2372_v21 = vrot.slane %v2370_v28, 5  ;;  %v2375_v16 = vrot.slane %v2373_v0, 6  ;;  %v11938_v7 = vld [vmem:[#allocation2 + $0x8] ss:$8 sps:$4 sm:$0xff]  }
 0x163   : > { %10987 = vmatprep.subr.bf16.mxu1 %v11934_v57  ;;  %v2381_v60 = vrot.slane %v2379_v18, 5  ;;  %v2388_v46 = vshrl.u32 %v13006_v52, 16  ;;  %v2359_v47 = vsel %vm12915_vm10, %v2350_v37, %v2358_v54  ;;  %10928 = vmatpush3.bf16.msra.mxu0 %v11935_v41  ;;  %v2391_v8 = vshll.u32 %v13006_v52, 16  ;;  %v11941_v28 = vld [vmem:[%s15563_s3 + $0x158] sm:$0xff]  }
 0x164   : > { %v2367_v17 = vor.u32 %v2366_v55, %v2363_v53  ;;  %v2384_v38 = vrot.slane %v2382_v12, 6  ;;  %v9675_v1 = vcombine.low %v2341_v11, %v2359_v47  ;;  %v2376_v2 = vor.u32 %v2375_v16, %v2372_v21  ;;  %10961 = vmatprep.subr.bf16.mxu0 %v11937_v45  ;;  %v2550_v53 = vld [vmem:[#allocation2 + $0x8] sm:$0xc]  ;;  %v11944_v21 = vld [vmem:[%s15563_s3 + $0x120] sm:$0xff]  }
 0x165   : > { %v2390_v61 = vrot.slane %v2388_v46, 5  ;;  %v9655_v48 = vrot.slane %v12921_v62, 9  ;;  %v2393_v9 = vrot.slane %v2391_v8, 6  ;;  %v2066_v13 = vrot.slane %v12814_v56, 5  ;;  %v11939_v62 = vld [vmem:[%s15563_s3 + $0x160] sm:$0xff]   ;;  %v11946_v46 = vld [vmem:[%s15563_s3 + $0x118] sm:$0xff]  }
 0x166   : > { %10988 = vmatpush3.bf16.msra.mxu1 %v11934_v57  ;;  %v2368_v49 = vrot.slane %v2367_v17, 4  ;;  %v2385_v40 = vor.u32 %v2384_v38, %v2381_v60  ;;  %10957 = vmatprep.mubr.bf16.mxu1 %v9675_v1  ;;  %v9656_v35 = vrot.slane %v12946_v43, 9  ;;  %v2070_v41 = vrot.slane %v12816_v4, 5  ;;  %v11945_v60 = vld [vmem:[%s15563_s3 + $0x148] sm:$0xff]   ;;  %v11947_v47 = vld [vmem:[%s15563_s3 + $0x140] sm:$0xff]   ;;  %v11948_v17 = vld [vmem:[%s15563_s3 + $0x110] sm:$0xff]  }
 0x167   : > { %10989 = vmatprep.subr.bf16.mxu1 %v11936_v23  ;;  %v9657_v5 = vrot.slane %v12960_v33, 9  ;;  %v2074_v39 = vrot.slane %v12845_v59, 5  ;;  %v2394_v24 = vor.u32 %v2393_v9, %v2390_v61  ;;  %v2067_v56 = vsel %vm12930_vm11, %v9655_v48, %v2066_v13  ;;  %v11950_v38 = vld [vmem:[%s15563_s3 + $0x1f8] sm:$0xff]   ;;  %v11951_v8 = vld [vmem:[%s15563_s3 + $0x108] sm:$0xff]   ;;  %v2933_v1 = vld [vmem:[#allocation2 + $0x10] sm:$0xf] }
 0x168   : > { %v2377_v10 = vsel %vm12915_vm10, %v2368_v49, %v2376_v2  ;;  %v2386_v22 = vrot.slane %v2385_v40, 4  ;;  %v2071_v43 = vsel %vm12930_vm11, %v9656_v35, %v2070_v41  ;;  %v9658_v59 = vrot.slane %v12975_v34, 9  ;;  %v11953_v2 = vld [vmem:[%s15563_s3 + $0x1f0] sm:$0xff]   ;;  %v13105_v61 = vld [vmem:[#allocation2 + $0xc] sm:$0x1] }
 0x169   : > { %v2075_v4 = vsel %vm12930_vm11, %v9657_v5, %v2074_v39  ;;  %v2078_v33 = vrot.slane %v12859_v30, 5  ;;  %v9662_v26 = vcombine.low %v2067_v56, %v2071_v43  ;;  %v9659_v34 = vrot.slane %v12987_v31, 9  ;;  %v13107_v48 = vld [vmem:[#allocation2 + $0x14] sm:$0x1]  ;;  %v13109_v49 = vld [vmem:[#allocation2 + $0x8] sm:$0xe] }
 0x16a   : > { %v2395_v58 = vsel %vm12915_vm10, %v2386_v22, %v2394_v24  ;;  %10990 = vmatpush3.bf16.msra.mxu1 %v11936_v23  ;;  %v2082_v30 = vrot.slane %v12898_v14, 5  ;;  %v9685_v0 = vrot.slane %v2549_v25, 10  ;;  %v2578_v18 = vrot.slane %v12866_v19, 6  ;;  %v11942_v14 = vld [vmem:[%s15563_s3 + $0x128] sm:$0xff]   ;;  %v13111_v40 = vld [vmem:[#allocation2 + $0x10] sm:$0xe] }
 0x16b   : > { %v9676_v57 = vcombine.low %v2377_v10, %v2395_v58  ;;  %v2079_v27 = vsel %vm12930_vm11, %v9658_v59, %v2078_v33  ;;  %10991 = vmatprep.subr.bf16.mxu1 %v11939_v62  ;;  %10930 = vmatmul.mubr.bf16.vlgmr.msra.gmra.mxu0 %v9662_v26  ;;  %v9660_v11 = vrot.slane %v12998_v51, 9  ;;  %v2086_v31 = vrot.slane %v12903_v44, 5  ;;  %v11949_v9 = vld [vmem:[#allocation2 + $0x18] ss:$8 sps:$4 sm:$0xff]   ;;  %v2551_v13 = vld [vmem:[#allocation2 + $0x10] sm:$0xc] }
 0x16c   : > { %v9663_v37 = vcombine.low %v2075_v4, %v2079_v27  ;;  %10962 = vmatpush3.bf16.msra.mxu0 %v11937_v45  ;;  %v9686_v54 = vrot.slane %v2550_v53, 10  ;;  %v2582_v55 = vrot.slane %v12878_v42, 6  ;;  %v2083_v19 = vsel %vm12930_vm11, %v9659_v34, %v2082_v30  ;;  %v11943_v45 = vld [vmem:[%s15563_s3 + $0x150] sm:$0xff]   ;;  %v2931_v35 = vld [vmem:[#allocation2 + $0x8] sm:$0xf]  ;;  %v11954_v24 = vld [vmem:[%s15563_s3 + $0x100] sm:$0xff]  }
 0x16d   : > { %10958 = vmatmul.mubr.bf16.gmra.mxu1 %v9676_v57  ;;  %10963 = vmatprep.subr.bf16.mxu0 %v11940_v29  ;;  %v2579_v44 = vsel %vm13068_vm14, %v9685_v0, %v2578_v18  ;;  %v2087_v42 = vsel %vm12930_vm11, %v9660_v11, %v2086_v31  ;;  %v2553_v41 = vld [vmem:[#allocation2 + $0x20] sm:$0xc]  ;;  %v2962_v5 = vshrl.u32 %v2933_v1, 16  ;;  %v2965_v39 = vshll.u32 %v2933_v1, 16  ;;  %v2552_v56 = vld [vmem:[#allocation2 + $0x18] sm:$0xc] }
 0x16e   : > { %11001 = vmatprep.mubr.bf16.mxu1 %v11938_v7  ;;  %10933 = vmatprep.mubr.bf16.mxu0 %v9663_v37  ;;  %v9664_v12 = vcombine.low %v2083_v19, %v2087_v42  ;;  %v2583_v23 = vsel %vm13068_vm14, %v9686_v54, %v2582_v55  ;;  %v9730_v10 = vrot.slane %v13111_v40, 9  ;;  %v3242_v22 = vrot.slane %v13107_v48, 5  ;;  %v2554_v26 = vld [vmem:[#allocation2 + $0x28] sm:$0xc]  ;;  %v11955_v31 = vld [vmem:[#allocation2 + $0x38] ss:$8 sps:$4 sm:$0xff]  }
 0x16f   : > { %10992 = vmatpush3.bf16.msra.mxu1 %v11939_v62  ;;  %v9693_v16 = vcombine.low %v2579_v44, %v2583_v23  ;;  %v11952_v62 = vld [vmem:[#allocation2 + $0x28] ss:$8 sps:$4 sm:$0xff]   ;;  %v2948_v43 = vshrl.u32 %v2931_v35, 16  ;;  %v2951_v4 = vshll.u32 %v2931_v35, 16  ;;  %v9687_v59 = vrot.slane %v2551_v13, 10 }
 0x170   : > { %10993 = vmatprep.subr.bf16.mxu1 %v11941_v28  ;;  %10964 = vmatpush3.bf16.msra.mxu0 %v11940_v29  ;;  %v2586_v33 = vrot.slane %v12948_v50, 6  ;;  %v9729_v25 = vrot.slane %v13109_v49, 9  ;;  %v3238_v58 = vrot.slane %v13105_v61, 5  ;;  %v11956_v57 = vld [vmem:[%s15563_s3 + $0x1e8] sm:$0xff]   ;;  %v9689_v27 = vrot.slane %v2553_v41, 10  ;;  %v11957_v50 = vld [vmem:[%s15563_s3 + $0x1b8] sm:$0xff]  }
 0x171   : > { %10965 = vmatprep.subr.bf16.mxu0 %v11942_v14  ;;  %v2594_v29 = vrot.slane %v12972_v36, 6  ;;  %v2964_v34 = vrot.slane %v2962_v5, 4  ;;  %v2967_v30 = vrot.slane %v2965_v39, 5  ;;  %v9688_v53 = vrot.slane %v2552_v56, 10  ;;  %v2555_v55 = vld [vmem:[#allocation2 + $0x30] sm:$0xc] }
 0x172   : > { %v2590_v7 = vrot.slane %v12958_v6, 6  ;;  %v3243_v37 = vsel %vm12930_vm11, %v9730_v10, %v3242_v22  ;;  %v2598_v0 = vrot.slane %v12980_v15, 6  ;;  %v2950_v18 = vrot.slane %v2948_v43, 4  ;;  %v11958_v6 = vld [vmem:[%s15563_s3 + $0x1e0] sm:$0xff]   ;;  %v11959_v23 = vld [vmem:[%s15563_s3 + $0x1b0] sm:$0xff]   ;;  %v11961_v1 = vld [vmem:[%s15563_s3 + $0x1a8] sm:$0xff]  }
 0x173   : > { %10994 = vmatpush3.bf16.msra.mxu1 %v11941_v28  ;;  %10934 = vmatmul.mubr.bf16.gmra.mxu0 %v9664_v12  ;;  %v9690_v28 = vrot.slane %v2554_v26, 10  ;;  %v2953_v11 = vrot.slane %v2951_v4, 5  ;;  %v2587_v36 = vsel %vm13068_vm14, %v9687_v59, %v2586_v33  ;;  %v2595_v54 = vsel %vm13068_vm14, %v9689_v27, %v2594_v29  ;;  %v13160_v13 = vld [vmem:[#allocation2 + $0x24] sm:$0x1]  ;;  %v13162_v35 = vld [vmem:[#allocation2 + $0x18] sm:$0xe] }
 0x174   : > { %10995 = vmatprep.subr.bf16.mxu1 %v11943_v45  ;;  %10966 = vmatpush3.bf16.msra.mxu0 %v11942_v14  ;;  %v3239_v14 = vsel %vm12930_vm11, %v9729_v25, %v3238_v58  ;;  %v2968_v15 = vor.u32 %v2967_v30, %v2964_v34  ;;  %v2591_v19 = vsel %vm13068_vm14, %v9688_v53, %v2590_v7  ;;  %v13167_v5 = vld [vmem:[#allocation2 + $0x20] sm:$0xe]  ;;  %v13171_v39 = vld [vmem:[#allocation2 + $0x2c] sm:$0x1]  ;;  %v13175_v10 = vld [vmem:[#allocation2 + $0x28] sm:$0xe] }
 0x175   : > { %10977 = vmatprep.mubr.bf16.mxu0 %v9693_v16  ;;  %10967 = vmatprep.subr.bf16.mxu0 %v11944_v21  ;;  %v9737_v44 = vcombine.low %v3239_v14, %v3243_v37  ;;  %v9694_v42 = vcombine.low %v2587_v36, %v2591_v19  ;;  %v2599_v12 = vsel %vm13068_vm14, %v9690_v28, %v2598_v0  ;;  %v2971_v16 = vshll.u32 %v13107_v48, 16  ;;  %v11963_v43 = vld [vmem:[%s15563_s3 + $0x1a0] sm:$0xff]   ;;  %v13184_v4 = vld [vmem:[#allocation2 + $0x30] sm:$0xe]  ;;  %v11964_v34 = vld [vmem:[%s15563_s3 + $0x1c8] sm:$0xff]  }
 0x176   : > { %v2969_v48 = vrot.slane %v2968_v15, 4  ;;  %v13186_v59 = vld [vmem:[#allocation2 + $0x44] sm:$0x1]  ;;  %v9731_v33 = vrot.slane %v13162_v35, 9  ;;  %v9732_v58 = vrot.slane %v13167_v5, 9  ;;  %v3250_v26 = vrot.slane %v13160_v13, 5 }
 0x177   : > { %10996 = vmatpush3.bf16.msra.mxu1 %v11943_v45  ;;  %v2556_v45 = vld [vmem:[#allocation2 + $0x38] sm:$0xc]  ;;  %v2973_v41 = vrot.slane %v2971_v16, 5  ;;  %v13199_v30 = vld [vmem:[#allocation2 + $0x3c] sm:$0x1] }
 0x178   : > { %10997 = vmatprep.subr.bf16.mxu1 %v11945_v60  ;;  %10968 = vmatpush3.bf16.msra.mxu0 %v11944_v21  ;;  %v2954_v21 = vor.u32 %v2953_v11, %v2950_v18  ;;  %v2937_v53 = vld [vmem:[#allocation2 + $0x20] sm:$0xf]  ;;  %v13203_v28 = vld [vmem:[#allocation2 + $0x38] sm:$0xe]  ;;  %v9733_v18 = vrot.slane %v13175_v10, 9  ;;  %v3254_v11 = vrot.slane %v13171_v39, 5 }
 0x179   : > { %10969 = vmatprep.subr.bf16.mxu0 %v11946_v46  ;;  %v2974_v56 = vsel %vm12769_vm5, %v2969_v48, %v2973_v41  ;;  %v2935_v0 = vld [vmem:[#allocation2 + $0x18] sm:$0xf]  ;;  %v2990_v15 = vshrl.u32 %v2937_v53, 16  ;;  %v2993_v19 = vshll.u32 %v2937_v53, 16  ;;  %v3726_v48 = vld [vmem:[#allocation2 + $0x8] sm:$0xc] }
 0x17a   : > { %v11965_v14 = vld [vmem:[%s15563_s3 + $0x198] sm:$0xff]  }
 0x17b   : > { %10998 = vmatpush3.bf16.msra.mxu1 %v11945_v60  ;;  %v9695_v60 = vcombine.low %v2595_v54, %v2599_v12  ;;  %v2979_v12 = vshll.u32 %v2935_v0, 16  ;;  %v2943_v53 = vld [vmem:[#allocation2 + $0x38] sm:$0xf] }
 0x17c   : > { %10999 = vmatprep.subr.bf16.mxu1 %v11947_v47  ;;  %10970 = vmatpush3.bf16.msra.mxu0 %v11946_v46  ;;  %v11960_v46 = vld [vmem:[%s15563_s3 + $0x1d8] sm:$0xff]  }
 0x17d   : > { %10971 = vmatprep.subr.bf16.mxu0 %v11948_v17 }
 0x17f   : > { %11000 = vmatpush3.bf16.msra.mxu1 %v11947_v47  ;;  %v9691_v47 = vrot.slane %v2555_v55, 10  ;;  %v13218_v55 = vsel %vm12930_vm11, %v9732_v58, %v3250_v26  ;;  %v3727_v58 = vld [vmem:[#allocation2 + $0x10] sm:$0xc] }
 0x180   : > { %11033 = vmatprep.subr.bf16.mxu1 %v11950_v38  ;;  %10972 = vmatpush3.bf16.msra.mxu0 %v11948_v17  ;;  %v2602_v17 = vrot.slane %v13000_v20, 6  ;;  %v2955_v20 = vrot.slane %v2954_v21, 4  ;;  %v11966_v21 = vld [vmem:[%s15563_s3 + $0x1c0] sm:$0xff]  }
 0x181   : > { %10973 = vmatprep.subr.bf16.mxu0 %v11951_v8 }
 0x182   : > { %11002 = vmatmul.mubr.bf16.vlgmr.msra.gmra.mxu1 %v11949_v9  ;;  %v13158_v9 = vld [vmem:[#allocation2 + $0x1c] sm:$0x1] }
 0x183   : > { %11005 = vmatprep.mubr.bf16.mxu1 %v11952_v62  ;;  %11034 = vmatpush3.bf16.msra.mxu1 %v11950_v38  ;;  %v9692_v38 = vrot.slane %v2556_v45, 10  ;;  %v13173_v62 = vld [vmem:[#allocation2 + $0x34] sm:$0x1]  ;;  %v3246_v25 = vrot.slane %v13158_v9, 5  ;;  %v3262_v45 = vrot.slane %v13199_v30, 5 }
 0x184   : > { %11035 = vmatprep.subr.bf16.mxu1 %v11953_v2  ;;  %10974 = vmatpush3.bf16.msra.mxu0 %v11951_v8  ;;  %v2606_v8 = vrot.slane %v13006_v52, 6  ;;  %v11962_v52 = vld [vmem:[%s15563_s3 + $0x1d0] sm:$0xff]   ;;  %v3258_v37 = vrot.slane %v13173_v62, 5 }
 0x185   : > { %10975 = vmatprep.subr.bf16.mxu0 %v11954_v24  ;;  %v13214_v54 = vsel %vm12930_vm11, %v9731_v33, %v3246_v25  ;;  %v2981_v33 = vrot.slane %v2979_v12, 5  ;;  %v13251_v25 = vld [vmem:[#allocation2 + $0x14] sm:$0x3] }
 0x186   : > { %v2607_v22 = vsel %vm13068_vm14, %v9692_v38, %v2606_v8  ;;  %v9738_v38 = vcombine.low %v13214_v54, %v13218_v55  ;;  %v13237_v8 = vsel %vm12930_vm11, %v9733_v18, %v3254_v11  ;;  %v9762_v55 = vrot.slane %v3727_v58, 10 }
 0x187   : > { %11036 = vmatpush3.bf16.msra.mxu1 %v11953_v2  ;;  %v2957_v2 = vshll.u32 %v13105_v61, 16  ;;  %v2603_v61 = vsel %vm13068_vm14, %v9691_v47, %v2602_v17  ;;  %v11967_v17 = vld [vmem:[%s15563_s3 + $0x190] sm:$0xff]  }
 0x188   : > { %11037 = vmatprep.subr.bf16.mxu1 %v11956_v57  ;;  %10976 = vmatpush3.bf16.msra.mxu0 %v11954_v24  ;;  %v9696_v27 = vcombine.low %v2603_v61, %v2607_v22  ;;  %v2945_v61 = vld [vmem:[#allocation2 + $0x40] sm:$0xf] }
 0x189   : > { %11009 = vmatprep.subr.bf16.mxu0 %v11957_v50  ;;  %v2959_v24 = vrot.slane %v2957_v2, 5  ;;  %v13243_v2 = vld [vmem:[#allocation2 + $0xc] sm:$0x3]  ;;  %v3049_v18 = vshll.u32 %v2945_v61, 16 }
 0x18a   : > { %11006 = vmatmul.mubr.bf16.gmra.mxu1 %v11955_v31  ;;  %v2941_v31 = vld [vmem:[#allocation2 + $0x30] sm:$0xf]  ;;  %v3752_v11 = vrot.slane %v13243_v2, 6 }
 0x18b   : > { %11038 = vmatpush3.bf16.msra.mxu1 %v11956_v57  ;;  %11049 = vmatprep.mubr.bf16.mxu1 %v9737_v44  ;;  %v13192_v57 = vld [vmem:[#allocation2 + $0x40] sm:$0xe]  ;;  %v2960_v29 = vsel %vm12769_vm5, %v2955_v20, %v2959_v24  ;;  %v9735_v44 = vrot.slane %v13203_v28, 9  ;;  %v3021_v47 = vshll.u32 %v2941_v31, 16  ;;  %v2995_v20 = vrot.slane %v2993_v19, 5 }
 0x18c   : > { %10978 = vmatmul.mubr.bf16.vlgmr.msra.gmra.mxu0 %v9694_v42  ;;  %11039 = vmatprep.subr.bf16.mxu1 %v11958_v6  ;;  %v9717_v7 = vcombine.low %v2960_v29, %v2974_v56  ;;  %v9736_v36 = vrot.slane %v13192_v57, 9  ;;  %v2976_v42 = vshrl.u32 %v2935_v0, 16  ;;  %v3046_v0 = vshrl.u32 %v2945_v61, 16 }
 0x18d   : > { %10981 = vmatprep.mubr.bf16.mxu0 %v9695_v60  ;;  %11010 = vmatpush3.bf16.msra.mxu0 %v11957_v50  ;;  %v9734_v50 = vrot.slane %v13184_v4, 9  ;;  %v2985_v60 = vshll.u32 %v13158_v9, 16  ;;  %v2992_v9 = vrot.slane %v2990_v15, 4  ;;  %v13249_v24 = vsel %vm12930_vm11, %v9735_v44, %v3262_v45 }
 0x18e   : > { %11011 = vmatprep.subr.bf16.mxu0 %v11959_v23  ;;  %v2978_v56 = vrot.slane %v2976_v42, 4  ;;  %v3023_v29 = vrot.slane %v3021_v47, 5  ;;  %v3756_v15 = vrot.slane %v13251_v25, 6  ;;  %v3032_v19 = vshrl.u32 %v2943_v53, 16  ;;  %v11970_v42 = vld [vmem:[%s15563_s3 + $0x270] sm:$0xff]  }
 0x18f   : > { %11040 = vmatpush3.bf16.msra.mxu1 %v11958_v6  ;;  %v3266_v6 = vrot.slane %v13186_v59, 5  ;;  %v13227_v16 = vsel %vm12930_vm11, %v9734_v50, %v3258_v37  ;;  %v13255_v26 = vrot.slane %v2985_v60, 5  ;;  %v2999_v50 = vshll.u32 %v13160_v13, 16 }
 0x190   : > { %11041 = vmatprep.subr.bf16.mxu1 %v11960_v46  ;;  %v9739_v22 = vcombine.low %v13237_v8, %v13227_v16  ;;  %v9761_v37 = vrot.slane %v3726_v48, 10  ;;  %v2982_v54 = vor.u32 %v2981_v33, %v2978_v56  ;;  %v3035_v44 = vshll.u32 %v2943_v53, 16  ;;  %v11973_v53 = vld [vmem:[%s15563_s3 + $0x238] sm:$0xff]  }
 0x191   : > { %11012 = vmatpush3.bf16.msra.mxu0 %v11959_v23  ;;  %v2939_v23 = vld [vmem:[#allocation2 + $0x28] sm:$0xf]  ;;  %v3451_v45 = vshll.u32 %v13111_v40, 16  ;;  %v3048_v12 = vrot.slane %v3046_v0, 4  ;;  %v3430_v16 = vshrl.u32 %v13109_v49, 16  ;;  %v3433_v60 = vshll.u32 %v13109_v49, 16 }
 0x192   : > { %11013 = vmatprep.subr.bf16.mxu0 %v11961_v1  ;;  %v3004_v41 = vshrl.u32 %v2939_v23, 16  ;;  %v3753_v47 = vsel %vm13068_vm14, %v9761_v37, %v3752_v11  ;;  %v2983_v48 = vrot.slane %v2982_v54, 4  ;;  %v3027_v49 = vshll.u32 %v13173_v62, 16  ;;  %v13304_v54 = vld [vmem:[#allocation2 + $0x1c] sm:$0x3] }
 0x193   : > { %11042 = vmatpush3.bf16.msra.mxu1 %v11960_v46  ;;  %v3018_v46 = vshrl.u32 %v2941_v31, 16  ;;  %v11969_v31 = vld [vmem:[%s15563_s3 + $0x188] sm:$0xff]   ;;  %v3453_v61 = vrot.slane %v3451_v45, 6  ;;  %v3432_v58 = vrot.slane %v3430_v16, 5  ;;  %v3439_v37 = vshrl.u32 %v13243_v2, 16 }
 0x194   : > { %10982 = vmatmul.mubr.bf16.gmra.mxu0 %v9696_v27  ;;  %11043 = vmatprep.subr.bf16.mxu1 %v11962_v52  ;;  %v3442_v0 = vshll.u32 %v13243_v2, 16 }
 0x195   : > { %11014 = vmatpush3.bf16.msra.mxu0 %v11961_v1  ;;  %11025 = vmatprep.mubr.bf16.mxu0 %v9717_v7  ;;  %v13241_v1 = vsel %vm12930_vm11, %v9736_v36, %v3266_v6  ;;  %v3020_v27 = vrot.slane %v3018_v46, 4  ;;  %v11968_v7 = vld [vmem:[%s15563_s3 + $0x278] sm:$0xff]   ;;  %v3006_v36 = vrot.slane %v3004_v41, 4  ;;  %v3037_v41 = vrot.slane %v3035_v44, 5 }
 0x196   : > { %11015 = vmatprep.subr.bf16.mxu0 %v11963_v43  ;;  %v3728_v44 = vld [vmem:[#allocation2 + $0x18] sm:$0xc] }
 0x197   : > { %11044 = vmatpush3.bf16.msra.mxu1 %v11962_v52  ;;  %v3007_v52 = vshll.u32 %v2939_v23, 16  ;;  %v3024_v13 = vor.u32 %v3023_v29, %v3020_v27  ;;  %v3051_v23 = vrot.slane %v3049_v18, 5  ;;  %v3435_v27 = vrot.slane %v3433_v60, 6 }
 0x198   : > { %11045 = vmatprep.subr.bf16.mxu1 %v11964_v34  ;;  %v3460_v29 = vshll.u32 %v13251_v25, 16  ;;  %v2988_v18 = vsel %vm12769_vm5, %v2983_v48, %v13255_v26  ;;  %v3760_v48 = vrot.slane %v13304_v54, 6 }
 0x199   : > { %11016 = vmatpush3.bf16.msra.mxu0 %v11963_v43  ;;  %v9740_v43 = vcombine.low %v13249_v24, %v13241_v1  ;;  %v3009_v6 = vrot.slane %v3007_v52, 5  ;;  %v3025_v56 = vrot.slane %v3024_v13, 4  ;;  %v3052_v33 = vor.u32 %v3051_v23, %v3048_v12  ;;  %v13306_v13 = vld [vmem:[#allocation2 + $0x24] sm:$0x3]  ;;  %v3729_v23 = vld [vmem:[#allocation2 + $0x20] sm:$0xc] }
 0x19a   : > { %11017 = vmatprep.subr.bf16.mxu0 %v11965_v14  ;;  %v3436_v2 = vor.u32 %v3435_v27, %v3432_v58  ;;  %v3444_v12 = vrot.slane %v3442_v0, 6  ;;  %v11976_v1 = vld [vmem:[%s15563_s3 + $0x258] sm:$0xff]   ;;  %v11978_v27 = vld [vmem:[%s15563_s3 + $0x250] sm:$0xff]   ;;  %v3487_v0 = vshll.u32 %v13167_v5, 16 }
 0x19b   : > { %11046 = vmatpush3.bf16.msra.mxu1 %v11964_v34  ;;  %v2996_v34 = vor.u32 %v2995_v20, %v2992_v9  ;;  %v3010_v8 = vor.u32 %v3009_v6, %v3006_v36  ;;  %v3757_v9 = vsel %vm13068_vm14, %v9762_v55, %v3756_v15  ;;  %v3013_v20 = vshll.u32 %v13171_v39, 16 }
 0x19c   : > { %11047 = vmatprep.subr.bf16.mxu1 %v11966_v21  ;;  %v3041_v6 = vshll.u32 %v13199_v30, 16  ;;  %v9769_v26 = vcombine.low %v3753_v47, %v3757_v9  ;;  %v9763_v47 = vrot.slane %v3728_v44, 10  ;;  %v9764_v9 = vrot.slane %v3729_v23, 10  ;;  %v11981_v23 = vld [vmem:[%s15563_s3 + $0x218] sm:$0xff]  }
 0x19d   : > { %11018 = vmatpush3.bf16.msra.mxu0 %v11965_v14  ;;  %v3448_v14 = vshrl.u32 %v13111_v40, 16  ;;  %v2997_v46 = vrot.slane %v2996_v34, 4  ;;  %v11971_v40 = vld [vmem:[%s15563_s3 + $0x180] sm:$0xff]   ;;  %v3011_v62 = vrot.slane %v3010_v8, 4  ;;  %v3015_v34 = vrot.slane %v3013_v20, 5 }
 0x19e   : > { %11019 = vmatprep.subr.bf16.mxu0 %v11967_v17  ;;  %v3043_v24 = vrot.slane %v3041_v6, 5  ;;  %v13321_v8 = vld [vmem:[#allocation2 + $0x2c] sm:$0x3]  ;;  %v3764_v20 = vrot.slane %v13306_v13, 6  ;;  %v3733_v6 = vld [vmem:[#allocation2 + $0x40] sm:$0xc] }
 0x19f   : > { %11048 = vmatpush3.bf16.msra.mxu1 %v11966_v21  ;;  %v3001_v21 = vrot.slane %v2999_v50, 5  ;;  %v3450_v52 = vrot.slane %v3448_v14, 5  ;;  %v3055_v50 = vshll.u32 %v13186_v59, 16  ;;  %v11974_v59 = vld [vmem:[%s15563_s3 + $0x260] sm:$0xff]   ;;  %v3016_v30 = vsel %vm12769_vm5, %v3011_v62, %v3015_v34  ;;  %v11975_v14 = vld [vmem:[%s15563_s3 + $0x230] sm:$0xff]  }
 0x1a0   : > { %11081 = vmatprep.subr.bf16.mxu1 %v11968_v7  ;;  %v3768_v62 = vrot.slane %v13321_v8, 6  ;;  %v11979_v34 = vld [vmem:[%s15563_s3 + $0x220] sm:$0xff]  }
 0x1a1   : > { %11020 = vmatpush3.bf16.msra.mxu0 %v11967_v17  ;;  %v3034_v17 = vrot.slane %v3032_v19, 4  ;;  %v3002_v39 = vsel %vm12769_vm5, %v2997_v46, %v3001_v21  ;;  %v3462_v19 = vrot.slane %v3460_v29, 6  ;;  %v3057_v45 = vrot.slane %v3055_v50, 5  ;;  %v13350_v50 = vld [vmem:[#allocation2 + $0x38] sm:$0xc] }
 0x1a2   : > { %11050 = vmatmul.mubr.bf16.vlgmr.msra.gmra.mxu1 %v9738_v38  ;;  %11021 = vmatprep.subr.bf16.mxu0 %v11969_v31  ;;  %v11972_v38 = vld [vmem:[%s15563_s3 + $0x268] sm:$0xff]   ;;  %v9718_v55 = vcombine.low %v2988_v18, %v3002_v39  ;;  %v3437_v21 = vrot.slane %v3436_v2, 4  ;;  %v13342_v29 = vsel %vm13068_vm14, %v9763_v47, %v3760_v48  ;;  %v3475_v2 = vshrl.u32 %v13304_v54, 16 }
 0x1a3   : > { %11053 = vmatprep.mubr.bf16.mxu1 %v9739_v22  ;;  %11082 = vmatpush3.bf16.msra.mxu1 %v11968_v7  ;;  %v3457_v22 = vshrl.u32 %v13251_v25, 16  ;;  %v3029_v7 = vrot.slane %v3027_v49, 5  ;;  %v3038_v11 = vor.u32 %v3037_v41, %v3034_v17  ;;  %v3454_v25 = vor.u32 %v3453_v61, %v3450_v52  ;;  %v3730_v49 = vld [vmem:[#allocation2 + $0x28] sm:$0xc] }
 0x1a4   : > { %11083 = vmatprep.subr.bf16.mxu1 %v11970_v42  ;;  %v11977_v17 = vld [vmem:[%s15563_s3 + $0x228] sm:$0xff]   ;;  %v9765_v39 = vrot.slane %v3730_v49, 10  ;;  %v3520_v48 = vshrl.u32 %v13184_v4, 16 }
 0x1a5   : > { %11022 = vmatpush3.bf16.msra.mxu0 %v11969_v31  ;;  %v3030_v36 = vsel %vm12769_vm5, %v3025_v56, %v3029_v7  ;;  %v3053_v31 = vrot.slane %v3052_v33, 4  ;;  %v3459_v15 = vrot.slane %v3457_v22, 5  ;;  %v3039_v60 = vrot.slane %v3038_v11, 4  ;;  %v3731_v56 = vld [vmem:[#allocation2 + $0x30] sm:$0xc] }
 0x1a6   : > { %11023 = vmatprep.subr.bf16.mxu0 %v11971_v40  ;;  %v9719_v16 = vcombine.low %v3016_v30, %v3030_v36  ;;  %v3455_v46 = vrot.slane %v3454_v25, 4  ;;  %v4105_v22 = vld [vmem:[#allocation2 + $0x10] sm:$0xf]  ;;  %v13348_v7 = vld [vmem:[#allocation2 + $0x3c] sm:$0x3]  ;;  %v9766_v11 = vrot.slane %v3731_v56, 10 }
 0x1a7   : > { %11084 = vmatpush3.bf16.msra.mxu1 %v11970_v42  ;;  %v3441_v42 = vrot.slane %v3439_v37, 5  ;;  %v3044_v52 = vsel %vm12769_vm5, %v3039_v60, %v3043_v24  ;;  %v3484_v37 = vshrl.u32 %v13167_v5, 16  ;;  %v13358_v36 = vld [vmem:[#allocation2 + $0x44] sm:$0x3]  ;;  %v4122_v5 = vshrl.u32 %v4105_v22, 16 }
 0x1a8   : > { %11085 = vmatprep.subr.bf16.mxu1 %v11972_v38  ;;  %v3776_v44 = vrot.slane %v13348_v7, 6  ;;  %v9768_v60 = vrot.slane %v3733_v6, 10  ;;  %v13383_v24 = vrot.slane %v3475_v2, 5 }
 0x1a9   : > { %11024 = vmatpush3.bf16.msra.mxu0 %v11971_v40  ;;  %v3463_v40 = vor.u32 %v3462_v19, %v3459_v15  ;;  %v3445_v41 = vor.u32 %v3444_v12, %v3441_v42  ;;  %v13368_v15 = vsel %vm13068_vm14, %v9765_v39, %v3768_v62  ;;  %v9767_v19 = vrot.slane %v13350_v50, 10  ;;  %v4107_v12 = vld [vmem:[#allocation2 + $0x18] sm:$0xf] }
 0x1aa   : > { %11054 = vmatmul.mubr.bf16.gmra.mxu1 %v9740_v43  ;;  %11057 = vmatprep.subr.bf16.mxu0 %v11973_v53  ;;  %v3058_v43 = vsel %vm12769_vm5, %v3053_v31, %v3057_v45  ;;  %v3469_v31 = vshll.u32 %v13162_v35, 16  ;;  %v3486_v30 = vrot.slane %v3484_v37, 5  ;;  %v3493_v45 = vshrl.u32 %v13306_v13, 16 }
 0x1ab   : > { %11086 = vmatpush3.bf16.msra.mxu1 %v11972_v38  ;;  %11097 = vmatprep.mubr.bf16.mxu1 %v9769_v26  ;;  %v3464_v61 = vsel %vm12915_vm10, %v3455_v46, %v3463_v40  ;;  %v13332_v38 = vld [vmem:[#allocation2 + $0x34] sm:$0x3]  ;;  %v9720_v33 = vcombine.low %v3044_v52, %v3058_v43  ;;  %v3446_v58 = vsel %vm12915_vm10, %v3437_v21, %v3445_v41  ;;  %v11980_v26 = vld [vmem:[%s15563_s3 + $0x248] sm:$0xff]   ;;  %v3496_v42 = vshll.u32 %v13306_v13, 16  ;;  %v11982_v21 = vld [vmem:[%s15563_s3 + $0x240] sm:$0xff]  }
 0x1ac   : > { %11026 = vmatmul.mubr.bf16.vlgmr.msra.gmra.mxu0 %v9718_v55  ;;  %11087 = vmatprep.subr.bf16.mxu1 %v11974_v59  ;;  %v9749_v18 = vcombine.low %v3446_v58, %v3464_v61  ;;  %v3772_v25 = vrot.slane %v13332_v38, 6  ;;  %v4125_v55 = vshll.u32 %v4105_v22, 16  ;;  %v4124_v43 = vrot.slane %v4122_v5, 4  ;;  %v11983_v52 = vld [vmem:[%s15563_s3 + $0x210] sm:$0xff]  }
 0x1ad   : > { %11029 = vmatprep.mubr.bf16.mxu0 %v9719_v16  ;;  %11058 = vmatpush3.bf16.msra.mxu0 %v11973_v53  ;;  %v13346_v53 = vsel %vm13068_vm14, %v9764_v9, %v3764_v20  ;;  %v4136_v47 = vshrl.u32 %v4107_v12, 16  ;;  %v4139_v40 = vshll.u32 %v4107_v12, 16  ;;  %v3523_v9 = vshll.u32 %v13184_v4, 16 }
 0x1ae   : > { %11059 = vmatprep.subr.bf16.mxu0 %v11975_v14  ;;  %v13380_v16 = vsel %vm13068_vm14, %v9766_v11, %v3772_v25  ;;  %v4127_v13 = vrot.slane %v4125_v55, 5  ;;  %v3498_v41 = vrot.slane %v3496_v42, 6  ;;  %v9770_v61 = vcombine.low %v13342_v29, %v13346_v53  ;;  %v13414_v53 = vld [vmem:[#allocation2 + $0x1c] sm:$0x1] }
 0x1af   : > { %11088 = vmatpush3.bf16.msra.mxu1 %v11974_v59  ;;  %v3466_v59 = vshrl.u32 %v13162_v35, 16  ;;  %v3478_v35 = vshll.u32 %v13304_v54, 16  ;;  %v3780_v54 = vrot.slane %v13358_v36, 6  ;;  %v9771_v56 = vcombine.low %v13368_v15, %v13380_v16 }
 0x1b0   : > { %11089 = vmatprep.subr.bf16.mxu1 %v11976_v1  ;;  %v3502_v4 = vshrl.u32 %v13175_v10, 16  ;;  %v3505_v58 = vshll.u32 %v13175_v10, 16  ;;  %v13408_v39 = vsel %vm13068_vm14, %v9767_v19, %v3776_v44  ;;  %v4128_v29 = vor.u32 %v4127_v13, %v4124_v43  ;;  %v11986_v44 = vld [vmem:[%s15563_s3 + $0x2f0] sm:$0xff]   ;;  %v11988_v43 = vld [vmem:[%s15563_s3 + $0x2e8] sm:$0xff]  }
 0x1b1   : > { %11060 = vmatpush3.bf16.msra.mxu0 %v11975_v14  ;;  %v3489_v14 = vrot.slane %v3487_v0, 6  ;;  %v3468_v46 = vrot.slane %v3466_v59, 5  ;;  %v13390_v20 = vrot.slane %v3478_v35, 6  ;;  %v13412_v62 = vsel %vm13068_vm14, %v9768_v60, %v3780_v54  ;;  %v11985_v59 = vld [vmem:[%s15563_s3 + $0x208] sm:$0xff]  }
 0x1b2   : > { %11061 = vmatprep.subr.bf16.mxu0 %v11977_v17  ;;  %v4138_v50 = vrot.slane %v4136_v47, 4  ;;  %v4141_v10 = vrot.slane %v4139_v40, 5  ;;  %v3522_v37 = vrot.slane %v3520_v48, 5  ;;  %v3525_v0 = vrot.slane %v3523_v9, 6 }
 0x1b3   : > { %11090 = vmatpush3.bf16.msra.mxu1 %v11976_v1  ;;  %v3471_v1 = vrot.slane %v3469_v31, 6  ;;  %v3490_v49 = vor.u32 %v3489_v14, %v3486_v30  ;;  %v3504_v6 = vrot.slane %v3502_v4, 5  ;;  %v3507_v31 = vrot.slane %v3505_v58, 6 }
 0x1b4   : > { %11030 = vmatmul.mubr.bf16.gmra.mxu0 %v9720_v33  ;;  %11091 = vmatprep.subr.bf16.mxu1 %v11978_v27  ;;  %v13399_v33 = vld [vmem:[#allocation2 + $0x14] sm:$0x1]  ;;  %v3529_v2 = vshrl.u32 %v13332_v38, 16  ;;  %v3532_v5 = vshll.u32 %v13332_v38, 16  ;;  %v4129_v55 = vrot.slane %v4128_v29, 4  ;;  %v3556_v15 = vshrl.u32 %v13192_v57, 16 }
 0x1b5   : > { %11062 = vmatpush3.bf16.msra.mxu0 %v11977_v17  ;;  %11073 = vmatprep.mubr.bf16.mxu0 %v9749_v18  ;;  %v3495_v17 = vrot.slane %v3493_v45, 5  ;;  %v3472_v22 = vor.u32 %v3471_v1, %v3468_v46  ;;  %v3481_v18 = vor.u32 %v13390_v20, %v13383_v24  ;;  %v4131_v25 = vshll.u32 %v13399_v33, 16 }
 0x1b6   : > { %11063 = vmatprep.subr.bf16.mxu0 %v11979_v34  ;;  %v3559_v19 = vshll.u32 %v13192_v57, 16  ;;  %v4142_v35 = vor.u32 %v4141_v10, %v4138_v50  ;;  %v3511_v30 = vshrl.u32 %v13321_v8, 16  ;;  %v3514_v14 = vshll.u32 %v13321_v8, 16  ;;  %v11987_v57 = vld [vmem:[%s15563_s3 + $0x200] sm:$0xff]  }
 0x1b7   : > { %11092 = vmatpush3.bf16.msra.mxu1 %v11978_v27  ;;  %v11984_v27 = vld [vmem:[%s15563_s3 + $0x2f8] sm:$0xff]   ;;  %v3499_v11 = vor.u32 %v3498_v41, %v3495_v17  ;;  %v3526_v45 = vor.u32 %v3525_v0, %v3522_v37  ;;  %v3473_v38 = vrot.slane %v3472_v22, 4  ;;  %v4133_v42 = vrot.slane %v4131_v25, 5 }
 0x1b8   : > { %11093 = vmatprep.subr.bf16.mxu1 %v11980_v26  ;;  %v3538_v12 = vshrl.u32 %v13203_v28, 16  ;;  %v3508_v60 = vor.u32 %v3507_v31, %v3504_v6  ;;  %v3531_v54 = vrot.slane %v3529_v2, 5  ;;  %v3534_v8 = vrot.slane %v3532_v5, 6  ;;  %v11989_v17 = vld [vmem:[%s15563_s3 + $0x2b8] sm:$0xff]  }
 0x1b9   : > { %11064 = vmatpush3.bf16.msra.mxu0 %v11979_v34  ;;  %v3491_v34 = vrot.slane %v3490_v49, 4  ;;  %v4134_v46 = vsel %vm12769_vm5, %v4129_v55, %v4133_v42  ;;  %v3558_v24 = vrot.slane %v3556_v15, 5  ;;  %v4143_v13 = vrot.slane %v4142_v35, 4  ;;  %v4113_v55 = vld [vmem:[#allocation2 + $0x30] sm:$0xf] }
 0x1ba   : > { %11065 = vmatprep.subr.bf16.mxu0 %v11981_v23  ;;  %v3516_v47 = vrot.slane %v3514_v14, 6  ;;  %v3527_v40 = vrot.slane %v3526_v45, 4  ;;  %v3540_v48 = vrot.slane %v3538_v12, 5  ;;  %v3565_v20 = vshrl.u32 %v13358_v36, 16  ;;  %v4115_v15 = vld [vmem:[#allocation2 + $0x38] sm:$0xf] }
 0x1bb   : > { %11094 = vmatpush3.bf16.msra.mxu1 %v11980_v26  ;;  %v4145_v26 = vshll.u32 %v13414_v53, 16  ;;  %v3500_v16 = vsel %vm12915_vm10, %v3491_v34, %v3499_v11  ;;  %v3568_v49 = vshll.u32 %v13358_v36, 16  ;;  %v3509_v41 = vrot.slane %v3508_v60, 4  ;;  %v4109_v36 = vld [vmem:[#allocation2 + $0x20] sm:$0xf]  ;;  %v11991_v34 = vld [vmem:[%s15563_s3 + $0x2b0] sm:$0xff]  }
 0x1bc   : > { %11095 = vmatprep.subr.bf16.mxu1 %v11982_v21  ;;  %v9772_v4 = vcombine.low %v13408_v39, %v13412_v62  ;;  %v3482_v58 = vsel %vm12915_vm10, %v3473_v38, %v3481_v18  ;;  %v3567_v37 = vrot.slane %v3565_v20, 5  ;;  %v4150_v6 = vshrl.u32 %v4109_v36, 16  ;;  %v11993_v45 = vld [vmem:[%s15563_s3 + $0x2a8] sm:$0xff]   ;;  %v4117_v20 = vld [vmem:[#allocation2 + $0x40] sm:$0xf] }
 0x1bd   : > { %11066 = vmatpush3.bf16.msra.mxu0 %v11981_v23  ;;  %v3541_v23 = vshll.u32 %v13203_v28, 16  ;;  %v4147_v1 = vrot.slane %v4145_v26, 5  ;;  %v3561_v28 = vrot.slane %v3559_v19, 6  ;;  %v9750_v22 = vcombine.low %v3482_v58, %v3500_v16  ;;  %v11992_v26 = vld [vmem:[%s15563_s3 + $0x2d8] sm:$0xff]   ;;  %v4119_v58 = vld [vmem:[#allocation2 + $0x48] sm:$0xf] }
 0x1be   : > { %11067 = vmatprep.subr.bf16.mxu0 %v11983_v52  ;;  %v3570_v0 = vrot.slane %v3568_v49, 6  ;;  %v4153_v5 = vshll.u32 %v4109_v36, 16  ;;  %v4152_v38 = vrot.slane %v4150_v6, 4  ;;  %v4178_v42 = vshrl.u32 %v4113_v55, 16 }
 0x1bf   : > { %11096 = vmatpush3.bf16.msra.mxu1 %v11982_v21  ;;  %v3513_v21 = vrot.slane %v3511_v30, 5  ;;  %v3543_v9 = vrot.slane %v3541_v23, 6  ;;  %v4148_v29 = vsel %vm12769_vm5, %v4143_v13, %v4147_v1  ;;  %v4181_v12 = vshll.u32 %v4113_v55, 16 }
 0x1c0   : > { %11129 = vmatprep.subr.bf16.mxu1 %v11984_v27  ;;  %v9793_v39 = vcombine.low %v4134_v46, %v4148_v29  ;;  %v4192_v16 = vshrl.u32 %v4115_v15, 16  ;;  %v4195_v60 = vshll.u32 %v4115_v15, 16  ;;  %v13481_v46 = vld [vmem:[#allocation2 + $0x24] sm:$0x1]  ;;  %v4206_v36 = vshrl.u32 %v4117_v20, 16 }
 0x1c1   : > { %11068 = vmatpush3.bf16.msra.mxu0 %v11983_v52  ;;  %v3535_v52 = vor.u32 %v3534_v8, %v3531_v54  ;;  %v3517_v50 = vor.u32 %v3516_v47, %v3513_v21  ;;  %v3544_v62 = vor.u32 %v3543_v9, %v3540_v48  ;;  %v11995_v54 = vld [vmem:[%s15563_s3 + $0x2d0] sm:$0xff]   ;;  %v11996_v8 = vld [vmem:[%s15563_s3 + $0x2a0] sm:$0xff]   ;;  %v4180_v48 = vrot.slane %v4178_v42, 4  ;;  %v13498_v29 = vld [vmem:[#allocation2 + $0x18] sm:$0xe] }
 0x1c2   : > { %11098 = vmatmul.mubr.bf16.vlgmr.msra.gmra.mxu1 %v9770_v61  ;;  %11069 = vmatprep.subr.bf16.mxu0 %v11985_v59  ;;  %v3547_v61 = vshrl.u32 %v13348_v7, 16  ;;  %v13487_v21 = vld [vmem:[#allocation2 + $0x34] sm:$0x1]  ;;  %v4183_v9 = vrot.slane %v4181_v12, 5  ;;  %v4622_v6 = vshrl.u32 %v13498_v29, 16  ;;  %v4208_v55 = vrot.slane %v4206_v36, 4 }
 0x1c3   : > { %11101 = vmatprep.mubr.bf16.mxu1 %v9771_v56  ;;  %11130 = vmatpush3.bf16.msra.mxu1 %v11984_v27  ;;  %v3550_v56 = vshll.u32 %v13348_v7, 16  ;;  %v3562_v27 = vor.u32 %v3561_v28, %v3558_v24  ;;  %v3536_v10 = vsel %vm12915_vm10, %v3527_v40, %v3535_v52  ;;  %v11990_v7 = vld [vmem:[%s15563_s3 + $0x2e0] sm:$0xff]   ;;  %v3518_v18 = vsel %vm12915_vm10, %v3509_v41, %v3517_v50  ;;  %v11994_v24 = vld [vmem:[#allocation2 + $0x10] ss:$8 sps:$4 sm:$0xff]   ;;  %v13485_v28 = vld [vmem:[#allocation2 + $0x2c] sm:$0x1] }
 0x1c4   : > { %11131 = vmatprep.subr.bf16.mxu1 %v11986_v44  ;;  %v3549_v11 = vrot.slane %v3547_v61, 5  ;;  %v9751_v31 = vcombine.low %v3518_v18, %v3536_v10  ;;  %v3545_v19 = vrot.slane %v3544_v62, 4  ;;  %v11997_v40 = vld [vmem:[%s15563_s3 + $0x2c8] sm:$0xff]   ;;  %v4197_v41 = vrot.slane %v4195_v60, 5  ;;  %v13492_v52 = vld [vmem:[#allocation2 + $0x10] sm:$0xe] }
 0x1c5   : > { %11070 = vmatpush3.bf16.msra.mxu0 %v11985_v59  ;;  %v3552_v25 = vrot.slane %v3550_v56, 6  ;;  %v4111_v59 = vld [vmem:[#allocation2 + $0x28] sm:$0xf]  ;;  %v3563_v2 = vrot.slane %v3562_v27, 4  ;;  %v4159_v61 = vshll.u32 %v13481_v46, 16  ;;  %v4173_v56 = vshll.u32 %v13485_v28, 16 }
 0x1c6   : > { %11071 = vmatprep.subr.bf16.mxu0 %v11987_v57  ;;  %v4164_v35 = vshrl.u32 %v4111_v59, 16  ;;  %v4167_v30 = vshll.u32 %v4111_v59, 16  ;;  %v11998_v50 = vld [vmem:[%s15563_s3 + $0x298] sm:$0xff]   ;;  %v4184_v10 = vor.u32 %v4183_v9, %v4180_v48  ;;  %v4607_v62 = vshll.u32 %v13492_v52, 16  ;;  %v13512_v15 = vld [vmem:[#allocation2 + $0x14] sm:$0x3] }
 0x1c7   : > { %11132 = vmatpush3.bf16.msra.mxu1 %v11986_v44  ;;  %v3571_v44 = vor.u32 %v3570_v0, %v3567_v37  ;;  %v3553_v14 = vor.u32 %v3552_v25, %v3549_v11  ;;  %v4220_v18 = vshrl.u32 %v4119_v58, 16  ;;  %v11999_v11 = vld [vmem:[%s15563_s3 + $0x2c0] sm:$0xff]   ;;  %v4161_v25 = vrot.slane %v4159_v61, 5  ;;  %v13535_v48 = vld [vmem:[#allocation2 + $0x4c] sm:$0x1] }
 0x1c8   : > { %11133 = vmatprep.subr.bf16.mxu1 %v11988_v43  ;;  %v4169_v13 = vrot.slane %v4167_v30, 5  ;;  %v4175_v59 = vrot.slane %v4173_v56, 5  ;;  %v4613_v60 = vshrl.u32 %v13512_v15, 16 }
 0x1c9   : > { %11072 = vmatpush3.bf16.msra.mxu0 %v11987_v57  ;;  %v3572_v23 = vsel %vm12915_vm10, %v3563_v2, %v3571_v44  ;;  %v4155_v57 = vrot.slane %v4153_v5, 5  ;;  %v3554_v1 = vsel %vm12915_vm10, %v3545_v19, %v3553_v14  ;;  %v12000_v19 = vld [vmem:[%s15563_s3 + $0x290] sm:$0xff]   ;;  %v4185_v44 = vrot.slane %v4184_v10, 4 }
 0x1ca   : > { %11102 = vmatmul.mubr.bf16.gmra.mxu1 %v9772_v4  ;;  %11105 = vmatprep.subr.bf16.mxu0 %v11989_v17  ;;  %v9752_v47 = vcombine.low %v3554_v1, %v3572_v23  ;;  %v13496_v4 = vld [vmem:[#allocation2 + $0x3c] sm:$0x1]  ;;  %v4609_v14 = vrot.slane %v4607_v62, 6  ;;  %v4222_v12 = vrot.slane %v4220_v18, 4 }
 0x1cb   : > { %11134 = vmatpush3.bf16.msra.mxu1 %v11988_v43  ;;  %11145 = vmatprep.mubr.bf16.mxu1 %v9793_v39  ;;  %v4166_v43 = vrot.slane %v4164_v35, 4  ;;  %v4156_v49 = vor.u32 %v4155_v57, %v4152_v38  ;;  %v4604_v39 = vshrl.u32 %v13492_v52, 16  ;;  %v4201_v5 = vshll.u32 %v13496_v4, 16  ;;  %v12001_v38 = vld [vmem:[%s15563_s3 + $0x378] sm:$0xff]  }
 0x1cc   : > { %11074 = vmatmul.mubr.bf16.vlgmr.msra.gmra.mxu0 %v9750_v22  ;;  %11135 = vmatprep.subr.bf16.mxu1 %v11990_v7  ;;  %v4209_v22 = vshll.u32 %v4117_v20, 16  ;;  %v13522_v57 = vld [vmem:[#allocation2 + $0x1c] sm:$0x3] }
 0x1cd   : > { %11077 = vmatprep.mubr.bf16.mxu0 %v9751_v31  ;;  %11106 = vmatpush3.bf16.msra.mxu0 %v11989_v17  ;;  %v4194_v17 = vrot.slane %v4192_v16, 4  ;;  %v4170_v27 = vor.u32 %v4169_v13, %v4166_v43  ;;  %v4157_v37 = vrot.slane %v4156_v49, 4  ;;  %v4625_v31 = vshll.u32 %v13498_v29, 16  ;;  %v13524_v16 = vld [vmem:[#allocation2 + $0x44] sm:$0x1] }
 0x1ce   : > { %11107 = vmatprep.subr.bf16.mxu0 %v11991_v34  ;;  %v4606_v30 = vrot.slane %v4604_v39, 5  ;;  %v4203_v43 = vrot.slane %v4201_v5, 5  ;;  %v4631_v20 = vshrl.u32 %v13522_v57, 16  ;;  %v4634_v49 = vshll.u32 %v13522_v57, 16  ;;  %v12004_v39 = vld [vmem:[%s15563_s3 + $0x280] sm:$0xff]  }
 0x1cf   : > { %11136 = vmatpush3.bf16.msra.mxu1 %v11990_v7  ;;  %v4187_v7 = vshll.u32 %v13487_v21, 16  ;;  %v4198_v0 = vor.u32 %v4197_v41, %v4194_v17  ;;  %v4171_v2 = vrot.slane %v4170_v27, 4  ;;  %v4627_v1 = vrot.slane %v4625_v31, 6 }
 0x1d0   : > { %11137 = vmatprep.subr.bf16.mxu1 %v11992_v26  ;;  %v4610_v9 = vor.u32 %v4609_v14, %v4606_v30  ;;  %v4215_v41 = vshll.u32 %v13524_v16, 16  ;;  %v4615_v27 = vrot.slane %v4613_v60, 5  ;;  %v12009_v30 = vld [vmem:[%s15563_s3 + $0x360] sm:$0xff]  }
 0x1d1   : > { %11108 = vmatpush3.bf16.msra.mxu0 %v11991_v34  ;;  %v4223_v34 = vshll.u32 %v4119_v58, 16  ;;  %v4189_v35 = vrot.slane %v4187_v7, 5  ;;  %v4199_v42 = vrot.slane %v4198_v0, 4  ;;  %v12003_v58 = vld [vmem:[%s15563_s3 + $0x370] sm:$0xff]   ;;  %v4229_v7 = vshll.u32 %v13535_v48, 16 }
 0x1d2   : > { %11109 = vmatprep.subr.bf16.mxu0 %v11993_v45  ;;  %v4611_v62 = vrot.slane %v4610_v9, 4  ;;  %v4636_v0 = vrot.slane %v4634_v49, 6  ;;  %v4217_v18 = vrot.slane %v4215_v41, 5  ;;  %v13566_v14 = vld [vmem:[#allocation2 + $0x20] sm:$0xe]  ;;  %v4416_v49 = vrot.slane %v13414_v53, 5 }
 0x1d3   : > { %11138 = vmatpush3.bf16.msra.mxu1 %v11992_v26  ;;  %v4211_v26 = vrot.slane %v4209_v22, 5  ;;  %v4225_v23 = vrot.slane %v4223_v34, 5  ;;  %v4204_v56 = vsel %vm12769_vm5, %v4199_v42, %v4203_v43  ;;  %v4231_v31 = vrot.slane %v4229_v7, 5  ;;  %v12010_v42 = vld [vmem:[%s15563_s3 + $0x330] sm:$0xff]   ;;  %v13589_v9 = vld [vmem:[#allocation2 + $0x38] sm:$0xe] }
 0x1d4   : > { %11078 = vmatmul.mubr.bf16.gmra.mxu0 %v9752_v47  ;;  %11139 = vmatprep.subr.bf16.mxu1 %v11995_v54  ;;  %v12002_v47 = vld [vmem:[%s15563_s3 + $0x288] sm:$0xff]   ;;  %v4640_v60 = vshrl.u32 %v13566_v14, 16  ;;  %v4412_v43 = vrot.slane %v13399_v33, 5 }
 0x1d5   : > { %11110 = vmatpush3.bf16.msra.mxu0 %v11993_v45  ;;  %11121 = vmatprep.mubr.bf16.mxu0 %v11994_v24  ;;  %v4162_v45 = vsel %vm12769_vm5, %v4157_v37, %v4161_v25  ;;  %v4176_v24 = vsel %vm12769_vm5, %v4171_v2, %v4175_v59  ;;  %v4212_v13 = vor.u32 %v4211_v26, %v4208_v55  ;;  %v4633_v37 = vrot.slane %v4631_v20, 5  ;;  %v12007_v2 = vld [vmem:[%s15563_s3 + $0x338] sm:$0xff]  }
 0x1d6   : > { %11111 = vmatprep.subr.bf16.mxu0 %v11996_v8  ;;  %v9794_v17 = vcombine.low %v4162_v45, %v4176_v24  ;;  %v4226_v61 = vor.u32 %v4225_v23, %v4222_v12  ;;  %v12011_v12 = vld [vmem:[%s15563_s3 + $0x358] sm:$0xff]   ;;  %v13574_v23 = vld [vmem:[#allocation2 + $0x28] sm:$0xe]  ;;  %v9805_v24 = vrot.slane %v13492_v52, 9  ;;  %v9806_v20 = vrot.slane %v13498_v29, 9  ;;  %v12014_v52 = vld [vmem:[%s15563_s3 + $0x350] sm:$0xff]  }
 0x1d7   : > { %11140 = vmatpush3.bf16.msra.mxu1 %v11995_v54  ;;  %v4616_v54 = vshll.u32 %v13512_v15, 16  ;;  %v4213_v10 = vrot.slane %v4212_v13, 4  ;;  %v4637_v55 = vor.u32 %v4636_v0, %v4633_v37  ;;  %v13585_v13 = vld [vmem:[#allocation2 + $0x24] sm:$0x3]  ;;  %v4642_v41 = vrot.slane %v4640_v60, 5 }
 0x1d8   : > { %11141 = vmatprep.subr.bf16.mxu1 %v11997_v40  ;;  %v4227_v34 = vrot.slane %v4226_v61, 4  ;;  %v4413_v53 = vsel %vm12930_vm11, %v9805_v24, %v4412_v43  ;;  %v12015_v29 = vld [vmem:[%s15563_s3 + $0x320] sm:$0xff]   ;;  %v4417_v0 = vsel %vm12930_vm11, %v9806_v20, %v4416_v49  ;;  %v12019_v20 = vld [vmem:[%s15563_s3 + $0x310] sm:$0xff]  }
 0x1d9   : > { %11112 = vmatpush3.bf16.msra.mxu0 %v11996_v8  ;;  %v4624_v8 = vrot.slane %v4622_v6, 5  ;;  %v4618_v36 = vrot.slane %v4616_v54, 6  ;;  %v4218_v6 = vsel %vm12769_vm5, %v4213_v10, %v4217_v18  ;;  %v4643_v54 = vshll.u32 %v13566_v14, 16  ;;  %v13613_v37 = vld [vmem:[#allocation2 + $0x40] sm:$0xe]  ;;  %v12016_v18 = vld [vmem:[%s15563_s3 + $0x348] sm:$0xff]  }
 0x1da   : > { %11113 = vmatprep.subr.bf16.mxu0 %v11998_v50  ;;  %v4232_v26 = vsel %vm12769_vm5, %v4227_v34, %v4231_v31  ;;  %v4697_v10 = vshll.u32 %v13589_v9, 16  ;;  %v12018_v24 = vld [vmem:[%s15563_s3 + $0x340] sm:$0xff]  }
 0x1db   : > { %11142 = vmatpush3.bf16.msra.mxu1 %v11997_v40  ;;  %v4190_v40 = vsel %vm12769_vm5, %v4185_v44, %v4189_v35  ;;  %v4628_v22 = vor.u32 %v4627_v1, %v4624_v8  ;;  %v4619_v25 = vor.u32 %v4618_v36, %v4615_v27  ;;  %v12006_v44 = vld [vmem:[#allocation2 + $0x20] ss:$8 sps:$4 sm:$0xff]   ;;  %v13578_v8 = vld [vmem:[#allocation2 + $0x30] sm:$0xe]  ;;  %v4645_v61 = vrot.slane %v4643_v54, 6 }
 0x1dc   : > { %11143 = vmatprep.subr.bf16.mxu1 %v11999_v11  ;;  %v12013_v1 = vld [vmem:[%s15563_s3 + $0x328] sm:$0xff]   ;;  %v4676_v33 = vshrl.u32 %v13578_v8, 16 }
 0x1dd   : > { %11114 = vmatpush3.bf16.msra.mxu0 %v11998_v50  ;;  %v9795_v50 = vcombine.low %v4190_v40, %v4204_v56  ;;  %v4629_v59 = vrot.slane %v4628_v22, 4  ;;  %v4620_v5 = vsel %vm12915_vm10, %v4611_v62, %v4619_v25  ;;  %v4661_v40 = vshll.u32 %v13574_v23, 16  ;;  %v12012_v27 = vld [vmem:[#allocation2 + $0x40] ss:$8 sps:$4 sm:$0xff]   ;;  %v13605_v36 = vld [vmem:[#allocation2 + $0x2c] sm:$0x3] }
 0x1de   : > { %11115 = vmatprep.subr.bf16.mxu0 %v12000_v19  ;;  %v4649_v56 = vshrl.u32 %v13585_v13, 16  ;;  %v13607_v22 = vld [vmem:[#allocation2 + $0x34] sm:$0x3]  ;;  %v13611_v62 = vld [vmem:[#allocation2 + $0x3c] sm:$0x3]  ;;  %v4678_v34 = vrot.slane %v4676_v33, 5  ;;  %v9813_v25 = vcombine.low %v4413_v53, %v4417_v0 }
 0x1df   : > { %11144 = vmatpush3.bf16.msra.mxu1 %v11999_v11  ;;  %v12005_v11 = vld [vmem:[%s15563_s3 + $0x368] sm:$0xff]   ;;  %v4638_v35 = vsel %vm12915_vm10, %v4629_v59, %v4637_v55  ;;  %v4646_v59 = vor.u32 %v4645_v61, %v4642_v41  ;;  %v4688_v55 = vshll.u32 %v13607_v22, 16  ;;  %v4703_v60 = vshrl.u32 %v13611_v62, 16 }
 0x1e0   : > { %11177 = vmatprep.subr.bf16.mxu1 %v12001_v38  ;;  %v9825_v45 = vcombine.low %v4620_v5, %v4638_v35  ;;  %v4685_v5 = vshrl.u32 %v13607_v22, 16  ;;  %v4670_v35 = vshll.u32 %v13605_v36, 16  ;;  %v4706_v54 = vshll.u32 %v13611_v62, 16  ;;  %v13643_v61 = vld [vmem:[#allocation2 + $0x4c] sm:$0x3] }
 0x1e1   : > { %11116 = vmatpush3.bf16.msra.mxu0 %v12000_v19  ;;  %v9796_v19 = vcombine.low %v4218_v6, %v4232_v26  ;;  %v4651_v6 = vrot.slane %v4649_v56, 5  ;;  %v4647_v43 = vrot.slane %v4646_v59, 4 }
 0x1e2   : > { %11146 = vmatmul.mubr.bf16.vlgmr.msra.gmra.mxu1 %v9794_v17  ;;  %11117 = vmatprep.subr.bf16.mxu0 %v12002_v47  ;;  %v4679_v17 = vshll.u32 %v13578_v8, 16  ;;  %v4687_v33 = vrot.slane %v4685_v5, 5  ;;  %v4672_v56 = vrot.slane %v4670_v35, 6 }
 0x1e3   : > { %11149 = vmatprep.mubr.bf16.mxu1 %v9795_v50  ;;  %11178 = vmatpush3.bf16.msra.mxu1 %v12001_v38  ;;  %v12008_v38 = vld [vmem:[#allocation2 + $0x30] ss:$8 sps:$4 sm:$0xff]   ;;  %v4694_v50 = vshrl.u32 %v13589_v9, 16 }
 0x1e4   : > { %11179 = vmatprep.subr.bf16.mxu1 %v12003_v58 }
 0x1e5   : > { %11118 = vmatpush3.bf16.msra.mxu0 %v12002_v47  ;;  %v4658_v47 = vshrl.u32 %v13574_v23, 16  ;;  %v4696_v26 = vrot.slane %v4694_v50, 5 }
 0x1e6   : > { %11119 = vmatprep.subr.bf16.mxu0 %v12004_v39 }
 0x1e7   : > { %11180 = vmatpush3.bf16.msra.mxu1 %v12003_v58  ;;  %v4652_v58 = vshll.u32 %v13585_v13, 16  ;;  %v4660_v7 = vrot.slane %v4658_v47, 5 }
 0x1e8   : > { %11181 = vmatprep.subr.bf16.mxu1 %v12005_v11 }
 0x1e9   : > { %11120 = vmatpush3.bf16.msra.mxu0 %v12004_v39  ;;  %v4663_v39 = vrot.slane %v4661_v40, 6  ;;  %v4654_v31 = vrot.slane %v4652_v58, 6 }
 0x1ea   : > { %11150 = vmatmul.mubr.bf16.gmra.mxu1 %v9796_v19  ;;  %11153 = vmatprep.subr.bf16.mxu0 %v12007_v2  ;;  %v4699_v19 = vrot.slane %v4697_v10, 6  ;;  %v4705_v10 = vrot.slane %v4703_v60, 5  ;;  %v12022_v60 = vld [vmem:[%s15563_s3 + $0x3f0] sm:$0xff]  }
 0x1eb   : > { %11182 = vmatpush3.bf16.msra.mxu1 %v12005_v11  ;;  %11193 = vmatprep.mubr.bf16.mxu1 %v9825_v45  ;;  %v4681_v11 = vrot.slane %v4679_v17, 6  ;;  %v4715_v45 = vshll.u32 %v13613_v37, 16  ;;  %v4655_v49 = vor.u32 %v4654_v31, %v4651_v6  ;;  %v4690_v17 = vrot.slane %v4688_v55, 6 }
 0x1ec   : > { %11122 = vmatmul.mubr.bf16.vlgmr.msra.gmra.mxu0 %v12006_v44  ;;  %11183 = vmatprep.subr.bf16.mxu1 %v12009_v30  ;;  %v4667_v44 = vshrl.u32 %v13605_v36, 16  ;;  %v4700_v41 = vor.u32 %v4699_v19, %v4696_v26  ;;  %v4742_v55 = vshll.u32 %v13643_v61, 16  ;;  %v12021_v26 = vld [vmem:[%s15563_s3 + $0x308] sm:$0xff]  }
 0x1ed   : > { %11125 = vmatprep.mubr.bf16.mxu0 %v12008_v38  ;;  %11154 = vmatpush3.bf16.msra.mxu0 %v12007_v2  ;;  %v13620_v2 = vld [vmem:[#allocation2 + $0x48] sm:$0xe]  ;;  %v12017_v38 = vld [vmem:[%s15563_s3 + $0x318] sm:$0xff]   ;;  %v4691_v59 = vor.u32 %v4690_v17, %v4687_v33 }
 0x1ee   : > { %11155 = vmatprep.subr.bf16.mxu0 %v12010_v42  ;;  %v4730_v47 = vshrl.u32 %v13620_v2, 16  ;;  %v4733_v40 = vshll.u32 %v13620_v2, 16  ;;  %v4701_v6 = vrot.slane %v4700_v41, 4 }
 0x1ef   : > { %11184 = vmatpush3.bf16.msra.mxu1 %v12009_v30  ;;  %v4712_v30 = vshrl.u32 %v13613_v37, 16 }
 0x1f0   : > { %11185 = vmatprep.subr.bf16.mxu1 %v12011_v12 }
 0x1f1   : > { %11156 = vmatpush3.bf16.msra.mxu0 %v12010_v42  ;;  %v4664_v42 = vor.u32 %v4663_v39, %v4660_v7  ;;  %v4714_v58 = vrot.slane %v4712_v30, 5  ;;  %v4708_v7 = vrot.slane %v4706_v54, 6 }
 0x1f2   : > { %11157 = vmatprep.subr.bf16.mxu0 %v12013_v1 }
 0x1f3   : > { %11186 = vmatpush3.bf16.msra.mxu1 %v12011_v12  ;;  %v4682_v12 = vor.u32 %v4681_v11, %v4678_v34  ;;  %v4665_v53 = vrot.slane %v4664_v42, 4  ;;  %v4732_v34 = vrot.slane %v4730_v47, 5  ;;  %v4735_v11 = vrot.slane %v4733_v40, 6  ;;  %v12023_v40 = vld [vmem:[%s15563_s3 + $0x300] sm:$0xff]  }
 0x1f4   : > { %11126 = vmatmul.mubr.bf16.gmra.mxu0 %v12012_v27  ;;  %11187 = vmatprep.subr.bf16.mxu1 %v12014_v52  ;;  %v4717_v27 = vrot.slane %v4715_v45, 6 }
 0x1f5   : > { %11158 = vmatpush3.bf16.msra.mxu0 %v12013_v1  ;;  %11169 = vmatprep.mubr.bf16.mxu0 %v9813_v25  ;;  %v13633_v1 = vld [vmem:[#allocation2 + $0x44] sm:$0x3]  ;;  %v4683_v50 = vrot.slane %v4682_v12, 4  ;;  %v12020_v25 = vld [vmem:[%s15563_s3 + $0x3f8] sm:$0xff]  }
 0x1f6   : > { %11159 = vmatprep.subr.bf16.mxu0 %v12015_v29  ;;  %v4721_v39 = vshrl.u32 %v13633_v1, 16  ;;  %v4724_v0 = vshll.u32 %v13633_v1, 16  ;;  %v4718_v5 = vor.u32 %v4717_v27, %v4714_v58  ;;  %v10907_v33 = vpop.f32.mrf.mxu1  ;;  %v4428_v58 = vrot.slane %v13487_v21, 5 }
 0x1f7   : > { %11188 = vmatpush3.bf16.msra.mxu1 %v12014_v52  ;;  %v4669_v52 = vrot.slane %v4667_v44, 5  ;;  %v4692_v19 = vsel %vm12915_vm10, %v4683_v50, %v4691_v59  ;;  %v4709_v44 = vor.u32 %v4708_v7, %v4705_v10  ;;  %v4424_v50 = vrot.slane %v13485_v28, 5 }
 0x1f8   : > { %11189 = vmatprep.subr.bf16.mxu1 %v12016_v18  ;;  %v4723_v30 = vrot.slane %v4721_v39, 5  ;;  %v4726_v45 = vrot.slane %v4724_v0, 6  ;;  %v9810_v10 = vrot.slane %v13589_v9, 9  ;;  %v1998_v7 = vpop.f32.mrf.mxu1 }
 0x1f9   : > { %11160 = vmatpush3.bf16.msra.mxu0 %v12015_v29  ;;  %v4656_v29 = vsel %vm12915_vm10, %v4647_v43, %v4655_v49  ;;  %v4673_v31 = vor.u32 %v4672_v56, %v4669_v52  ;;  %v4710_v12 = vsel %vm12915_vm10, %v4701_v6, %v4709_v44  ;;  %v4719_v43 = vrot.slane %v4718_v5, 4  ;;  %v12028_v5 = vld [vmem:[%s15563_s3 + $0x3b0] sm:$0xff]   ;;  %v12029_v44 = vld [vmem:[%s15563_s3 + $0x3d8] sm:$0xff]  }
 0x1fa   : > { %11161 = vmatprep.subr.bf16.mxu0 %v12017_v38  ;;  %v9827_v54 = vcombine.low %v4692_v19, %v4710_v12  ;;  %v9807_v49 = vrot.slane %v13566_v14, 9  ;;  %v4727_v17 = vor.u32 %v4726_v45, %v4723_v30  ;;  %v4420_v52 = vrot.slane %v13481_v46, 5  ;;  %v12025_v46 = vld [vmem:[%s15563_s3 + $0x3b8] sm:$0xff]  }
 0x1fb   : > { %11190 = vmatpush3.bf16.msra.mxu1 %v12016_v18  ;;  %v4739_v18 = vshrl.u32 %v13643_v61, 16  ;;  %v4674_v35 = vsel %vm12915_vm10, %v4665_v53, %v4673_v31  ;;  %v9809_v56 = vrot.slane %v13578_v8, 9  ;;  %v9808_v53 = vrot.slane %v13574_v23, 9  ;;  %v12026_v23 = vld [vmem:[#allocation2 + $0x18] ss:$8 sps:$4 sm:$0xff]  }
 0x1fc   : > { %11191 = vmatprep.subr.bf16.mxu1 %v12018_v24  ;;  %v9826_v42 = vcombine.low %v4656_v29, %v4674_v35  ;;  %v4728_v14 = vsel %vm12915_vm10, %v4719_v43, %v4727_v17  ;;  %v4432_v8 = vrot.slane %v13496_v4, 5  ;;  %v4421_v39 = vsel %vm12930_vm11, %v9807_v49, %v4420_v52  ;;  %v12027_v4 = vld [vmem:[%s15563_s3 + $0x3e0] sm:$0xff]   ;;  %v12033_v17 = vld [vmem:[%s15563_s3 + $0x3c8] sm:$0xff]   ;;  %v12034_v52 = vld [vmem:[%s15563_s3 + $0x398] sm:$0xff]  }
 0x1fd   : > { %11162 = vmatpush3.bf16.msra.mxu0 %v12017_v38  ;;  %v4736_v38 = vor.u32 %v4735_v11, %v4732_v34  ;;  %v4741_v47 = vrot.slane %v4739_v18, 5  ;;  %v4429_v11 = vsel %vm12930_vm11, %v9809_v56, %v4428_v58  ;;  %v4425_v9 = vsel %vm12930_vm11, %v9808_v53, %v4424_v50  ;;  %v4901_v18 = vld [vmem:[#allocation2 + $0x18] sm:$0xc]  ;;  %v12036_v50 = vld [vmem:[%s15563_s3 + $0x390] sm:$0xff]  }
 0x1fe   : > { %11163 = vmatprep.subr.bf16.mxu0 %v12019_v20  ;;  %v9814_v59 = vcombine.low %v4421_v39, %v4425_v9  ;;  %v4433_v6 = vsel %vm12930_vm11, %v9810_v10, %v4432_v8  ;;  %v9811_v35 = vrot.slane %v13613_v37, 9  ;;  %v4436_v30 = vrot.slane %v13524_v16, 5  ;;  %v4903_v10 = vld [vmem:[#allocation2 + $0x28] sm:$0xc]  ;;  %v13755_v39 = vld [vmem:[#allocation2 + $0x18] sm:$0xe] }
 0x1ff   : > { %11192 = vmatpush3.bf16.msra.mxu1 %v12018_v24  ;;  %v4744_v24 = vrot.slane %v4742_v55, 6  ;;  %v4737_v41 = vrot.slane %v4736_v38, 4  ;;  %v10908_v55 = vpop.f32.mrf.mxu1  ;;  %v12030_v38 = vld [vmem:[%s15563_s3 + $0x3a8] sm:$0xff]   ;;  %v4926_v12 = vrot.slane %v13512_v15, 6  ;;  %v9838_v37 = vrot.slane %v4901_v18, 10  ;;  %v12031_v15 = vld [vmem:[%s15563_s3 + $0x3d0] sm:$0xff]  }
 0x200   : > { %11225 = vmatprep.subr.bf16.mxu1 %v12020_v25  ;;  %v4930_v16 = vrot.slane %v13522_v57, 6  ;;  %v4437_v43 = vsel %vm12930_vm11, %v9811_v35, %v4436_v30  ;;  %v12039_v9 = vld [vmem:[%s15563_s3 + $0x388] sm:$0xff]   ;;  %v4938_v35 = vrot.slane %v13605_v36, 6  ;;  %v13774_v30 = vld [vmem:[#allocation2 + $0x38] sm:$0xc]  ;;  %v4942_v36 = vrot.slane %v13607_v22, 6 }
 0x201   : > { %11164 = vmatpush3.bf16.msra.mxu0 %v12019_v20  ;;  %v12024_v20 = vld [vmem:[%s15563_s3 + $0x3e8] sm:$0xff]   ;;  %v4745_v27 = vor.u32 %v4744_v24, %v4741_v47  ;;  %v13726_v24 = vpop.f32.mrf.mxu1 }
 0x202   : > { %11194 = vmatmul.mubr.bf16.vlgmr.msra.gmra.mxu1 %v9826_v42  ;;  %11165 = vmatprep.subr.bf16.mxu0 %v12021_v26  ;;  %v4931_v57 = vsel %vm13068_vm14, %v9838_v37, %v4930_v16 }
 0x203   : > { %11197 = vmatprep.mubr.bf16.mxu1 %v9827_v54  ;;  %11226 = vmatpush3.bf16.msra.mxu1 %v12020_v25  ;;  %v4746_v21 = vsel %vm12915_vm10, %v4737_v41, %v4745_v27  ;;  %v4900_v25 = vld [vmem:[#allocation2 + $0x10] sm:$0xc]  ;;  %v4440_v54 = vrot.slane %v13535_v48, 5 }
 0x204   : > { %11227 = vmatprep.subr.bf16.mxu1 %v12022_v60  ;;  %v9828_v28 = vcombine.low %v4728_v14, %v4746_v21  ;;  %v9837_v42 = vrot.slane %v4900_v25, 10  ;;  %v12035_v14 = vld [vmem:[%s15563_s3 + $0x3c0] sm:$0xff]   ;;  %v13753_v21 = vld [vmem:[#allocation2 + $0x1c] sm:$0x1]  ;;  %v5279_v25 = vld [vmem:[#allocation2 + $0x18] sm:$0xf] }
 0x205   : > { %11166 = vmatpush3.bf16.msra.mxu0 %v12021_v26  ;;  %v9815_v26 = vcombine.low %v4429_v11, %v4433_v6  ;;  %v13762_v11 = vld [vmem:[#allocation2 + $0x24] sm:$0x1]  ;;  %v12041_v6 = vld [vmem:[%s15563_s3 + $0x470] sm:$0xff]   ;;  %v5299_v37 = vshll.u32 %v5279_v25, 16 }
 0x206   : > { %11167 = vmatprep.subr.bf16.mxu0 %v12023_v40  ;;  %v10883_v0 = vpop.f32.mrf.mxu0  ;;  %v4927_v47 = vsel %vm13068_vm14, %v9837_v42, %v4926_v12  ;;  %v9881_v42 = vrot.slane %v13755_v39, 9  ;;  %v5586_v12 = vrot.slane %v13753_v21, 5 }
 0x207   : > { %11228 = vmatpush3.bf16.msra.mxu1 %v12022_v60  ;;  %v13689_v34 = vadd.f32 %v10907_v33, %v10883_v0  ;;  %v9812_v60 = vrot.slane %v13620_v2, 9  ;;  %v10911_v49 = vpop.f32.mrf.mxu1  ;;  %v9845_v33 = vcombine.low %v4927_v47, %v4931_v57  ;;  %v13785_v47 = vld [vmem:[#allocation2 + $0x48] sm:$0xc] }
 0x208   : > { %11229 = vmatprep.subr.bf16.mxu1 %v12024_v20  ;;  %v1861_v29 = vpop.f32.mrf.mxu0 }
 0x209   : > { %11168 = vmatpush3.bf16.msra.mxu0 %v12023_v40  ;;  %v13700_v31 = vadd.f32 %v1998_v7, %v1861_v29  ;;  %v4441_v48 = vsel %vm12930_vm11, %v9812_v60, %v4440_v54  ;;  %v12032_v40 = vld [vmem:[%s15563_s3 + $0x3a0] sm:$0xff]   ;;  %v4904_v29 = vld [vmem:[#allocation2 + $0x30] sm:$0xc]  ;;  %v5296_v54 = vshrl.u32 %v5279_v25, 16 }
 0x20a   : > { %11198 = vmatmul.mubr.bf16.gmra.mxu1 %v9828_v28  ;;  %11201 = vmatprep.subr.bf16.mxu0 %v12025_v46  ;;  %v10884_v19 = vpop.f32.mrf.mxu0  ;;  %v9816_v2 = vcombine.low %v4437_v43, %v4441_v48  ;;  %v12038_v28 = vld [vmem:[%s15563_s3 + $0x478] sm:$0xff]   ;;  %v13780_v60 = vld [vmem:[#allocation2 + $0x40] sm:$0xc]  ;;  %v9841_v43 = vrot.slane %v4904_v29, 10  ;;  %v12043_v25 = vld [vmem:[#allocation2 + $0x48] ss:$8 sps:$4 sm:$0xff]  }
 0x20b   : > { %11230 = vmatpush3.bf16.msra.mxu1 %v12024_v20  ;;  %11241 = vmatprep.mubr.bf16.mxu1 %v12026_v23  ;;  %v13710_v45 = vadd.f32 %v10908_v55, %v10884_v19  ;;  %v2014_v20 = vpop.f32.mrf.mxu1  ;;  %v5281_v23 = vld [vmem:[#allocation2 + $0x20] sm:$0xf]  ;;  %v4934_v19 = vrot.slane %v13585_v13, 6  ;;  %v5590_v13 = vrot.slane %v13762_v11, 5 }
 0x20c   : > { %11170 = vmatmul.mubr.bf16.vlgmr.msra.gmra.mxu0 %v9814_v59  ;;  %11231 = vmatprep.subr.bf16.mxu1 %v12027_v4  ;;  %v13738_v41 = vpop.f32.mrf.mxu0  ;;  %v12037_v59 = vld [vmem:[#allocation2 + $0x28] ss:$8 sps:$4 sm:$0xff]   ;;  %v5313_v18 = vshll.u32 %v5281_v23, 16  ;;  %v12040_v55 = vld [vmem:[#allocation2 + $0x38] ss:$8 sps:$4 sm:$0xff]  }
 0x20d   : > { %11173 = vmatprep.mubr.bf16.mxu0 %v9815_v26  ;;  %11202 = vmatpush3.bf16.msra.mxu0 %v12025_v46  ;;  %v4902_v46 = vld [vmem:[#allocation2 + $0x20] sm:$0xc]  ;;  %v10912_v8 = vpop.f32.mrf.mxu1 }
 0x20e   : > { %11203 = vmatprep.subr.bf16.mxu0 %v12028_v5  ;;  %v9839_v26 = vrot.slane %v4902_v46, 10  ;;  %v12042_v48 = vld [vmem:[%s15563_s3 + $0x380] sm:$0xff]   ;;  %v5315_v57 = vrot.slane %v5313_v18, 5  ;;  %v4954_v18 = vrot.slane %v13643_v61, 6 }
 0x20f   : > { %11232 = vmatpush3.bf16.msra.mxu1 %v12027_v4  ;;  %v13764_v4 = vld [vmem:[#allocation2 + $0x20] sm:$0xe]  ;;  %v13814_v46 = vld [vmem:[#allocation2 + $0x44] sm:$0x1] }
 0x210   : > { %11233 = vmatprep.subr.bf16.mxu1 %v12029_v44  ;;  %v9882_v16 = vrot.slane %v13764_v4, 9  ;;  %v12046_v61 = vld [vmem:[%s15563_s3 + $0x460] sm:$0xff]  }
 0x211   : > { %11204 = vmatpush3.bf16.msra.mxu0 %v12028_v5  ;;  %v5310_v5 = vshrl.u32 %v5281_v23, 16  ;;  %v4946_v23 = vrot.slane %v13611_v62, 6  ;;  %v5305_v62 = vshll.u32 %v13753_v21, 16 }
 0x212   : > { %11205 = vmatprep.subr.bf16.mxu0 %v12030_v38 }
 0x213   : > { %11234 = vmatpush3.bf16.msra.mxu1 %v12029_v44  ;;  %v9840_v44 = vrot.slane %v4903_v10, 10  ;;  %v13816_v10 = vld [vmem:[#allocation2 + $0x40] sm:$0xe] }
 0x214   : > { %11174 = vmatmul.mubr.bf16.gmra.mxu0 %v9816_v2  ;;  %11235 = vmatprep.subr.bf16.mxu1 %v12031_v15  ;;  %v5312_v2 = vrot.slane %v5310_v5, 4  ;;  %v9844_v5 = vrot.slane %v13785_v47, 10  ;;  %v12047_v47 = vld [vmem:[%s15563_s3 + $0x430] sm:$0xff]  }
 0x215   : > { %11206 = vmatpush3.bf16.msra.mxu0 %v12030_v38  ;;  %11217 = vmatprep.mubr.bf16.mxu0 %v9845_v33  ;;  %v13776_v38 = vpop.f32.mrf.mxu1  ;;  %v13800_v22 = vsel %vm13068_vm14, %v9840_v44, %v4938_v35  ;;  %v13802_v33 = vld [vmem:[#allocation2 + $0x34] sm:$0x1] }
 0x216   : > { %11207 = vmatprep.subr.bf16.mxu0 %v12032_v40  ;;  %v10887_v56 = vpop.f32.mrf.mxu0  ;;  %15587 = vst [vmem:[#allocation9_spill] sm:$0xff] %v13776_v38  ;;  %v12054_v38 = vld [vmem:[%s15563_s3 + $0x440] sm:$0xff]  }
 0x217   : > { %11236 = vmatpush3.bf16.msra.mxu1 %v12031_v15  ;;  %v13743_v58 = vadd.f32 %v10911_v49, %v10887_v56  ;;  %v13796_v49 = vsel %vm13068_vm14, %v9839_v26, %v4934_v19  ;;  %v5587_v56 = vsel %vm12930_vm11, %v9881_v42, %v5586_v12  ;;  %v13832_v26 = vld [vmem:[#allocation2 + $0x38] sm:$0xe]  ;;  %v5319_v19 = vshll.u32 %v13762_v11, 16  ;;  %v13840_v42 = vld [vmem:[#allocation2 + $0x48] sm:$0xe] }
 0x218   : > { %11237 = vmatprep.subr.bf16.mxu1 %v12033_v17  ;;  %v1877_v27 = vpop.f32.mrf.mxu0  ;;  %v5598_v11 = vrot.slane %v13802_v33, 5  ;;  %v13849_v12 = vld [vmem:[#allocation2 + $0x4c] sm:$0x1] }
 0x219   : > { %11208 = vmatpush3.bf16.msra.mxu0 %v12032_v40  ;;  %v13748_v53 = vadd.f32 %v2014_v20, %v1877_v27  ;;  %v13792_v40 = vld [vmem:[#allocation2 + $0x2c] sm:$0x1]  ;;  %v5298_v27 = vrot.slane %v5296_v54, 4 }
 0x21a   : > { %11209 = vmatprep.subr.bf16.mxu0 %v12034_v52  ;;  %v10888_v7 = vpop.f32.mrf.mxu0  ;;  %v12044_v20 = vld [vmem:[%s15563_s3 + $0x468] sm:$0xff]   ;;  %v5594_v35 = vrot.slane %v13792_v40, 5 }
 0x21b   : > { %11238 = vmatpush3.bf16.msra.mxu1 %v12033_v17  ;;  %v13757_v0 = vadd.f32 %v10912_v8, %v10888_v7  ;;  %v13804_v17 = vld [vmem:[#allocation2 + $0x28] sm:$0xe]  ;;  %v5591_v8 = vsel %vm12930_vm11, %v9882_v16, %v5590_v13  ;;  %v4943_v7 = vsel %vm13068_vm14, %v9841_v43, %v4942_v36  ;;  %v5606_v16 = vrot.slane %v13814_v46, 5 }
 0x21c   : > { %11239 = vmatprep.subr.bf16.mxu1 %v12035_v14  ;;  %v9883_v44 = vrot.slane %v13804_v17, 9  ;;  %v13855_v13 = vpop.f32.mrf.mxu0 }
 0x21d   : > { %11210 = vmatpush3.bf16.msra.mxu0 %v12034_v52  ;;  %v13806_v52 = vld [vmem:[#allocation2 + $0x30] sm:$0xe] }
 0x21e   : > { %11211 = vmatprep.subr.bf16.mxu0 %v12036_v50  ;;  %v9884_v21 = vrot.slane %v13806_v52, 9 }
 0x21f   : > { %11240 = vmatpush3.bf16.msra.mxu1 %v12035_v14  ;;  %v9842_v14 = vrot.slane %v13774_v30, 10  ;;  %v13838_v30 = vld [vmem:[#allocation2 + $0x3c] sm:$0x1] }
 0x220   : > { %11273 = vmatprep.subr.bf16.mxu1 %v12038_v28 }
 0x221   : > { %11212 = vmatpush3.bf16.msra.mxu0 %v12036_v50  ;;  %v13787_v15 = vpop.f32.mrf.mxu1  ;;  %v5301_v50 = vrot.slane %v5299_v37, 5  ;;  %v4947_v54 = vsel %vm13068_vm14, %v9842_v14, %v4946_v23  ;;  %v9886_v37 = vrot.slane %v13816_v10, 9  ;;  %v5321_v14 = vrot.slane %v5319_v19, 5  ;;  %v12048_v23 = vld [vmem:[%s15563_s3 + $0x458] sm:$0xff]  }
 0x222   : > { %11242 = vmatmul.mubr.bf16.vlgmr.msra.gmra.mxu1 %v12037_v59  ;;  %11213 = vmatprep.subr.bf16.mxu0 %v12039_v9  ;;  %v12045_v59 = vld [vmem:[%s15563_s3 + $0x438] sm:$0xff]   ;;  %v9847_v36 = vcombine.low %v4943_v7, %v4947_v54 }
 0x223   : > { %11245 = vmatprep.mubr.bf16.mxu1 %v12040_v55  ;;  %11274 = vmatpush3.bf16.msra.mxu1 %v12038_v28  ;;  %v9843_v28 = vrot.slane %v13780_v60, 10  ;;  %v13824_v29 = vpop.f32.mrf.mxu1  ;;  %v5316_v55 = vor.u32 %v5315_v57, %v5312_v2  ;;  %v9889_v60 = vcombine.low %v5587_v56, %v5591_v8  ;;  %v13868_v2 = vsel %vm13068_vm14, %v9844_v5, %v4954_v18  ;;  %v5285_v8 = vld [vmem:[#allocation2 + $0x30] sm:$0xf]  ;;  %v5283_v5 = vld [vmem:[#allocation2 + $0x28] sm:$0xf] }
 0x224   : > { %11275 = vmatprep.subr.bf16.mxu1 %v12041_v6  ;;  %v5307_v56 = vrot.slane %v5305_v62, 5  ;;  %v5610_v62 = vrot.slane %v13849_v12, 5  ;;  %v5324_v54 = vshrl.u32 %v5283_v5, 16 }
 0x225   : > { %11214 = vmatpush3.bf16.msra.mxu0 %v12039_v9  ;;  %v4950_v9 = vrot.slane %v13633_v1, 6  ;;  %v9846_v1 = vcombine.low %v13796_v49, %v13800_v22  ;;  %v13857_v43 = vpop.f32.mrf.mxu1  ;;  %v5317_v57 = vrot.slane %v5316_v55, 4  ;;  %v13870_v49 = vld [vmem:[#allocation2 + $0x54] sm:$0x1]  ;;  %v13872_v22 = vld [vmem:[#allocation2 + $0x50] sm:$0xe]  ;;  %v13891_v55 = vsel %vm12930_vm11, %v9886_v37, %v5606_v16 }
 0x226   : > { %11215 = vmatprep.subr.bf16.mxu0 %v12042_v48  ;;  %v9888_v19 = vrot.slane %v13872_v22, 9  ;;  %v5327_v37 = vshll.u32 %v5283_v5, 16 }
 0x227   : > { %11276 = vmatpush3.bf16.msra.mxu1 %v12041_v6  ;;  %v5302_v6 = vor.u32 %v5301_v50, %v5298_v27  ;;  %v13876_v27 = vsel %vm12930_vm11, %v9883_v44, %v5594_v35  ;;  %v9885_v50 = vrot.slane %v13832_v26, 9  ;;  %v13895_v44 = vpop.f32.mrf.mxu1 }
 0x228   : > { %11277 = vmatprep.subr.bf16.mxu1 %v12044_v20  ;;  %15588 = vst [vmem:[#allocation10_spill] sm:$0xff] %v13895_v44 }
 0x229   : > { %11216 = vmatpush3.bf16.msra.mxu0 %v12042_v48  ;;  %v13864_v48 = vsel %vm13068_vm14, %v9843_v28, %v4950_v9  ;;  %v5303_v28 = vrot.slane %v5302_v6, 4  ;;  %v9887_v9 = vrot.slane %v13840_v42, 9  ;;  %v5338_v6 = vshrl.u32 %v5285_v8, 16 }
 0x22a   : > { %11246 = vmatmul.mubr.bf16.gmra.mxu1 %v12043_v25  ;;  %11249 = vmatprep.subr.bf16.mxu0 %v12045_v59  ;;  %v5602_v25 = vrot.slane %v13838_v30, 5 }
 0x22b   : > { %11278 = vmatpush3.bf16.msra.mxu1 %v12044_v20  ;;  %11289 = vmatprep.mubr.bf16.mxu1 %v9889_v60  ;;  %v10931_v7 = vpop.f32.mrf.mxu0  ;;  %v13884_v20 = vsel %vm12930_vm11, %v9884_v21, %v5598_v11  ;;  %v5341_v21 = vshll.u32 %v5285_v8, 16  ;;  %v13925_v8 = vld [vmem:[#allocation2 + $0x24] sm:$0x3] }
 0x22c   : > { %11218 = vmatmul.mubr.bf16.vlgmr.msra.gmra.mxu0 %v9846_v1  ;;  %11279 = vmatprep.subr.bf16.mxu1 %v12046_v61  ;;  %v2235_v18 = vadd.f32 %v10931_v7, %v13689_v34  ;;  %v12049_v1 = vld [vmem:[%s15563_s3 + $0x428] sm:$0xff]   ;;  %v5322_v34 = vsel %vm12769_vm5, %v5317_v57, %v5321_v14  ;;  %v12050_v57 = vld [vmem:[%s15563_s3 + $0x450] sm:$0xff]   ;;  %v6075_v7 = vld [vmem:[#allocation2 + $0x20] sm:$0xc] }
 0x22d   : > { %11221 = vmatprep.mubr.bf16.mxu0 %v9847_v36  ;;  %11250 = vmatpush3.bf16.msra.mxu0 %v12045_v59  ;;  %v2202_v35 = vpop.f32.mrf.mxu0  ;;  %v5614_v59 = vrot.slane %v13870_v49, 5  ;;  %v9848_v36 = vcombine.low %v13864_v48, %v13868_v2  ;;  %v13923_v2 = vld [vmem:[#allocation2 + $0x1c] sm:$0x3] }
 0x22e   : > { %11251 = vmatprep.subr.bf16.mxu0 %v12047_v47  ;;  %v2233_v11 = vadd.f32 %v2202_v35, %v13700_v31  ;;  %v13905_v60 = vadd.f32 %v13787_v15, %v2235_v18  ;;  %v13916_v31 = vsel %vm12930_vm11, %v9885_v50, %v5602_v25  ;;  %v10959_v18 = vpop.f32.mrf.mxu1  ;;  %v5343_v25 = vrot.slane %v5341_v21, 5  ;;  %v13939_v35 = vld [vmem:[#allocation2 + $0x18] sm:$0xc] }
 0x22f   : > { %11280 = vmatpush3.bf16.msra.mxu1 %v12046_v61  ;;  %v10932_v16 = vpop.f32.mrf.mxu0  ;;  %v5308_v61 = vsel %vm12769_vm5, %v5303_v28, %v5307_v56  ;;  %v13937_v56 = vsel %vm12930_vm11, %v9888_v19, %v5614_v59  ;;  %v5340_v28 = vrot.slane %v5338_v6, 4  ;;  %v5333_v59 = vshll.u32 %v13792_v40, 16  ;;  %v12053_v40 = vld [vmem:[%s15563_s3 + $0x418] sm:$0xff]  }
 0x230   : > { %11281 = vmatprep.subr.bf16.mxu1 %v12048_v23  ;;  %v2236_v15 = vadd.f32 %v10932_v16, %v13710_v45  ;;  %v13928_v5 = vadd.f32 %v13824_v29, %v2233_v11  ;;  %v9869_v45 = vcombine.low %v5308_v61, %v5322_v34  ;;  %v13943_v29 = vsel %vm12930_vm11, %v9887_v9, %v5610_v62  ;;  %v5287_v16 = vld [vmem:[#allocation2 + $0x38] sm:$0xf]  ;;  %v5289_v61 = vld [vmem:[#allocation2 + $0x40] sm:$0xf] }
 0x231   : > { %11252 = vmatpush3.bf16.msra.mxu0 %v12047_v47  ;;  %v13930_v50 = vpop.f32.mrf.mxu0  ;;  %v12051_v47 = vld [vmem:[%s15563_s3 + $0x420] sm:$0xff]   ;;  %v13945_v11 = vrot.slane %v5324_v54, 4  ;;  %v13947_v34 = vrot.slane %v5327_v37, 5  ;;  %v5347_v9 = vshll.u32 %v13802_v33, 16  ;;  %v9914_v62 = vrot.slane %v6075_v7, 10 }
 0x232   : > { %11253 = vmatprep.subr.bf16.mxu0 %v12049_v1  ;;  %v13950_v48 = vadd.f32 %v13857_v43, %v2236_v15  ;;  %v6104_v6 = vrot.slane %v13925_v8, 6  ;;  %v9913_v54 = vrot.slane %v13939_v35, 10  ;;  %v6100_v37 = vrot.slane %v13923_v2, 6  ;;  %v2526_v15 = vpop.f32.mrf.mxu1 }
 0x233   : > { %11282 = vmatpush3.bf16.msra.mxu1 %v12048_v23  ;;  %v10935_v19 = vpop.f32.mrf.mxu0  ;;  %v12052_v23 = vld [vmem:[%s15563_s3 + $0x448] sm:$0xff]   ;;  %v5344_v33 = vor.u32 %v5343_v25, %v5340_v28  ;;  %v5352_v7 = vshrl.u32 %v5287_v16, 16  ;;  %v5330_v35 = vor.u32 %v13947_v34, %v13945_v11  ;;  %v5369_v43 = vshll.u32 %v5289_v61, 16 }
 0x234   : > { %11222 = vmatmul.mubr.bf16.gmra.mxu0 %v9848_v36  ;;  %11283 = vmatprep.subr.bf16.mxu1 %v12050_v57  ;;  %v2239_v21 = vadd.f32 %v10935_v19, %v13743_v58  ;;  %v5293_v36 = vld [vmem:[#allocation2 + $0x50] sm:$0xf]  ;;  %v5355_v58 = vshll.u32 %v5287_v16, 16  ;;  %v13974_v28 = vrot.slane %v5347_v9, 5  ;;  %v13978_v25 = vsel %vm13068_vm14, %v9914_v62, %v6104_v6  ;;  %v10960_v16 = vpop.f32.mrf.mxu1 }
 0x235   : > { %11254 = vmatpush3.bf16.msra.mxu0 %v12049_v1  ;;  %11265 = vmatprep.mubr.bf16.mxu0 %v9869_v45  ;;  %v2218_v14 = vpop.f32.mrf.mxu0  ;;  %v5366_v1 = vshrl.u32 %v5289_v61, 16  ;;  %v5291_v45 = vld [vmem:[#allocation2 + $0x48] sm:$0xf]  ;;  %v12055_v61 = vld [vmem:[%s15563_s3 + $0x410] sm:$0xff]   ;;  %v13986_v9 = vrot.slane %v5344_v33, 4  ;;  %v5778_v33 = vshrl.u32 %v13755_v39, 16 }
 0x236   : > { %11255 = vmatprep.subr.bf16.mxu0 %v12051_v47  ;;  %v2237_v19 = vadd.f32 %v2218_v14, %v13748_v53  ;;  %v13969_v3 = vadd.f32 %v10959_v18, %v2239_v21  ;;  %v5394_v53 = vshrl.u32 %v5293_v36, 16  ;;  %v5380_v11 = vshrl.u32 %v5291_v45, 16 }
 0x237   : > { %11284 = vmatpush3.bf16.msra.mxu1 %v12050_v57  ;;  %v10936_v44 = vpop.f32.mrf.mxu0  ;;  %v5397_v57 = vshll.u32 %v5293_v36, 16  ;;  %v5383_v18 = vshll.u32 %v5291_v45, 16  ;;  %v5354_v21 = vrot.slane %v5352_v7, 4  ;;  %v5357_v62 = vrot.slane %v5355_v58, 5 }
 0x238   : > { %11285 = vmatprep.subr.bf16.mxu1 %v12052_v23  ;;  %v2240_v14 = vadd.f32 %v10936_v44, %v13757_v0  ;;  %v13981_v34 = vadd.f32 %v2526_v15, %v2237_v19  ;;  %v5368_v6 = vrot.slane %v5366_v1, 4  ;;  %v5371_v36 = vrot.slane %v5369_v43, 5  ;;  %v12056_v15 = vld [vmem:[%s15563_s3 + $0x4f8] sm:$0xff]   ;;  %v12057_v1 = vld [vmem:[%s15563_s3 + $0x408] sm:$0xff]  }
 0x239   : > { %11256 = vmatpush3.bf16.msra.mxu0 %v12051_v47  ;;  %v5796_v0 = vshrl.u32 %v13764_v4, 16  ;;  %v5799_v44 = vshll.u32 %v13764_v4, 16  ;;  %v5396_v45 = vrot.slane %v5394_v53, 4  ;;  %v5399_v19 = vrot.slane %v5397_v57, 5 }
 0x23a   : > { %11257 = vmatprep.subr.bf16.mxu0 %v12053_v40  ;;  %v13990_v47 = vadd.f32 %v10960_v16, %v2240_v14  ;;  %v5781_v7 = vshll.u32 %v13755_v39, 16  ;;  %v13999_v43 = vsel %vm13068_vm14, %v9913_v54, %v6100_v37  ;;  %v5382_v4 = vrot.slane %v5380_v11, 4  ;;  %v14011_v11 = vpop.f32.mrf.mxu1 }
 0x23b   : > { %11286 = vmatpush3.bf16.msra.mxu1 %v12052_v23  ;;  %v5335_v23 = vrot.slane %v5333_v59, 5  ;;  %v5385_v58 = vrot.slane %v5383_v18, 5  ;;  %v5331_v14 = vrot.slane %v5330_v35, 4  ;;  %v5350_v53 = vsel %vm12769_vm5, %v13986_v9, %v13974_v28  ;;  %v12058_v35 = vld [vmem:[%s15563_s3 + $0x4f0] sm:$0xff]  }
 0x23c   : > { %11287 = vmatprep.subr.bf16.mxu1 %v12054_v38  ;;  %v5361_v59 = vshll.u32 %v13838_v30, 16  ;;  %v5358_v54 = vor.u32 %v5357_v62, %v5354_v21  ;;  %v5372_v37 = vor.u32 %v5371_v36, %v5368_v6  ;;  %v5801_v57 = vrot.slane %v5799_v44, 6 }
 0x23d   : > { %11258 = vmatpush3.bf16.msra.mxu0 %v12053_v40  ;;  %v5798_v40 = vrot.slane %v5796_v0, 5  ;;  %v5375_v18 = vshll.u32 %v13814_v46, 16  ;;  %v5400_v28 = vor.u32 %v5399_v19, %v5396_v45  ;;  %v5780_v16 = vrot.slane %v5778_v33, 5  ;;  %v12059_v46 = vld [vmem:[%s15563_s3 + $0x400] sm:$0xff]   ;;  %v14034_v0 = vld [vmem:[#allocation2 + $0x34] sm:$0x3] }
 0x23e   : > { %11259 = vmatprep.subr.bf16.mxu0 %v12055_v61  ;;  %v5783_v9 = vrot.slane %v5781_v7, 6  ;;  %v5386_v39 = vor.u32 %v5385_v58, %v5382_v4  ;;  %v5805_v30 = vshrl.u32 %v13925_v8, 16  ;;  %v5808_v21 = vshll.u32 %v13925_v8, 16  ;;  %v14040_v33 = vld [vmem:[#allocation2 + $0x2c] sm:$0x3] }
 0x23f   : > { %11288 = vmatpush3.bf16.msra.mxu1 %v12054_v38  ;;  %v5403_v38 = vshll.u32 %v13870_v49, 16  ;;  %v15589_v6 = vcombine.low %v13876_v27, %v13884_v20  ;;  %v14030_v36 = vrot.slane %v5361_v59, 5  ;;  %v5787_v49 = vshrl.u32 %v13923_v2, 16  ;;  %v14042_v7 = vld [vmem:[#allocation2 + $0x28] sm:$0xc] }
 0x240   : > { %11321 = vmatprep.subr.bf16.mxu1 %v12056_v15  ;;  %v5790_v8 = vshll.u32 %v13923_v2, 16  ;;  %v15590_v27 = vcombine.low %v13916_v31, %v13891_v55  ;;  %v5359_v20 = vrot.slane %v5358_v54, 4  ;;  %v5373_v44 = vrot.slane %v5372_v37, 4  ;;  %v12060_v2 = vld [vmem:[%s15563_s3 + $0x4e8] sm:$0xff]   ;;  %v6078_v37 = vld [vmem:[#allocation2 + $0x38] sm:$0xc] }
 0x241   : > { %11260 = vmatpush3.bf16.msra.mxu0 %v12055_v61  ;;  %v5336_v61 = vsel %vm12769_vm5, %v5331_v14, %v5335_v23  ;;  %v5389_v45 = vshll.u32 %v13849_v12, 16  ;;  %v5802_v19 = vor.u32 %v5801_v57, %v5798_v40  ;;  %v6077_v23 = vld [vmem:[#allocation2 + $0x30] sm:$0xc]  ;;  %v5377_v58 = vrot.slane %v5375_v18, 5  ;;  %v12061_v57 = vld [vmem:[%s15563_s3 + $0x4b8] sm:$0xff]  }
 0x242   : > { %v14020_v62 = vpop.f32.mrf.mxu1  ;;  %11290 = vmatmul.mubr.bf16.vlgmr.msra.gmra.mxu1 %v15589_v6  ;;  %11261 = vmatprep.subr.bf16.mxu0 %v12057_v1  ;;  %v9870_v4 = vcombine.low %v5336_v61, %v5350_v53  ;;  %v5401_v55 = vrot.slane %v5400_v28, 4  ;;  %v5784_v31 = vor.u32 %v5783_v9, %v5780_v16  ;;  %v5387_v14 = vrot.slane %v5386_v39, 4 }
 0x243   : > { %11293 = vmatprep.mubr.bf16.mxu1 %v15590_v27  ;;  %11322 = vmatpush3.bf16.msra.mxu1 %v12056_v15  ;;  %v14047_v15 = vld [vmem:[#allocation2 + $0x3c] sm:$0x3]  ;;  %v5405_v12 = vrot.slane %v5403_v38, 5  ;;  %v5807_v59 = vrot.slane %v5805_v30, 5  ;;  %v5810_v54 = vrot.slane %v5808_v21, 6  ;;  %v5789_v6 = vrot.slane %v5787_v49, 5 }
 0x244   : > { %11323 = vmatprep.subr.bf16.mxu1 %v12058_v35  ;;  %v14049_v40 = vpop.f32.mrf.mxu1  ;;  %v5792_v53 = vrot.slane %v5790_v8, 6  ;;  %v9916_v18 = vrot.slane %v6077_v23, 10  ;;  %v6112_v28 = vrot.slane %v14034_v0, 6  ;;  %v5378_v39 = vsel %vm12769_vm5, %v5373_v44, %v5377_v58  ;;  %v14060_v38 = vld [vmem:[#allocation2 + $0x44] sm:$0x3] }
 0x245   : > { %11262 = vmatpush3.bf16.msra.mxu0 %v12057_v1  ;;  %v5364_v1 = vsel %vm12769_vm5, %v5359_v20, %v14030_v36  ;;  %v5391_v16 = vrot.slane %v5389_v45, 5  ;;  %v5803_v9 = vrot.slane %v5802_v19, 4  ;;  %v6079_v30 = vld [vmem:[#allocation2 + $0x40] sm:$0xc]  ;;  %v5785_v61 = vrot.slane %v5784_v31, 4  ;;  %v14074_v19 = vpop.f32.mrf.mxu0 }
 0x246   : > { %11263 = vmatprep.subr.bf16.mxu0 %v12059_v46  ;;  %v12062_v21 = vld [vmem:[%s15563_s3 + $0x4e0] sm:$0xff]   ;;  %v9915_v49 = vrot.slane %v14042_v7, 10  ;;  %v6108_v36 = vrot.slane %v14040_v33, 6  ;;  %v5811_v27 = vor.u32 %v5810_v54, %v5807_v59  ;;  %v9917_v20 = vrot.slane %v6078_v37, 10  ;;  %v14072_v45 = vld [vmem:[#allocation2 + $0x48] sm:$0xc]  ;;  %v14076_v23 = vpop.f32.mrf.mxu1 }
 0x247   : > { %11324 = vmatpush3.bf16.msra.mxu1 %v12058_v35  ;;  %v5406_v35 = vsel %vm12769_vm5, %v5401_v55, %v5405_v12  ;;  %v5392_v8 = vsel %vm12769_vm5, %v5387_v14, %v5391_v16  ;;  %v6116_v44 = vrot.slane %v14047_v15, 6  ;;  %v15591_v58 = vcombine.low %v13943_v29, %v13937_v56  ;;  %v14096_v54 = vld [vmem:[#allocation2 + $0x4c] sm:$0x3]  ;;  %v14098_v37 = vld [vmem:[#allocation2 + $0x54] sm:$0x3] }
 0x248   : > { %11325 = vmatprep.subr.bf16.mxu1 %v12060_v2  ;;  %v5793_v7 = vor.u32 %v5792_v53, %v5789_v6  ;;  %v14086_v55 = vsel %vm13068_vm14, %v9916_v18, %v6112_v28  ;;  %v9918_v31 = vrot.slane %v6079_v30, 10  ;;  %v6120_v14 = vrot.slane %v14060_v38, 6  ;;  %v6081_v53 = vld [vmem:[#allocation2 + $0x50] sm:$0xc]  ;;  %v14123_v30 = vpop.f32.mrf.mxu1 }
 0x249   : > { %11264 = vmatpush3.bf16.msra.mxu0 %v12059_v46  ;;  %v12063_v46 = vld [vmem:[%s15563_s3 + $0x4b0] sm:$0xff]   ;;  %v15592_v12 = vcombine.low %v13999_v43, %v13978_v25  ;;  %v9871_v56 = vcombine.low %v5364_v1, %v5378_v39  ;;  %v9872_v29 = vcombine.low %v5392_v8, %v5406_v35  ;;  %v14094_v59 = vsel %vm12915_vm10, %v5803_v9, %v5811_v27  ;;  %v6453_v8 = vld [vmem:[#allocation2 + $0x20] sm:$0xf]  ;;  %v6455_v27 = vld [vmem:[#allocation2 + $0x28] sm:$0xf] }
 0x24a   : > { %11294 = vmatmul.mubr.bf16.gmra.mxu1 %v15591_v58  ;;  %11297 = vmatprep.subr.bf16.mxu0 %v12061_v57  ;;  %v5794_v25 = vsel %vm12915_vm10, %v5785_v61, %v5793_v7  ;;  %v14107_v43 = vsel %vm13068_vm14, %v9915_v49, %v6108_v36  ;;  %v9919_v18 = vrot.slane %v14072_v45, 10  ;;  %v5814_v28 = vshrl.u32 %v13804_v17, 16 }
 0x24b   : > { %11326 = vmatpush3.bf16.msra.mxu1 %v12060_v2  ;;  %11337 = vmatprep.mubr.bf16.mxu1 %v15592_v12  ;;  %v12064_v2 = vld [vmem:[%s15563_s3 + $0x4d8] sm:$0xff]   ;;  %v14116_v39 = vsel %vm13068_vm14, %v9917_v20, %v6116_v44  ;;  %v5817_v16 = vshll.u32 %v13804_v17, 16  ;;  %v14121_v9 = vadd.f32 %v13726_v24, %v13738_v41  ;;  %v14131_v61 = vsel %vm13068_vm14, %v9918_v31, %v6120_v14  ;;  %v12066_v44 = vld [vmem:[%s15563_s3 + $0x4d0] sm:$0xff]   ;;  %v11007_v12 = vpop.f32.mrf.mxu1 }
 0x24c   : > { %v10979_v6 = vpop.f32.mrf.mxu0  ;;  %11266 = vmatmul.mubr.bf16.vlgmr.msra.gmra.mxu0 %v9870_v4  ;;  %11327 = vmatprep.subr.bf16.mxu1 %v12062_v21  ;;  %v9922_v4 = vcombine.low %v14107_v43, %v14086_v55  ;;  %v6124_v17 = vrot.slane %v14096_v54, 6  ;;  %v9920_v24 = vrot.slane %v6081_v53, 10  ;;  %v6128_v41 = vrot.slane %v14098_v37, 6 }
 0x24d   : > { %v2755_v1 = vadd.f32 %v10979_v6, %v13905_v60  ;;  %11269 = vmatprep.mubr.bf16.mxu0 %v9871_v56  ;;  %11298 = vmatpush3.bf16.msra.mxu0 %v12061_v57  ;;  %v12065_v60 = vld [vmem:[%s15563_s3 + $0x4a8] sm:$0xff]   ;;  %v9901_v57 = vcombine.low %v5794_v25, %v14094_v59  ;;  %v14142_v45 = vrot.slane %v5814_v28, 5  ;;  %v5823_v58 = vshrl.u32 %v14040_v33, 16  ;;  %v12067_v59 = vld [vmem:[%s15563_s3 + $0x4a0] sm:$0xff]  }
 0x24e   : > { %v2722_v35 = vpop.f32.mrf.mxu0  ;;  %11299 = vmatprep.subr.bf16.mxu0 %v12063_v46  ;;  %v5835_v31 = vshll.u32 %v13806_v52, 16  ;;  %v6473_v6 = vshll.u32 %v6453_v8, 16  ;;  %v6484_v25 = vshrl.u32 %v6455_v27, 16  ;;  %v6487_v53 = vshll.u32 %v6455_v27, 16 }
 0x24f   : > { %v2753_v49 = vadd.f32 %v2722_v35, %v13928_v5  ;;  %11328 = vmatpush3.bf16.msra.mxu1 %v12062_v21  ;;  %v14137_v36 = vadd.f32 %v14020_v62, %v2755_v1  ;;  %v5826_v5 = vshll.u32 %v14040_v33, 16  ;;  %v5832_v21 = vshrl.u32 %v13806_v52, 16 }
 0x250   : > { %v10980_v20 = vpop.f32.mrf.mxu0  ;;  %11329 = vmatprep.subr.bf16.mxu1 %v12064_v2  ;;  %v5819_v62 = vrot.slane %v5817_v16, 6  ;;  %v6470_v33 = vshrl.u32 %v6453_v8, 16  ;;  %v14161_v52 = vsel %vm13068_vm14, %v9919_v18, %v6124_v17  ;;  %v14173_v1 = vrot.slane %v5823_v58, 5  ;;  %v12069_v8 = vld [vmem:[%s15563_s3 + $0x498] sm:$0xff]  }
 0x251   : > { %v2756_v7 = vadd.f32 %v10980_v20, %v13950_v48  ;;  %11300 = vmatpush3.bf16.msra.mxu0 %v12063_v46  ;;  %v14150_v14 = vadd.f32 %v14049_v40, %v2753_v49  ;;  %v9923_v48 = vcombine.low %v14116_v39, %v14131_v61  ;;  %v14165_v40 = vsel %vm13068_vm14, %v9920_v24, %v6128_v41  ;;  %v2908_v24 = vpop.f32.mrf.mxu1 }
 0x252   : > { %v14152_v56 = vpop.f32.mrf.mxu0  ;;  %11301 = vmatprep.subr.bf16.mxu0 %v12065_v60  ;;  %v14175_v16 = vrot.slane %v5826_v5, 6  ;;  %v5834_v18 = vrot.slane %v5832_v21, 5  ;;  %v5841_v35 = vshrl.u32 %v14034_v0, 16  ;;  %v5837_v49 = vrot.slane %v5835_v31, 6 }
 0x253   : > { %11330 = vmatpush3.bf16.msra.mxu1 %v12064_v2  ;;  %v14168_v46 = vadd.f32 %v14076_v23, %v2756_v7  ;;  %v12068_v2 = vld [vmem:[%s15563_s3 + $0x4c8] sm:$0xff]   ;;  %v5820_v23 = vor.u32 %v5819_v62, %v14142_v45  ;;  %v6472_v27 = vrot.slane %v6470_v33, 4  ;;  %v6475_v20 = vrot.slane %v6473_v6, 5  ;;  %v12070_v7 = vld [vmem:[%s15563_s3 + $0x4c0] sm:$0xff]  }
 0x254   : > { %v10983_v28 = vpop.f32.mrf.mxu0  ;;  %11270 = vmatmul.mubr.bf16.gmra.mxu0 %v9872_v29  ;;  %11331 = vmatprep.subr.bf16.mxu1 %v12066_v44  ;;  %v5844_v29 = vshll.u32 %v14034_v0, 16  ;;  %v6486_v58 = vrot.slane %v6484_v25, 4  ;;  %v6489_v5 = vrot.slane %v6487_v53, 5  ;;  %v5871_v0 = vshll.u32 %v13816_v10, 16  ;;  %v11008_v25 = vpop.f32.mrf.mxu1  ;;  %v12071_v53 = vld [vmem:[%s15563_s3 + $0x490] sm:$0xff]  }
 0x255   : > { %v2759_v17 = vadd.f32 %v10983_v28, %v13969_v3  ;;  %11302 = vmatpush3.bf16.msra.mxu0 %v12065_v60  ;;  %11313 = vmatprep.mubr.bf16.mxu0 %v9901_v57  ;;  %v14185_v60 = vld [vmem:[#allocation2 + $0x24] sm:$0x1]  ;;  %v5868_v57 = vshrl.u32 %v13816_v10, 16  ;;  %v14196_v31 = vrot.slane %v5841_v35, 5  ;;  %v14208_v28 = vrot.slane %v5820_v23, 4 }
 0x256   : > { %v2738_v41 = vpop.f32.mrf.mxu0  ;;  %11303 = vmatprep.subr.bf16.mxu0 %v12067_v59  ;;  %v14210_v35 = vrot.slane %v5844_v29, 6  ;;  %v5859_v29 = vshrl.u32 %v14047_v15, 16  ;;  %v6457_v10 = vld [vmem:[#allocation2 + $0x30] sm:$0xf]  ;;  %v5913_v55 = vshrl.u32 %v14098_v37, 16  ;;  %v5916_v43 = vshll.u32 %v14098_v37, 16 }
 0x257   : > { %v2757_v3 = vadd.f32 %v2738_v41, %v13981_v34  ;;  %11332 = vmatpush3.bf16.msra.mxu1 %v12066_v44  ;;  %v14189_v45 = vadd.f32 %v11007_v12, %v2759_v17  ;;  %v5850_v34 = vshrl.u32 %v13832_v26, 16  ;;  %v5853_v44 = vshll.u32 %v13832_v26, 16  ;;  %v12072_v41 = vld [vmem:[%s15563_s3 + $0x578] sm:$0xff]  }
 0x258   : > { %v10984_v21 = vpop.f32.mrf.mxu0  ;;  %11333 = vmatprep.subr.bf16.mxu1 %v12068_v2  ;;  %v5838_v12 = vor.u32 %v5837_v49, %v5834_v18  ;;  %v6476_v26 = vor.u32 %v6475_v20, %v6472_v27  ;;  %v6490_v17 = vor.u32 %v6489_v5, %v6486_v58  ;;  %v5870_v18 = vrot.slane %v5868_v57, 5  ;;  %v12073_v57 = vld [vmem:[%s15563_s3 + $0x488] sm:$0xff]  }
 0x259   : > { %v2760_v33 = vadd.f32 %v10984_v21, %v13990_v47  ;;  %11304 = vmatpush3.bf16.msra.mxu0 %v12067_v59  ;;  %v14203_v6 = vadd.f32 %v2908_v24, %v2757_v3  ;;  %v6479_v47 = vshll.u32 %v14185_v60, 16  ;;  %v14213_v59 = vld [vmem:[#allocation2 + $0x2c] sm:$0x1]  ;;  %v5873_v49 = vrot.slane %v5871_v0, 6 }
 0x25a   : > { %11305 = vmatprep.subr.bf16.mxu0 %v12069_v8  ;;  %v5852_v23 = vrot.slane %v5850_v34, 5  ;;  %v5855_v3 = vrot.slane %v5853_v44, 6  ;;  %v5862_v27 = vshll.u32 %v14047_v15, 16  ;;  %v5880_v20 = vshll.u32 %v14060_v38, 16 }
 0x25b   : > { %11334 = vmatpush3.bf16.msra.mxu1 %v12068_v2  ;;  %v14215_v24 = vadd.f32 %v11008_v25, %v2760_v33  ;;  %v5877_v2 = vshrl.u32 %v14060_v38, 16  ;;  %v5886_v58 = vshrl.u32 %v13840_v42, 16  ;;  %v5889_v5 = vshll.u32 %v13840_v42, 16  ;;  %v14238_v33 = vpop.f32.mrf.mxu1 }
 0x25c   : > { %11335 = vmatprep.subr.bf16.mxu1 %v12070_v7  ;;  %v5839_v0 = vrot.slane %v5838_v12, 4  ;;  %v5847_v21 = vor.u32 %v14210_v35, %v14196_v31  ;;  %v5904_v15 = vshrl.u32 %v13872_v22, 16  ;;  %v14233_v34 = vrot.slane %v6476_v26, 4  ;;  %v12074_v12 = vld [vmem:[%s15563_s3 + $0x570] sm:$0xff]  }
 0x25d   : > { %11306 = vmatpush3.bf16.msra.mxu0 %v12069_v8  ;;  %v5907_v8 = vshll.u32 %v13872_v22, 16  ;;  %v14235_v38 = vrot.slane %v6479_v47, 5  ;;  %v6493_v42 = vshll.u32 %v14213_v59, 16  ;;  %v5874_v44 = vor.u32 %v5873_v49, %v5870_v18 }
 0x25e   : > { %11307 = vmatprep.subr.bf16.mxu0 %v12071_v53  ;;  %v6491_v31 = vrot.slane %v6490_v17, 4  ;;  %v5856_v25 = vor.u32 %v5855_v3, %v5852_v23  ;;  %v14243_v35 = vrot.slane %v5859_v29, 5  ;;  %v14245_v22 = vrot.slane %v5862_v27, 6  ;;  %v12075_v17 = vld [vmem:[%s15563_s3 + $0x480] sm:$0xff]  }
 0x25f   : > { %11336 = vmatpush3.bf16.msra.mxu1 %v12070_v7  ;;  %v5879_v7 = vrot.slane %v5877_v2, 5  ;;  %v5882_v26 = vrot.slane %v5880_v20, 6  ;;  %v5888_v47 = vrot.slane %v5886_v58, 5  ;;  %v5891_v62 = vrot.slane %v5889_v5, 6  ;;  %v6459_v5 = vld [vmem:[#allocation2 + $0x38] sm:$0xf] }
 0x260   : > { %11369 = vmatprep.subr.bf16.mxu1 %v12072_v41  ;;  %v5895_v49 = vshrl.u32 %v14096_v54, 16  ;;  %v5906_v23 = vrot.slane %v5904_v15, 5  ;;  %v5909_v3 = vrot.slane %v5907_v8, 6  ;;  %v6495_v29 = vrot.slane %v6493_v42, 5  ;;  %v14284_v42 = vld [vmem:[#allocation2 + $0x34] sm:$0x1] }
 0x261   : > { %11308 = vmatpush3.bf16.msra.mxu0 %v12071_v53  ;;  %v5898_v53 = vshll.u32 %v14096_v54, 16  ;;  %v5875_v27 = vrot.slane %v5874_v44, 4  ;;  %v12076_v54 = vld [vmem:[%s15563_s3 + $0x568] sm:$0xff]   ;;  %v5848_v2 = vsel %vm12915_vm10, %v5839_v0, %v5847_v21  ;;  %v6482_v39 = vsel %vm12769_vm5, %v14233_v34, %v14235_v38  ;;  %v12077_v0 = vld [vmem:[%s15563_s3 + $0x538] sm:$0xff]  }
 0x262   : > { %v14247_v18 = vpop.f32.mrf.mxu1  ;;  %11338 = vmatmul.mubr.bf16.vlgmr.msra.gmra.mxu1 %v9922_v4  ;;  %11309 = vmatprep.subr.bf16.mxu0 %v12073_v57  ;;  %v6498_v61 = vshrl.u32 %v6457_v10, 16  ;;  %v6496_v37 = vsel %vm12769_vm5, %v6491_v31, %v6495_v29  ;;  %v5883_v20 = vor.u32 %v5882_v26, %v5879_v7  ;;  %v5892_v58 = vor.u32 %v5891_v62, %v5888_v47  ;;  %v12078_v31 = vld [vmem:[%s15563_s3 + $0x560] sm:$0xff]  }
 0x263   : > { %11341 = vmatprep.mubr.bf16.mxu1 %v9923_v48  ;;  %11370 = vmatpush3.bf16.msra.mxu1 %v12072_v41  ;;  %v6501_v48 = vshll.u32 %v6457_v10, 16  ;;  %v5857_v41 = vrot.slane %v5856_v25, 4  ;;  %v5865_v21 = vor.u32 %v14245_v22, %v14243_v35  ;;  %v5897_v15 = vrot.slane %v5895_v49, 5  ;;  %v15594_v47 = vld [vmem:[#allocation9_spill] sm:$0xff]  ;;  %v15596_v29 = vld [vmem:[#allocation10_spill] sm:$0xff] }
 0x264   : > { %v14262_v4 = vpop.f32.mrf.mxu1  ;;  %11371 = vmatprep.subr.bf16.mxu1 %v12074_v12  ;;  %v5900_v8 = vrot.slane %v5898_v53, 6  ;;  %v5910_v34 = vor.u32 %v5909_v3, %v5906_v23  ;;  %v2234_v10 = vadd.f32 %v13930_v50, %v14121_v9  ;;  %v5915_v62 = vrot.slane %v5913_v55, 5  ;;  %v14299_v53 = vpop.f32.mrf.mxu0 }
 0x265   : > { %11310 = vmatpush3.bf16.msra.mxu0 %v12073_v57  ;;  %v5884_v57 = vsel %vm12915_vm10, %v5875_v27, %v5883_v20  ;;  %v5918_v38 = vrot.slane %v5916_v43, 6  ;;  %v6500_v25 = vrot.slane %v6498_v61, 4  ;;  %v6503_v35 = vrot.slane %v6501_v48, 5  ;;  %v14316_v48 = vld [vmem:[#allocation2 + $0x3c] sm:$0x1] }
 0x266   : > { %11311 = vmatprep.subr.bf16.mxu0 %v12075_v17  ;;  %v14286_v44 = vpop.f32.mrf.mxu1  ;;  %v6512_v22 = vshrl.u32 %v6459_v5, 16  ;;  %v6515_v7 = vshll.u32 %v6459_v5, 16  ;;  %v15593_v50 = vor.u32 %v14175_v16, %v14173_v1  ;;  %v5893_v26 = vrot.slane %v5892_v58, 4  ;;  %v12079_v16 = vld [vmem:[%s15563_s3 + $0x530] sm:$0xff]  }
 0x267   : > { %11372 = vmatpush3.bf16.msra.mxu1 %v12074_v12  ;;  %v9945_v12 = vcombine.low %v6482_v39, %v6496_v37  ;;  %v2018_v49 = vadd.f32 %v15594_v47, %v13855_v13  ;;  %v15595_v23 = vcombine.low %v14161_v52, %v14165_v40  ;;  %v5866_v1 = vsel %vm12915_vm10, %v5857_v41, %v5865_v21  ;;  %v6463_v40 = vld [vmem:[#allocation2 + $0x48] sm:$0xf]  ;;  %v12080_v39 = vld [vmem:[%s15563_s3 + $0x558] sm:$0xff]   ;;  %v14322_v21 = vld [vmem:[#allocation2 + $0x44] sm:$0x1] }
 0x268   : > { %11373 = vmatprep.subr.bf16.mxu1 %v12076_v54  ;;  %v5830_v9 = vsel %vm12915_vm10, %v14208_v28, %v15593_v50  ;;  %v5911_v28 = vrot.slane %v5910_v34, 4  ;;  %v2542_v27 = vadd.f32 %v15596_v29, %v2234_v10  ;;  %v9903_v13 = vcombine.low %v5866_v1, %v5884_v57  ;;  %v14311_v43 = vpop.f32.mrf.mxu1  ;;  %v12081_v10 = vld [vmem:[%s15563_s3 + $0x528] sm:$0xff]  }
 0x269   : > { %11312 = vmatpush3.bf16.msra.mxu0 %v12075_v17  ;;  %v9902_v3 = vcombine.low %v5830_v9, %v5848_v2  ;;  %v6461_v17 = vld [vmem:[#allocation2 + $0x40] sm:$0xf]  ;;  %v5901_v55 = vor.u32 %v5900_v8, %v5897_v15  ;;  %v6507_v52 = vshll.u32 %v14284_v42, 16  ;;  %v5919_v61 = vor.u32 %v5918_v38, %v5915_v62 }
 0x26a   : > { %11342 = vmatmul.mubr.bf16.gmra.mxu1 %v15595_v23  ;;  %11345 = vmatprep.subr.bf16.mxu0 %v12077_v0  ;;  %v6504_v37 = vor.u32 %v6503_v35, %v6500_v25  ;;  %v6517_v41 = vrot.slane %v6515_v7, 5  ;;  %v2754_v20 = vadd.f32 %v14152_v56, %v2542_v27  ;;  %v6526_v15 = vshrl.u32 %v6461_v17, 16  ;;  %v11055_v35 = vpop.f32.mrf.mxu1  ;;  %v12083_v7 = vld [vmem:[%s15563_s3 + $0x550] sm:$0xff]   ;;  %v12084_v23 = vld [vmem:[%s15563_s3 + $0x520] sm:$0xff]  }
 0x26b   : > { %11374 = vmatpush3.bf16.msra.mxu1 %v12076_v54  ;;  %11385 = vmatprep.mubr.bf16.mxu1 %v9945_v12  ;;  %v6514_v54 = vrot.slane %v6512_v22, 4  ;;  %v5902_v5 = vsel %vm12915_vm10, %v5893_v26, %v5901_v55  ;;  %v5920_v34 = vsel %vm12915_vm10, %v5911_v28, %v5919_v61  ;;  %v6529_v56 = vshll.u32 %v6461_v17, 16  ;;  %v6465_v26 = vld [vmem:[#allocation2 + $0x50] sm:$0xf]  ;;  %v14354_v27 = vld [vmem:[#allocation2 + $0x20] sm:$0xe] }
 0x26c   : > { %v11027_v2 = vpop.f32.mrf.mxu0  ;;  %11314 = vmatmul.mubr.bf16.vlgmr.msra.gmra.mxu0 %v9902_v3  ;;  %11375 = vmatprep.subr.bf16.mxu1 %v12078_v31  ;;  %v6540_v57 = vshrl.u32 %v6463_v40, 16  ;;  %v6521_v38 = vshll.u32 %v14316_v48, 16  ;;  %v14338_v50 = vrot.slane %v6504_v37, 4  ;;  %v14340_v9 = vrot.slane %v6507_v52, 5  ;;  %v12085_v52 = vld [vmem:[%s15563_s3 + $0x548] sm:$0xff]  }
 0x26d   : > { %v3206_v58 = vadd.f32 %v11027_v2, %v14137_v36  ;;  %11317 = vmatprep.mubr.bf16.mxu0 %v9903_v13  ;;  %11346 = vmatpush3.bf16.msra.mxu0 %v12077_v0  ;;  %v6543_v36 = vshll.u32 %v6463_v40, 16  ;;  %v2238_v0 = vadd.f32 %v14074_v19, %v2018_v49  ;;  %v6518_v19 = vor.u32 %v6517_v41, %v6514_v54  ;;  %v3398_v13 = vpop.f32.mrf.mxu1  ;;  %v14372_v54 = vld [vmem:[#allocation2 + $0x4c] sm:$0x1] }
 0x26e   : > { %v3173_v8 = vpop.f32.mrf.mxu0  ;;  %11347 = vmatprep.subr.bf16.mxu0 %v12079_v16  ;;  %v9904_v12 = vcombine.low %v5902_v5, %v5920_v34  ;;  %v6528_v3 = vrot.slane %v6526_v15, 4  ;;  %v6531_v1 = vrot.slane %v6529_v56, 5  ;;  %v6542_v28 = vrot.slane %v6540_v57, 4  ;;  %v12086_v15 = vld [vmem:[%s15563_s3 + $0x518] sm:$0xff]  }
 0x26f   : > { %v3204_v62 = vadd.f32 %v3173_v8, %v14150_v14  ;;  %11376 = vmatpush3.bf16.msra.mxu1 %v12078_v31  ;;  %v14333_v25 = vadd.f32 %v14247_v18, %v3206_v58  ;;  %v6535_v14 = vshll.u32 %v14322_v21, 16  ;;  %v2924_v18 = vadd.f32 %v14123_v30, %v2754_v20  ;;  %v12082_v30 = vld [vmem:[#allocation2 + $0x20] ss:$8 sps:$4 sm:$0xff]  }
 0x270   : > { %v11028_v22 = vpop.f32.mrf.mxu0  ;;  %11377 = vmatprep.subr.bf16.mxu1 %v12080_v39  ;;  %v6545_v17 = vrot.slane %v6543_v36, 5  ;;  %v14352_v29 = vrot.slane %v6521_v38, 5  ;;  %v14366_v40 = vrot.slane %v6518_v19, 4  ;;  %v6557_v41 = vshll.u32 %v6465_v26, 16  ;;  %v14374_v20 = vld [vmem:[#allocation2 + $0x28] sm:$0xe] }
 0x271   : > { %v3207_v31 = vadd.f32 %v11028_v22, %v14168_v46  ;;  %11348 = vmatpush3.bf16.msra.mxu0 %v12079_v16  ;;  %v14346_v47 = vadd.f32 %v14262_v4, %v3204_v62  ;;  %v2546_v46 = vadd.f32 %v14011_v11, %v2238_v0  ;;  %v6510_v11 = vsel %vm12769_vm5, %v14338_v50, %v14340_v9  ;;  %v12087_v62 = vld [vmem:[%s15563_s3 + $0x540] sm:$0xff]  }
 0x272   : > { %v3176_v49 = vpop.f32.mrf.mxu0  ;;  %11349 = vmatprep.subr.bf16.mxu0 %v12081_v10  ;;  %v14368_v2 = vrot.slane %v6535_v14, 5  ;;  %v6532_v8 = vor.u32 %v6531_v1, %v6528_v3  ;;  %v6955_v34 = vshll.u32 %v14354_v27, 16  ;;  %v6549_v38 = vshll.u32 %v14372_v54, 16 }
 0x273   : > { %v3205_v16 = vadd.f32 %v3176_v49, %v2924_v18  ;;  %11378 = vmatpush3.bf16.msra.mxu1 %v12080_v39  ;;  %v14357_v4 = vadd.f32 %v14286_v44, %v3207_v31  ;;  %v6467_v39 = vld [vmem:[#allocation2 + $0x58] sm:$0xf]  ;;  %v6554_v44 = vshrl.u32 %v6465_v26, 16  ;;  %v2758_v61 = vadd.f32 %v14299_v53, %v2546_v46  ;;  %v14395_v31 = vld [vmem:[#allocation2 + $0x24] sm:$0x3]  ;;  %v12088_v26 = vld [vmem:[%s15563_s3 + $0x510] sm:$0xff]  }
 0x274   : > { %v11031_v55 = vpop.f32.mrf.mxu0  ;;  %11318 = vmatmul.mubr.bf16.gmra.mxu0 %v9904_v12  ;;  %11379 = vmatprep.subr.bf16.mxu1 %v12083_v7  ;;  %v6546_v53 = vor.u32 %v6545_v17, %v6542_v28  ;;  %v6568_v56 = vshrl.u32 %v6467_v39, 16  ;;  %v6571_v57 = vshll.u32 %v6467_v39, 16  ;;  %v6970_v19 = vshrl.u32 %v14374_v20, 16  ;;  %v14404_v46 = vld [vmem:[#allocation2 + $0x2c] sm:$0x3] }
 0x275   : > { %v3210_v37 = vadd.f32 %v11031_v55, %v14189_v45  ;;  %11350 = vmatpush3.bf16.msra.mxu0 %v12081_v10  ;;  %11361 = vmatprep.mubr.bf16.mxu0 %v12082_v30  ;;  %v14377_v58 = vadd.f32 %v14311_v43, %v3205_v16  ;;  %v6952_v45 = vshrl.u32 %v14354_v27, 16  ;;  %v11056_v43 = vpop.f32.mrf.mxu1  ;;  %v6556_v22 = vrot.slane %v6554_v44, 4 }
 0x276   : > { %v3189_v5 = vpop.f32.mrf.mxu0  ;;  %11351 = vmatprep.subr.bf16.mxu0 %v12084_v23  ;;  %v6973_v14 = vshll.u32 %v14374_v20, 16  ;;  %v6533_v49 = vrot.slane %v6532_v8, 4  ;;  %v6547_v3 = vrot.slane %v6546_v53, 4  ;;  %v6957_v28 = vrot.slane %v6955_v34, 6  ;;  %v12090_v8 = vld [vmem:[%s15563_s3 + $0x508] sm:$0xff]  }
 0x277   : > { %v3208_v10 = vadd.f32 %v3189_v5, %v14203_v6  ;;  %11380 = vmatpush3.bf16.msra.mxu1 %v12083_v7  ;;  %v14385_v36 = vadd.f32 %v11055_v35, %v3210_v37  ;;  %v2928_v35 = vadd.f32 %v14238_v33, %v2758_v61  ;;  %v6559_v7 = vrot.slane %v6557_v41, 5  ;;  %v3401_v30 = vpop.f32.mrf.mxu1 }
 0x278   : > { %v11032_v0 = vpop.f32.mrf.mxu0  ;;  %11381 = vmatprep.subr.bf16.mxu1 %v12085_v52  ;;  %v6954_v1 = vrot.slane %v6952_v45, 5  ;;  %v6570_v33 = vrot.slane %v6568_v56, 4  ;;  %v6961_v55 = vshrl.u32 %v14395_v31, 16  ;;  %v6964_v39 = vshll.u32 %v14395_v31, 16  ;;  %v14425_v45 = vld [vmem:[#allocation2 + $0x5c] sm:$0x1] }
 0x279   : > { %v3211_v6 = vadd.f32 %v11032_v0, %v14215_v24  ;;  %11352 = vmatpush3.bf16.msra.mxu0 %v12084_v23  ;;  %v14397_v18 = vadd.f32 %v3398_v13, %v3208_v10  ;;  %v14402_v24 = vld [vmem:[#allocation2 + $0x54] sm:$0x1]  ;;  %v6573_v23 = vrot.slane %v6571_v57, 5  ;;  %v12089_v13 = vld [vmem:[%s15563_s3 + $0x5f8] sm:$0xff]   ;;  %v6972_v44 = vrot.slane %v6970_v19, 5 }
 0x27a   : > { %v3192_v12 = vpop.f32.mrf.mxu0  ;;  %11353 = vmatprep.subr.bf16.mxu0 %v12086_v15  ;;  %v6524_v61 = vsel %vm12769_vm5, %v14366_v40, %v14352_v29  ;;  %v6551_v37 = vrot.slane %v6549_v38, 5  ;;  %v6560_v41 = vor.u32 %v6559_v7, %v6556_v22  ;;  %v6538_v53 = vsel %vm12769_vm5, %v6533_v49, %v14368_v2  ;;  %v12091_v57 = vld [vmem:[%s15563_s3 + $0x5f0] sm:$0xff]   ;;  %v12093_v49 = vld [vmem:[%s15563_s3 + $0x5e8] sm:$0xff]  }
 0x27b   : > { %v3209_v17 = vadd.f32 %v3192_v12, %v2928_v35  ;;  %11382 = vmatpush3.bf16.msra.mxu1 %v12085_v52  ;;  %v14406_v16 = vadd.f32 %v11056_v43, %v3211_v6  ;;  %v6975_v52 = vrot.slane %v6973_v14, 6  ;;  %v6979_v34 = vshrl.u32 %v14404_v46, 16  ;;  %v14446_v35 = vld [vmem:[#allocation2 + $0x30] sm:$0xe] }
 0x27c   : > { %11383 = vmatprep.subr.bf16.mxu1 %v12087_v62  ;;  %v6982_v29 = vshll.u32 %v14404_v46, 16  ;;  %v9946_v40 = vcombine.low %v6510_v11, %v6524_v61  ;;  %v6563_v10 = vshll.u32 %v14402_v24, 16  ;;  %v6574_v56 = vor.u32 %v6573_v23, %v6570_v33  ;;  %v12092_v11 = vld [vmem:[%s15563_s3 + $0x500] sm:$0xff]   ;;  %v12095_v23 = vld [vmem:[%s15563_s3 + $0x5b8] sm:$0xff]  }
 0x27d   : > { %11354 = vmatpush3.bf16.msra.mxu0 %v12086_v15  ;;  %v14417_v5 = vadd.f32 %v3401_v30, %v3209_v17  ;;  %v6958_v15 = vor.u32 %v6957_v28, %v6954_v1  ;;  %v6552_v2 = vsel %vm12769_vm5, %v6547_v3, %v6551_v37  ;;  %v6963_v43 = vrot.slane %v6961_v55, 5  ;;  %v14461_v55 = vld [vmem:[#allocation2 + $0x34] sm:$0x3] }
 0x27e   : > { %11355 = vmatprep.subr.bf16.mxu0 %v12088_v26  ;;  %v6966_v0 = vrot.slane %v6964_v39, 6  ;;  %v9947_v38 = vcombine.low %v6538_v53, %v6552_v2  ;;  %v6561_v22 = vrot.slane %v6560_v41, 4  ;;  %v6577_v50 = vshll.u32 %v14425_v45, 16  ;;  %v12094_v41 = vld [vmem:[#allocation2 + $0x30] ss:$8 sps:$4 sm:$0xff]   ;;  %v12097_v53 = vld [vmem:[%s15563_s3 + $0x5e0] sm:$0xff]  }
 0x27f   : > { %11384 = vmatpush3.bf16.msra.mxu1 %v12087_v62  ;;  %v6976_v62 = vor.u32 %v6975_v52, %v6972_v44  ;;  %v6959_v19 = vrot.slane %v6958_v15, 4  ;;  %v6981_v14 = vrot.slane %v6979_v34, 5  ;;  %v6984_v6 = vrot.slane %v6982_v29, 6  ;;  %v14466_v52 = vld [vmem:[#allocation2 + $0x38] sm:$0xe] }
 0x280   : > { %11417 = vmatprep.subr.bf16.mxu1 %v12089_v13  ;;  %v6565_v7 = vrot.slane %v6563_v10, 5  ;;  %v6575_v12 = vrot.slane %v6574_v56, 4  ;;  %v6967_v3 = vor.u32 %v6966_v0, %v6963_v43  ;;  %v6579_v17 = vrot.slane %v6577_v50, 5  ;;  %v14478_v10 = vld [vmem:[#allocation2 + $0x40] sm:$0xe]  ;;  %v12098_v56 = vld [vmem:[%s15563_s3 + $0x5b0] sm:$0xff]  }
 0x281   : > { %11356 = vmatpush3.bf16.msra.mxu0 %v12088_v26  ;;  %v6977_v1 = vrot.slane %v6976_v62, 4  ;;  %v6988_v33 = vshrl.u32 %v14446_v35, 16  ;;  %v6991_v39 = vshll.u32 %v14446_v35, 16  ;;  %v9957_v15 = vrot.slane %v14354_v27, 9  ;;  %v12099_v50 = vld [vmem:[%s15563_s3 + $0x5d8] sm:$0xff]  }
 0x282   : > { %v14441_v9 = vpop.f32.mrf.mxu1  ;;  %11386 = vmatmul.mubr.bf16.vlgmr.msra.gmra.mxu1 %v9946_v40  ;;  %11357 = vmatprep.subr.bf16.mxu0 %v12090_v8  ;;  %v6566_v28 = vsel %vm12769_vm5, %v6561_v22, %v6565_v7  ;;  %v6968_v30 = vsel %vm12915_vm10, %v6959_v19, %v6967_v3  ;;  %v6580_v44 = vsel %vm12769_vm5, %v6575_v12, %v6579_v17  ;;  %v6760_v32 = vrot.slane %v14185_v60, 5  ;;  %v12096_v60 = vld [vmem:[#allocation2 + $0x40] ss:$8 sps:$4 sm:$0xff]  }
 0x283   : > { %11389 = vmatprep.mubr.bf16.mxu1 %v9947_v38  ;;  %11418 = vmatpush3.bf16.msra.mxu1 %v12089_v13  ;;  %v6985_v13 = vor.u32 %v6984_v6, %v6981_v14  ;;  %v9948_v37 = vcombine.low %v6566_v28, %v6580_v44  ;;  %v6990_v29 = vrot.slane %v6988_v33, 5  ;;  %v6997_v40 = vshrl.u32 %v14461_v55, 16  ;;  %v14502_v12 = vld [vmem:[#allocation2 + $0x48] sm:$0xe] }
 0x284   : > { %v14448_v26 = vpop.f32.mrf.mxu1  ;;  %11419 = vmatprep.subr.bf16.mxu1 %v12091_v57  ;;  %v6993_v2 = vrot.slane %v6991_v39, 6  ;;  %v7006_v27 = vshrl.u32 %v14466_v52, 16  ;;  %v7009_v43 = vshll.u32 %v14466_v52, 16  ;;  %v9958_v0 = vrot.slane %v14374_v20, 9  ;;  %v12101_v3 = vld [vmem:[%s15563_s3 + $0x5a8] sm:$0xff]  }
 0x285   : > { %11358 = vmatpush3.bf16.msra.mxu0 %v12090_v8  ;;  %v6986_v8 = vsel %vm12915_vm10, %v6977_v1, %v6985_v13  ;;  %v6764_v62 = vrot.slane %v14213_v59, 5  ;;  %v7024_v19 = vshrl.u32 %v14478_v10, 16  ;;  %v7027_v14 = vshll.u32 %v14478_v10, 16  ;;  %v14513_v13 = vld [vmem:[#allocation2 + $0x44] sm:$0x3] }
 0x286   : > { %11359 = vmatprep.subr.bf16.mxu0 %v12092_v11  ;;  %v14468_v61 = vpop.f32.mrf.mxu1  ;;  %v9977_v34 = vcombine.low %v6968_v30, %v6986_v8  ;;  %v6761_v20 = vsel %vm12930_vm11, %v9957_v15, %v6760_v32  ;;  %v14500_v7 = vrot.slane %v6997_v40, 5  ;;  %v6994_v1 = vor.u32 %v6993_v2, %v6990_v29  ;;  %v12100_v32 = vld [vmem:[#allocation2 + $0x50] ss:$8 sps:$4 sm:$0xff]   ;;  %v12103_v2 = vld [vmem:[%s15563_s3 + $0x5a0] sm:$0xff]  }
 0x287   : > { %11420 = vmatpush3.bf16.msra.mxu1 %v12091_v57  ;;  %v7000_v57 = vshll.u32 %v14461_v55, 16  ;;  %v7008_v17 = vrot.slane %v7006_v27, 5  ;;  %v7026_v8 = vrot.slane %v7024_v19, 5  ;;  %v7045_v15 = vshll.u32 %v14502_v12, 16 }
 0x288   : > { %11421 = vmatprep.subr.bf16.mxu1 %v12093_v49  ;;  %v14488_v38 = vpop.f32.mrf.mxu1 }
 0x289   : > { %11360 = vmatpush3.bf16.msra.mxu0 %v12092_v11  ;;  %v14493_v11 = vld [vmem:[#allocation2 + $0x3c] sm:$0x3]  ;;  %v14507_v28 = vrot.slane %v7000_v57, 6  ;;  %v14530_v57 = vrot.slane %v6994_v1, 4  ;;  %v14550_v1 = vld [vmem:[#allocation2 + $0x58] sm:$0xe] }
 0x28a   : > { %11390 = vmatmul.mubr.bf16.gmra.mxu1 %v9948_v37  ;;  %11393 = vmatprep.subr.bf16.mxu0 %v12095_v23  ;;  %15597 = vst [vmem:[#allocation9_spill] sm:$0xff] %v14493_v11  ;;  %v7015_v30 = vshrl.u32 %v14493_v11, 16  ;;  %v11103_v44 = vpop.f32.mrf.mxu1 }
 0x28b   : > { %11422 = vmatpush3.bf16.msra.mxu1 %v12093_v49  ;;  %11433 = vmatprep.mubr.bf16.mxu1 %v9977_v34 }
 0x28c   : > { %v11075_v22 = vpop.f32.mrf.mxu0  ;;  %11362 = vmatmul.mubr.bf16.vlgmr.msra.gmra.mxu0 %v12094_v41  ;;  %11423 = vmatprep.subr.bf16.mxu1 %v12097_v53  ;;  %v12102_v41 = vld [vmem:[%s15563_s3 + $0x5d0] sm:$0xff]   ;;  %v3912_v19 = vpop.f32.mrf.mxu1 }
 0x28d   : > { %v3720_v6 = vadd.f32 %v11075_v22, %v14333_v25  ;;  %11365 = vmatprep.mubr.bf16.mxu0 %v12096_v60  ;;  %11394 = vmatpush3.bf16.msra.mxu0 %v12095_v23  ;;  %v7011_v25 = vrot.slane %v7009_v43, 6  ;;  %v6765_v23 = vsel %vm12930_vm11, %v9958_v0, %v6764_v62  ;;  %v14540_v0 = vld [vmem:[#allocation2 + $0x4c] sm:$0x3]  ;;  %v7033_v62 = vshrl.u32 %v14513_v13, 16 }
 0x28e   : > { %v3687_v49 = vpop.f32.mrf.mxu0  ;;  %11395 = vmatprep.subr.bf16.mxu0 %v12098_v56  ;;  %v9965_v29 = vcombine.low %v6761_v20, %v6765_v23  ;;  %15599 = vst [vmem:[#allocation10_spill] sm:$0xff] %v14540_v0 }
 0x28f   : > { %v3718_v33 = vadd.f32 %v3687_v49, %v14346_v47  ;;  %11424 = vmatpush3.bf16.msra.mxu1 %v12097_v53  ;;  %v14516_v39 = vadd.f32 %v14441_v9, %v3720_v6  ;;  %v7029_v47 = vrot.slane %v7027_v14, 6  ;;  %v7042_v53 = vshrl.u32 %v14502_v12, 16  ;;  %v12104_v6 = vld [vmem:[%s15563_s3 + $0x5c8] sm:$0xff]  }
 0x290   : > { %v11076_v37 = vpop.f32.mrf.mxu0  ;;  %11425 = vmatprep.subr.bf16.mxu1 %v12099_v50  ;;  %v7012_v43 = vor.u32 %v7011_v25, %v7008_v17  ;;  %v7047_v49 = vrot.slane %v7045_v15, 6  ;;  %v7081_v15 = vshll.u32 %v14550_v1, 16 }
 0x291   : > { %v3721_v34 = vadd.f32 %v11076_v37, %v14357_v4  ;;  %11396 = vmatpush3.bf16.msra.mxu0 %v12098_v56  ;;  %v14525_v9 = vadd.f32 %v14448_v26, %v3718_v33  ;;  %v7018_v4 = vshll.u32 %v14493_v11, 16  ;;  %v14535_v56 = vld [vmem:[#allocation2 + $0x50] sm:$0xe]  ;;  %v14538_v26 = vrot.slane %v7015_v30, 5  ;;  %v12105_v30 = vld [vmem:[%s15563_s3 + $0x598] sm:$0xff]  }
 0x292   : > { %v3690_v40 = vpop.f32.mrf.mxu0  ;;  %11397 = vmatprep.subr.bf16.mxu0 %v12101_v3  ;;  %v7030_v20 = vor.u32 %v7029_v47, %v7026_v8  ;;  %v7063_v25 = vshll.u32 %v14535_v56, 16  ;;  %v7013_v37 = vrot.slane %v7012_v43, 4  ;;  %v7051_v47 = vshrl.u32 %v14540_v0, 16 }
 0x293   : > { %v3719_v60 = vadd.f32 %v3690_v40, %v14377_v58  ;;  %11426 = vmatpush3.bf16.msra.mxu1 %v12099_v50  ;;  %v14544_v22 = vadd.f32 %v14468_v61, %v3721_v34  ;;  %v7036_v58 = vshll.u32 %v14513_v13, 16  ;;  %v7044_v50 = vrot.slane %v7042_v53, 5  ;;  %v14564_v53 = vld [vmem:[#allocation2 + $0x54] sm:$0x3]  ;;  %v12106_v40 = vld [vmem:[%s15563_s3 + $0x5c0] sm:$0xff]  }
 0x294   : > { %v11079_v14 = vpop.f32.mrf.mxu0  ;;  %11366 = vmatmul.mubr.bf16.gmra.mxu0 %v12100_v32  ;;  %11427 = vmatprep.subr.bf16.mxu1 %v12102_v41  ;;  %v7060_v61 = vshrl.u32 %v14535_v56, 16  ;;  %v7020_v8 = vrot.slane %v7018_v4, 6  ;;  %v11104_v32 = vpop.f32.mrf.mxu1  ;;  %v7031_v43 = vrot.slane %v7030_v20, 4  ;;  %v7035_v4 = vrot.slane %v7033_v62, 5 }
 0x295   : > { %v3724_v17 = vadd.f32 %v11079_v14, %v14385_v36  ;;  %11398 = vmatpush3.bf16.msra.mxu0 %v12101_v3  ;;  %11409 = vmatprep.mubr.bf16.mxu0 %v9965_v29  ;;  %v14556_v33 = vadd.f32 %v14488_v38, %v3719_v60  ;;  %v7054_v36 = vshll.u32 %v14540_v0, 16  ;;  %v7078_v38 = vshrl.u32 %v14550_v1, 16  ;;  %v14574_v14 = vld [vmem:[#allocation2 + $0x5c] sm:$0x3]  ;;  %v12107_v0 = vld [vmem:[%s15563_s3 + $0x590] sm:$0xff]  }
 0x296   : > { %v3703_v23 = vpop.f32.mrf.mxu0  ;;  %11399 = vmatprep.subr.bf16.mxu0 %v12103_v2  ;;  %v7038_v60 = vrot.slane %v7036_v58, 6  ;;  %v7065_v27 = vrot.slane %v7063_v25, 6  ;;  %v7053_v11 = vrot.slane %v7051_v47, 5  ;;  %v7069_v62 = vshrl.u32 %v14564_v53, 16 }
 0x297   : > { %v3722_v3 = vadd.f32 %v3703_v23, %v14397_v18  ;;  %11428 = vmatpush3.bf16.msra.mxu1 %v12102_v41  ;;  %v14568_v34 = vadd.f32 %v11103_v44, %v3724_v17  ;;  %v7048_v18 = vor.u32 %v7047_v49, %v7044_v50  ;;  %v7062_v23 = vrot.slane %v7060_v61, 5 }
 0x298   : > { %v11080_v29 = vpop.f32.mrf.mxu0  ;;  %11429 = vmatprep.subr.bf16.mxu1 %v12104_v6  ;;  %v7056_v20 = vrot.slane %v7054_v36, 6  ;;  %v7072_v58 = vshll.u32 %v14564_v53, 16  ;;  %v7083_v50 = vrot.slane %v7081_v15, 6  ;;  %v15600_v61 = vor.u32 %v14507_v28, %v14500_v7  ;;  %v12108_v7 = vld [vmem:[%s15563_s3 + $0x588] sm:$0xff]  }
 0x299   : > { %v3725_v41 = vadd.f32 %v11080_v29, %v14406_v16  ;;  %11400 = vmatpush3.bf16.msra.mxu0 %v12103_v2  ;;  %v14576_v44 = vadd.f32 %v3912_v19, %v3722_v3  ;;  %v7080_v2 = vrot.slane %v7078_v38, 5  ;;  %v3915_v19 = vpop.f32.mrf.mxu1  ;;  %v7021_v47 = vor.u32 %v7020_v8, %v14538_v26 }
 0x29a   : > { %v3706_v17 = vpop.f32.mrf.mxu0  ;;  %11401 = vmatprep.subr.bf16.mxu0 %v12105_v30  ;;  %v7004_v25 = vsel %vm12915_vm10, %v14530_v57, %v15600_v61  ;;  %v7039_v36 = vor.u32 %v7038_v60, %v7035_v4  ;;  %v7049_v3 = vrot.slane %v7048_v18, 4  ;;  %v7090_v38 = vshll.u32 %v14574_v14, 16 }
 0x29b   : > { %v3723_v16 = vadd.f32 %v3706_v17, %v14417_v5  ;;  %11430 = vmatpush3.bf16.msra.mxu1 %v12104_v6  ;;  %v14584_v49 = vadd.f32 %v11104_v32, %v3725_v41  ;;  %v7066_v5 = vor.u32 %v7065_v27, %v7062_v23  ;;  %v7087_v6 = vshrl.u32 %v14574_v14, 16 }
 0x29c   : > { %11431 = vmatprep.subr.bf16.mxu1 %v12106_v40  ;;  %v7040_v28 = vsel %vm12915_vm10, %v7031_v43, %v7039_v36  ;;  %v7057_v57 = vor.u32 %v7056_v20, %v7053_v11  ;;  %v7022_v26 = vsel %vm12915_vm10, %v7013_v37, %v7021_v47  ;;  %v7071_v27 = vrot.slane %v7069_v62, 5  ;;  %v12109_v11 = vld [vmem:[%s15563_s3 + $0x580] sm:$0xff]  }
 0x29d   : > { %11402 = vmatpush3.bf16.msra.mxu0 %v12105_v30  ;;  %v14595_v15 = vadd.f32 %v3915_v19, %v3723_v16  ;;  %v7074_v30 = vrot.slane %v7072_v58, 6  ;;  %v7084_v8 = vor.u32 %v7083_v50, %v7080_v2  ;;  %v9978_v32 = vcombine.low %v7004_v25, %v7022_v26  ;;  %v7248_v47 = vld [vmem:[#allocation2 + $0x20] sm:$0xc] }
 0x29e   : > { %11403 = vmatprep.subr.bf16.mxu0 %v12107_v0  ;;  %v7058_v29 = vsel %vm12915_vm10, %v7049_v3, %v7057_v57  ;;  %v7067_v60 = vrot.slane %v7066_v5, 4  ;;  %v7089_v18 = vrot.slane %v7087_v6, 5  ;;  %v7092_v41 = vrot.slane %v7090_v38, 6  ;;  %v7249_v6 = vld [vmem:[#allocation2 + $0x28] sm:$0xc] }
 0x29f   : > { %11432 = vmatpush3.bf16.msra.mxu1 %v12106_v40  ;;  %v9979_v4 = vcombine.low %v7040_v28, %v7058_v29  ;;  %v7075_v37 = vor.u32 %v7074_v30, %v7071_v27  ;;  %v7085_v40 = vrot.slane %v7084_v8, 4  ;;  %v9959_v43 = vrot.slane %v14446_v35, 9  ;;  %v12110_v35 = vld [vmem:[%s15563_s3 + $0x638] sm:$0xff]  }
 0x2a0   : > { %v6768_v17 = vrot.slane %v14284_v42, 5  ;;  %v6776_v62 = vrot.slane %v14322_v21, 5  ;;  %v7093_v16 = vor.u32 %v7092_v41, %v7089_v18  ;;  %v9960_v2 = vrot.slane %v14466_v52, 9 }
 0x2a1   : > { %11404 = vmatpush3.bf16.msra.mxu0 %v12107_v0  ;;  %v9961_v0 = vrot.slane %v14478_v10, 9  ;;  %v7076_v58 = vsel %vm12915_vm10, %v7067_v60, %v7075_v37  ;;  %v6772_v50 = vrot.slane %v14316_v48, 5  ;;  %v9962_v42 = vrot.slane %v14502_v12, 9 }
 0x2a2   : > { %v11147_v23 = vpop.f32.mrf.mxu1  ;;  %11434 = vmatmul.mubr.bf16.vlgmr.msra.gmra.mxu1 %v9978_v32  ;;  %11405 = vmatprep.subr.bf16.mxu0 %v12108_v7  ;;  %v6780_v10 = vrot.slane %v14372_v54, 5  ;;  %v7094_v21 = vsel %vm12915_vm10, %v7085_v40, %v7093_v16  ;;  %v6769_v19 = vsel %vm12930_vm11, %v9959_v43, %v6768_v17  ;;  %v12111_v54 = vld [vmem:[%s15563_s3 + $0x630] sm:$0xff]   ;;  %v9963_v3 = vrot.slane %v14535_v56, 9 }
 0x2a3   : > { %11437 = vmatprep.mubr.bf16.mxu1 %v9979_v4  ;;  %v9980_v25 = vcombine.low %v7076_v58, %v7094_v21  ;;  %v6777_v48 = vsel %vm12930_vm11, %v9961_v0, %v6776_v62  ;;  %v6773_v52 = vsel %vm12930_vm11, %v9960_v2, %v6772_v50  ;;  %v6784_v5 = vrot.slane %v14402_v24, 5  ;;  %v12112_v24 = vld [vmem:[%s15563_s3 + $0x628] sm:$0xff]   ;;  %v12114_v62 = vld [vmem:[%s15563_s3 + $0x618] sm:$0xff]  }
 0x2a4   : > { %v4347_v20 = vpop.f32.mrf.mxu1  ;;  %v9966_v12 = vcombine.low %v6769_v19, %v6773_v52  ;;  %v6781_v63 = vsel %vm12930_vm11, %v9962_v42, %v6780_v10  ;;  %v9989_v28 = vrot.slane %v7248_v47, 10  ;;  %v7274_v57 = vrot.slane %v14395_v31, 6  ;;  %v12115_v42 = vld [vmem:[%s15563_s3 + $0x610] sm:$0xff]  }
 0x2a5   : > { %11406 = vmatpush3.bf16.msra.mxu0 %v12108_v7  ;;  %v9967_v36 = vcombine.low %v6777_v48, %v6781_v63  ;;  %v9964_v27 = vrot.slane %v14550_v1, 9  ;;  %v6788_v30 = vrot.slane %v14425_v45, 5  ;;  %v9990_v56 = vrot.slane %v7249_v6, 10  ;;  %v12117_v48 = vld [vmem:[%s15563_s3 + $0x600] sm:$0xff]  }
 0x2a6   : > { %11407 = vmatprep.subr.bf16.mxu0 %v12109_v11  ;;  %v11148_v61 = vpop.f32.mrf.mxu1  ;;  %v7278_v32 = vrot.slane %v14404_v46, 6  ;;  %v6785_v31 = vsel %vm12930_vm11, %v9963_v3, %v6784_v5  ;;  %v7275_v45 = vsel %vm13068_vm14, %v9989_v28, %v7274_v57  ;;  %v7282_v47 = vrot.slane %v14461_v55, 6  ;;  %v15601_v5 = vld [vmem:[#allocation9_spill] sm:$0xff] }
 0x2a7   : > { %v6789_v18 = vsel %vm12930_vm11, %v9964_v27, %v6788_v30  ;;  %v7286_v6 = vrot.slane %v15601_v5, 6  ;;  %v7254_v27 = vld [vmem:[#allocation2 + $0x50] sm:$0xc] }
 0x2a8   : > { %v4350_v38 = vpop.f32.mrf.mxu1 }
 0x2a9   : > { %11408 = vmatpush3.bf16.msra.mxu0 %v12109_v11  ;;  %v12113_v11 = vld [vmem:[%s15563_s3 + $0x620] sm:$0xff]  }
 0x2aa   : > { %11438 = vmatmul.mubr.bf16.gmra.mxu1 %v9980_v25  ;;  %11441 = vmatprep.subr.bf16.mxu0 %v12110_v35  ;;  %v11151_v4 = vpop.f32.mrf.mxu1  ;;  %v7252_v25 = vld [vmem:[#allocation2 + $0x40] sm:$0xc] }
 0x2ac   : > { %v11123_v7 = vpop.f32.mrf.mxu0  ;;  %11410 = vmatmul.mubr.bf16.vlgmr.msra.gmra.mxu0 %v9966_v12  ;;  %v4363_v43 = vpop.f32.mrf.mxu1  ;;  %v7253_v12 = vld [vmem:[#allocation2 + $0x48] sm:$0xc] }
 0x2ad   : > { %v4099_v26 = vadd.f32 %v11123_v7, %v14516_v39  ;;  %11413 = vmatprep.mubr.bf16.mxu0 %v9967_v36  ;;  %11442 = vmatpush3.bf16.msra.mxu0 %v12110_v35  ;;  %v7290_v36 = vrot.slane %v14513_v13, 6  ;;  %v15602_v7 = vld [vmem:[#allocation10_spill] sm:$0xff] }
 0x2ae   : > { %v4066_v8 = vpop.f32.mrf.mxu0  ;;  %11443 = vmatprep.subr.bf16.mxu0 %v12111_v54  ;;  %v11152_v16 = vpop.f32.mrf.mxu1  ;;  %v7294_v28 = vrot.slane %v15602_v7, 6 }
 0x2af   : > { %v4097_v29 = vadd.f32 %v4066_v8, %v14525_v9  ;;  %v14648_v39 = vadd.f32 %v11147_v23, %v4099_v26  ;;  %v9968_v9 = vcombine.low %v6785_v31, %v6789_v18  ;;  %v7279_v23 = vsel %vm13068_vm14, %v9990_v56, %v7278_v32 }
 0x2b0   : > { %v11124_v1 = vpop.f32.mrf.mxu0  ;;  %v9997_v40 = vcombine.low %v7275_v45, %v7279_v23  ;;  %v9995_v32 = vrot.slane %v7254_v27, 10  ;;  %v12119_v27 = vld [vmem:[%s15565_s5 + $0x38] sm:$0xff]  }
 0x2b1   : > { %v4100_v60 = vadd.f32 %v11124_v1, %v14544_v22  ;;  %11444 = vmatpush3.bf16.msra.mxu0 %v12111_v54  ;;  %v14655_v41 = vadd.f32 %v4347_v20, %v4097_v29  ;;  %v9993_v54 = vrot.slane %v7252_v25, 10  ;;  %v7298_v29 = vrot.slane %v14564_v53, 6 }
 0x2b2   : > { %v4069_v46 = vpop.f32.mrf.mxu0  ;;  %11445 = vmatprep.subr.bf16.mxu0 %v12112_v24 }
 0x2b3   : > { %v4098_v37 = vadd.f32 %v4069_v46, %v14556_v33  ;;  %v14663_v22 = vadd.f32 %v11148_v61, %v4100_v60  ;;  %v7250_v61 = vld [vmem:[#allocation2 + $0x30] sm:$0xc]  ;;  %v7291_v55 = vsel %vm13068_vm14, %v9993_v54, %v7290_v36  ;;  %v7302_v60 = vrot.slane %v14574_v14, 6 }
 0x2b4   : > { %v11127_v59 = vpop.f32.mrf.mxu0  ;;  %11414 = vmatmul.mubr.bf16.gmra.mxu0 %v9968_v9  ;;  %v9991_v52 = vrot.slane %v7250_v61, 10  ;;  %v7299_v9 = vsel %vm13068_vm14, %v9995_v32, %v7298_v29  ;;  %v12121_v32 = vld [vmem:[%s15565_s5 + $0x30] sm:$0xff]  }
 0x2b5   : > { %v4103_v17 = vadd.f32 %v11127_v59, %v14568_v34  ;;  %11446 = vmatpush3.bf16.msra.mxu0 %v12112_v24  ;;  %11457 = vmatprep.mubr.bf16.mxu0 %v9997_v40  ;;  %v14666_v20 = vadd.f32 %v4350_v38, %v4098_v37  ;;  %v9994_v38 = vrot.slane %v7253_v12, 10  ;;  %v7255_v24 = vld [vmem:[#allocation2 + $0x58] sm:$0xc] }
 0x2b6   : > { %v4082_v0 = vpop.f32.mrf.mxu0  ;;  %11447 = vmatprep.subr.bf16.mxu0 %v12113_v11  ;;  %v7283_v57 = vsel %vm13068_vm14, %v9991_v52, %v7282_v47  ;;  %v9996_v45 = vrot.slane %v7255_v24, 10 }
 0x2b7   : > { %v4101_v33 = vadd.f32 %v4082_v0, %v14576_v44  ;;  %v14672_v58 = vadd.f32 %v11151_v4, %v4103_v17  ;;  %v4366_v44 = vpop.f32.mrf.mxu1  ;;  %v7295_v8 = vsel %vm13068_vm14, %v9994_v38, %v7294_v28 }
 0x2b8   : > { %v11128_v2 = vpop.f32.mrf.mxu0  ;;  %v9999_v56 = vcombine.low %v7291_v55, %v7295_v8  ;;  %v12118_v55 = vld [vmem:[%s15565_s5 + $0x78] sm:$0xff]  }
 0x2b9   : > { %v4104_v50 = vadd.f32 %v11128_v2, %v14584_v49  ;;  %11448 = vmatpush3.bf16.msra.mxu0 %v12113_v11  ;;  %v14675_v34 = vadd.f32 %v4363_v43, %v4101_v33  ;;  %v12116_v49 = vld [vmem:[%s15563_s3 + $0x608] sm:$0xff]  }
 0x2ba   : > { %v4085_v35 = vpop.f32.mrf.mxu0  ;;  %11449 = vmatprep.subr.bf16.mxu0 %v12114_v62 }
 0x2bb   : > { %v4102_v10 = vadd.f32 %v4085_v35, %v14595_v15  ;;  %v14681_v21 = vadd.f32 %v11152_v16, %v4104_v50  ;;  %v7251_v15 = vld [vmem:[#allocation2 + $0x38] sm:$0xc] }
 0x2bc   : > { %v9992_v3 = vrot.slane %v7251_v15, 10 }
 0x2bd   : > { %11450 = vmatpush3.bf16.msra.mxu0 %v12114_v62  ;;  %v14683_v19 = vadd.f32 %v4366_v44, %v4102_v10 }
 0x2be   : > { %11451 = vmatprep.subr.bf16.mxu0 %v12115_v42  ;;  %v7287_v13 = vsel %vm13068_vm14, %v9992_v3, %v7286_v6 }
 0x2bf   : > { %v9998_v30 = vcombine.low %v7283_v57, %v7287_v13 }
 0x2c1   : > { %11452 = vmatpush3.bf16.msra.mxu0 %v12115_v42 }
 0x2c2   : > { %11453 = vmatprep.subr.bf16.mxu0 %v12116_v49  ;;  %v11195_v63 = vpop.f32.mrf.mxu1 }
 0x2c4   : > { %v4861_v26 = vpop.f32.mrf.mxu1 }
 0x2c5   : > { %11454 = vmatpush3.bf16.msra.mxu0 %v12116_v49 }
 0x2c6   : > { %11455 = vmatprep.subr.bf16.mxu0 %v12117_v48  ;;  %v14704_v31 = vpop.f32.mrf.mxu1 }
 0x2c8   : > { %v14711_v11 = vpop.f32.mrf.mxu1 }
 0x2c9   : > { %11456 = vmatpush3.bf16.msra.mxu0 %v12117_v48 }
 0x2cc   : > { %v11171_v4 = vpop.f32.mrf.mxu0  ;;  %11458 = vmatmul.mubr.bf16.vlgmr.msra.gmra.mxu0 %v9998_v30  ;;  %v15574_v30 = vmov 0.0  }
 0x2cd   : > { %v4589_v1 = vadd.f32 %v11171_v4, %v14648_v39  ;;  %11461 = vmatprep.mubr.bf16.mxu0 %v9999_v56  ;;  %v7303_v39 = vsel %vm13068_vm14, %v9996_v45, %v7302_v60  ;;  %11465 = vmatprep.subr.bf16.mxu1 %v15574_v30  ;;  %v12120_v56 = vld [vmem:[%s15565_s5 + $0x70] sm:$0xff]   ;;  %v12122_v4 = vld [vmem:[%s15565_s5 + $0x68] sm:$0xff]  }
 0x2ce   : > { %v4556_v18 = vpop.f32.mrf.mxu0  ;;  %v10000_v59 = vcombine.low %v7299_v9, %v7303_v39  ;;  %11485 = vmatprep.subr.bf16.mxu0 %v15574_v30  ;;  %11466 = vmatpush3.bf16.msra.mxu1 %v12118_v55  ;;  %v12125_v9 = vld [vmem:[%s15565_s5 + $0x20] sm:$0xff]   ;;  %v12127_v39 = vld [vmem:[%s15565_s5 + $0x18] sm:$0xff]  }
 0x2cf   : > { %v4587_v46 = vadd.f32 %v4556_v18, %v14655_v41  ;;  %v4894_v23 = vadd.f32 %v11195_v63, %v4589_v1  ;;  %v11199_v41 = vpop.f32.mrf.mxu1  ;;  %11486 = vmatpush3.bf16.msra.mxu0 %v12119_v27  ;;  %11467 = vmatprep.subr.bf16.mxu1 %v15574_v30  ;;  %v12123_v1 = vld [vmem:[%s15565_s5 + $0x28] sm:$0xff]  }
 0x2d0   : > { %v11172_v53 = vpop.f32.mrf.mxu0  ;;  %11487 = vmatprep.subr.bf16.mxu0 %v15574_v30  ;;  %11481 = vmatprep.mubr.msk.bf16.mxu1 %vm12324_vm15, %v15574_v30 }
 0x2d1   : > { %v14714_v37 = vadd.f32 %v11172_v53, %v14663_v22  ;;  %v4892_v40 = vadd.f32 %v4861_v26, %v4587_v46  ;;  %v4877_v22 = vpop.f32.mrf.mxu1  ;;  %v12124_v46 = vld [vmem:[%s15565_s5 + $0x60] sm:$0xff]   ;;  %v12126_v53 = vld [vmem:[%s15565_s5 + $0x58] sm:$0xff]  }
 0x2d2   : > { %v4559_v43 = vpop.f32.mrf.mxu0  ;;  %11468 = vmatpush3.bf16.msra.mxu1 %v12120_v56 }
 0x2d3   : > { %v14719_v14 = vadd.f32 %v4559_v43, %v14666_v20  ;;  %v14741_v15 = vpop.f32.mrf.mxu1  ;;  %11488 = vmatpush3.bf16.msra.mxu0 %v12121_v32  ;;  %11469 = vmatprep.subr.bf16.mxu1 %v15574_v30 }
 0x2d4   : > { %v11175_v17 = vpop.f32.mrf.mxu0  ;;  %11462 = vmatmul.mubr.bf16.gmra.mxu0 %v10000_v59  ;;  %11489 = vmatprep.subr.bf16.mxu0 %v15574_v30  ;;  %v12128_v59 = vld [vmem:[%s15565_s5 + $0x50] sm:$0xff]  }
 0x2d5   : > { %v4593_v0 = vadd.f32 %v11175_v17, %v14672_v58  ;;  %11501 = vmatprep.mubr.msk.bf16.mxu0 %vm12324_vm15, %v15574_v30 }
 0x2d6   : > { %v4572_v62 = vpop.f32.mrf.mxu0  ;;  %11470 = vmatpush3.bf16.msra.mxu1 %v12122_v4 }
 0x2d7   : > { %v4591_v33 = vadd.f32 %v4572_v62, %v14675_v34  ;;  %v4898_v16 = vadd.f32 %v11199_v41, %v4593_v0  ;;  %11490 = vmatpush3.bf16.msra.mxu0 %v12123_v1  ;;  %11471 = vmatprep.subr.bf16.mxu1 %v15574_v30  ;;  %v12129_v41 = vld [vmem:[%s15565_s5 + $0x10] sm:$0xff]   ;;  %v12130_v62 = vld [vmem:[%s15565_s5 + $0x48] sm:$0xff]  }
 0x2d8   : > { %v11176_v2 = vpop.f32.mrf.mxu0  ;;  %11491 = vmatprep.subr.bf16.mxu0 %v15574_v30 }
 0x2d9   : > { %v14724_v51 = vadd.f32 %v11176_v2, %v14681_v21  ;;  %v4896_v50 = vadd.f32 %v4877_v22, %v4591_v33  ;;  %v12131_v33 = vld [vmem:[%s15565_s5 + $0x8] sm:$0xff]   ;;  %v12132_v2 = vld [vmem:[%s15565_s5 + $0x40] sm:$0xff]  }
 0x2da   : > { %v4575_v35 = vpop.f32.mrf.mxu0  ;;  %11472 = vmatpush3.bf16.msra.mxu1 %v12124_v46 }
 0x2db   : > { %v14727_v42 = vadd.f32 %v4575_v35, %v14683_v19  ;;  %v14743_v19 = vpop.f32.mrf.mxu1  ;;  %11492 = vmatpush3.bf16.msra.mxu0 %v12125_v9  ;;  %11473 = vmatprep.subr.bf16.mxu1 %v15574_v30 }
 0x2dc   : > { %11493 = vmatprep.subr.bf16.mxu0 %v15574_v30 }
 0x2de   : > { %11474 = vmatpush3.bf16.msra.mxu1 %v12126_v53 }
 0x2df   : > { %11494 = vmatpush3.bf16.msra.mxu0 %v12127_v39  ;;  %11475 = vmatprep.subr.bf16.mxu1 %v15574_v30 }
 0x2e0   : > { %11495 = vmatprep.subr.bf16.mxu0 %v15574_v30 }
 0x2e2   : > { %v14745_v52 = vpop.f32.mrf.mxu1  ;;  %11476 = vmatpush3.bf16.msra.mxu1 %v12128_v59 }
 0x2e3   : > { %11496 = vmatpush3.bf16.msra.mxu0 %v12129_v41  ;;  %11477 = vmatprep.subr.bf16.mxu1 %v15574_v30 }
 0x2e4   : > { %v14747_v47 = vpop.f32.mrf.mxu1  ;;  %11497 = vmatprep.subr.bf16.mxu0 %v15574_v30 }
 0x2e6   : > { %v14749_v12 = vpop.f32.mrf.mxu1  ;;  %11478 = vmatpush3.bf16.msra.mxu1 %v12130_v62 }
 0x2e7   : > { %11498 = vmatpush3.bf16.msra.mxu0 %v12131_v33  ;;  %11479 = vmatprep.subr.bf16.mxu1 %v15574_v30 }
 0x2e8   : > { %v14753_v54 = vpop.f32.mrf.mxu1  ;;  %11499 = vmatprep.subr.bf16.mxu0 %v15574_v30 }
 0x2ea   : > { %v14757_v3 = vpop.f32.mrf.mxu1  ;;  %11480 = vmatpush3.bf16.msra.mxu1 %v12132_v2 }
 0x2eb   : > { %11505 = vmatprep.subr.bf16.mxu1 %v15574_v30 }
 0x2ec   : > { %v11219_v20 = vpop.f32.mrf.mxu0  ;;  %v14761_v6 = vpop.f32.mrf.mxu1 }
 0x2ed   : > { %v14729_v10 = vadd.f32 %v11219_v20, %v4894_v23 }
 0x2ee   : > { %v5070_v44 = vpop.f32.mrf.mxu0  ;;  %v14765_v7 = vpop.f32.mrf.mxu1 }
 0x2ef   : > { %v14731_v49 = vadd.f32 %v5070_v44, %v4892_v40 }
 0x2f0   : > { %v14733_v58 = vpop.f32.mrf.mxu0  ;;  %v14769_v57 = vpop.f32.mrf.mxu1 }
 0x2f2   : > { %v14735_v34 = vpop.f32.mrf.mxu0 }
 0x2f4   : > { %v11223_v61 = vpop.f32.mrf.mxu0 }
 0x2f5   : > { %v14737_v25 = vadd.f32 %v11223_v61, %v4898_v16 }
 0x2f6   : > { %v5086_v21 = vpop.f32.mrf.mxu0 }
 0x2f7   : > { %v14739_v48 = vadd.f32 %v5086_v21, %v4896_v50  ;;  %v12133_v50 = vld [vmem:[%s15565_s5] sm:$0xff]  }
 0x2f8   : > { %v14751_v63 = vpop.f32.mrf.mxu0  ;;  %11500 = vmatpush3.bf16.msra.mxu0 %v12133_v50 }
 0x2f9   : > { %11525 = vmatprep.subr.bf16.mxu0 %v15574_v30 }
 0x2fa   : > { %v14755_v36 = vpop.f32.mrf.mxu0 }
 0x302   : > { %v14779_v13 = vpop.f32.mrf.mxu1 }
 0x304   : > { %v14787_v24 = vpop.f32.mrf.mxu1 }
 0x306   : > { %v14803_v45 = vpop.f32.mrf.mxu1 }
 0x308   : > { %v14809_v18 = vpop.f32.mrf.mxu1 }
 0x30a   : > { %v14831_v40 = vpop.f32.mrf.mxu1 }
 0x30c   : > { %v14759_v5 = vpop.f32.mrf.mxu0  ;;  %v14843_v17 = vpop.f32.mrf.mxu1 }
 0x30e   : > { %v14763_v38 = vpop.f32.mrf.mxu0  ;;  %v14855_v16 = vpop.f32.mrf.mxu1 }
 0x310   : > { %v14767_v28 = vpop.f32.mrf.mxu0  ;;  %v14867_v35 = vpop.f32.mrf.mxu1 }
 0x312   : > { %v14771_v26 = vpop.f32.mrf.mxu0 }
 0x314   : > { %v14783_v8 = vpop.f32.mrf.mxu0 }
 0x316   : > { %v14795_v29 = vpop.f32.mrf.mxu0 }
 0x318   : > { %v14807_v60 = vpop.f32.mrf.mxu0 }
 0x31a   : > { %v14819_v23 = vpop.f32.mrf.mxu0 }
 0x322   : > { %v14873_v44 = vpop.f32.mrf.mxu1 }
 0x324   : > { %v14879_v21 = vpop.f32.mrf.mxu1 }
 0x326   : > { %v14883_v27 = vpop.f32.mrf.mxu1 }
 0x328   : > { %v14887_v32 = vpop.f32.mrf.mxu1 }
 0x32a   : > { %v14891_v1 = vpop.f32.mrf.mxu1 }
 0x32b   : > { %15605 = vst [vmem:[#allocation10_spill] sm:$0xff] %v14891_v1 }
 0x32c   : > { %v14833_v43 = vpop.f32.mrf.mxu0  ;;  %v14895_v9 = vpop.f32.mrf.mxu1 }
 0x32d   : > { %15606 = vst [vmem:[#allocation11_spill] sm:$0xff] %v14895_v9 }
 0x32e   : > { %v14845_v0 = vpop.f32.mrf.mxu0  ;;  %v14899_v39 = vpop.f32.mrf.mxu1 }
 0x32f   : > { %15607 = vst [vmem:[#allocation12_spill] sm:$0xff] %v14899_v39 }
 0x330   : > { %v14857_v22 = vpop.f32.mrf.mxu0  ;;  %v14901_v41 = vpop.f32.mrf.mxu1 }
 0x331   : > { %15608 = vst [vmem:[#allocation13_spill] sm:$0xff] %v14901_v41 }
 0x332   : > { %v14869_v20 = vpop.f32.mrf.mxu0 }
 0x334   : > { %v14875_v61 = vpop.f32.mrf.mxu0 }
 0x336   : > { %v14881_v55 = vpop.f32.mrf.mxu0 }
 0x337   : > { %15603 = vst [vmem:[#allocation8_spill] sm:$0xff] %v14881_v55 }
 0x338   : > { %v14885_v56 = vpop.f32.mrf.mxu0 }
 0x33a   : > { %v14889_v4 = vpop.f32.mrf.mxu0 }
 0x33b   : > { %15604 = vst [vmem:[#allocation9_spill] sm:$0xff] %v14889_v4 }
 0x342   : > { %v14905_v33 = vpop.f32.mrf.mxu1 }
 0x343   : > { %15609 = vst [vmem:[#allocation14_spill] sm:$0xff] %v14905_v33  ;;  %v4895_v33 = vadd.f32 %v14704_v31, %v14714_v37  ;;  %v4899_v31 = vadd.f32 %v14741_v15, %v14724_v51 }
 0x344   : > { %v14909_v50 = vpop.f32.mrf.mxu1 }
 0x345   : > { %15611 = vst [vmem:[#allocation16_spill] sm:$0xff] %v14909_v50 }
 0x346   : > { %v14913_v1 = vpop.f32.mrf.mxu1 }
 0x347   : > { %15613 = vst [vmem:[#allocation18_spill] sm:$0xff] %v14913_v1 }
 0x348   : > { %v14917_v4 = vpop.f32.mrf.mxu1 }
 0x349   : > { %15615 = vst [vmem:[#allocation20_spill] sm:$0xff] %v14917_v4 }
 0x34a   : > { %v14921_v55 = vpop.f32.mrf.mxu1 }
 0x34b   : > { %15617 = vst [vmem:[#allocation22_spill] sm:$0xff] %v14921_v55  ;;  %v5273_v55 = vadd.f32 %v14745_v52, %v14729_v10 }
 0x34c   : > { %v14893_v46 = vpop.f32.mrf.mxu0 }
 0x34d   : > { %v5554_v37 = vadd.f32 %v14759_v5, %v5273_v55 }
 0x34e   : > { %v14897_v53 = vpop.f32.mrf.mxu0 }
 0x350   : > { %v11364_v59 = vpop.f32.mrf.mxu0 }
 0x352   : > { %v14903_v62 = vpop.f32.mrf.mxu0 }
 0x354   : > { %v14907_v2 = vpop.f32.mrf.mxu0 }
 0x355   : > { %15610 = vst [vmem:[#allocation15_spill] sm:$0xff] %v14907_v2  ;;  %v14927_v2 = vpop.f32.mrf.mxu1 }
 0x356   : > { %v14911_v30 = vpop.f32.mrf.mxu0 }
 0x357   : > { %15612 = vst [vmem:[#allocation17_spill] sm:$0xff] %v14911_v30  ;;  %v5104_v30 = vadd.f32 %v14733_v58, %v4895_v33  ;;  %v14935_v1 = vpop.f32.mrf.mxu1  ;;  %v5271_v58 = vadd.f32 %v14747_v47, %v14731_v49  ;;  %v5763_v49 = vadd.f32 %v14779_v13, %v5554_v37  ;;  %v5275_v13 = vadd.f32 %v14761_v6, %v14739_v48  ;;  %v15620_v33 = vld [vmem:[#allocation9_spill] sm:$0xff]  ;;  %v15622_v37 = vld [vmem:[#allocation18_spill] sm:$0xff] }
 0x358   : > { %v14915_v9 = vpop.f32.mrf.mxu0 }
 0x359   : > { %15614 = vst [vmem:[#allocation19_spill] sm:$0xff] %v14915_v9  ;;  %v4893_v9 = vadd.f32 %v14711_v11, %v14719_v14  ;;  %v14950_v10 = vpop.f32.mrf.mxu1 }
 0x35a   : > { %v14919_v39 = vpop.f32.mrf.mxu0 }
 0x35b   : > { %15616 = vst [vmem:[#allocation21_spill] sm:$0xff] %v14919_v39  ;;  %v5102_v4 = vadd.f32 %v14735_v34, %v4893_v9  ;;  %v5108_v34 = vadd.f32 %v14751_v63, %v4899_v31  ;;  %v4897_v9 = vadd.f32 %v14743_v19, %v14727_v42  ;;  %v5277_v63 = vadd.f32 %v14757_v3, %v14737_v25  ;;  %v15621_v31 = vld [vmem:[#allocation14_spill] sm:$0xff] }
 0x35c   : > { %v6068_v19 = vadd.f32 %v14833_v43, %v5763_v49 }
 0x35d   : > { %v5272_v14 = vadd.f32 %v14753_v54, %v5102_v4  ;;  %v5106_v15 = vadd.f32 %v14755_v36, %v4897_v9  ;;  %v5278_v54 = vadd.f32 %v14765_v7, %v5108_v34  ;;  %v15626_v9 = vld [vmem:[#allocation16_spill] sm:$0xff] }
 0x35f   : > { %v5553_v51 = vadd.f32 %v14771_v26, %v5272_v14  ;;  %v5558_v26 = vadd.f32 %v14783_v8, %v5277_v63  ;;  %v5276_v25 = vadd.f32 %v14769_v57, %v5106_v15  ;;  %v15628_v15 = vld [vmem:[#allocation15_spill] sm:$0xff] }
 0x361   : > { %v5762_v36 = vadd.f32 %v14809_v18, %v5553_v51  ;;  %v5557_v43 = vadd.f32 %v14819_v23, %v5276_v25  ;;  %v6277_v18 = vadd.f32 %v14873_v44, %v6068_v19  ;;  %v5767_v48 = vadd.f32 %v14831_v40, %v5558_v26  ;;  %v15632_v25 = vld [vmem:[#allocation17_spill] sm:$0xff] }
 0x362   : > { %v11435_v5 = vpop.f32.mrf.mxu1 }
 0x363   : > { %v6447_v57 = vadd.f32 %v14893_v46, %v6277_v18 }
 0x364   : > { %v7209_v3 = vpop.f32.mrf.mxu1 }
 0x36c   : > { %v14923_v41 = vpop.f32.mrf.mxu0 }
 0x36d   : > { %15618 = vst [vmem:[#allocation23_spill] sm:$0xff] %v14923_v41  ;;  %v5274_v41 = vadd.f32 %v14749_v12, %v5104_v30  ;;  %v5552_v12 = vadd.f32 %v14763_v38, %v5271_v58  ;;  %v5559_v30 = vadd.f32 %v14807_v60, %v5278_v54  ;;  %v11436_v60 = vpop.f32.mrf.mxu1  ;;  %v15623_v58 = vld [vmem:[#allocation10_spill] sm:$0xff]  ;;  %v15630_v54 = vld [vmem:[#allocation19_spill] sm:$0xff] }
 0x36e   : > { %v14929_v50 = vpop.f32.mrf.mxu0 }
 0x36f   : > { %v5555_v11 = vadd.f32 %v14767_v28, %v5274_v41  ;;  %v5761_v38 = vadd.f32 %v14787_v24, %v5552_v12  ;;  %v5556_v24 = vadd.f32 %v14795_v29, %v5275_v13  ;;  %v5768_v6 = vadd.f32 %v14855_v16, %v5559_v30  ;;  %v15619_v41 = vld [vmem:[#allocation8_spill] sm:$0xff] }
 0x370   : > { %v11412_v39 = vpop.f32.mrf.mxu0  ;;  %v6072_v29 = vadd.f32 %v14875_v61, %v5767_v48  ;;  %v15634_v48 = vld [vmem:[#allocation22_spill] sm:$0xff] }
 0x371   : > { %v5764_v47 = vadd.f32 %v14803_v45, %v5555_v11  ;;  %v6066_v7 = vadd.f32 %v14845_v0, %v5761_v38  ;;  %v6067_v45 = vadd.f32 %v14869_v20, %v5762_v36  ;;  %v5765_v23 = vadd.f32 %v14843_v17, %v5556_v24  ;;  %v15624_v11 = vld [vmem:[#allocation12_spill] sm:$0xff]  ;;  %v15631_v38 = vld [vmem:[#allocation13_spill] sm:$0xff] }
 0x372   : > { %v6907_v52 = vpop.f32.mrf.mxu0  ;;  %v6073_v44 = vadd.f32 %v14885_v56, %v5768_v6  ;;  %v6281_v17 = vadd.f32 %v15623_v58, %v6072_v29  ;;  %v10009_v58 = vld [vmem:[%s15564_s4] ss:$0 sm:$0xff] }
 0x373   : > { %v6069_v28 = vadd.f32 %v14857_v22, %v5764_v47  ;;  %v6275_v0 = vadd.f32 %v14879_v21, %v6066_v7  ;;  %v6276_v20 = vadd.f32 %v14887_v32, %v6067_v45  ;;  %v6070_v46 = vadd.f32 %v15619_v41, %v5765_v23  ;;  %v15629_v47 = vld [vmem:[#allocation11_spill] sm:$0xff]  ;;  %v15633_v45 = vld [vmem:[#allocation21_spill] sm:$0xff] }
 0x374   : > { %v14960_v42 = vpop.f32.mrf.mxu0  ;;  %v6728_v32 = vadd.f32 %v15621_v31, %v6447_v57  ;;  %v6282_v56 = vadd.f32 %v15624_v11, %v6073_v44  ;;  %v6451_v49 = vadd.f32 %v15628_v15, %v6281_v17 }
 0x375   : > { %v6278_v8 = vadd.f32 %v14883_v27, %v6069_v28  ;;  %v5766_v27 = vadd.f32 %v14867_v35, %v5557_v43  ;;  %v6445_v40 = vadd.f32 %v14897_v53, %v6275_v0  ;;  %v6446_v16 = vadd.f32 %v14903_v62, %v6276_v20  ;;  %v15625_v35 = vld [vmem:[#allocation23_spill] sm:$0xff]  ;;  %v15627_v62 = vld [vmem:[#allocation20_spill] sm:$0xff] }
 0x376   : > { %v6920_v22 = vpop.f32.mrf.mxu0  ;;  %v6937_v34 = vadd.f32 %v15625_v35, %v6728_v32  ;;  %v6279_v63 = vadd.f32 %v15629_v47, %v6070_v46  ;;  %v6452_v19 = vadd.f32 %v15630_v54, %v6282_v56  ;;  %v6732_v6 = vadd.f32 %v15634_v48, %v6451_v49  ;;  %v12136_v48 = vld [vmem:[%s15565_s5 + $0xb0] sm:$0xff]  }
 0x377   : > { %v6448_v55 = vadd.f32 %v11364_v59, %v6278_v8  ;;  %v6071_v21 = vadd.f32 %v15620_v33, %v5766_v27  ;;  %v7212_v59 = vpop.f32.mrf.mxu1  ;;  %v6726_v53 = vadd.f32 %v15626_v9, %v6445_v40  ;;  %v6727_v51 = vadd.f32 %v15627_v62, %v6446_v16 }
 0x378   : > { %v11416_v4 = vpop.f32.mrf.mxu0  ;;  %v6449_v7 = vadd.f32 %v15632_v25, %v6279_v63  ;;  %v7242_v43 = vadd.f32 %v11435_v5, %v6937_v34  ;;  %v6733_v57 = vadd.f32 %v14935_v1, %v6452_v19 }
 0x379   : > { %v6729_v61 = vadd.f32 %v15622_v37, %v6448_v55  ;;  %v6280_v28 = vadd.f32 %v15631_v38, %v6071_v21  ;;  %v11439_v36 = vpop.f32.mrf.mxu1  ;;  %v6935_v13 = vadd.f32 %v14929_v50, %v6726_v53  ;;  %v6936_v30 = vadd.f32 %v6907_v52, %v6727_v51 }
 0x37a   : > { %v6923_v14 = vpop.f32.mrf.mxu0  ;;  %v6941_v50 = vadd.f32 %v14960_v42, %v6732_v6  ;;  %v6730_v52 = vadd.f32 %v14927_v2, %v6449_v7  ;;  %v6942_v40 = vadd.f32 %v11416_v4, %v6733_v57  ;;  %v12137_v6 = vld [vmem:[%s15565_s5 + $0xf0] sm:$0xff]   ;;  %v15635_v57 = vmov 0.0  }
 0x37b   : > { %v6938_v12 = vadd.f32 %v11412_v39, %v6729_v61  ;;  %v6450_v24 = vadd.f32 %v15633_v45, %v6280_v28  ;;  %v7225_v8 = vpop.f32.mrf.mxu1  ;;  %v7240_v20 = vadd.f32 %v7209_v3, %v6935_v13  ;;  %v7241_v23 = vadd.f32 %v7212_v59, %v6936_v30  ;;  %v12134_v45 = vld [vmem:[%s15565_s5 + $0xb8] sm:$0xff]  }
 0x37c   : > { %v6939_v33 = vadd.f32 %v6920_v22, %v6730_v52  ;;  %v7246_v59 = vadd.f32 %v11439_v36, %v6941_v50  ;;  %v12143_v50 = vld [vmem:[%s15565_s5 + $0xd8] sm:$0xff]   ;;  %v12144_v52 = vld [vmem:[%s15565_s5 + $0x90] sm:$0xff]  }
 0x37d   : > { %v7243_v18 = vadd.f32 %v11436_v60, %v6938_v12  ;;  %v6731_v44 = vadd.f32 %v14950_v10, %v6450_v24  ;;  %v11440_v41 = vpop.f32.mrf.mxu1  ;;  %v12135_v24 = vld [vmem:[%s15565_s5 + $0xf8] sm:$0xff]  }
 0x37e   : > { %v7247_v31 = vadd.f32 %v11440_v41, %v6942_v40  ;;  %v7244_v37 = vadd.f32 %v7225_v8, %v6939_v33  ;;  %v12147_v40 = vld [vmem:[%s15565_s5 + $0xc8] sm:$0xff]   ;;  %v12151_v33 = vld [vmem:[%s15565_s5 + $0x178] sm:$0xff]  }
 0x37f   : > { %v6940_v1 = vadd.f32 %v6923_v14, %v6731_v44  ;;  %v7228_v42 = vpop.f32.mrf.mxu1  ;;  %v12145_v44 = vld [vmem:[%s15565_s5 + $0xd0] sm:$0xff]  }
 0x381   : > { %v7245_v61 = vadd.f32 %v7228_v42, %v6940_v1  ;;  %v12155_v42 = vld [vmem:[%s15565_s5 + $0x168] sm:$0xff]  }
 0x38c   : > { %v11459_v26 = vpop.f32.mrf.mxu0 }
 0x38d   : > { %v7451_v55 = vadd.f32 %v11459_v26, %v7242_v43 }
 0x38e   : > { %v7418_v39 = vpop.f32.mrf.mxu0 }
 0x38f   : > { %v7449_v5 = vadd.f32 %v7418_v39, %v7240_v20  ;;  %v12140_v20 = vld [vmem:[%s15565_s5 + $0xa0] sm:$0xff]  }
 0x390   : > { %v11460_v0 = vpop.f32.mrf.mxu0 }
 0x391   : > { %v7452_v29 = vadd.f32 %v11460_v0, %v7243_v18  ;;  %v12138_v0 = vld [vmem:[%s15565_s5 + $0xa8] sm:$0xff]  }
 0x392   : > { %v7421_v27 = vpop.f32.mrf.mxu0 }
 0x393   : > { %v7458_v60 = vmax.f32 %v7451_v55, %v7452_v29  ;;  %v7450_v16 = vadd.f32 %v7421_v27, %v7241_v23  ;;  %v12139_v55 = vld [vmem:[%s15565_s5 + $0xe8] sm:$0xff]   ;;  %v12141_v29 = vld [vmem:[%s15565_s5 + $0xe0] sm:$0xff]   ;;  %v12142_v23 = vld [vmem:[%s15565_s5 + $0x98] sm:$0xff]  }
 0x394   : > { %v11463_v46 = vpop.f32.mrf.mxu0  ;;  %v12146_v27 = vld [vmem:[%s15565_s5 + $0x88] sm:$0xff]  }
 0x395   : > { %7462 = vst [vmem:[#allocation4 + $0x8] sm:$0xff] %v7458_v60  ;;  %v7457_v21 = vmax.f32 %v7449_v5, %v7450_v16  ;;  %v7455_v2 = vadd.f32 %v11463_v46, %v7246_v59  ;;  %v12148_v5 = vld [vmem:[%s15565_s5 + $0x80] sm:$0xff]   ;;  %v12150_v46 = vld [vmem:[%s15565_s5 + $0x138] sm:$0xff]   ;;  %v12153_v59 = vld [vmem:[%s15565_s5 + $0x170] sm:$0xff]  }
 0x396   : > { %v7434_v3 = vpop.f32.mrf.mxu0  ;;  %v12149_v60 = vld [vmem:[%s15565_s5 + $0xc0] sm:$0xff]  }
 0x397   : > { %7461 = vst [vmem:[#allocation4] sm:$0xff] %v7457_v21  ;;  %v7453_v17 = vadd.f32 %v7434_v3, %v7244_v37  ;;  %v12152_v3 = vld [vmem:[%s15565_s5 + $0x130] sm:$0xff]   ;;  %v12158_v37 = vld [vmem:[%s15565_s5 + $0x118] sm:$0xff]  }
 0x398   : > { %v11464_v32 = vpop.f32.mrf.mxu0 }
 0x399   : > { %v7456_v10 = vadd.f32 %v11464_v32, %v7247_v31  ;;  %v12154_v31 = vld [vmem:[%s15565_s5 + $0x128] sm:$0xff]   ;;  %v12156_v32 = vld [vmem:[%s15565_s5 + $0x120] sm:$0xff]  }
 0x39a   : > { %v7437_v4 = vpop.f32.mrf.mxu0 }
 0x39b   : > { %v7460_v22 = vmax.f32 %v7455_v2, %v7456_v10  ;;  %v7454_v11 = vadd.f32 %v7437_v4, %v7245_v61  ;;  %v12157_v2 = vld [vmem:[%s15565_s5 + $0x160] sm:$0xff]   ;;  %v12159_v10 = vld [vmem:[%s15565_s5 + $0x158] sm:$0xff]   ;;  %v12160_v61 = vld [vmem:[%s15565_s5 + $0x110] sm:$0xff]  }
 0x39c   : > { %v7467_v56 = vld [vmem:[#allocation4 + $0x8] ss:$2 sm:$0xf]  ;;  %v7475_v14 = vld [vmem:[#allocation4 + $0x9] ss:$2 sm:$0xf] }
 0x39d   : > { %v7481_v35 = vmax.f32 %v7467_v56, %v7475_v14  ;;  %7464 = vst [vmem:[#allocation4 + $0x18] sm:$0xff] %v7460_v22  ;;  %v7459_v34 = vmax.f32 %v7453_v17, %v7454_v11  ;;  %v12161_v4 = vld [vmem:[%s15565_s5 + $0x150] sm:$0xff]   ;;  %v12163_v17 = vld [vmem:[%s15565_s5 + $0x148] sm:$0xff]   ;;  %v12164_v22 = vld [vmem:[%s15565_s5 + $0x100] sm:$0xff]  }
 0x39e   : > { %v7465_v9 = vld [vmem:[#allocation4] ss:$2 sm:$0xf]  ;;  %v7473_v53 = vld [vmem:[#allocation4 + $0x1] ss:$2 sm:$0xf] }
 0x39f   : > { %v7492_v12 = vadd.f32 %v10009_v58, %v7481_v35  ;;  %v7480_v62 = vmax.f32 %v7465_v9, %v7473_v53  ;;  %7463 = vst [vmem:[#allocation4 + $0x10] sm:$0xff] %v7459_v34  ;;  %v12165_v11 = vld [vmem:[%s15565_s5 + $0x140] sm:$0xff]   ;;  %v12166_v35 = vld [vmem:[%s15565_s5 + $0x1b8] sm:$0xff]  }
 0x3a0   : > { %v12167_v34 = vld [vmem:[%s15565_s5 + $0x1f8] sm:$0xff]  }
 0x3a1   : > { %v7491_v51 = vadd.f32 %v10009_v58, %v7480_v62  ;;  %v7496_v15 = vmax.f32 %v7492_v12, 0.0  ;;  %v12168_v12 = vld [vmem:[%s15565_s5 + $0x1b0] sm:$0xff]  }
 0x3a2   : > { %v12169_v62 = vld [vmem:[%s15565_s5 + $0x1f0] sm:$0xff]  }
 0x3a3   : > { %v7495_v49 = vmax.f32 %v7491_v51, 0.0  ;;  %v12170_v51 = vld [vmem:[%s15565_s5 + $0x1a8] sm:$0xff]  }
 0x3a4   : > { %v7471_v47 = vld [vmem:[#allocation4 + $0x18] ss:$2 sm:$0xf]  ;;  %v7479_v63 = vld [vmem:[#allocation4 + $0x19] ss:$2 sm:$0xf] }
 0x3a5   : > { %v7503_v54 = vcombine.low %v7495_v49, %v7496_v15  ;;  %v7483_v19 = vmax.f32 %v7471_v47, %v7479_v63  ;;  %v12171_v15 = vld [vmem:[%s15565_s5 + $0x1e8] sm:$0xff]   ;;  %v12172_v49 = vld [vmem:[%s15565_s5 + $0x1a0] sm:$0xff]   ;;  %v12174_v63 = vld [vmem:[%s15565_s5 + $0x198] sm:$0xff]  }
 0x3a6   : > { %v7469_v38 = vld [vmem:[#allocation4 + $0x10] ss:$2 sm:$0xf]  ;;  %v7477_v28 = vld [vmem:[#allocation4 + $0x11] ss:$2 sm:$0xf] }
 0x3a7   : > { %7507 = vst [vmem:[#allocation3] sm:$0xff] %v7503_v54  ;;  %v7494_v36 = vadd.f32 %v10009_v58, %v7483_v19  ;;  %v7482_v26 = vmax.f32 %v7469_v38, %v7477_v28  ;;  %v12173_v47 = vld [vmem:[%s15565_s5 + $0x1e0] sm:$0xff]   ;;  %v12175_v54 = vld [vmem:[%s15565_s5 + $0x1d8] sm:$0xff]   ;;  %v12176_v19 = vld [vmem:[%s15565_s5 + $0x190] sm:$0xff]  }
 0x3a8   : > { %v12177_v38 = vld [vmem:[%s15565_s5 + $0x1d0] sm:$0xff]   ;;  %v12178_v28 = vld [vmem:[%s15565_s5 + $0x188] sm:$0xff]  }
 0x3a9   : > { %v7493_v13 = vadd.f32 %v10009_v58, %v7482_v26  ;;  %v7498_v30 = vmax.f32 %v7494_v36, 0.0  ;;  %v12162_v58 = vld [vmem:[%s15565_s5 + $0x108] sm:$0xff]   ;;  %v12180_v26 = vld [vmem:[%s15565_s5 + $0x180] sm:$0xff]  }
 0x3aa   : > { %v12179_v36 = vld [vmem:[%s15565_s5 + $0x1c8] sm:$0xff]  }
 0x3ab   : > { %v7497_v25 = vmax.f32 %v7493_v13, 0.0  ;;  %v12181_v13 = vld [vmem:[%s15565_s5 + $0x1c0] sm:$0xff]  }
 0x3ad   : > { %v7504_v7 = vcombine.low %v7497_v25, %v7498_v30 }
 0x3ae   : > { %v7528_v39 = vld [vmem:[#allocation3 + $0x1] ss:$16 sm:$0x1]  ;;  %v7509_v43 = vld [vmem:[#allocation3] ss:$16 sm:$0x1] }
 0x3af   : > { %7508 = vst [vmem:[#allocation3 + $0x8] sm:$0xff] %v7504_v7  ;;  %v7529_v18 = vpack.c.bf16 %v7528_v39, %v7528_v39  ;;  %v7510_v8 = vpack.c.bf16 %v7509_v43, %v7509_v43  ;;  %v7723_v16 = vld [vmem:[#allocation3 + $0x2] ss:$16 sm:$0x1]  ;;  %v12182_v7 = vld [vmem:[%s15565_s5 + $0x238] sm:$0xff]   ;;  %v12184_v43 = vld [vmem:[%s15565_s5 + $0x230] sm:$0xff]  }
 0x3b0   : > { %v7831_v41 = vld [vmem:[#allocation3 + $0x3] ss:$16 sm:$0x1]  ;;  %v7724_v1 = vpack.c.bf16 %v7723_v16, %v7723_v16  ;;  %v7939_v56 = vld [vmem:[#allocation3 + $0x4] ss:$16 sm:$0x1] }
 0x3b1   : > { %11482 = vmatmul.mubr.bf16.vlgmr.msra.gmra.mxu1 %v7529_v18  ;;  %11502 = vmatmul.mubr.bf16.vlgmr.msra.gmra.mxu0 %v7510_v8  ;;  %v7832_v21 = vpack.c.bf16 %v7831_v41, %v7831_v41  ;;  %v8047_v14 = vld [vmem:[#allocation3 + $0x5] ss:$16 sm:$0x1]  ;;  %v7940_v9 = vpack.c.bf16 %v7939_v56, %v7939_v56  ;;  %v8155_v30 = vld [vmem:[#allocation3 + $0x6] ss:$16 sm:$0x1] }
 0x3b2   : > { %11506 = vmatpush3.bf16.msra.mxu1 %v12134_v45  ;;  %11526 = vmatpush3.bf16.msra.mxu0 %v12135_v24  ;;  %v8048_v53 = vpack.c.bf16 %v8047_v14, %v8047_v14  ;;  %v8263_v25 = vld [vmem:[#allocation3 + $0x7] ss:$16 sm:$0x1]  ;;  %v12183_v45 = vld [vmem:[%s15565_s5 + $0x278] sm:$0xff]   ;;  %v8156_v24 = vpack.c.bf16 %v8155_v30, %v8155_v30  ;;  %v12185_v18 = vld [vmem:[%s15565_s5 + $0x270] sm:$0xff]  }
 0x3b3   : > { %11507 = vmatprep.subr.bf16.mxu1 %v15635_v57  ;;  %11527 = vmatprep.subr.bf16.mxu0 %v15635_v57  ;;  %v8264_v39 = vpack.c.bf16 %v8263_v25, %v8263_v25  ;;  %v12186_v8 = vld [vmem:[%s15565_s5 + $0x228] sm:$0xff]   ;;  %v12199_v16 = vld [vmem:[%s15565_s5 + $0x2f8] sm:$0xff]  }
 0x3b4   : > { %11521 = vmatprep.mubr.msk.bf16.mxu1 %vm12324_vm15, %v15635_v57  ;;  %11541 = vmatprep.mubr.msk.bf16.mxu0 %vm12324_vm15, %v15635_v57  ;;  %v12215_v56 = vld [vmem:[%s15565_s5 + $0x378] sm:$0xff]  }
 0x3b5   : > { %v12231_v30 = vld [vmem:[%s15565_s5 + $0x3f8] sm:$0xff]  }
 0x3b6   : > { %11508 = vmatpush3.bf16.msra.mxu1 %v12136_v48  ;;  %11528 = vmatpush3.bf16.msra.mxu0 %v12137_v6  ;;  %v12187_v48 = vld [vmem:[%s15565_s5 + $0x268] sm:$0xff]   ;;  %v12188_v6 = vld [vmem:[%s15565_s5 + $0x220] sm:$0xff]  }
 0x3b7   : > { %11509 = vmatprep.subr.bf16.mxu1 %v15635_v57  ;;  %11529 = vmatprep.subr.bf16.mxu0 %v15635_v57 }
 0x3ba   : > { %11510 = vmatpush3.bf16.msra.mxu1 %v12138_v0  ;;  %11530 = vmatpush3.bf16.msra.mxu0 %v12139_v55  ;;  %v12189_v0 = vld [vmem:[%s15565_s5 + $0x260] sm:$0xff]   ;;  %v12190_v55 = vld [vmem:[%s15565_s5 + $0x218] sm:$0xff]  }
 0x3bb   : > { %11511 = vmatprep.subr.bf16.mxu1 %v15635_v57  ;;  %11531 = vmatprep.subr.bf16.mxu0 %v15635_v57 }
 0x3be   : > { %11512 = vmatpush3.bf16.msra.mxu1 %v12140_v20  ;;  %11532 = vmatpush3.bf16.msra.mxu0 %v12141_v29  ;;  %v12191_v20 = vld [vmem:[%s15565_s5 + $0x258] sm:$0xff]   ;;  %v12192_v29 = vld [vmem:[%s15565_s5 + $0x210] sm:$0xff]  }
 0x3bf   : > { %11513 = vmatprep.subr.bf16.mxu1 %v15635_v57  ;;  %11533 = vmatprep.subr.bf16.mxu0 %v15635_v57 }
 0x3c2   : > { %11514 = vmatpush3.bf16.msra.mxu1 %v12142_v23  ;;  %11534 = vmatpush3.bf16.msra.mxu0 %v12143_v50  ;;  %v12193_v23 = vld [vmem:[%s15565_s5 + $0x250] sm:$0xff]   ;;  %v12194_v50 = vld [vmem:[%s15565_s5 + $0x208] sm:$0xff]  }
 0x3c3   : > { %11515 = vmatprep.subr.bf16.mxu1 %v15635_v57  ;;  %11535 = vmatprep.subr.bf16.mxu0 %v15635_v57 }
 0x3c6   : > { %11516 = vmatpush3.bf16.msra.mxu1 %v12144_v52  ;;  %11536 = vmatpush3.bf16.msra.mxu0 %v12145_v44  ;;  %v12195_v52 = vld [vmem:[%s15565_s5 + $0x248] sm:$0xff]   ;;  %v12196_v44 = vld [vmem:[%s15565_s5 + $0x200] sm:$0xff]  }
 0x3c7   : > { %11517 = vmatprep.subr.bf16.mxu1 %v15635_v57  ;;  %11537 = vmatprep.subr.bf16.mxu0 %v15635_v57 }
 0x3ca   : > { %11518 = vmatpush3.bf16.msra.mxu1 %v12146_v27  ;;  %11538 = vmatpush3.bf16.msra.mxu0 %v12147_v40  ;;  %v12197_v27 = vld [vmem:[%s15565_s5 + $0x240] sm:$0xff]   ;;  %v8371_v40 = vld [vmem:[#allocation3 + $0x8] ss:$16 sm:$0x1] }
 0x3cb   : > { %11519 = vmatprep.subr.bf16.mxu1 %v15635_v57  ;;  %11539 = vmatprep.subr.bf16.mxu0 %v15635_v57  ;;  %v8372_v41 = vpack.c.bf16 %v8371_v40, %v8371_v40  ;;  %v12240_v40 = vld [vmem:[%s15565_s5 + $0x390] sm:$0xff]  }
 0x3ce   : > { %11520 = vmatpush3.bf16.msra.mxu1 %v12148_v5  ;;  %11540 = vmatpush3.bf16.msra.mxu0 %v12149_v60  ;;  %v8479_v5 = vld [vmem:[#allocation3 + $0x9] ss:$16 sm:$0x1]  ;;  %v12198_v60 = vld [vmem:[%s15565_s5 + $0x2b8] sm:$0xff]  }
 0x3cf   : > { %11545 = vmatprep.subr.bf16.mxu1 %v15635_v57  ;;  %11565 = vmatprep.subr.bf16.mxu0 %v15635_v57 }
 0x3d1   : > { %11522 = vmatmul.mubr.bf16.vlgmr.msra.gmra.mxu1 %v7724_v1  ;;  %11542 = vmatmul.mubr.bf16.vlgmr.msra.gmra.mxu0 %v7832_v21  ;;  %v12201_v1 = vld [vmem:[%s15565_s5 + $0x2f0] sm:$0xff]   ;;  %v12202_v21 = vld [vmem:[%s15565_s5 + $0x2a8] sm:$0xff]  }
 0x3d2   : > { %11546 = vmatpush3.bf16.msra.mxu1 %v12150_v46  ;;  %11566 = vmatpush3.bf16.msra.mxu0 %v12151_v33  ;;  %v8480_v46 = vpack.c.bf16 %v8479_v5, %v8479_v5  ;;  %v12200_v33 = vld [vmem:[%s15565_s5 + $0x2b0] sm:$0xff]  }
 0x3d3   : > { %11547 = vmatprep.subr.bf16.mxu1 %v15635_v57  ;;  %11567 = vmatprep.subr.bf16.mxu0 %v15635_v57  ;;  %v12241_v5 = vld [vmem:[%s15565_s5 + $0x3d0] sm:$0xff]  }
 0x3d4   : > { %11561 = vmatprep.mubr.msk.bf16.mxu1 %vm12324_vm15, %v15635_v57  ;;  %11581 = vmatprep.mubr.msk.bf16.mxu0 %vm12324_vm15, %v15635_v57 }
 0x3d6   : > { %11548 = vmatpush3.bf16.msra.mxu1 %v12152_v3  ;;  %11568 = vmatpush3.bf16.msra.mxu0 %v12153_v59  ;;  %v12203_v3 = vld [vmem:[%s15565_s5 + $0x2e8] sm:$0xff]   ;;  %v12204_v59 = vld [vmem:[%s15565_s5 + $0x2a0] sm:$0xff]  }
 0x3d7   : > { %11549 = vmatprep.subr.bf16.mxu1 %v15635_v57  ;;  %11569 = vmatprep.subr.bf16.mxu0 %v15635_v57 }
 0x3da   : > { %11550 = vmatpush3.bf16.msra.mxu1 %v12154_v31  ;;  %11570 = vmatpush3.bf16.msra.mxu0 %v12155_v42  ;;  %v12205_v31 = vld [vmem:[%s15565_s5 + $0x2e0] sm:$0xff]   ;;  %v12206_v42 = vld [vmem:[%s15565_s5 + $0x298] sm:$0xff]  }
 0x3db   : > { %11551 = vmatprep.subr.bf16.mxu1 %v15635_v57  ;;  %11571 = vmatprep.subr.bf16.mxu0 %v15635_v57 }
 0x3de   : > { %11552 = vmatpush3.bf16.msra.mxu1 %v12156_v32  ;;  %11572 = vmatpush3.bf16.msra.mxu0 %v12157_v2  ;;  %v12207_v32 = vld [vmem:[%s15565_s5 + $0x2d8] sm:$0xff]   ;;  %v12208_v2 = vld [vmem:[%s15565_s5 + $0x290] sm:$0xff]  }
 0x3df   : > { %11553 = vmatprep.subr.bf16.mxu1 %v15635_v57  ;;  %11573 = vmatprep.subr.bf16.mxu0 %v15635_v57 }
 0x3e2   : > { %11554 = vmatpush3.bf16.msra.mxu1 %v12158_v37  ;;  %11574 = vmatpush3.bf16.msra.mxu0 %v12159_v10  ;;  %v12209_v37 = vld [vmem:[%s15565_s5 + $0x2d0] sm:$0xff]   ;;  %v12210_v10 = vld [vmem:[%s15565_s5 + $0x288] sm:$0xff]  }
 0x3e3   : > { %11555 = vmatprep.subr.bf16.mxu1 %v15635_v57  ;;  %11575 = vmatprep.subr.bf16.mxu0 %v15635_v57 }
 0x3e6   : > { %11556 = vmatpush3.bf16.msra.mxu1 %v12160_v61  ;;  %11576 = vmatpush3.bf16.msra.mxu0 %v12161_v4  ;;  %v12211_v61 = vld [vmem:[%s15565_s5 + $0x2c8] sm:$0xff]   ;;  %v12212_v4 = vld [vmem:[%s15565_s5 + $0x280] sm:$0xff]  }
 0x3e7   : > { %11557 = vmatprep.subr.bf16.mxu1 %v15635_v57  ;;  %11577 = vmatprep.subr.bf16.mxu0 %v15635_v57 }
 0x3ea   : > { %11558 = vmatpush3.bf16.msra.mxu1 %v12162_v58  ;;  %11578 = vmatpush3.bf16.msra.mxu0 %v12163_v17  ;;  %v12213_v58 = vld [vmem:[%s15565_s5 + $0x2c0] sm:$0xff]   ;;  %v8587_v17 = vld [vmem:[#allocation3 + $0xa] ss:$16 sm:$0x1] }
 0x3eb   : > { %11559 = vmatprep.subr.bf16.mxu1 %v15635_v57  ;;  %11579 = vmatprep.subr.bf16.mxu0 %v15635_v57  ;;  %v8588_v14 = vpack.c.bf16 %v8587_v17, %v8587_v17 }
 0x3ee   : > { %11560 = vmatpush3.bf16.msra.mxu1 %v12164_v22  ;;  %11580 = vmatpush3.bf16.msra.mxu0 %v12165_v11  ;;  %v8695_v22 = vld [vmem:[#allocation3 + $0xb] ss:$16 sm:$0x1]  ;;  %v12214_v11 = vld [vmem:[%s15565_s5 + $0x338] sm:$0xff]  }
 0x3ef   : > { %11585 = vmatprep.subr.bf16.mxu1 %v15635_v57  ;;  %11605 = vmatprep.subr.bf16.mxu0 %v15635_v57 }
 0x3f1   : > { %11562 = vmatmul.mubr.bf16.vlgmr.msra.gmra.mxu1 %v7940_v9  ;;  %11582 = vmatmul.mubr.bf16.vlgmr.msra.gmra.mxu0 %v8048_v53  ;;  %v12217_v9 = vld [vmem:[%s15565_s5 + $0x370] sm:$0xff]   ;;  %v12218_v53 = vld [vmem:[%s15565_s5 + $0x328] sm:$0xff]  }
 0x3f2   : > { %11586 = vmatpush3.bf16.msra.mxu1 %v12166_v35  ;;  %11606 = vmatpush3.bf16.msra.mxu0 %v12167_v34  ;;  %v8696_v35 = vpack.c.bf16 %v8695_v22, %v8695_v22  ;;  %v12216_v34 = vld [vmem:[%s15565_s5 + $0x330] sm:$0xff]  }
 0x3f3   : > { %11587 = vmatprep.subr.bf16.mxu1 %v15635_v57  ;;  %11607 = vmatprep.subr.bf16.mxu0 %v15635_v57 }
 0x3f4   : > { %11601 = vmatprep.mubr.msk.bf16.mxu1 %vm12324_vm15, %v15635_v57  ;;  %11621 = vmatprep.mubr.msk.bf16.mxu0 %vm12324_vm15, %v15635_v57 }
 0x3f6   : > { %11588 = vmatpush3.bf16.msra.mxu1 %v12168_v12  ;;  %11608 = vmatpush3.bf16.msra.mxu0 %v12169_v62  ;;  %v12219_v12 = vld [vmem:[%s15565_s5 + $0x368] sm:$0xff]   ;;  %v12220_v62 = vld [vmem:[%s15565_s5 + $0x320] sm:$0xff]  }
 0x3f7   : > { %11589 = vmatprep.subr.bf16.mxu1 %v15635_v57  ;;  %11609 = vmatprep.subr.bf16.mxu0 %v15635_v57 }
 0x3fa   : > { %11590 = vmatpush3.bf16.msra.mxu1 %v12170_v51  ;;  %11610 = vmatpush3.bf16.msra.mxu0 %v12171_v15  ;;  %v12221_v51 = vld [vmem:[%s15565_s5 + $0x360] sm:$0xff]   ;;  %v12222_v15 = vld [vmem:[%s15565_s5 + $0x318] sm:$0xff]  }
 0x3fb   : > { %11591 = vmatprep.subr.bf16.mxu1 %v15635_v57  ;;  %11611 = vmatprep.subr.bf16.mxu0 %v15635_v57 }
 0x3fe   : > { %11592 = vmatpush3.bf16.msra.mxu1 %v12172_v49  ;;  %11612 = vmatpush3.bf16.msra.mxu0 %v12173_v47  ;;  %v12223_v49 = vld [vmem:[%s15565_s5 + $0x358] sm:$0xff]   ;;  %v12224_v47 = vld [vmem:[%s15565_s5 + $0x310] sm:$0xff]  }
 0x3ff   : > { %11593 = vmatprep.subr.bf16.mxu1 %v15635_v57  ;;  %11613 = vmatprep.subr.bf16.mxu0 %v15635_v57 }
 0x402   : > { %11594 = vmatpush3.bf16.msra.mxu1 %v12174_v63  ;;  %11614 = vmatpush3.bf16.msra.mxu0 %v12175_v54  ;;  %v12225_v63 = vld [vmem:[%s15565_s5 + $0x350] sm:$0xff]   ;;  %v12226_v54 = vld [vmem:[%s15565_s5 + $0x308] sm:$0xff]  }
 0x403   : > { %11595 = vmatprep.subr.bf16.mxu1 %v15635_v57  ;;  %11615 = vmatprep.subr.bf16.mxu0 %v15635_v57 }
 0x406   : > { %11596 = vmatpush3.bf16.msra.mxu1 %v12176_v19  ;;  %11616 = vmatpush3.bf16.msra.mxu0 %v12177_v38  ;;  %v12227_v19 = vld [vmem:[%s15565_s5 + $0x348] sm:$0xff]   ;;  %v12228_v38 = vld [vmem:[%s15565_s5 + $0x300] sm:$0xff]  }
 0x407   : > { %11597 = vmatprep.subr.bf16.mxu1 %v15635_v57  ;;  %11617 = vmatprep.subr.bf16.mxu0 %v15635_v57 }
 0x40a   : > { %11598 = vmatpush3.bf16.msra.mxu1 %v12178_v28  ;;  %11618 = vmatpush3.bf16.msra.mxu0 %v12179_v36  ;;  %v12229_v28 = vld [vmem:[%s15565_s5 + $0x340] sm:$0xff]   ;;  %v8803_v36 = vld [vmem:[#allocation3 + $0xc] ss:$16 sm:$0x1] }
 0x40b   : > { %11599 = vmatprep.subr.bf16.mxu1 %v15635_v57  ;;  %11619 = vmatprep.subr.bf16.mxu0 %v15635_v57  ;;  %v8804_v25 = vpack.c.bf16 %v8803_v36, %v8803_v36 }
 0x40e   : > { %11600 = vmatpush3.bf16.msra.mxu1 %v12180_v26  ;;  %11620 = vmatpush3.bf16.msra.mxu0 %v12181_v13  ;;  %v8911_v26 = vld [vmem:[#allocation3 + $0xd] ss:$16 sm:$0x1]  ;;  %v12230_v13 = vld [vmem:[%s15565_s5 + $0x3b8] sm:$0xff]  }
 0x40f   : > { %11625 = vmatprep.subr.bf16.mxu1 %v15635_v57  ;;  %11645 = vmatprep.subr.bf16.mxu0 %v15635_v57 }
 0x411   : > { %11602 = vmatmul.mubr.bf16.vlgmr.msra.gmra.mxu1 %v8156_v24  ;;  %11622 = vmatmul.mubr.bf16.vlgmr.msra.gmra.mxu0 %v8264_v39 }
 0x412   : > { %11626 = vmatpush3.bf16.msra.mxu1 %v12182_v7  ;;  %11646 = vmatpush3.bf16.msra.mxu0 %v12183_v45  ;;  %v8912_v7 = vpack.c.bf16 %v8911_v26, %v8911_v26 }
 0x413   : > { %11627 = vmatprep.subr.bf16.mxu1 %v15635_v57  ;;  %11647 = vmatprep.subr.bf16.mxu0 %v15635_v57 }
 0x414   : > { %11641 = vmatprep.mubr.msk.bf16.mxu1 %vm12324_vm15, %v15635_v57  ;;  %11661 = vmatprep.mubr.msk.bf16.mxu0 %vm12324_vm15, %v15635_v57 }
 0x416   : > { %11628 = vmatpush3.bf16.msra.mxu1 %v12184_v43  ;;  %11648 = vmatpush3.bf16.msra.mxu0 %v12185_v18  ;;  %v12232_v43 = vld [vmem:[%s15565_s5 + $0x3b0] sm:$0xff]  }
 0x417   : > { %11629 = vmatprep.subr.bf16.mxu1 %v15635_v57  ;;  %11649 = vmatprep.subr.bf16.mxu0 %v15635_v57  ;;  %v12233_v18 = vld [vmem:[%s15565_s5 + $0x3f0] sm:$0xff]  }
 0x41a   : > { %11630 = vmatpush3.bf16.msra.mxu1 %v12186_v8  ;;  %11650 = vmatpush3.bf16.msra.mxu0 %v12187_v48 }
 0x41b   : > { %11631 = vmatprep.subr.bf16.mxu1 %v15635_v57  ;;  %11651 = vmatprep.subr.bf16.mxu0 %v15635_v57 }
 0x41e   : > { %11632 = vmatpush3.bf16.msra.mxu1 %v12188_v6  ;;  %11652 = vmatpush3.bf16.msra.mxu0 %v12189_v0 }
 0x41f   : > { %11633 = vmatprep.subr.bf16.mxu1 %v15635_v57  ;;  %11653 = vmatprep.subr.bf16.mxu0 %v15635_v57 }
 0x422   : > { %11634 = vmatpush3.bf16.msra.mxu1 %v12190_v55  ;;  %11654 = vmatpush3.bf16.msra.mxu0 %v12191_v20  ;;  %v12234_v55 = vld [vmem:[%s15565_s5 + $0x3a8] sm:$0xff]  }
 0x423   : > { %11635 = vmatprep.subr.bf16.mxu1 %v15635_v57  ;;  %11655 = vmatprep.subr.bf16.mxu0 %v15635_v57  ;;  %v12235_v20 = vld [vmem:[%s15565_s5 + $0x3e8] sm:$0xff]  }
 0x426   : > { %11636 = vmatpush3.bf16.msra.mxu1 %v12192_v29  ;;  %11656 = vmatpush3.bf16.msra.mxu0 %v12193_v23 }
 0x427   : > { %11637 = vmatprep.subr.bf16.mxu1 %v15635_v57  ;;  %11657 = vmatprep.subr.bf16.mxu0 %v15635_v57 }
 0x42a   : > { %11638 = vmatpush3.bf16.msra.mxu1 %v12194_v50  ;;  %11658 = vmatpush3.bf16.msra.mxu0 %v12195_v52  ;;  %v12236_v50 = vld [vmem:[%s15565_s5 + $0x3a0] sm:$0xff]  }
 0x42b   : > { %11639 = vmatprep.subr.bf16.mxu1 %v15635_v57  ;;  %11659 = vmatprep.subr.bf16.mxu0 %v15635_v57  ;;  %v12237_v52 = vld [vmem:[%s15565_s5 + $0x3e0] sm:$0xff]  }
 0x42e   : > { %11640 = vmatpush3.bf16.msra.mxu1 %v12196_v44  ;;  %11660 = vmatpush3.bf16.msra.mxu0 %v12197_v27  ;;  %v12238_v44 = vld [vmem:[%s15565_s5 + $0x398] sm:$0xff]  }
 0x42f   : > { %11665 = vmatprep.subr.bf16.mxu1 %v15635_v57  ;;  %11685 = vmatprep.subr.bf16.mxu0 %v15635_v57  ;;  %v12239_v27 = vld [vmem:[%s15565_s5 + $0x3d8] sm:$0xff]  }
 0x431   : > { %11642 = vmatmul.mubr.bf16.vlgmr.msra.gmra.mxu1 %v8372_v41  ;;  %11662 = vmatmul.mubr.bf16.vlgmr.msra.gmra.mxu0 %v8480_v46  ;;  %v12244_v41 = vld [vmem:[%s15565_s5 + $0x380] sm:$0xff]  }
 0x432   : > { %11666 = vmatpush3.bf16.msra.mxu1 %v12198_v60  ;;  %11686 = vmatpush3.bf16.msra.mxu0 %v12199_v16  ;;  %v12242_v60 = vld [vmem:[%s15565_s5 + $0x388] sm:$0xff]   ;;  %v12245_v46 = vld [vmem:[%s15565_s5 + $0x3c0] sm:$0xff]  }
 0x433   : > { %11667 = vmatprep.subr.bf16.mxu1 %v15635_v57  ;;  %11687 = vmatprep.subr.bf16.mxu0 %v15635_v57  ;;  %v12243_v16 = vld [vmem:[%s15565_s5 + $0x3c8] sm:$0xff]  }
 0x434   : > { %11681 = vmatprep.mubr.msk.bf16.mxu1 %vm12324_vm15, %v15635_v57  ;;  %11701 = vmatprep.mubr.msk.bf16.mxu0 %vm12324_vm15, %v15635_v57 }
 0x436   : > { %11668 = vmatpush3.bf16.msra.mxu1 %v12200_v33  ;;  %11688 = vmatpush3.bf16.msra.mxu0 %v12201_v1  ;;  %v9019_v33 = vld [vmem:[#allocation3 + $0xe] ss:$16 sm:$0x1]  ;;  %v9127_v1 = vld [vmem:[#allocation3 + $0xf] ss:$16 sm:$0x1] }
 0x437   : > { %11669 = vmatprep.subr.bf16.mxu1 %v15635_v57  ;;  %11689 = vmatprep.subr.bf16.mxu0 %v15635_v57 }
 0x43a   : > { %11670 = vmatpush3.bf16.msra.mxu1 %v12202_v21  ;;  %11690 = vmatpush3.bf16.msra.mxu0 %v12203_v3  ;;  %v9020_v21 = vpack.c.bf16 %v9019_v33, %v9019_v33  ;;  %v9128_v3 = vpack.c.bf16 %v9127_v1, %v9127_v1 }
 0x43b   : > { %11671 = vmatprep.subr.bf16.mxu1 %v15635_v57  ;;  %11691 = vmatprep.subr.bf16.mxu0 %v15635_v57 }
 0x43e   : > { %11672 = vmatpush3.bf16.msra.mxu1 %v12204_v59  ;;  %11692 = vmatpush3.bf16.msra.mxu0 %v12205_v31 }
 0x43f   : > { %11673 = vmatprep.subr.bf16.mxu1 %v15635_v57  ;;  %11693 = vmatprep.subr.bf16.mxu0 %v15635_v57 }
 0x442   : > { %11674 = vmatpush3.bf16.msra.mxu1 %v12206_v42  ;;  %11694 = vmatpush3.bf16.msra.mxu0 %v12207_v32 }
 0x443   : > { %11675 = vmatprep.subr.bf16.mxu1 %v15635_v57  ;;  %11695 = vmatprep.subr.bf16.mxu0 %v15635_v57 }
 0x446   : > { %11676 = vmatpush3.bf16.msra.mxu1 %v12208_v2  ;;  %11696 = vmatpush3.bf16.msra.mxu0 %v12209_v37 }
 0x447   : > { %11677 = vmatprep.subr.bf16.mxu1 %v15635_v57  ;;  %11697 = vmatprep.subr.bf16.mxu0 %v15635_v57 }
 0x44a   : > { %11678 = vmatpush3.bf16.msra.mxu1 %v12210_v10  ;;  %11698 = vmatpush3.bf16.msra.mxu0 %v12211_v61 }
 0x44b   : > { %11679 = vmatprep.subr.bf16.mxu1 %v15635_v57  ;;  %11699 = vmatprep.subr.bf16.mxu0 %v15635_v57 }
 0x44e   : > { %11680 = vmatpush3.bf16.msra.mxu1 %v12212_v4  ;;  %11700 = vmatpush3.bf16.msra.mxu0 %v12213_v58 }
 0x44f   : > { %11705 = vmatprep.subr.bf16.mxu1 %v15635_v57  ;;  %11725 = vmatprep.subr.bf16.mxu0 %v15635_v57 }
 0x451   : > { %11682 = vmatmul.mubr.bf16.vlgmr.msra.gmra.mxu1 %v8588_v14  ;;  %11702 = vmatmul.mubr.bf16.vlgmr.msra.gmra.mxu0 %v8696_v35 }
 0x452   : > { %11706 = vmatpush3.bf16.msra.mxu1 %v12214_v11  ;;  %11726 = vmatpush3.bf16.msra.mxu0 %v12215_v56 }
 0x453   : > { %11707 = vmatprep.subr.bf16.mxu1 %v15635_v57  ;;  %11727 = vmatprep.subr.bf16.mxu0 %v15635_v57 }
 0x454   : > { %11721 = vmatprep.mubr.msk.bf16.mxu1 %vm12324_vm15, %v15635_v57  ;;  %11741 = vmatprep.mubr.msk.bf16.mxu0 %vm12324_vm15, %v15635_v57 }
 0x456   : > { %11708 = vmatpush3.bf16.msra.mxu1 %v12216_v34  ;;  %11728 = vmatpush3.bf16.msra.mxu0 %v12217_v9 }
 0x457   : > { %11709 = vmatprep.subr.bf16.mxu1 %v15635_v57  ;;  %11729 = vmatprep.subr.bf16.mxu0 %v15635_v57 }
 0x45a   : > { %11710 = vmatpush3.bf16.msra.mxu1 %v12218_v53  ;;  %11730 = vmatpush3.bf16.msra.mxu0 %v12219_v12 }
 0x45b   : > { %11711 = vmatprep.subr.bf16.mxu1 %v15635_v57  ;;  %11731 = vmatprep.subr.bf16.mxu0 %v15635_v57 }
 0x45e   : > { %11712 = vmatpush3.bf16.msra.mxu1 %v12220_v62  ;;  %11732 = vmatpush3.bf16.msra.mxu0 %v12221_v51  ;;  %v12246_v62 = vld [vmem:[%s15567_s7 + $0x38] sm:$0xff]   ;;  %v12247_v51 = vld [vmem:[%s15567_s7 + $0x30] sm:$0xff]  }
 0x45f   : > { %11713 = vmatprep.subr.bf16.mxu1 %v15635_v57  ;;  %11733 = vmatprep.subr.bf16.mxu0 %v15635_v57 }
 0x462   : > { %11714 = vmatpush3.bf16.msra.mxu1 %v12222_v15  ;;  %11734 = vmatpush3.bf16.msra.mxu0 %v12223_v49  ;;  %v12248_v15 = vld [vmem:[%s15567_s7 + $0x28] sm:$0xff]   ;;  %v12249_v49 = vld [vmem:[%s15567_s7 + $0x20] sm:$0xff]  }
 0x463   : > { %11715 = vmatprep.subr.bf16.mxu1 %v15635_v57  ;;  %11735 = vmatprep.subr.bf16.mxu0 %v15635_v57 }
 0x466   : > { %11716 = vmatpush3.bf16.msra.mxu1 %v12224_v47  ;;  %11736 = vmatpush3.bf16.msra.mxu0 %v12225_v63  ;;  %v12250_v47 = vld [vmem:[%s15567_s7 + $0x18] sm:$0xff]  }
 0x467   : > { %11717 = vmatprep.subr.bf16.mxu1 %v15635_v57  ;;  %11737 = vmatprep.subr.bf16.mxu0 %v15635_v57 }
 0x46a   : > { %11718 = vmatpush3.bf16.msra.mxu1 %v12226_v54  ;;  %11738 = vmatpush3.bf16.msra.mxu0 %v12227_v19 }
 0x46b   : > { %11719 = vmatprep.subr.bf16.mxu1 %v15635_v57  ;;  %11739 = vmatprep.subr.bf16.mxu0 %v15635_v57 }
 0x46e   : > { %11720 = vmatpush3.bf16.msra.mxu1 %v12228_v38  ;;  %11740 = vmatpush3.bf16.msra.mxu0 %v12229_v28 }
 0x46f   : > { %11745 = vmatprep.subr.bf16.mxu1 %v15635_v57  ;;  %11765 = vmatprep.subr.bf16.mxu0 %v15635_v57 }
 0x471   : > { %11722 = vmatmul.mubr.bf16.vlgmr.msra.gmra.mxu1 %v8804_v25  ;;  %11742 = vmatmul.mubr.bf16.vlgmr.msra.gmra.mxu0 %v8912_v7  ;;  %v7628_v45 = vpop.f32.mrf.mxu1  ;;  %v7716_v24 = vpop.f32.mrf.mxu0  ;;  %v12251_v7 = vld [vmem:[%s15567_s7 + $0x10] sm:$0xff]  }
 0x472   : > { %v7717_v39 = vadd.f32 %v7716_v24, %v7628_v45  ;;  %11746 = vmatpush3.bf16.msra.mxu1 %v12230_v13  ;;  %11766 = vmatpush3.bf16.msra.mxu0 %v12231_v30  ;;  %v12252_v45 = vld [vmem:[%s15567_s7 + $0x8] sm:$0xff]   ;;  %v12253_v24 = vld [vmem:[%s15567_s7] sm:$0xff]  }
 0x473   : > { %v11483_v8 = vpop.f32.mrf.mxu1  ;;  %v11503_v48 = vpop.f32.mrf.mxu0  ;;  %11747 = vmatprep.subr.bf16.mxu1 %v15635_v57  ;;  %11767 = vmatprep.subr.bf16.mxu0 %v15635_v57 }
 0x474   : > { %11761 = vmatprep.mubr.msk.bf16.mxu1 %vm12324_vm15, %v15635_v57  ;;  %11781 = vmatprep.mubr.msk.bf16.mxu0 %vm12324_vm15, %v15635_v57 }
 0x475   : > { %v7631_v6 = vpop.f32.mrf.mxu1  ;;  %v7719_v0 = vpop.f32.mrf.mxu0 }
 0x476   : > { %11748 = vmatpush3.bf16.msra.mxu1 %v12232_v43  ;;  %11768 = vmatpush3.bf16.msra.mxu0 %v12233_v18 }
 0x477   : > { %v11484_v29 = vpop.f32.mrf.mxu1  ;;  %v11504_v23 = vpop.f32.mrf.mxu0  ;;  %11749 = vmatprep.subr.bf16.mxu1 %v15635_v57  ;;  %11769 = vmatprep.subr.bf16.mxu0 %v15635_v57 }
 0x47a   : > { %11750 = vmatpush3.bf16.msra.mxu1 %v12234_v55  ;;  %11770 = vmatpush3.bf16.msra.mxu0 %v12235_v20 }
 0x47b   : > { %11751 = vmatprep.subr.bf16.mxu1 %v15635_v57  ;;  %11771 = vmatprep.subr.bf16.mxu0 %v15635_v57 }
 0x47e   : > { %11752 = vmatpush3.bf16.msra.mxu1 %v12236_v50  ;;  %11772 = vmatpush3.bf16.msra.mxu0 %v12237_v52 }
 0x47f   : > { %11753 = vmatprep.subr.bf16.mxu1 %v15635_v57  ;;  %11773 = vmatprep.subr.bf16.mxu0 %v15635_v57 }
 0x482   : > { %11754 = vmatpush3.bf16.msra.mxu1 %v12238_v44  ;;  %11774 = vmatpush3.bf16.msra.mxu0 %v12239_v27 }
 0x483   : > { %11755 = vmatprep.subr.bf16.mxu1 %v15635_v57  ;;  %11775 = vmatprep.subr.bf16.mxu0 %v15635_v57 }
 0x486   : > { %11756 = vmatpush3.bf16.msra.mxu1 %v12240_v40  ;;  %11776 = vmatpush3.bf16.msra.mxu0 %v12241_v5 }
 0x487   : > { %11757 = vmatprep.subr.bf16.mxu1 %v15635_v57  ;;  %11777 = vmatprep.subr.bf16.mxu0 %v15635_v57 }
 0x48a   : > { %11758 = vmatpush3.bf16.msra.mxu1 %v12242_v60  ;;  %11778 = vmatpush3.bf16.msra.mxu0 %v12243_v16 }
 0x48b   : > { %11759 = vmatprep.subr.bf16.mxu1 %v15635_v57  ;;  %11779 = vmatprep.subr.bf16.mxu0 %v15635_v57 }
 0x48e   : > { %11760 = vmatpush3.bf16.msra.mxu1 %v12244_v41  ;;  %11780 = vmatpush3.bf16.msra.mxu0 %v12245_v46 }
 0x48f   : > { %11785 = vmatprep.subr.bf16.mxu1 %v15635_v57 }
 0x491   : > { %v7823_v59 = vpop.f32.mrf.mxu1  ;;  %v7931_v31 = vpop.f32.mrf.mxu0  ;;  %11762 = vmatmul.mubr.bf16.vlgmr.msra.gmra.mxu1 %v9020_v21  ;;  %11782 = vmatmul.mubr.bf16.vlgmr.msra.gmra.mxu0 %v9128_v3 }
 0x492   : > { %v7829_v42 = vadd.f32 %v7823_v59, %v7717_v39  ;;  %11801 = vmatprep.mubr.msk.bf16.mxu1 %vm12324_vm15, %v15635_v57  ;;  %11786 = vmatpush3.bf16.msra.mxu1 %v12246_v62  ;;  %v9254_v62 = vld [vmem:[%s15568_s8] sm:$0x1] }
 0x493   : > { %v11523_v32 = vpop.f32.mrf.mxu1  ;;  %v11543_v2 = vpop.f32.mrf.mxu0  ;;  %11787 = vmatprep.subr.bf16.mxu1 %v15635_v57 }
 0x494   : > { %v7937_v37 = vadd.f32 %v7931_v31, %v7829_v42 }
 0x495   : > { %v7826_v10 = vpop.f32.mrf.mxu1  ;;  %v7934_v61 = vpop.f32.mrf.mxu0 }
 0x496   : > { %11788 = vmatpush3.bf16.msra.mxu1 %v12247_v51  ;;  %v9234_v61 = vld [vmem:[%s15566_s6] sm:$0x1] }
 0x497   : > { %v11524_v4 = vpop.f32.mrf.mxu1  ;;  %v11544_v58 = vpop.f32.mrf.mxu0  ;;  %11789 = vmatprep.subr.bf16.mxu1 %v15635_v57 }
 0x49a   : > { %11790 = vmatpush3.bf16.msra.mxu1 %v12248_v15 }
 0x49b   : > { %11791 = vmatprep.subr.bf16.mxu1 %v15635_v57 }
 0x49e   : > { %11792 = vmatpush3.bf16.msra.mxu1 %v12249_v49 }
 0x49f   : > { %11793 = vmatprep.subr.bf16.mxu1 %v15635_v57 }
 0x4a2   : > { %11794 = vmatpush3.bf16.msra.mxu1 %v12250_v47 }
 0x4a3   : > { %11795 = vmatprep.subr.bf16.mxu1 %v15635_v57 }
 0x4a6   : > { %11796 = vmatpush3.bf16.msra.mxu1 %v12251_v7 }
 0x4a7   : > { %11797 = vmatprep.subr.bf16.mxu1 %v15635_v57 }
 0x4aa   : > { %11798 = vmatpush3.bf16.msra.mxu1 %v12252_v45 }
 0x4ab   : > { %11799 = vmatprep.subr.bf16.mxu1 %v15635_v57 }
 0x4ae   : > { %11800 = vmatpush3.bf16.msra.mxu1 %v12253_v24 }
 0x4b1   : > { %v8039_v17 = vpop.f32.mrf.mxu1  ;;  %v8147_v22 = vpop.f32.mrf.mxu0 }
 0x4b2   : > { %v8045_v11 = vadd.f32 %v8039_v17, %v7937_v37 }
 0x4b3   : > { %v11563_v56 = vpop.f32.mrf.mxu1  ;;  %v11583_v14 = vpop.f32.mrf.mxu0 }
 0x4b4   : > { %v8153_v35 = vadd.f32 %v8147_v22, %v8045_v11 }
 0x4b5   : > { %v8042_v34 = vpop.f32.mrf.mxu1  ;;  %v8150_v9 = vpop.f32.mrf.mxu0 }
 0x4b7   : > { %v11564_v53 = vpop.f32.mrf.mxu1  ;;  %v11584_v12 = vpop.f32.mrf.mxu0 }
 0x4b8   : > { %v9343_v53 = vlaneseq }
 0x4ba   : > { %v9344_v12 = vand.u32 127, %v9343_v53 }
 0x4bc   : > { %vm9345_vm0 = vcmp.lt.s32.totalorder %v9344_v12, 10 }
 0x4d1   : > { %v8255_v63 = vpop.f32.mrf.mxu1  ;;  %v8363_v54 = vpop.f32.mrf.mxu0 }
 0x4d2   : > { %v8261_v19 = vadd.f32 %v8255_v63, %v8153_v35 }
 0x4d3   : > { %v11603_v38 = vpop.f32.mrf.mxu1  ;;  %v11623_v28 = vpop.f32.mrf.mxu0 }
 0x4d4   : > { %v8369_v36 = vadd.f32 %v8363_v54, %v8261_v19 }
 0x4d5   : > { %v8258_v26 = vpop.f32.mrf.mxu1  ;;  %v8366_v13 = vpop.f32.mrf.mxu0 }
 0x4d7   : > { %v11604_v30 = vpop.f32.mrf.mxu1  ;;  %v11624_v25 = vpop.f32.mrf.mxu0 }
 0x4f1   : > { %v8471_v39 = vpop.f32.mrf.mxu1  ;;  %v8579_v43 = vpop.f32.mrf.mxu0 }
 0x4f2   : > { %v8477_v18 = vadd.f32 %v8471_v39, %v8369_v36 }
 0x4f3   : > { %v11643_v8 = vpop.f32.mrf.mxu1  ;;  %v11663_v48 = vpop.f32.mrf.mxu0 }
 0x4f4   : > { %v8585_v6 = vadd.f32 %v8579_v43, %v8477_v18 }
 0x4f5   : > { %v8474_v0 = vpop.f32.mrf.mxu1  ;;  %v8582_v55 = vpop.f32.mrf.mxu0 }
 0x4f7   : > { %v11644_v20 = vpop.f32.mrf.mxu1  ;;  %v11664_v29 = vpop.f32.mrf.mxu0 }
 0x511   : > { %v8687_v23 = vpop.f32.mrf.mxu1  ;;  %v8795_v50 = vpop.f32.mrf.mxu0 }
 0x512   : > { %v8693_v59 = vadd.f32 %v8687_v23, %v8585_v6 }
 0x513   : > { %v11683_v52 = vpop.f32.mrf.mxu1  ;;  %v11703_v44 = vpop.f32.mrf.mxu0 }
 0x514   : > { %v8801_v31 = vadd.f32 %v8795_v50, %v8693_v59 }
 0x515   : > { %v8690_v27 = vpop.f32.mrf.mxu1  ;;  %v8798_v40 = vpop.f32.mrf.mxu0 }
 0x517   : > { %v11684_v5 = vpop.f32.mrf.mxu1  ;;  %v11704_v60 = vpop.f32.mrf.mxu0 }
 0x531   : > { %v8903_v57 = vpop.f32.mrf.mxu1  ;;  %v9011_v16 = vpop.f32.mrf.mxu0 }
 0x532   : > { %v8909_v42 = vadd.f32 %v8903_v57, %v8801_v31 }
 0x533   : > { %v11723_v41 = vpop.f32.mrf.mxu1  ;;  %v11743_v46 = vpop.f32.mrf.mxu0 }
 0x534   : > { %v9017_v32 = vadd.f32 %v9011_v16, %v8909_v42 }
 0x535   : > { %v8906_v33 = vpop.f32.mrf.mxu1  ;;  %v9014_v1 = vpop.f32.mrf.mxu0 }
 0x537   : > { %v11724_v21 = vpop.f32.mrf.mxu1  ;;  %v11744_v3 = vpop.f32.mrf.mxu0 }
 0x551   : > { %v9119_v2 = vpop.f32.mrf.mxu1  ;;  %v9227_v37 = vpop.f32.mrf.mxu0 }
 0x552   : > { %v9125_v10 = vadd.f32 %v9119_v2, %v9017_v32 }
 0x553   : > { %v11763_v4 = vpop.f32.mrf.mxu1  ;;  %v11783_v58 = vpop.f32.mrf.mxu0 }
 0x554   : > { %v9233_v17 = vadd.f32 %v9227_v37, %v9125_v10 }
 0x555   : > { %v9122_v22 = vpop.f32.mrf.mxu1  ;;  %v9230_v11 = vpop.f32.mrf.mxu0 }
 0x556   : > { %v9235_v56 = vadd.f32 %v9234_v61, %v9233_v17 }
 0x557   : > { %v11764_v14 = vpop.f32.mrf.mxu1  ;;  %v11784_v35 = vpop.f32.mrf.mxu0 }
 0x558   : > { %v9236_v34 = vmax.f32 %v9235_v56, 0.0 }
 0x55a   : > { %v9237_v9 = vpack.c.bf16 %v9236_v34, %v9236_v34 }
 0x55c   : > { %11802 = vmatmul.mubr.bf16.vlgmr.msra.gmra.mxu1 %v9237_v9 }
 0x61c   : > { %v9337_v51 = vpop.f32.mrf.mxu1 }
 0x61d   : > { %v9338_v15 = vadd.f32 %v9337_v51, %v9254_v62 }
 0x61e   : > { %v11803_v49 = vpop.f32.mrf.mxu1 }
 0x61f   : > { %v9346_v47 = vsel %vm9345_vm0, %v9338_v15, -1e+30 }
 0x620   : > { %v9340_v63 = vpop.f32.mrf.mxu1  ;;  %v9348_v54 = vsel %vm9347_vm1, %v9346_v47, -inf }
 0x621   : > { %9349 = vmax.xlane.f32.xlu0 %v9348_v54 }
 0x622   : > { %v11804_v19 = vpop.f32.mrf.mxu1 }
 0x6aa   : > { %v9350_v38 = vpop.xlane.xlu0 %9349 }
 0x6ab   : > { %v9351_v28 = vsub.f32 %v9346_v47, %v9350_v38 }
 0x6ad   : > { %v9352_v36 = vmul.f32 1.442695, %v9351_v28 }
 0x6af   : > { %12254 = vpow2.f32 %v9352_v36 }
 0x6bc   : > { %v12255_v26 = vpop.eup %12254 }
 0x6bd   : > { %v9354_v13 = vsel %vm9347_vm1, %v12255_v26, 0.0 }
 0x6be   : > { %9355 = vadd.xlane.f32.xlu0 %v9354_v13 }
 0x747   : > { %v9356_v30 = vpop.xlane.xlu0 %9355 }
 0x748   : > { %12256 = vlog2.f32 %v9356_v30 }
 0x755   : > { %v12257_v25 = vpop.eup %12256 }
 0x756   : > { %v9358_v7 = vmul.f32 0.6931472, %v12257_v25 }
 0x758   : > { %v9359_v45 = vsub.f32 %v9351_v28, %v9358_v7 }
 0x75a   : > { %9360 = vst [vmem:[%s324_s17] sm:$0x1] %v9359_v45 }
 0x75b   : > { %12273 = shalt.err (!%p12270_p3)
}
 0x75c   : > { %s12274_s29 = scalar_lea.hbm %s9372_s24, 16  ;;  %s12278_s17 = scalar_lea.hbm %s15569_s9, 32 }
 0x75d   : > { %p12275_p4 = scmp.ne.s32.totalorder %s9372_s24, %s12274_s29  ;;  %p12279_p9 = scmp.lt.s32.totalorder %s9372_s24, %s15569_s9 }
 0x75e   : > { %p12280_p10 = scmp.lt.s32.totalorder %s12278_s17, %s12274_s29 }
 0x75f   : > { %p12276_p7 = pnand %p12275_p4, %p12414_p5 }
 0x760   : > { %p12281_p11 = por %p12280_p10, %p12279_p9 }
 0x761   : > { %p12277_p8 = pneg %p12276_p7 }
 0x763   : > { %p12282_p12 = pnand %p12281_p11, %p12277_p8 }
 0x765   : > { %12285 = shalt.err (!%p12282_p12)
}
 0x766   : > { %11806 = dma.vmem_to_hbm [thread:$0]  (%p12414_p5), %s9375_s21, 16, %s9372_s24, %s9362_s25  }
 0x767 PF: > { %p11812_p13 = scmp.ge.s32.totalorder %s12320_s12, 2  ;;  %s9386_s26 = sand.u32 1, %s12308_s30  }
 0x768   : > { %s9387_s27 = scalar_lea.sflag [#allocation6], %s9386_s26 }
 0x769   : > { %p11809_p0 = pnand %p11812_p13, %p12418_p6 }
 0x76b   : > { %p11810_p1 = pneg %p11809_p0 }
 0x76d   : > { %12303 = dma.done.wait (%p11810_p1), %s9387_s27, 16  }
 0x76e   : > { %12305 = vsyncadd (%p11810_p1), %s9387_s27, 4294967280  ;;  %p19_p2 = scmp.ge.s32.totalorder %s12401_s15, 4   ;;  %s15636_s30 = smov %s12312_s10 }
 0x76f   : > { %s15637_s10 = smov %s12316_s11  ;;  %s15638_s11 = smov %s12412_s18 }
 0x770   : > { %s15639_s12 = smov %s12401_s15  ;;  %21 = sbr.rel (!%p19_p2) target bundleno = 3 (0x3), region = 120 }
 0x775   :  { %9391 = vsyncpa [#allocation6], 1 }
 0x776   :  { %9393 = vsyncpa [#allocation6 + $0x1], 1 }

</bundles_post_ra>
